<compile_context>
chip_gen: v5e
topology: v5e:2x2
jax: 0.10.0
libtpu: 0.0.40
codegen_flags: <defaults>
</compile_context>

<pallas_src>
import numpy as np
import jax
import jax.numpy as jnp
from jax.experimental import pallas as pl
from jax.experimental.pallas import tpu as pltpu


# -----------------------------------------------------------------------------
# Host-side bilinear 2x interpolation matrices (align_corners=True).
# -----------------------------------------------------------------------------
def _bilinear_matrix_np(in_size, out_size):
    dst = np.arange(out_size)
    src = dst * (in_size - 1) / (out_size - 1)          # align_corners=True
    lo = np.floor(src).astype(np.int64)
    hi = np.minimum(lo + 1, in_size - 1)
    frac = (src - lo).astype(np.float32)
    mat = np.zeros((out_size, in_size), np.float32)
    mat[dst, lo] += 1.0 - frac
    mat[dst, hi] += frac
    return mat


def _kron_upsample_matrix_t(h, w):
    """(H*W, 4*H*W) matrix K^T with K = kron(Ah, Aw): whole 2x bilinear
    upsample as ONE flat-spatial matmul  y_up = y_flat @ K^T.  Only used while
    H*W is small (8x8, 16x16 here), where K^T is 64 KB / 1 MB."""
    ah = _bilinear_matrix_np(h, 2 * h)
    aw = _bilinear_matrix_np(w, 2 * w)
    return jnp.asarray(np.kron(ah, aw).T)


# -----------------------------------------------------------------------------
# Fused flat chain kernel: channel-major (C, M) activations stay in
# vregs/VMEM; ops are either
#   ("conv", w_idx, b_idx, relu):  y <- relu(W @ y + b)   (1x1 conv, BN folded)
#   ("spatial", m_idx):            y <- y @ K^T           (fused 2x upsample)
# -----------------------------------------------------------------------------
def _make_flat_chain_kernel(plan):
    def kernel(*refs):
        x_ref, o_ref = refs[0], refs[-1]
        y = x_ref[0]                                    # (C_in, M_in)
        for op in plan:
            if op[0] == "conv":
                _, wi, bi, relu = op
                y = jnp.dot(refs[wi][...], y,
                            preferred_element_type=jnp.float32) + refs[bi][...]
                if relu:
                    y = jnp.maximum(y, 0.0)
            else:                                       # "spatial"
                _, mi = op
                y = jnp.dot(y, refs[mi][...],
                            preferred_element_type=jnp.float32)
        o_ref[0] = y.astype(o_ref.dtype)
    return kernel


def flat_chain(x_flat, ops):
    """x_flat: (N, C_in, M_in) channel-major.  Returns (N, C_out, M_out)."""
    n, c_in, m_in = x_flat.shape
    args = [x_flat]
    in_specs = [pl.BlockSpec((1, c_in, m_in), lambda i: (i, 0, 0))]
    plan = []

    # NOTE: each constant is one in_spec (double-buffered VMEM + one prologue
    # DMA); total constants here are < 1.5 MB so this is cheap.  Packing (w, b)
    # pairs would shave a few prologue DMAs (review: low priority).
    def add_const(a):
        args.append(a)
        in_specs.append(pl.BlockSpec(a.shape, lambda i: (0, 0)))
        return len(args) - 1                            # == ref index in kernel

    c_out, m_out = c_in, m_in
    for op in ops:
        if op[0] == "conv":
            _, (w, b), relu = op
            plan.append(("conv", add_const(w), add_const(b), relu))
            c_out = w.shape[0]
        else:
            _, kt = op
            plan.append(("spatial", add_const(kt)))
            m_out = kt.shape[1]

    return pl.pallas_call(
        _make_flat_chain_kernel(tuple(plan)),
        out_shape=jax.ShapeDtypeStruct((n, c_out, m_out), jnp.float32),
        grid=(n,),
        in_specs=in_specs,
        out_specs=pl.BlockSpec((1, c_out, m_out), lambda i: (i, 0, 0)),
        compiler_params=pltpu.CompilerParams(
            dimension_semantics=("parallel",)),
    )(*args)


# -----------------------------------------------------------------------------
# Standalone bilinear 2x upsample (align_corners=True), channel-major.
# Used only for the two late, low-channel-count stages (C=32 and C=2).
# -----------------------------------------------------------------------------
def _upsample_kernel(x_ref, aw_ref, ah_ref, o_ref):
    x = x_ref[0]                                        # (C, H, W)
    c, h, w = x.shape
    ow = aw_ref.shape[0]
    oh = ah_ref.shape[0]
    aw_b = jnp.broadcast_to(aw_ref[...][None, :, :], (c, ow, w))   # (C, OW, W)
    ah_b = jnp.broadcast_to(ah_ref[...][None, :, :], (c, oh, h))   # (C, OH, H)
    # W-interp then H-interp: both contract the minor dims, batched over C.
    u = jnp.einsum('cuw,chw->cuh', aw_b, x, preferred_element_type=jnp.float32)
    y = jnp.einsum('cvh,cuh->cvu', ah_b, u, preferred_element_type=jnp.float32)
    o_ref[0] = y.astype(o_ref.dtype)


def upsample2x_bilinear(x_nchw):
    n, c, h, w = x_nchw.shape
    oh, ow = 2 * h, 2 * w
    ah = jnp.asarray(_bilinear_matrix_np(h, oh))        # (OH, H)
    aw = jnp.asarray(_bilinear_matrix_np(w, ow))        # (OW, W)
    return pl.pallas_call(
        _upsample_kernel,
        out_shape=jax.ShapeDtypeStruct((n, c, oh, ow), jnp.float32),
        grid=(n,),
        in_specs=[
            pl.BlockSpec((1, c, h, w), lambda i: (i, 0, 0, 0)),
            pl.BlockSpec((ow, w), lambda i: (0, 0)),
            pl.BlockSpec((oh, h), lambda i: (0, 0)),
        ],
        out_specs=pl.BlockSpec((1, c, oh, ow), lambda i: (i, 0, 0, 0)),
        compiler_params=pltpu.CompilerParams(dimension_semantics=("parallel",)),
    )(x_nchw, aw, ah)


# -----------------------------------------------------------------------------
# Parameters (deterministic synthetic init, eval-mode BN folded into weights).
# -----------------------------------------------------------------------------
_LAYER_SPECS = [(128, 128), (128, 128), (128, 64), (64, 64),
                (64, 64), (64, 32), (32, 32), (32, 32)]
_BN_EPS = 1e-5


def init_params(key, n_class_out):
    params = []
    for cin, cout in _LAYER_SPECS:
        key, k1, k2, k3, k4, k5, k6 = jax.random.split(key, 7)
        w = jax.random.normal(k1, (cout, cin), jnp.float32) / np.sqrt(cin)
        b_conv = 0.01 * jax.random.normal(k2, (cout,), jnp.float32)
        gamma = 1.0 + 0.1 * jax.random.normal(k3, (cout,), jnp.float32)
        beta = 0.01 * jax.random.normal(k4, (cout,), jnp.float32)
        rmean = 0.01 * jax.random.normal(k5, (cout,), jnp.float32)
        rvar = 1.0 + 0.1 * jnp.abs(jax.random.normal(k6, (cout,), jnp.float32))
        scale = gamma / jnp.sqrt(rvar + _BN_EPS)
        w_eff = w * scale[:, None]                       # fold BN scale
        b_eff = (b_conv * scale + beta - rmean * scale).reshape(cout, 1)
        params.append((w_eff, b_eff))
    key, k1, k2 = jax.random.split(key, 3)
    w_last = jax.random.normal(k1, (n_class_out, 32), jnp.float32) / np.sqrt(32)
    b_last = (0.01 * jax.random.normal(k2, (n_class_out,), jnp.float32)
              ).reshape(n_class_out, 1)
    params.append((w_last, b_last))
    return params


# -----------------------------------------------------------------------------
# Forward pass: 4 pallas_calls, NCHW in / NCHW out, no XLA transposes;
# wrapper-side reshapes are all contiguous (free).
# -----------------------------------------------------------------------------
def decoder_occupancy_block(x_nchw, params):
    n, c0, h, w = x_nchw.shape
    x = x_nchw.reshape(n, c0, h * w).astype(jnp.float32)

    # Call 1: layer0..layer5 + first two 2x upsamples (single kron matmuls).
    front_ops = [
        ("conv", params[0], True), ("conv", params[1], True),
        ("spatial", _kron_upsample_matrix_t(h, w)),
        ("conv", params[2], True), ("conv", params[3], True),
        ("spatial", _kron_upsample_matrix_t(2 * h, 2 * w)),
        ("conv", params[4], True), ("conv", params[5], True),
    ]
    y = flat_chain(x, front_ops)                         # (N, 32, 16*h*w)
    y = y.reshape(n, 32, 4 * h, 4 * w)

    # Call 2: third 2x upsample (C = 32).
    y = upsample2x_bilinear(y)                           # (N, 32, 8h, 8w)

    # Call 3: layer6 + layer7 + conv_last (conv_last commuted in front of the
    # last upsample so that upsample only touches n_class_out channels).
    n_class = params[8][0].shape[0]
    y = y.reshape(n, 32, 64 * h * w)
    back_ops = [
        ("conv", params[6], True), ("conv", params[7], True),
        ("conv", params[8], False),
    ]
    y = flat_chain(y, back_ops)                          # (N, n_class, 64*h*w)
    y = y.reshape(n, n_class, 8 * h, 8 * w)

    # Call 4: final 2x upsample (C = n_class_out).
    return upsample2x_bilinear(y)                        # (N, n_class, 16h, 16w)


# -----------------------------------------------------------------------------
# Pure-JAX reference in the ORIGINAL op order (conv_last after the last
# upsample, per-layer convs, per-stage two-pass upsamples) — also validates the
# conv_last/upsample commutation and the kron fusion numerically.
# -----------------------------------------------------------------------------
def _reference(x_nchw, params):
    x = x_nchw.astype(jnp.float32)

    def conv(x, p, relu):
        w, b = p
        y = jnp.einsum('oc,nchw->nohw', w, x) + b.reshape(1, -1, 1, 1)
        return jnp.maximum(y, 0.0) if relu else y

    def ups(x):
        _, _, h, w = x.shape
        ah = jnp.asarray(_bilinear_matrix_np(h, 2 * h))
        aw = jnp.asarray(_bilinear_matrix_np(w, 2 * w))
        y = jnp.einsum('oh,nchw->ncow', ah, x)
        y = jnp.einsum('pw,ncow->ncop', aw, y)
        return y

    x = conv(x, params[0], True)
    x = conv(x, params[1], True)
    x = ups(x)
    x = conv(x, params[2], True)
    x = conv(x, params[3], True)
    x = ups(x)
    x = conv(x, params[4], True)
    x = conv(x, params[5], True)
    x = ups(x)
    x = conv(x, params[6], True)
    x = conv(x, params[7], True)
    x = ups(x)
    x = conv(x, params[8], False)
    return x


if __name__ == "__main__":
    n_class_out = 2
    key = jax.random.PRNGKey(0)
    key, kx, kp = jax.random.split(key, 3)

    # forward() requires 128 input channels (layer0_1x1 is 128->128).
    x = jax.random.normal(kx, (2, 128, 8, 8), jnp.float32)   # NCHW
    params = init_params(kp, n_class_out)

    fwd = jax.jit(decoder_occupancy_block)
    out = jax.block_until_ready(fwd(x, params))
    assert out.shape == (2, n_class_out, 128, 128), out.shape

    ref = jax.block_until_ready(jax.jit(_reference)(x, params))
    err = float(jnp.max(jnp.abs(out - ref)))
    assert err < 1e-3, f"mismatch vs reference: {err}"

    print("KERNEL_OK")
</pallas_src>

<mosaic_0001>
module attributes {stable_mosaic.version = 11 : i64} {
  func.func @kernel(%arg0: i32, %arg1: memref<1x128x64xf32, #tpu.memory_space<vmem>>, %arg2: memref<128x128xf32, #tpu.memory_space<vmem>>, %arg3: memref<128x1xf32, #tpu.memory_space<vmem>>, %arg4: memref<128x128xf32, #tpu.memory_space<vmem>>, %arg5: memref<128x1xf32, #tpu.memory_space<vmem>>, %arg6: memref<64x256xf32, #tpu.memory_space<vmem>>, %arg7: memref<64x128xf32, #tpu.memory_space<vmem>>, %arg8: memref<64x1xf32, #tpu.memory_space<vmem>>, %arg9: memref<64x64xf32, #tpu.memory_space<vmem>>, %arg10: memref<64x1xf32, #tpu.memory_space<vmem>>, %arg11: memref<256x1024xf32, #tpu.memory_space<vmem>>, %arg12: memref<64x64xf32, #tpu.memory_space<vmem>>, %arg13: memref<64x1xf32, #tpu.memory_space<vmem>>, %arg14: memref<32x64xf32, #tpu.memory_space<vmem>>, %arg15: memref<32x1xf32, #tpu.memory_space<vmem>>, %arg16: memref<1x32x1024xf32, #tpu.memory_space<vmem>>) attributes {dimension_semantics = [#tpu.dimension_semantics<parallel>], iteration_bounds = array<i64: 2>, scalar_prefetch = 0 : i64, scratch_operands = 0 : i64, tpu.core_type = #tpu.core_type<tc>, window_params = [{transform_indices = @transform_0, window_bounds = array<i64: 1, 128, 64>}, {pipeline_mode = #tpu.pipeline_mode<synchronous>, transform_indices = @transform_1, window_bounds = array<i64: 128, 128>}, {pipeline_mode = #tpu.pipeline_mode<synchronous>, transform_indices = @transform_2, window_bounds = array<i64: 128, 1>}, {pipeline_mode = #tpu.pipeline_mode<synchronous>, transform_indices = @transform_3, window_bounds = array<i64: 128, 128>}, {pipeline_mode = #tpu.pipeline_mode<synchronous>, transform_indices = @transform_4, window_bounds = array<i64: 128, 1>}, {pipeline_mode = #tpu.pipeline_mode<synchronous>, transform_indices = @transform_5, window_bounds = array<i64: 64, 256>}, {pipeline_mode = #tpu.pipeline_mode<synchronous>, transform_indices = @transform_6, window_bounds = array<i64: 64, 128>}, {pipeline_mode = #tpu.pipeline_mode<synchronous>, transform_indices = @transform_7, window_bounds = array<i64: 64, 1>}, {pipeline_mode = #tpu.pipeline_mode<synchronous>, transform_indices = @transform_8, window_bounds = array<i64: 64, 64>}, {pipeline_mode = #tpu.pipeline_mode<synchronous>, transform_indices = @transform_9, window_bounds = array<i64: 64, 1>}, {pipeline_mode = #tpu.pipeline_mode<synchronous>, transform_indices = @transform_10, window_bounds = array<i64: 256, 1024>}, {pipeline_mode = #tpu.pipeline_mode<synchronous>, transform_indices = @transform_11, window_bounds = array<i64: 64, 64>}, {pipeline_mode = #tpu.pipeline_mode<synchronous>, transform_indices = @transform_12, window_bounds = array<i64: 64, 1>}, {pipeline_mode = #tpu.pipeline_mode<synchronous>, transform_indices = @transform_13, window_bounds = array<i64: 32, 64>}, {pipeline_mode = #tpu.pipeline_mode<synchronous>, transform_indices = @transform_14, window_bounds = array<i64: 32, 1>}, {transform_indices = @transform_15, window_bounds = array<i64: 1, 32, 1024>}]} {
    %c0 = arith.constant 0 : index
    %c0_0 = arith.constant 0 : index
    %c0_1 = arith.constant 0 : index
    %0 = vector.load %arg1[%c0, %c0_0, %c0_1] : memref<1x128x64xf32, #tpu.memory_space<vmem>>, vector<1x128x64xf32>
    %1 = vector.shape_cast %0 : vector<1x128x64xf32> to vector<128x64xf32>
    %c0_2 = arith.constant 0 : index
    %c0_3 = arith.constant 0 : index
    %2 = vector.load %arg2[%c0_2, %c0_3] : memref<128x128xf32, #tpu.memory_space<vmem>>, vector<128x128xf32>
    %cst = arith.constant dense<0.000000e+00> : vector<128x64xf32>
    %3 = tpu.matmul %2, %1, %cst {dimension_numbers = #tpu.dot_dimension_numbers<[1], [0], [0], [1], [0, 0, 1, 1], [], []>} : vector<128x128xf32>, vector<128x64xf32>, vector<128x64xf32> -> vector<128x64xf32>
    %c0_4 = arith.constant 0 : index
    %c0_5 = arith.constant 0 : index
    %4 = vector.load %arg3[%c0_4, %c0_5] : memref<128x1xf32, #tpu.memory_space<vmem>>, vector<128x1xf32>
    %5 = vector.broadcast %4 : vector<128x1xf32> to vector<128x64xf32>
    %6 = arith.addf %3, %5 : vector<128x64xf32>
    %cst_6 = arith.constant 0.000000e+00 : f32
    %7 = vector.broadcast %cst_6 : f32 to vector<128x64xf32>
    %8 = arith.maximumf %6, %7 : vector<128x64xf32>
    %c0_7 = arith.constant 0 : index
    %c0_8 = arith.constant 0 : index
    %9 = vector.load %arg4[%c0_7, %c0_8] : memref<128x128xf32, #tpu.memory_space<vmem>>, vector<128x128xf32>
    %cst_9 = arith.constant dense<0.000000e+00> : vector<128x64xf32>
    %10 = tpu.matmul %9, %8, %cst_9 {dimension_numbers = #tpu.dot_dimension_numbers<[1], [0], [0], [1], [0, 0, 1, 1], [], []>} : vector<128x128xf32>, vector<128x64xf32>, vector<128x64xf32> -> vector<128x64xf32>
    %c0_10 = arith.constant 0 : index
    %c0_11 = arith.constant 0 : index
    %11 = vector.load %arg5[%c0_10, %c0_11] : memref<128x1xf32, #tpu.memory_space<vmem>>, vector<128x1xf32>
    %12 = vector.broadcast %11 : vector<128x1xf32> to vector<128x64xf32>
    %13 = arith.addf %10, %12 : vector<128x64xf32>
    %cst_12 = arith.constant 0.000000e+00 : f32
    %14 = vector.broadcast %cst_12 : f32 to vector<128x64xf32>
    %15 = arith.maximumf %13, %14 : vector<128x64xf32>
    %c0_13 = arith.constant 0 : index
    %c0_14 = arith.constant 0 : index
    %16 = vector.load %arg6[%c0_13, %c0_14] : memref<64x256xf32, #tpu.memory_space<vmem>>, vector<64x256xf32>
    %cst_15 = arith.constant dense<0.000000e+00> : vector<128x256xf32>
    %17 = tpu.matmul %15, %16, %cst_15 {dimension_numbers = #tpu.dot_dimension_numbers<[1], [0], [0], [1], [0, 0, 1, 1], [], []>} : vector<128x64xf32>, vector<64x256xf32>, vector<128x256xf32> -> vector<128x256xf32>
    %c0_16 = arith.constant 0 : index
    %c0_17 = arith.constant 0 : index
    %18 = vector.load %arg7[%c0_16, %c0_17] : memref<64x128xf32, #tpu.memory_space<vmem>>, vector<64x128xf32>
    %cst_18 = arith.constant dense<0.000000e+00> : vector<64x256xf32>
    %19 = tpu.matmul %18, %17, %cst_18 {dimension_numbers = #tpu.dot_dimension_numbers<[1], [0], [0], [1], [0, 0, 1, 1], [], []>} : vector<64x128xf32>, vector<128x256xf32>, vector<64x256xf32> -> vector<64x256xf32>
    %c0_19 = arith.constant 0 : index
    %c0_20 = arith.constant 0 : index
    %20 = vector.load %arg8[%c0_19, %c0_20] : memref<64x1xf32, #tpu.memory_space<vmem>>, vector<64x1xf32>
    %21 = vector.broadcast %20 : vector<64x1xf32> to vector<64x256xf32>
    %22 = arith.addf %19, %21 : vector<64x256xf32>
    %cst_21 = arith.constant 0.000000e+00 : f32
    %23 = vector.broadcast %cst_21 : f32 to vector<64x256xf32>
    %24 = arith.maximumf %22, %23 : vector<64x256xf32>
    %c0_22 = arith.constant 0 : index
    %c0_23 = arith.constant 0 : index
    %25 = vector.load %arg9[%c0_22, %c0_23] : memref<64x64xf32, #tpu.memory_space<vmem>>, vector<64x64xf32>
    %cst_24 = arith.constant dense<0.000000e+00> : vector<64x256xf32>
    %26 = tpu.matmul %25, %24, %cst_24 {dimension_numbers = #tpu.dot_dimension_numbers<[1], [0], [0], [1], [0, 0, 1, 1], [], []>} : vector<64x64xf32>, vector<64x256xf32>, vector<64x256xf32> -> vector<64x256xf32>
    %c0_25 = arith.constant 0 : index
    %c0_26 = arith.constant 0 : index
    %27 = vector.load %arg10[%c0_25, %c0_26] : memref<64x1xf32, #tpu.memory_space<vmem>>, vector<64x1xf32>
    %28 = vector.broadcast %27 : vector<64x1xf32> to vector<64x256xf32>
    %29 = arith.addf %26, %28 : vector<64x256xf32>
    %cst_27 = arith.constant 0.000000e+00 : f32
    %30 = vector.broadcast %cst_27 : f32 to vector<64x256xf32>
    %31 = arith.maximumf %29, %30 : vector<64x256xf32>
    %c0_28 = arith.constant 0 : index
    %c0_29 = arith.constant 0 : index
    %32 = vector.load %arg11[%c0_28, %c0_29] : memref<256x1024xf32, #tpu.memory_space<vmem>>, vector<256x1024xf32>
    %cst_30 = arith.constant dense<0.000000e+00> : vector<64x1024xf32>
    %33 = tpu.matmul %31, %32, %cst_30 {dimension_numbers = #tpu.dot_dimension_numbers<[1], [0], [0], [1], [0, 0, 1, 1], [], []>} : vector<64x256xf32>, vector<256x1024xf32>, vector<64x1024xf32> -> vector<64x1024xf32>
    %c0_31 = arith.constant 0 : index
    %c0_32 = arith.constant 0 : index
    %34 = vector.load %arg12[%c0_31, %c0_32] : memref<64x64xf32, #tpu.memory_space<vmem>>, vector<64x64xf32>
    %cst_33 = arith.constant dense<0.000000e+00> : vector<64x1024xf32>
    %35 = tpu.matmul %34, %33, %cst_33 {dimension_numbers = #tpu.dot_dimension_numbers<[1], [0], [0], [1], [0, 0, 1, 1], [], []>} : vector<64x64xf32>, vector<64x1024xf32>, vector<64x1024xf32> -> vector<64x1024xf32>
    %c0_34 = arith.constant 0 : index
    %c0_35 = arith.constant 0 : index
    %36 = vector.load %arg13[%c0_34, %c0_35] : memref<64x1xf32, #tpu.memory_space<vmem>>, vector<64x1xf32>
    %37 = vector.broadcast %36 : vector<64x1xf32> to vector<64x1024xf32>
    %38 = arith.addf %35, %37 : vector<64x1024xf32>
    %cst_36 = arith.constant 0.000000e+00 : f32
    %39 = vector.broadcast %cst_36 : f32 to vector<64x1024xf32>
    %40 = arith.maximumf %38, %39 : vector<64x1024xf32>
    %c0_37 = arith.constant 0 : index
    %c0_38 = arith.constant 0 : index
    %41 = vector.load %arg14[%c0_37, %c0_38] : memref<32x64xf32, #tpu.memory_space<vmem>>, vector<32x64xf32>
    %cst_39 = arith.constant dense<0.000000e+00> : vector<32x1024xf32>
    %42 = tpu.matmul %41, %40, %cst_39 {dimension_numbers = #tpu.dot_dimension_numbers<[1], [0], [0], [1], [0, 0, 1, 1], [], []>} : vector<32x64xf32>, vector<64x1024xf32>, vector<32x1024xf32> -> vector<32x1024xf32>
    %c0_40 = arith.constant 0 : index
    %c0_41 = arith.constant 0 : index
    %43 = vector.load %arg15[%c0_40, %c0_41] : memref<32x1xf32, #tpu.memory_space<vmem>>, vector<32x1xf32>
    %44 = vector.broadcast %43 : vector<32x1xf32> to vector<32x1024xf32>
    %45 = arith.addf %42, %44 : vector<32x1024xf32>
    %cst_42 = arith.constant 0.000000e+00 : f32
    %46 = vector.broadcast %cst_42 : f32 to vector<32x1024xf32>
    %47 = arith.maximumf %45, %46 : vector<32x1024xf32>
    %c0_43 = arith.constant 0 : index
    %c0_44 = arith.constant 0 : index
    %c0_45 = arith.constant 0 : index
    %48 = vector.load %arg16[%c0_43, %c0_44, %c0_45] : memref<1x32x1024xf32, #tpu.memory_space<vmem>>, vector<1x32x1024xf32>
    %49 = vector.shape_cast %48 : vector<1x32x1024xf32> to vector<32x1024xf32>
    %50 = vector.shape_cast %47 : vector<32x1024xf32> to vector<1x32x1024xf32>
    tpu.vector_store %arg16[%c0_43, %c0_44, %c0_45], %50 {strides = array<i32>} : memref<1x32x1024xf32, #tpu.memory_space<vmem>>, vector<1x32x1024xf32>,
    return
  }
  func.func @transform_0(%arg0: i32) -> (i32, i32, i32) {
    %c0_i32 = arith.constant 0 : i32
    %c0_i32_0 = arith.constant 0 : i32
    %c0_i32_1 = arith.constant 0 : i32
    return %arg0, %c0_i32, %c0_i32_0 : i32, i32, i32
  }
  func.func @transform_1(%arg0: i32) -> (i32, i32) {
    %c0_i32 = arith.constant 0 : i32
    %c0_i32_0 = arith.constant 0 : i32
    %c0_i32_1 = arith.constant 0 : i32
    return %c0_i32, %c0_i32_0 : i32, i32
  }
  func.func @transform_2(%arg0: i32) -> (i32, i32) {
    %c0_i32 = arith.constant 0 : i32
    %c0_i32_0 = arith.constant 0 : i32
    %c0_i32_1 = arith.constant 0 : i32
    return %c0_i32, %c0_i32_0 : i32, i32
  }
  func.func @transform_3(%arg0: i32) -> (i32, i32) {
    %c0_i32 = arith.constant 0 : i32
    %c0_i32_0 = arith.constant 0 : i32
    %c0_i32_1 = arith.constant 0 : i32
    return %c0_i32, %c0_i32_0 : i32, i32
  }
  func.func @transform_4(%arg0: i32) -> (i32, i32) {
    %c0_i32 = arith.constant 0 : i32
    %c0_i32_0 = arith.constant 0 : i32
    %c0_i32_1 = arith.constant 0 : i32
    return %c0_i32, %c0_i32_0 : i32, i32
  }
  func.func @transform_5(%arg0: i32) -> (i32, i32) {
    %c0_i32 = arith.constant 0 : i32
    %c0_i32_0 = arith.constant 0 : i32
    %c0_i32_1 = arith.constant 0 : i32
    return %c0_i32, %c0_i32_0 : i32, i32
  }
  func.func @transform_6(%arg0: i32) -> (i32, i32) {
    %c0_i32 = arith.constant 0 : i32
    %c0_i32_0 = arith.constant 0 : i32
    %c0_i32_1 = arith.constant 0 : i32
    return %c0_i32, %c0_i32_0 : i32, i32
  }
  func.func @transform_7(%arg0: i32) -> (i32, i32) {
    %c0_i32 = arith.constant 0 : i32
    %c0_i32_0 = arith.constant 0 : i32
    %c0_i32_1 = arith.constant 0 : i32
    return %c0_i32, %c0_i32_0 : i32, i32
  }
  func.func @transform_8(%arg0: i32) -> (i32, i32) {
    %c0_i32 = arith.constant 0 : i32
    %c0_i32_0 = arith.constant 0 : i32
    %c0_i32_1 = arith.constant 0 : i32
    return %c0_i32, %c0_i32_0 : i32, i32
  }
  func.func @transform_9(%arg0: i32) -> (i32, i32) {
    %c0_i32 = arith.constant 0 : i32
    %c0_i32_0 = arith.constant 0 : i32
    %c0_i32_1 = arith.constant 0 : i32
    return %c0_i32, %c0_i32_0 : i32, i32
  }
  func.func @transform_10(%arg0: i32) -> (i32, i32) {
    %c0_i32 = arith.constant 0 : i32
    %c0_i32_0 = arith.constant 0 : i32
    %c0_i32_1 = arith.constant 0 : i32
    return %c0_i32, %c0_i32_0 : i32, i32
  }
  func.func @transform_11(%arg0: i32) -> (i32, i32) {
    %c0_i32 = arith.constant 0 : i32
    %c0_i32_0 = arith.constant 0 : i32
    %c0_i32_1 = arith.constant 0 : i32
    return %c0_i32, %c0_i32_0 : i32, i32
  }
  func.func @transform_12(%arg0: i32) -> (i32, i32) {
    %c0_i32 = arith.constant 0 : i32
    %c0_i32_0 = arith.constant 0 : i32
    %c0_i32_1 = arith.constant 0 : i32
    return %c0_i32, %c0_i32_0 : i32, i32
  }
  func.func @transform_13(%arg0: i32) -> (i32, i32) {
    %c0_i32 = arith.constant 0 : i32
    %c0_i32_0 = arith.constant 0 : i32
    %c0_i32_1 = arith.constant 0 : i32
    return %c0_i32, %c0_i32_0 : i32, i32
  }
  func.func @transform_14(%arg0: i32) -> (i32, i32) {
    %c0_i32 = arith.constant 0 : i32
    %c0_i32_0 = arith.constant 0 : i32
    %c0_i32_1 = arith.constant 0 : i32
    return %c0_i32, %c0_i32_0 : i32, i32
  }
  func.func @transform_15(%arg0: i32) -> (i32, i32, i32) {
    %c0_i32 = arith.constant 0 : i32
    %c0_i32_0 = arith.constant 0 : i32
    %c0_i32_1 = arith.constant 0 : i32
    return %arg0, %c0_i32, %c0_i32_0 : i32, i32, i32
  }
}

module attributes {stable_mosaic.version = 11 : i64} {
  func.func @_upsample_kernel(%arg0: i32, %arg1: memref<1x32x32x32xf32, #tpu.memory_space<vmem>>, %arg2: memref<64x32xf32, #tpu.memory_space<vmem>>, %arg3: memref<64x32xf32, #tpu.memory_space<vmem>>, %arg4: memref<1x32x64x64xf32, #tpu.memory_space<vmem>>) attributes {dimension_semantics = [#tpu.dimension_semantics<parallel>], iteration_bounds = array<i64: 2>, scalar_prefetch = 0 : i64, scratch_operands = 0 : i64, tpu.core_type = #tpu.core_type<tc>, window_params = [{transform_indices = @transform_0, window_bounds = array<i64: 1, 32, 32, 32>}, {pipeline_mode = #tpu.pipeline_mode<synchronous>, transform_indices = @transform_1, window_bounds = array<i64: 64, 32>}, {pipeline_mode = #tpu.pipeline_mode<synchronous>, transform_indices = @transform_2, window_bounds = array<i64: 64, 32>}, {transform_indices = @transform_3, window_bounds = array<i64: 1, 32, 64, 64>}]} {
    %c0 = arith.constant 0 : index
    %c0_0 = arith.constant 0 : index
    %c0_1 = arith.constant 0 : index
    %c0_2 = arith.constant 0 : index
    %0 = vector.load %arg1[%c0, %c0_0, %c0_1, %c0_2] : memref<1x32x32x32xf32, #tpu.memory_space<vmem>>, vector<1x32x32x32xf32>
    %1 = vector.shape_cast %0 : vector<1x32x32x32xf32> to vector<32x32x32xf32>
    %c0_3 = arith.constant 0 : index
    %c0_4 = arith.constant 0 : index
    %2 = vector.load %arg2[%c0_3, %c0_4] : memref<64x32xf32, #tpu.memory_space<vmem>>, vector<64x32xf32>
    %3 = vector.shape_cast %2 : vector<64x32xf32> to vector<1x64x32xf32>
    %4 = vector.shape_cast %3 : vector<1x64x32xf32> to vector<1x64x32xf32>
    %5 = vector.broadcast %4 : vector<1x64x32xf32> to vector<32x64x32xf32>
    %c0_5 = arith.constant 0 : index
    %c0_6 = arith.constant 0 : index
    %6 = vector.load %arg3[%c0_5, %c0_6] : memref<64x32xf32, #tpu.memory_space<vmem>>, vector<64x32xf32>
    %7 = vector.shape_cast %6 : vector<64x32xf32> to vector<1x64x32xf32>
    %8 = vector.shape_cast %7 : vector<1x64x32xf32> to vector<1x64x32xf32>
    %9 = vector.broadcast %8 : vector<1x64x32xf32> to vector<32x64x32xf32>
    "tpu.trace_start"() <{level = 10 : i32, message = "cuw,chw->cuh"}> : () -> ()
    %cst = arith.constant dense<0.000000e+00> : vector<32x64x32xf32>
    %10 = tpu.matmul %5, %1, %cst {dimension_numbers = #tpu.dot_dimension_numbers<[2], [2], [1], [1], [0, 0, 0, 1, 1, 1], [0], [0]>} : vector<32x64x32xf32>, vector<32x32x32xf32>, vector<32x64x32xf32> -> vector<32x64x32xf32>
    "tpu.trace_stop"() : () -> ()
    "tpu.trace_start"() <{level = 10 : i32, message = "cvh,cuh->cvu"}> : () -> ()
    %cst_7 = arith.constant dense<0.000000e+00> : vector<32x64x64xf32>
    %11 = tpu.matmul %9, %10, %cst_7 {dimension_numbers = #tpu.dot_dimension_numbers<[2], [2], [1], [1], [0, 0, 0, 1, 1, 1], [0], [0]>} : vector<32x64x32xf32>, vector<32x64x32xf32>, vector<32x64x64xf32> -> vector<32x64x64xf32>
    "tpu.trace_stop"() : () -> ()
    %c0_8 = arith.constant 0 : index
    %c0_9 = arith.constant 0 : index
    %c0_10 = arith.constant 0 : index
    %c0_11 = arith.constant 0 : index
    %12 = vector.load %arg4[%c0_8, %c0_9, %c0_10, %c0_11] : memref<1x32x64x64xf32, #tpu.memory_space<vmem>>, vector<1x32x64x64xf32>
    %13 = vector.shape_cast %12 : vector<1x32x64x64xf32> to vector<32x64x64xf32>
    %14 = vector.shape_cast %11 : vector<32x64x64xf32> to vector<1x32x64x64xf32>
    tpu.vector_store %arg4[%c0_8, %c0_9, %c0_10, %c0_11], %14 {strides = array<i32>} : memref<1x32x64x64xf32, #tpu.memory_space<vmem>>, vector<1x32x64x64xf32>,
    return
  }
  func.func @transform_0(%arg0: i32) -> (i32, i32, i32, i32) {
    %c0_i32 = arith.constant 0 : i32
    %c0_i32_0 = arith.constant 0 : i32
    %c0_i32_1 = arith.constant 0 : i32
    %c0_i32_2 = arith.constant 0 : i32
    return %arg0, %c0_i32, %c0_i32_0, %c0_i32_1 : i32, i32, i32, i32
  }
  func.func @transform_1(%arg0: i32) -> (i32, i32) {
    %c0_i32 = arith.constant 0 : i32
    %c0_i32_0 = arith.constant 0 : i32
    %c0_i32_1 = arith.constant 0 : i32
    return %c0_i32, %c0_i32_0 : i32, i32
  }
  func.func @transform_2(%arg0: i32) -> (i32, i32) {
    %c0_i32 = arith.constant 0 : i32
    %c0_i32_0 = arith.constant 0 : i32
    %c0_i32_1 = arith.constant 0 : i32
    return %c0_i32, %c0_i32_0 : i32, i32
  }
  func.func @transform_3(%arg0: i32) -> (i32, i32, i32, i32) {
    %c0_i32 = arith.constant 0 : i32
    %c0_i32_0 = arith.constant 0 : i32
    %c0_i32_1 = arith.constant 0 : i32
    %c0_i32_2 = arith.constant 0 : i32
    return %arg0, %c0_i32, %c0_i32_0, %c0_i32_1 : i32, i32, i32, i32
  }
}

module attributes {stable_mosaic.version = 11 : i64} {
  func.func @kernel(%arg0: i32, %arg1: memref<1x32x4096xf32, #tpu.memory_space<vmem>>, %arg2: memref<32x32xf32, #tpu.memory_space<vmem>>, %arg3: memref<32x1xf32, #tpu.memory_space<vmem>>, %arg4: memref<32x32xf32, #tpu.memory_space<vmem>>, %arg5: memref<32x1xf32, #tpu.memory_space<vmem>>, %arg6: memref<2x32xf32, #tpu.memory_space<vmem>>, %arg7: memref<2x1xf32, #tpu.memory_space<vmem>>, %arg8: memref<1x2x4096xf32, #tpu.memory_space<vmem>>) attributes {dimension_semantics = [#tpu.dimension_semantics<parallel>], iteration_bounds = array<i64: 2>, scalar_prefetch = 0 : i64, scratch_operands = 0 : i64, tpu.core_type = #tpu.core_type<tc>, window_params = [{transform_indices = @transform_0, window_bounds = array<i64: 1, 32, 4096>}, {pipeline_mode = #tpu.pipeline_mode<synchronous>, transform_indices = @transform_1, window_bounds = array<i64: 32, 32>}, {pipeline_mode = #tpu.pipeline_mode<synchronous>, transform_indices = @transform_2, window_bounds = array<i64: 32, 1>}, {pipeline_mode = #tpu.pipeline_mode<synchronous>, transform_indices = @transform_3, window_bounds = array<i64: 32, 32>}, {pipeline_mode = #tpu.pipeline_mode<synchronous>, transform_indices = @transform_4, window_bounds = array<i64: 32, 1>}, {pipeline_mode = #tpu.pipeline_mode<synchronous>, transform_indices = @transform_5, window_bounds = array<i64: 2, 32>}, {pipeline_mode = #tpu.pipeline_mode<synchronous>, transform_indices = @transform_6, window_bounds = array<i64: 2, 1>}, {transform_indices = @transform_7, window_bounds = array<i64: 1, 2, 4096>}]} {
    %c0 = arith.constant 0 : index
    %c0_0 = arith.constant 0 : index
    %c0_1 = arith.constant 0 : index
    %0 = vector.load %arg1[%c0, %c0_0, %c0_1] : memref<1x32x4096xf32, #tpu.memory_space<vmem>>, vector<1x32x4096xf32>
    %1 = vector.shape_cast %0 : vector<1x32x4096xf32> to vector<32x4096xf32>
    %c0_2 = arith.constant 0 : index
    %c0_3 = arith.constant 0 : index
    %2 = vector.load %arg2[%c0_2, %c0_3] : memref<32x32xf32, #tpu.memory_space<vmem>>, vector<32x32xf32>
    %cst = arith.constant dense<0.000000e+00> : vector<32x4096xf32>
    %3 = tpu.matmul %2, %1, %cst {dimension_numbers = #tpu.dot_dimension_numbers<[1], [0], [0], [1], [0, 0, 1, 1], [], []>} : vector<32x32xf32>, vector<32x4096xf32>, vector<32x4096xf32> -> vector<32x4096xf32>
    %c0_4 = arith.constant 0 : index
    %c0_5 = arith.constant 0 : index
    %4 = vector.load %arg3[%c0_4, %c0_5] : memref<32x1xf32, #tpu.memory_space<vmem>>, vector<32x1xf32>
    %5 = vector.broadcast %4 : vector<32x1xf32> to vector<32x4096xf32>
    %6 = arith.addf %3, %5 : vector<32x4096xf32>
    %cst_6 = arith.constant 0.000000e+00 : f32
    %7 = vector.broadcast %cst_6 : f32 to vector<32x4096xf32>
    %8 = arith.maximumf %6, %7 : vector<32x4096xf32>
    %c0_7 = arith.constant 0 : index
    %c0_8 = arith.constant 0 : index
    %9 = vector.load %arg4[%c0_7, %c0_8] : memref<32x32xf32, #tpu.memory_space<vmem>>, vector<32x32xf32>
    %cst_9 = arith.constant dense<0.000000e+00> : vector<32x4096xf32>
    %10 = tpu.matmul %9, %8, %cst_9 {dimension_numbers = #tpu.dot_dimension_numbers<[1], [0], [0], [1], [0, 0, 1, 1], [], []>} : vector<32x32xf32>, vector<32x4096xf32>, vector<32x4096xf32> -> vector<32x4096xf32>
    %c0_10 = arith.constant 0 : index
    %c0_11 = arith.constant 0 : index
    %11 = vector.load %arg5[%c0_10, %c0_11] : memref<32x1xf32, #tpu.memory_space<vmem>>, vector<32x1xf32>
    %12 = vector.broadcast %11 : vector<32x1xf32> to vector<32x4096xf32>
    %13 = arith.addf %10, %12 : vector<32x4096xf32>
    %cst_12 = arith.constant 0.000000e+00 : f32
    %14 = vector.broadcast %cst_12 : f32 to vector<32x4096xf32>
    %15 = arith.maximumf %13, %14 : vector<32x4096xf32>
    %c0_13 = arith.constant 0 : index
    %c0_14 = arith.constant 0 : index
    %16 = vector.load %arg6[%c0_13, %c0_14] : memref<2x32xf32, #tpu.memory_space<vmem>>, vector<2x32xf32>
    %cst_15 = arith.constant dense<0.000000e+00> : vector<2x4096xf32>
    %17 = tpu.matmul %16, %15, %cst_15 {dimension_numbers = #tpu.dot_dimension_numbers<[1], [0], [0], [1], [0, 0, 1, 1], [], []>} : vector<2x32xf32>, vector<32x4096xf32>, vector<2x4096xf32> -> vector<2x4096xf32>
    %c0_16 = arith.constant 0 : index
    %c0_17 = arith.constant 0 : index
    %18 = vector.load %arg7[%c0_16, %c0_17] : memref<2x1xf32, #tpu.memory_space<vmem>>, vector<2x1xf32>
    %19 = vector.broadcast %18 : vector<2x1xf32> to vector<2x4096xf32>
    %20 = arith.addf %17, %19 : vector<2x4096xf32>
    %c0_18 = arith.constant 0 : index
    %c0_19 = arith.constant 0 : index
    %c0_20 = arith.constant 0 : index
    %21 = vector.load %arg8[%c0_18, %c0_19, %c0_20] : memref<1x2x4096xf32, #tpu.memory_space<vmem>>, vector<1x2x4096xf32>
    %22 = vector.shape_cast %21 : vector<1x2x4096xf32> to vector<2x4096xf32>
    %23 = vector.shape_cast %20 : vector<2x4096xf32> to vector<1x2x4096xf32>
    tpu.vector_store %arg8[%c0_18, %c0_19, %c0_20], %23 {strides = array<i32>} : memref<1x2x4096xf32, #tpu.memory_space<vmem>>, vector<1x2x4096xf32>,
    return
  }
  func.func @transform_0(%arg0: i32) -> (i32, i32, i32) {
    %c0_i32 = arith.constant 0 : i32
    %c0_i32_0 = arith.constant 0 : i32
    %c0_i32_1 = arith.constant 0 : i32
    return %arg0, %c0_i32, %c0_i32_0 : i32, i32, i32
  }
  func.func @transform_1(%arg0: i32) -> (i32, i32) {
    %c0_i32 = arith.constant 0 : i32
    %c0_i32_0 = arith.constant 0 : i32
    %c0_i32_1 = arith.constant 0 : i32
    return %c0_i32, %c0_i32_0 : i32, i32
  }
  func.func @transform_2(%arg0: i32) -> (i32, i32) {
    %c0_i32 = arith.constant 0 : i32
    %c0_i32_0 = arith.constant 0 : i32
    %c0_i32_1 = arith.constant 0 : i32
    return %c0_i32, %c0_i32_0 : i32, i32
  }
  func.func @transform_3(%arg0: i32) -> (i32, i32) {
    %c0_i32 = arith.constant 0 : i32
    %c0_i32_0 = arith.constant 0 : i32
    %c0_i32_1 = arith.constant 0 : i32
    return %c0_i32, %c0_i32_0 : i32, i32
  }
  func.func @transform_4(%arg0: i32) -> (i32, i32) {
    %c0_i32 = arith.constant 0 : i32
    %c0_i32_0 = arith.constant 0 : i32
    %c0_i32_1 = arith.constant 0 : i32
    return %c0_i32, %c0_i32_0 : i32, i32
  }
  func.func @transform_5(%arg0: i32) -> (i32, i32) {
    %c0_i32 = arith.constant 0 : i32
    %c0_i32_0 = arith.constant 0 : i32
    %c0_i32_1 = arith.constant 0 : i32
    return %c0_i32, %c0_i32_0 : i32, i32
  }
  func.func @transform_6(%arg0: i32) -> (i32, i32) {
    %c0_i32 = arith.constant 0 : i32
    %c0_i32_0 = arith.constant 0 : i32
    %c0_i32_1 = arith.constant 0 : i32
    return %c0_i32, %c0_i32_0 : i32, i32
  }
  func.func @transform_7(%arg0: i32) -> (i32, i32, i32) {
    %c0_i32 = arith.constant 0 : i32
    %c0_i32_0 = arith.constant 0 : i32
    %c0_i32_1 = arith.constant 0 : i32
    return %arg0, %c0_i32, %c0_i32_0 : i32, i32, i32
  }
}

module attributes {stable_mosaic.version = 11 : i64} {
  func.func @_upsample_kernel(%arg0: i32, %arg1: memref<1x2x64x64xf32, #tpu.memory_space<vmem>>, %arg2: memref<128x64xf32, #tpu.memory_space<vmem>>, %arg3: memref<128x64xf32, #tpu.memory_space<vmem>>, %arg4: memref<1x2x128x128xf32, #tpu.memory_space<vmem>>) attributes {dimension_semantics = [#tpu.dimension_semantics<parallel>], iteration_bounds = array<i64: 2>, scalar_prefetch = 0 : i64, scratch_operands = 0 : i64, tpu.core_type = #tpu.core_type<tc>, window_params = [{transform_indices = @transform_0, window_bounds = array<i64: 1, 2, 64, 64>}, {pipeline_mode = #tpu.pipeline_mode<synchronous>, transform_indices = @transform_1, window_bounds = array<i64: 128, 64>}, {pipeline_mode = #tpu.pipeline_mode<synchronous>, transform_indices = @transform_2, window_bounds = array<i64: 128, 64>}, {transform_indices = @transform_3, window_bounds = array<i64: 1, 2, 128, 128>}]} {
    %c0 = arith.constant 0 : index
    %c0_0 = arith.constant 0 : index
    %c0_1 = arith.constant 0 : index
    %c0_2 = arith.constant 0 : index
    %0 = vector.load %arg1[%c0, %c0_0, %c0_1, %c0_2] : memref<1x2x64x64xf32, #tpu.memory_space<vmem>>, vector<1x2x64x64xf32>
    %1 = vector.shape_cast %0 : vector<1x2x64x64xf32> to vector<2x64x64xf32>
    %c0_3 = arith.constant 0 : index
    %c0_4 = arith.constant 0 : index
    %2 = vector.load %arg2[%c0_3, %c0_4] : memref<128x64xf32, #tpu.memory_space<vmem>>, vector<128x64xf32>
    %3 = vector.shape_cast %2 : vector<128x64xf32> to vector<1x128x64xf32>
    %4 = vector.shape_cast %3 : vector<1x128x64xf32> to vector<1x128x64xf32>
    %5 = vector.broadcast %4 : vector<1x128x64xf32> to vector<2x128x64xf32>
    %c0_5 = arith.constant 0 : index
    %c0_6 = arith.constant 0 : index
    %6 = vector.load %arg3[%c0_5, %c0_6] : memref<128x64xf32, #tpu.memory_space<vmem>>, vector<128x64xf32>
    %7 = vector.shape_cast %6 : vector<128x64xf32> to vector<1x128x64xf32>
    %8 = vector.shape_cast %7 : vector<1x128x64xf32> to vector<1x128x64xf32>
    %9 = vector.broadcast %8 : vector<1x128x64xf32> to vector<2x128x64xf32>
    "tpu.trace_start"() <{level = 10 : i32, message = "cuw,chw->cuh"}> : () -> ()
    %cst = arith.constant dense<0.000000e+00> : vector<2x128x64xf32>
    %10 = tpu.matmul %5, %1, %cst {dimension_numbers = #tpu.dot_dimension_numbers<[2], [2], [1], [1], [0, 0, 0, 1, 1, 1], [0], [0]>} : vector<2x128x64xf32>, vector<2x64x64xf32>, vector<2x128x64xf32> -> vector<2x128x64xf32>
    "tpu.trace_stop"() : () -> ()
    "tpu.trace_start"() <{level = 10 : i32, message = "cvh,cuh->cvu"}> : () -> ()
    %cst_7 = arith.constant dense<0.000000e+00> : vector<2x128x128xf32>
    %11 = tpu.matmul %9, %10, %cst_7 {dimension_numbers = #tpu.dot_dimension_numbers<[2], [2], [1], [1], [0, 0, 0, 1, 1, 1], [0], [0]>} : vector<2x128x64xf32>, vector<2x128x64xf32>, vector<2x128x128xf32> -> vector<2x128x128xf32>
    "tpu.trace_stop"() : () -> ()
    %c0_8 = arith.constant 0 : index
    %c0_9 = arith.constant 0 : index
    %c0_10 = arith.constant 0 : index
    %c0_11 = arith.constant 0 : index
    %12 = vector.load %arg4[%c0_8, %c0_9, %c0_10, %c0_11] : memref<1x2x128x128xf32, #tpu.memory_space<vmem>>, vector<1x2x128x128xf32>
    %13 = vector.shape_cast %12 : vector<1x2x128x128xf32> to vector<2x128x128xf32>
    %14 = vector.shape_cast %11 : vector<2x128x128xf32> to vector<1x2x128x128xf32>
    tpu.vector_store %arg4[%c0_8, %c0_9, %c0_10, %c0_11], %14 {strides = array<i32>} : memref<1x2x128x128xf32, #tpu.memory_space<vmem>>, vector<1x2x128x128xf32>,
    return
  }
  func.func @transform_0(%arg0: i32) -> (i32, i32, i32, i32) {
    %c0_i32 = arith.constant 0 : i32
    %c0_i32_0 = arith.constant 0 : i32
    %c0_i32_1 = arith.constant 0 : i32
    %c0_i32_2 = arith.constant 0 : i32
    return %arg0, %c0_i32, %c0_i32_0, %c0_i32_1 : i32, i32, i32, i32
  }
  func.func @transform_1(%arg0: i32) -> (i32, i32) {
    %c0_i32 = arith.constant 0 : i32
    %c0_i32_0 = arith.constant 0 : i32
    %c0_i32_1 = arith.constant 0 : i32
    return %c0_i32, %c0_i32_0 : i32, i32
  }
  func.func @transform_2(%arg0: i32) -> (i32, i32) {
    %c0_i32 = arith.constant 0 : i32
    %c0_i32_0 = arith.constant 0 : i32
    %c0_i32_1 = arith.constant 0 : i32
    return %c0_i32, %c0_i32_0 : i32, i32
  }
  func.func @transform_3(%arg0: i32) -> (i32, i32, i32, i32) {
    %c0_i32 = arith.constant 0 : i32
    %c0_i32_0 = arith.constant 0 : i32
    %c0_i32_1 = arith.constant 0 : i32
    %c0_i32_2 = arith.constant 0 : i32
    return %arg0, %c0_i32, %c0_i32_0, %c0_i32_1 : i32, i32, i32, i32
  }
}

</mosaic_0001>

<bundles_post_ra>
// kernel: decoder_occupancy_block.4
= control target key start
LH: loop header
LB: loop body
LE: loop exit
PB: predicated region body
PF: predicated region fallthrough
CT: control target
= control target key end

     0   :  { %s5175_s0 = inlined_call_operand.vmem [shape: f32[2,128,64], index: 0, kind: input, shape index: {}]   ;;  %s5176_s1 = inlined_call_operand.hbm [shape: f32[128,128], index: 1, kind: input, shape index: {}]   ;;  %s5177_s2 = inlined_call_operand.vmem [shape: f32[128,1], index: 2, kind: input, shape index: {}]   ;;  %s5178_s3 = inlined_call_operand.hbm [shape: f32[128,128], index: 3, kind: input, shape index: {}]   ;;  %s5179_s4 = inlined_call_operand.vmem [shape: f32[128,1], index: 4, kind: input, shape index: {}]   ;;  %s5180_s5 = inlined_call_operand.hbm [shape: f32[64,256], index: 5, kind: input, shape index: {}]   ;;  %s5181_s6 = inlined_call_operand.hbm [shape: f32[64,128], index: 6, kind: input, shape index: {}]   ;;  %s5182_s7 = inlined_call_operand.vmem [shape: f32[64,1], index: 7, kind: input, shape index: {}]   ;;  %s5183_s8 = inlined_call_operand.hbm [shape: f32[64,64], index: 8, kind: input, shape index: {}]   ;;  %s5184_s9 = inlined_call_operand.vmem [shape: f32[64,1], index: 9, kind: input, shape index: {}]   ;;  %s5185_s10 = inlined_call_operand.hbm [shape: f32[256,1024], index: 10, kind: input, shape index: {}]   ;;  %s5186_s11 = inlined_call_operand.hbm [shape: f32[64,64], index: 11, kind: input, shape index: {}]   ;;  %s5187_s12 = inlined_call_operand.vmem [shape: f32[64,1], index: 12, kind: input, shape index: {}]   ;;  %s5188_s13 = inlined_call_operand.hbm [shape: f32[32,64], index: 13, kind: input, shape index: {}]   ;;  %s5189_s14 = inlined_call_operand.vmem [shape: f32[32,1], index: 14, kind: input, shape index: {}]   ;;  %s5190_s15 = inlined_call_operand.vmem [shape: f32[2,32,1024], index: 15, kind: output, shape index: {}]  }
   0x1   :  { %5192 = sst [smem:[#allocation21_spill]] %s5178_s3 }
   0x2   :  { %5193 = sst [smem:[#allocation22_spill]] %s5181_s6 }
   0x3   :  { %5194 = sst [smem:[#allocation23_spill]] %s5185_s10 }
   0x4   :  { %5195 = sst [smem:[#allocation24_spill]] %s5190_s15 }
   0x5   :  { %20 = vsyncpa [#allocation3], 0 }
   0x6   :  { %21 = vsyncpa [#allocation5], 0 }
   0x7   :  { %22 = vsyncpa [#allocation8], 0 }
   0x8   :  { %23 = vsyncpa [#allocation11], 0 }
   0x9   :  { %24 = vsyncpa [#allocation14], 0  ;;  %s4062_s18 = smov 0  }
   0xa LB: > { %5196 = sst [smem:[#allocation20_spill]] %s3965_s18  ;;  %s4068_s19 = sadd.s32 4294967295, %s3965_s18   ;;  %s3965_s18 = sphi %s4062_s18, %s30_s18  }
   0xb   : > { %p3413_p0 = scmp.ge.s32.totalorder %s3965_s18, 1  ;;  %p381_p1 = scmp.lt.s32.totalorder %s3965_s18, 3 }
   0xc   : > { %p3657_p2 = scmp.eq.s32.totalorder %s4068_s19, 0  ;;  %s5197_s3 = sld [smem:[#allocation21_spill]] }
   0xd   : > { %p4076_p3 = pnand %p3413_p0, %p381_p1  ;;  %s5199_s6 = sld [smem:[#allocation22_spill]] }
   0xe   : > { %s3967_s27 = smov [#allocation4]   ;;  %s3968_s30 = smov [#allocation7]  }
   0xf   : > { %p3632_p4 = pneg %p4076_p3  ;;  %s411_s28 = sshll.u32 %s3967_s27, 4  ;;  %s412_s28 = int_to_ptr.vmem [resolvable:$true] %s411_s28 }
  0x10   : > { %s442_s16 = sshll.u32 %s3968_s30, 4  ;;  %s5201_s10 = sld [smem:[#allocation23_spill]]  ;;  %s443_s16 = int_to_ptr.vmem [resolvable:$true] %s442_s16 }
  0x11   : > { %p4087_p5 = pnand %p3657_p2, %p3632_p4  ;;  %s3969_s24 = smov 128  }
  0x12   : > { %s409_s22 = sshll.u32 %s5197_s3, 4  ;;  %s3970_s25 = smov 8   ;;  %s410_s22 = int_to_ptr.hbm [resolvable:$true] %s409_s22 }
  0x13   : > { %s440_s26 = sshll.u32 %s5199_s6, 4  ;;  %s3971_s27 = smov [#allocation10]   ;;  %s441_s26 = int_to_ptr.hbm [resolvable:$true] %s440_s26 }
  0x14   : > { %3638 = dma.hbm_to_vmem [thread:$0]  (!%p4087_p5), %s410_s22, 2048, %s412_s28, [#allocation5], %s3969_s24, %s3969_s24, %s3970_s25  }
  0x15   : > { %3644 = dma.hbm_to_vmem [thread:$0]  (!%p4087_p5), %s441_s26, 1024, %s443_s16, [#allocation8], %s3969_s24, %s3969_s24, %s3970_s25  }
  0x16   : > { %s474_s21 = sshll.u32 %s5201_s10, 4  ;;  %s476_s30 = sshll.u32 %s3971_s27, 4  ;;  %s475_s21 = int_to_ptr.hbm [resolvable:$true] %s474_s21  ;;  %s477_s30 = int_to_ptr.vmem [resolvable:$true] %s476_s30 }
  0x17   : > { %s3972_s17 = smov 1024   ;;  %s3973_s20 = smov 64  }
  0x18   : > { %3650 = dma.hbm_to_vmem [thread:$0]  (!%p4087_p5), %s475_s21, 32768, %s477_s30, [#allocation11], %s3972_s17, %s3972_s17, %s3973_s20  }
  0x19   : > { %s392_s10 = sshll.u32 %s5176_s1, 4  ;;  %s3974_s22 = smov [#allocation2]   ;;  %s393_s10 = int_to_ptr.hbm [resolvable:$true] %s392_s10 }
  0x1a   : > { %s394_s28 = sshll.u32 %s3974_s22, 4  ;;  %s426_s26 = sshll.u32 %s5180_s5, 4  ;;  %s395_s28 = int_to_ptr.vmem [resolvable:$true] %s394_s28  ;;  %s427_s26 = int_to_ptr.hbm [resolvable:$true] %s426_s26 }
  0x1b   : > { %3635 = dma.hbm_to_vmem [thread:$0]  (!%p4087_p5), %s393_s10, 2048, %s395_s28, [#allocation3], %s3969_s24, %s3969_s24, %s3970_s25  }
  0x1c   : > { %s3975_s16 = smov [#allocation6]   ;;  %s3976_s3 = smov 256  }
  0x1d   : > { %s428_s21 = sshll.u32 %s3975_s16, 4  ;;  %s3977_s6 = smov 16   ;;  %s429_s21 = int_to_ptr.vmem [resolvable:$true] %s428_s21 }
  0x1e   : > { %3641 = dma.hbm_to_vmem [thread:$0]  (!%p4087_p5), %s427_s26, 2048, %s429_s21, [#allocation5], %s3976_s3, %s3976_s3, %s3977_s6  }
  0x1f   : > { %s457_s15 = sshll.u32 %s5183_s8, 4  ;;  %s3978_s18 = smov [#allocation9]   ;;  %s458_s15 = int_to_ptr.hbm [resolvable:$true] %s457_s15 }
  0x20   : > { %s459_s17 = sshll.u32 %s3978_s18, 4  ;;  %s488_s22 = sshll.u32 %s5186_s11, 4  ;;  %s460_s17 = int_to_ptr.vmem [resolvable:$true] %s459_s17  ;;  %s489_s22 = int_to_ptr.hbm [resolvable:$true] %s488_s22 }
  0x21   : > { %3647 = dma.hbm_to_vmem [thread:$0]  (!%p4087_p5), %s458_s15, 1024, %s460_s17, [#allocation8], %s3969_s24, %s3969_s24, %s3970_s25  }
  0x22   : > { %s3979_s28 = smov [#allocation12]   ;;  %s505_s3 = sshll.u32 %s5188_s13, 4  ;;  %s506_s3 = int_to_ptr.hbm [resolvable:$true] %s505_s3 }
  0x23   : > { %s490_s26 = sshll.u32 %s3979_s28, 4  ;;  %s3980_s6 = smov [#allocation13]   ;;  %s491_s26 = int_to_ptr.vmem [resolvable:$true] %s490_s26 }
  0x24   : > { %3653 = dma.hbm_to_vmem [thread:$0]  (!%p4087_p5), %s489_s22, 1024, %s491_s26, [#allocation11], %s3969_s24, %s3969_s24, %s3970_s25  }
  0x25   : > { %s507_s27 = sshll.u32 %s3980_s6, 4  ;;  %534 = sbr.rel (%p4076_p3) target bundleno = 1867 (0x74b), region = 80  ;;  %s508_s27 = int_to_ptr.vmem [resolvable:$true] %s507_s27 }
  0x26   : > { %3656 = dma.hbm_to_vmem [thread:$0]  (!%p4087_p5), %s506_s3, 512, %s508_s27, [#allocation14], %s3969_s24, %s3969_s24, %s3970_s25  }
  0x2a   : > { %3944 = dma.done.wait (%p3657_p2), [#allocation3], 2048  }
  0x2b   : > { %3946 = vsyncadd (%p3657_p2), [#allocation3], 4294965248 }
  0x2c   : > { %3948 = dma.done.wait (%p3657_p2), [#allocation5], 4096  }
  0x2d   : > { %3950 = vsyncadd (%p3657_p2), [#allocation5], 4294963200 }
  0x2e   : > { %3952 = dma.done.wait (%p3657_p2), [#allocation8], 2048  }
  0x2f   : > { %3954 = vsyncadd (%p3657_p2), [#allocation8], 4294965248 }
  0x30   : > { %3956 = dma.done.wait (%p3657_p2), [#allocation11], 33792  }
  0x31   : > { %3958 = vsyncadd (%p3657_p2), [#allocation11], 4294933504 }
  0x32   : > { %3960 = dma.done.wait (%p3657_p2), [#allocation14], 512  }
  0x33   : > { %3962 = vsyncadd (%p3657_p2), [#allocation14], 4294966784  ;;  %p618_p6 = scmp.lt.s32.totalorder %s4068_s19, 1  ;;  %v3981_v0 = vmov 0   ;;  %v675_v1 = vld [vmem:[%s5177_s2 + $0x78] sm:$0xff]  ;;  %v673_v4 = vld [vmem:[%s5177_s2 + $0x68] sm:$0xff] }
  0x34   : > { %3696 = vset.pattern.permute.xlu0 %v3981_v0  ;;  %3697 = vset.pattern.permute.xlu1 %v3981_v0  ;;  %v674_v7 = vld [vmem:[%s5177_s2 + $0x70] sm:$0xff]  ;;  %v672_v9 = vld [vmem:[%s5177_s2 + $0x60] sm:$0xff]  ;;  %v671_v10 = vld [vmem:[%s5177_s2 + $0x58] sm:$0xff]  ;;  %vm1046_vm0 = vcmask 523264   ;;  %s5202_s29 = sld [smem:[#allocation24_spill]] }
  0x35   : > { %s5205_s19 = smov (!%p618_p6, %s4068_s19), 1  ;;  %3698 = vset.pattern.permute.xlu2 %v3981_v0  ;;  %753 = vperm.xlu0 %3696, %v675_v1   ;;  %v670_v14 = vld [vmem:[%s5177_s2 + $0x50] sm:$0xff]  ;;  %v669_v15 = vld [vmem:[%s5177_s2 + $0x48] sm:$0xff]  ;;  %v668_v17 = vld [vmem:[%s5177_s2 + $0x40] sm:$0xff] }
  0x36   : > { %s3582_s23 = sshll.u32 %s5205_s19, 7  ;;  %743 = vperm.xlu1 %3697, %v673_v4   ;;  %733 = vperm.xlu2 %3698, %v671_v10   ;;  %v667_v21 = vld [vmem:[%s5177_s2 + $0x38] sm:$0xff]  ;;  %v666_v22 = vld [vmem:[%s5177_s2 + $0x30] sm:$0xff]  ;;  %v665_v24 = vld [vmem:[%s5177_s2 + $0x28] sm:$0xff]  ;;  %s3583_s6 = sshll.u32 %s5205_s19, 8 }
  0x37   : > { %s4173_s25 = scalar_lea.vmem %s5175_s0, %s3582_s23  ;;  %v644_v28 = vld [vmem:[#allocation2] sm:$0xff]  ;;  %v663_v30 = vld [vmem:[%s5177_s2 + $0x18] sm:$0xff]  ;;  %v662_v31 = vld [vmem:[%s5177_s2 + $0x10] sm:$0xff] }
  0x38   : > { %v643_v2 = vld [vmem:[%s4173_s25 + $0x78] sm:$0xff]  ;;  %v642_v3 = vld [vmem:[%s4173_s25 + $0x70] sm:$0xff]  ;;  %v641_v5 = vld [vmem:[%s4173_s25 + $0x68] sm:$0xff] }
  0x39   : > { %756 = vmatpush.msra.mxu0 %v643_v2  ;;  %v640_v6 = vld [vmem:[%s4173_s25 + $0x60] sm:$0xff]  ;;  %v639_v8 = vld [vmem:[%s4173_s25 + $0x58] sm:$0xff]  ;;  %v638_v11 = vld [vmem:[%s4173_s25 + $0x50] sm:$0xff] }
  0x3a   : > { %v637_v12 = vld [vmem:[%s4173_s25 + $0x48] sm:$0xff]  ;;  %v636_v13 = vld [vmem:[%s4173_s25 + $0x40] sm:$0xff]  ;;  %v635_v16 = vld [vmem:[%s4173_s25 + $0x38] sm:$0xff]  ;;  %s5083_s19 = scalar_lea.vmem %s5202_s29, %s3583_s6 }
  0x3b   : > { %757 = vmatpush.msra.mxu0 %v642_v3  ;;  %v634_v18 = vld [vmem:[%s4173_s25 + $0x30] sm:$0xff]  ;;  %v633_v19 = vld [vmem:[%s4173_s25 + $0x28] sm:$0xff]  ;;  %v632_v20 = vld [vmem:[%s4173_s25 + $0x20] sm:$0xff] }
  0x3c   : > { %v631_v23 = vld [vmem:[%s4173_s25 + $0x18] sm:$0xff]  ;;  %v630_v25 = vld [vmem:[%s4173_s25 + $0x10] sm:$0xff]  ;;  %v629_v26 = vld [vmem:[%s4173_s25 + $0x8] sm:$0xff] }
  0x3d   : > { %758 = vmatpush.msra.mxu0 %v641_v5  ;;  %748 = vperm.xlu0 %3696, %v674_v7   ;;  %v628_v27 = vld [vmem:[%s4173_s25] sm:$0xff]  ;;  %v645_v32 = vld [vmem:[#allocation2 + $0x8] sm:$0xff]  ;;  %v646_v36 = vld [vmem:[#allocation2 + $0x10] sm:$0xff] }
  0x3e   : > { %738 = vperm.xlu1 %3697, %v672_v9   ;;  %728 = vperm.xlu2 %3698, %v670_v14   ;;  %v664_v29 = vld [vmem:[%s5177_s2 + $0x20] sm:$0xff]  ;;  %v661_v33 = vld [vmem:[%s5177_s2 + $0x8] sm:$0xff]  ;;  %v855_v38 = vld [vmem:[%s5179_s4 + $0x10] sm:$0xff] }
  0x3f   : > { %759 = vmatpush.msra.mxu0 %v640_v6  ;;  %v660_v34 = vld [vmem:[%s5177_s2] sm:$0xff]  ;;  %v854_v37 = vld [vmem:[%s5179_s4 + $0x8] sm:$0xff]  ;;  %v856_v39 = vld [vmem:[%s5179_s4 + $0x18] sm:$0xff] }
  0x40   : > { %v853_v35 = vld [vmem:[%s5179_s4] sm:$0xff]  ;;  %v647_v40 = vld [vmem:[#allocation2 + $0x18] sm:$0xff]  ;;  %v858_v42 = vld [vmem:[%s5179_s4 + $0x28] sm:$0xff] }
  0x41   : > { %760 = vmatpush.msra.mxu0 %v639_v8  ;;  %v857_v41 = vld [vmem:[%s5179_s4 + $0x20] sm:$0xff]  ;;  %v859_v43 = vld [vmem:[%s5179_s4 + $0x30] sm:$0xff]  ;;  %v860_v45 = vld [vmem:[%s5179_s4 + $0x38] sm:$0xff] }
  0x42   : > { %v648_v44 = vld [vmem:[#allocation2 + $0x20] sm:$0xff]  ;;  %v862_v47 = vld [vmem:[%s5179_s4 + $0x48] sm:$0xff]  ;;  %v863_v49 = vld [vmem:[%s5179_s4 + $0x50] sm:$0xff] }
  0x43   : > { %761 = vmatpush.msra.mxu0 %v638_v11  ;;  %v861_v46 = vld [vmem:[%s5179_s4 + $0x40] sm:$0xff]  ;;  %v649_v48 = vld [vmem:[#allocation2 + $0x28] sm:$0xff]  ;;  %v864_v50 = vld [vmem:[%s5179_s4 + $0x58] sm:$0xff] }
  0x44   : > { %v865_v51 = vld [vmem:[%s5179_s4 + $0x60] sm:$0xff]  ;;  %v650_v52 = vld [vmem:[#allocation2 + $0x30] sm:$0xff]  ;;  %v866_v53 = vld [vmem:[%s5179_s4 + $0x68] sm:$0xff] }
  0x45   : > { %762 = vmatpush.msra.mxu0 %v637_v12  ;;  %723 = vperm.xlu0 %3696, %v669_v15   ;;  %v867_v54 = vld [vmem:[%s5179_s4 + $0x70] sm:$0xff]  ;;  %v868_v55 = vld [vmem:[%s5179_s4 + $0x78] sm:$0xff]  ;;  %v1238_v59 = vld [vmem:[%s5182_s7 + $0x28] sm:$0xff] }
  0x46   : > { %718 = vperm.xlu1 %3697, %v668_v17   ;;  %713 = vperm.xlu2 %3698, %v667_v21   ;;  %v651_v56 = vld [vmem:[#allocation2 + $0x38] sm:$0xff]  ;;  %v1239_v58 = vld [vmem:[%s5182_s7 + $0x30] sm:$0xff]  ;;  %v652_v60 = vld [vmem:[#allocation2 + $0x40] sm:$0xff] }
  0x47   : > { %763 = vmatpush.msra.mxu0 %v636_v13  ;;  %v1240_v57 = vld [vmem:[%s5182_s7 + $0x38] sm:$0xff]  ;;  %v1237_v61 = vld [vmem:[%s5182_s7 + $0x20] sm:$0xff]  ;;  %v1235_v63 = vld [vmem:[%s5182_s7 + $0x10] sm:$0xff] }
  0x48   : > { %v1236_v62 = vld [vmem:[%s5182_s7 + $0x18] sm:$0xff]  ;;  %v653_v0 = vld [vmem:[#allocation2 + $0x48] sm:$0xff]  ;;  %v1233_v2 = vld [vmem:[%s5182_s7] sm:$0xff] }
  0x49   : > { %764 = vmatpush.msra.mxu0 %v635_v16  ;;  %v1234_v1 = vld [vmem:[%s5182_s7 + $0x8] sm:$0xff]  ;;  %v1387_v3 = vld [vmem:[%s5184_s9] sm:$0xff]  ;;  %v654_v4 = vld [vmem:[#allocation2 + $0x50] sm:$0xff] }
  0x4a   : > { %v1388_v5 = vld [vmem:[%s5184_s9 + $0x8] sm:$0xff]  ;;  %v1389_v6 = vld [vmem:[%s5184_s9 + $0x10] sm:$0xff]  ;;  %v1390_v7 = vld [vmem:[%s5184_s9 + $0x18] sm:$0xff] }
  0x4b   : > { %765 = vmatpush.msra.mxu0 %v634_v18  ;;  %v655_v8 = vld [vmem:[#allocation2 + $0x58] sm:$0xff]  ;;  %v1391_v9 = vld [vmem:[%s5184_s9 + $0x20] sm:$0xff]  ;;  %v1392_v10 = vld [vmem:[%s5184_s9 + $0x28] sm:$0xff] }
  0x4c   : > { %v1393_v11 = vld [vmem:[%s5184_s9 + $0x30] sm:$0xff]  ;;  %v656_v12 = vld [vmem:[#allocation2 + $0x60] sm:$0xff]  ;;  %v1394_v13 = vld [vmem:[%s5184_s9 + $0x38] sm:$0xff] }
  0x4d   : > { %766 = vmatpush.msra.mxu0 %v633_v19  ;;  %708 = vperm.xlu0 %3696, %v666_v22   ;;  %v2484_v14 = vld [vmem:[%s5187_s12 + $0x38] sm:$0xff]  ;;  %v2483_v15 = vld [vmem:[%s5187_s12 + $0x30] sm:$0xff]  ;;  %v657_v16 = vld [vmem:[#allocation2 + $0x68] sm:$0xff] }
  0x4e   : > { %703 = vperm.xlu1 %3697, %v665_v24   ;;  %698 = vperm.xlu2 %3698, %v664_v29   ;;  %v2482_v17 = vld [vmem:[%s5187_s12 + $0x28] sm:$0xff]  ;;  %v2481_v18 = vld [vmem:[%s5187_s12 + $0x20] sm:$0xff]  ;;  %v2480_v19 = vld [vmem:[%s5187_s12 + $0x18] sm:$0xff] }
  0x4f   : > { %767 = vmatpush.msra.mxu0 %v632_v20  ;;  %v658_v20 = vld [vmem:[#allocation2 + $0x70] sm:$0xff]  ;;  %v2478_v22 = vld [vmem:[%s5187_s12 + $0x8] sm:$0xff]  ;;  %v659_v24 = vld [vmem:[#allocation2 + $0x78] sm:$0xff] }
  0x50   : > { %v2479_v21 = vld [vmem:[%s5187_s12 + $0x10] sm:$0xff]  ;;  %v2948_v29 = vld [vmem:[%s5189_s14 + $0x18] sm:$0xff] }
  0x51   : > { %768 = vmatpush.msra.mxu0 %v631_v23  ;;  %v2477_v23 = vld [vmem:[%s5187_s12] sm:$0xff] }
  0x53   : > { %769 = vmatpush.msra.mxu0 %v630_v25  ;;  %v2945_v25 = vld [vmem:[%s5189_s14] sm:$0xff] }
  0x55   : > { %770 = vmatpush.msra.mxu0 %v629_v26  ;;  %693 = vperm.xlu0 %3696, %v663_v30   ;;  %v2946_v26 = vld [vmem:[%s5189_s14 + $0x8] sm:$0xff] }
  0x56   : > { %688 = vperm.xlu1 %3697, %v662_v31   ;;  %683 = vperm.xlu2 %3698, %v661_v33  }
  0x57   : > { %771 = vmatpush.msra.mxu0 %v628_v27  ;;  %v2947_v27 = vld [vmem:[%s5189_s14 + $0x10] sm:$0xff] }
  0x58   : > { %772 = vmatmul.f32.vlgmr.msra.gmra.mxu0 %v644_v28 }
  0x5d   : > { %678 = vperm.xlu0 %3696, %v660_v34  }
  0x5e   : > { %871 = vperm.xlu1 %3697, %v853_v35   ;;  %876 = vperm.xlu2 %3698, %v854_v37  }
  0x60   : > { %775 = vmatmul.f32.gmra.mxu0 %v645_v32 }
  0x65   : > { %881 = vperm.xlu0 %3696, %v855_v38  }
  0x66   : > { %886 = vperm.xlu1 %3697, %v856_v39   ;;  %891 = vperm.xlu2 %3698, %v857_v41  }
  0x68   : > { %778 = vmatmul.f32.gmra.mxu0 %v646_v36 }
  0x6d   : > { %896 = vperm.xlu0 %3696, %v858_v42  }
  0x6e   : > { %901 = vperm.xlu1 %3697, %v859_v43   ;;  %906 = vperm.xlu2 %3698, %v860_v45  }
  0x70   : > { %781 = vmatmul.f32.gmra.mxu0 %v647_v40 }
  0x75   : > { %911 = vperm.xlu0 %3696, %v861_v46  }
  0x76   : > { %916 = vperm.xlu1 %3697, %v862_v47   ;;  %921 = vperm.xlu2 %3698, %v863_v49  }
  0x78   : > { %784 = vmatmul.f32.gmra.mxu0 %v648_v44 }
  0x7d   : > { %926 = vperm.xlu0 %3696, %v864_v50  }
  0x7e   : > { %931 = vperm.xlu1 %3697, %v865_v51   ;;  %936 = vperm.xlu2 %3698, %v866_v53  }
  0x80   : > { %787 = vmatmul.f32.gmra.mxu0 %v649_v48 }
  0x85   : > { %941 = vperm.xlu0 %3696, %v867_v54  }
  0x86   : > { %946 = vperm.xlu1 %3697, %v868_v55   ;;  %1278 = vperm.xlu2 %3698, %v1240_v57  }
  0x88   : > { %790 = vmatmul.f32.gmra.mxu0 %v650_v52 }
  0x8d   : > { %1273 = vperm.xlu0 %3696, %v1239_v58  }
  0x8e   : > { %1268 = vperm.xlu1 %3697, %v1238_v59   ;;  %1263 = vperm.xlu2 %3698, %v1237_v61  }
  0x90   : > { %793 = vmatmul.f32.gmra.mxu0 %v651_v56  ;;  %v734_v45 = vpop.permute.xlu2 %733 }
  0x95   : > { %1258 = vperm.xlu0 %3696, %v1236_v62  }
  0x96   : > { %1253 = vperm.xlu1 %3697, %v1235_v63   ;;  %1248 = vperm.xlu2 %3698, %v1234_v1  }
  0x98   : > { %796 = vmatmul.f32.gmra.mxu0 %v652_v60  ;;  %v729_v49 = vpop.permute.xlu2 %728 }
  0x9d   : > { %1243 = vperm.xlu0 %3696, %v1233_v2  }
  0x9e   : > { %1397 = vperm.xlu1 %3697, %v1387_v3   ;;  %1402 = vperm.xlu2 %3698, %v1388_v5  }
  0xa0   : > { %799 = vmatmul.f32.gmra.mxu0 %v653_v0  ;;  %v714_v59 = vpop.permute.xlu2 %713 }
  0xa5   : > { %1407 = vperm.xlu0 %3696, %v1389_v6  }
  0xa6   : > { %1412 = vperm.xlu1 %3697, %v1390_v7   ;;  %1417 = vperm.xlu2 %3698, %v1391_v9  }
  0xa7   : > { %v754_v42 = vpop.permute.xlu0 %753 }
  0xa8   : > { %802 = vmatmul.f32.gmra.mxu0 %v654_v4  ;;  %v744_v43 = vpop.permute.xlu1 %743 }
  0xad   : > { %1422 = vperm.xlu0 %3696, %v1392_v10  }
  0xae   : > { %1427 = vperm.xlu1 %3697, %v1393_v11   ;;  %1432 = vperm.xlu2 %3698, %v1394_v13  }
  0xaf   : > { %v749_v46 = vpop.permute.xlu0 %748 }
  0xb0   : > { %805 = vmatmul.f32.gmra.mxu0 %v655_v8  ;;  %v739_v48 = vpop.permute.xlu1 %738  ;;  %v699_v8 = vpop.permute.xlu2 %698 }
  0xb5   : > { %2522 = vperm.xlu0 %3696, %v2484_v14  }
  0xb6   : > { %2517 = vperm.xlu1 %3697, %v2483_v15   ;;  %2512 = vperm.xlu2 %3698, %v2482_v17  }
  0xb7   : > { %v724_v50 = vpop.permute.xlu0 %723 }
  0xb8   : > { %808 = vmatmul.f32.gmra.mxu0 %v656_v12  ;;  %v719_v56 = vpop.permute.xlu1 %718 }
  0xbd   : > { %2507 = vperm.xlu0 %3696, %v2481_v18  }
  0xbe   : > { %2502 = vperm.xlu1 %3697, %v2480_v19   ;;  %2497 = vperm.xlu2 %3698, %v2479_v21   ;;  %v684_v21 = vpop.permute.xlu2 %683 }
  0xbf   : > { %v709_v62 = vpop.permute.xlu0 %708 }
  0xc0   : > { %811 = vmatmul.f32.gmra.mxu0 %v657_v16  ;;  %v704_v5 = vpop.permute.xlu1 %703 }
  0xc5   : > { %2492 = vperm.xlu0 %3696, %v2478_v22  }
  0xc6   : > { %2487 = vperm.xlu1 %3697, %v2477_v23   ;;  %2951 = vperm.xlu2 %3698, %v2945_v25  }
  0xc7   : > { %v694_v11 = vpop.permute.xlu0 %693 }
  0xc8   : > { %814 = vmatmul.f32.gmra.mxu0 %v658_v20  ;;  %v689_v18 = vpop.permute.xlu1 %688 }
  0xcd   : > { %2956 = vperm.xlu0 %3696, %v2946_v26  }
  0xce   : > { %2961 = vperm.xlu1 %3697, %v2947_v27   ;;  %2966 = vperm.xlu2 %3698, %v2948_v29  }
  0xd0   : > { %817 = vmatmul.f32.gmra.mxu0 %v659_v24  ;;  %v679_v24 = vpop.permute.xlu0 %678 }
  0xd5   : > { %v4368_v28 = vpop.f32.mrf.mxu0 }
  0xd6   : > { %v774_v25 = vadd.f32 %v4368_v28, %v679_v24  ;;  %v843_v28 = vld [vmem:[#allocation4 + $0x30] sm:$0xff] }
  0xd8   : > { %v821_v29 = vmax.f32 %v774_v25, 0.0 }
  0xdd   : > { %v4373_v30 = vpop.f32.mrf.mxu0 }
  0xde   : > { %v777_v22 = vadd.f32 %v4373_v30, %v684_v21  ;;  %v841_v30 = vld [vmem:[#allocation4 + $0x20] sm:$0xff] }
  0xe0   : > { %v822_v27 = vmax.f32 %v777_v22, 0.0 }
  0xe5   : > { %v779_v31 = vpop.f32.mrf.mxu0 }
  0xe6   : > { %v780_v19 = vadd.f32 %v779_v31, %v689_v18  ;;  %v838_v31 = vld [vmem:[#allocation4 + $0x8] sm:$0xff] }
  0xe8   : > { %v823_v26 = vmax.f32 %v780_v19, 0.0 }
  0xed   : > { %v782_v32 = vpop.f32.mrf.mxu0 }
  0xee   : > { %v783_v16 = vadd.f32 %v782_v32, %v694_v11  ;;  %v837_v32 = vld [vmem:[#allocation4] sm:$0xff] }
  0xf0   : > { %v824_v23 = vmax.f32 %v783_v16, 0.0 }
  0xf5   : > { %v785_v33 = vpop.f32.mrf.mxu0 }
  0xf6   : > { %v786_v14 = vadd.f32 %v785_v33, %v699_v8  ;;  %v839_v33 = vld [vmem:[#allocation4 + $0x10] sm:$0xff] }
  0xf8   : > { %v825_v20 = vmax.f32 %v786_v14, 0.0 }
  0xfd   : > { %v788_v34 = vpop.f32.mrf.mxu0 }
  0xfe   : > { %v789_v12 = vadd.f32 %v788_v34, %v704_v5  ;;  %v840_v34 = vld [vmem:[#allocation4 + $0x18] sm:$0xff]  ;;  %v882_v5 = vpop.permute.xlu0 %881 }
 0x100   : > { %v826_v17 = vmax.f32 %v789_v12, 0.0 }
 0x105   : > { %v791_v35 = vpop.f32.mrf.mxu0 }
 0x106   : > { %v792_v9 = vadd.f32 %v791_v35, %v709_v62  ;;  %v842_v35 = vld [vmem:[#allocation4 + $0x28] sm:$0xff] }
 0x108   : > { %v827_v15 = vmax.f32 %v792_v9, 0.0 }
 0x10d   : > { %v794_v36 = vpop.f32.mrf.mxu0 }
 0x10e   : > { %v795_v6 = vadd.f32 %v794_v36, %v714_v59  ;;  %v844_v36 = vld [vmem:[#allocation4 + $0x38] sm:$0xff]  ;;  %v851_v59 = vld [vmem:[#allocation4 + $0x70] sm:$0xff] }
 0x110   : > { %v828_v13 = vmax.f32 %v795_v6, 0.0 }
 0x115   : > { %v797_v37 = vpop.f32.mrf.mxu0 }
 0x116   : > { %v798_v3 = vadd.f32 %v797_v37, %v719_v56  ;;  %v845_v37 = vld [vmem:[#allocation4 + $0x40] sm:$0xff] }
 0x117   : > { %v1030_v56 = vld [vmem:[#allocation6] sm:$0xff] }
 0x118   : > { %v829_v10 = vmax.f32 %v798_v3, 0.0 }
 0x11d   : > { %v800_v38 = vpop.f32.mrf.mxu0 }
 0x11e   : > { %v801_v1 = vadd.f32 %v800_v38, %v724_v50  ;;  %v846_v38 = vld [vmem:[#allocation4 + $0x48] sm:$0xff]  ;;  %v1037_v50 = vld [vmem:[#allocation6 + $0x38] sm:$0xff] }
 0x120   : > { %v830_v7 = vmax.f32 %v801_v1, 0.0  ;;  %v877_v1 = vpop.permute.xlu2 %876 }
 0x125   : > { %v803_v39 = vpop.f32.mrf.mxu0 }
 0x126   : > { %v804_v63 = vadd.f32 %v803_v39, %v729_v49  ;;  %v847_v39 = vld [vmem:[#allocation4 + $0x50] sm:$0xff] }
 0x127   : > { %v1036_v49 = vld [vmem:[#allocation6 + $0x30] sm:$0xff] }
 0x128   : > { %v831_v4 = vmax.f32 %v804_v63, 0.0 }
 0x12d   : > { %v806_v40 = vpop.f32.mrf.mxu0 }
 0x12e   : > { %v807_v60 = vadd.f32 %v806_v40, %v734_v45  ;;  %v1044_v40 = vld [vmem:[#allocation6 + $0x70] sm:$0xff]  ;;  %v1041_v45 = vld [vmem:[#allocation6 + $0x58] sm:$0xff] }
 0x12f   : > { %1103 = vmatpush.msra.mxu2 %v1044_v40 }
 0x130   : > { %v832_v2 = vmax.f32 %v807_v60, 0.0  ;;  %v852_v60 = vld [vmem:[#allocation4 + $0x78] sm:$0xff] }
 0x135   : > { %v809_v41 = vpop.f32.mrf.mxu0 }
 0x136   : > { %v810_v57 = vadd.f32 %v809_v41, %v739_v48  ;;  %v1045_v41 = vld [vmem:[#allocation6 + $0x78] sm:$0xff]  ;;  %v1039_v48 = vld [vmem:[#allocation6 + $0x48] sm:$0xff] }
 0x137   : > { %1168 = vmatpush.msra.mxu3 %v1045_v41 }
 0x138   : > { %v833_v0 = vmax.f32 %v810_v57, 0.0  ;;  %v1031_v57 = vld [vmem:[#allocation6 + $0x8] sm:$0xff] }
 0x13d   : > { %v812_v44 = vpop.f32.mrf.mxu0 }
 0x13e   : > { %v813_v54 = vadd.f32 %v812_v44, %v744_v43  ;;  %v1043_v43 = vld [vmem:[#allocation6 + $0x68] sm:$0xff]  ;;  %v1040_v44 = vld [vmem:[#allocation6 + $0x50] sm:$0xff] }
 0x13f   : > { %1169 = vmatpush.msra.mxu3 %v1043_v43 }
 0x140   : > { %v834_v61 = vmax.f32 %v813_v54, 0.0  ;;  %v1032_v54 = vld [vmem:[#allocation6 + $0x10] sm:$0xff] }
 0x141   : > { %1170 = vmatpush.msra.mxu3 %v1041_v45 }
 0x143   : > { %1171 = vmatpush.msra.mxu3 %v1039_v48 }
 0x145   : > { %v815_v47 = vpop.f32.mrf.mxu0  ;;  %1172 = vmatpush.msra.mxu3 %v1037_v50 }
 0x146   : > { %v816_v52 = vadd.f32 %v815_v47, %v749_v46  ;;  %v848_v46 = vld [vmem:[#allocation4 + $0x58] sm:$0xff]  ;;  %v1038_v47 = vld [vmem:[#allocation6 + $0x40] sm:$0xff] }
 0x148   : > { %v835_v58 = vmax.f32 %v816_v52, 0.0  ;;  %v1035_v52 = vld [vmem:[#allocation6 + $0x28] sm:$0xff] }
 0x149   : > { %1173 = vmatpush.msra.mxu3 %v1035_v52 }
 0x14d   : > { %v818_v51 = vpop.f32.mrf.mxu0 }
 0x14e   : > { %v819_v53 = vadd.f32 %v818_v51, %v754_v42  ;;  %v1042_v42 = vld [vmem:[#allocation6 + $0x60] sm:$0xff] }
 0x14f   : > { %1104 = vmatpush.msra.mxu2 %v1042_v42  ;;  %v1034_v51 = vld [vmem:[#allocation6 + $0x20] sm:$0xff] }
 0x150   : > { %v836_v55 = vmax.f32 %v819_v53, 0.0  ;;  %v849_v53 = vld [vmem:[#allocation4 + $0x60] sm:$0xff] }
 0x151   : > { %1105 = vmatpush.msra.mxu2 %v1040_v44 }
 0x152   : > { %949 = vmatpush.msra.mxu1 %v836_v55  ;;  %v1033_v55 = vld [vmem:[#allocation6 + $0x18] sm:$0xff] }
 0x153   : > { %1106 = vmatpush.msra.mxu2 %v1038_v47  ;;  %1174 = vmatpush.msra.mxu3 %v1033_v55 }
 0x154   : > { %950 = vmatpush.msra.mxu1 %v835_v58  ;;  %v850_v58 = vld [vmem:[#allocation4 + $0x68] sm:$0xff] }
 0x155   : > { %1107 = vmatpush.msra.mxu2 %v1036_v49  ;;  %1175 = vmatpush.msra.mxu3 %v1031_v57 }
 0x156   : > { %951 = vmatpush.msra.mxu1 %v834_v61  ;;  %v872_v61 = vpop.permute.xlu1 %871 }
 0x157   : > { %1108 = vmatpush.msra.mxu2 %v1034_v51 }
 0x158   : > { %952 = vmatpush.msra.mxu1 %v833_v0 }
 0x159   : > { %1109 = vmatpush.msra.mxu2 %v1032_v54 }
 0x15a   : > { %953 = vmatpush.msra.mxu1 %v832_v2 }
 0x15b   : > { %1110 = vmatpush.msra.mxu2 %v1030_v56 }
 0x15c   : > { %954 = vmatpush.msra.mxu1 %v831_v4 }
 0x15e   : > { %955 = vmatpush.msra.mxu1 %v830_v7  ;;  %v887_v9 = vpop.permute.xlu1 %886 }
 0x160   : > { %956 = vmatpush.msra.mxu1 %v829_v10 }
 0x162   : > { %957 = vmatpush.msra.mxu1 %v828_v13  ;;  %v892_v13 = vpop.permute.xlu2 %891 }
 0x164   : > { %958 = vmatpush.msra.mxu1 %v827_v15 }
 0x166   : > { %959 = vmatpush.msra.mxu1 %v826_v17  ;;  %v897_v17 = vpop.permute.xlu0 %896  ;;  %v902_v21 = vpop.permute.xlu1 %901 }
 0x168   : > { %960 = vmatpush.msra.mxu1 %v825_v20 }
 0x16a   : > { %961 = vmatpush.msra.mxu1 %v824_v23  ;;  %v907_v25 = vpop.permute.xlu2 %906 }
 0x16c   : > { %962 = vmatpush.msra.mxu1 %v823_v26 }
 0x16e   : > { %963 = vmatpush.msra.mxu1 %v822_v27 }
 0x170   : > { %964 = vmatpush.msra.mxu1 %v821_v29 }
 0x171   : > { %965 = vmatmul.f32.vlgmr.msra.gmra.mxu1 %v837_v32  ;;  %v912_v32 = vpop.permute.xlu0 %911 }
 0x179   : > { %968 = vmatmul.f32.gmra.mxu1 %v838_v31  ;;  %v927_v41 = vpop.permute.xlu0 %926 }
 0x181   : > { %971 = vmatmul.f32.gmra.mxu1 %v839_v33 }
 0x189   : > { %974 = vmatmul.f32.gmra.mxu1 %v840_v34 }
 0x191   : > { %977 = vmatmul.f32.gmra.mxu1 %v841_v30  ;;  %v917_v30 = vpop.permute.xlu1 %916 }
 0x199   : > { %980 = vmatmul.f32.gmra.mxu1 %v842_v35  ;;  %v932_v45 = vpop.permute.xlu1 %931 }
 0x1a1   : > { %983 = vmatmul.f32.gmra.mxu1 %v843_v28  ;;  %v947_v57 = vpop.permute.xlu1 %946 }
 0x1a9   : > { %986 = vmatmul.f32.gmra.mxu1 %v844_v36 }
 0x1b1   : > { %989 = vmatmul.f32.gmra.mxu1 %v845_v37  ;;  %v922_v37 = vpop.permute.xlu2 %921 }
 0x1b9   : > { %992 = vmatmul.f32.gmra.mxu1 %v846_v38  ;;  %v937_v49 = vpop.permute.xlu2 %936 }
 0x1c1   : > { %995 = vmatmul.f32.gmra.mxu1 %v847_v39 }
 0x1c9   : > { %998 = vmatmul.f32.gmra.mxu1 %v848_v46 }
 0x1d1   : > { %1001 = vmatmul.f32.gmra.mxu1 %v849_v53  ;;  %v942_v53 = vpop.permute.xlu0 %941 }
 0x1d9   : > { %1004 = vmatmul.f32.gmra.mxu1 %v850_v58 }
 0x1e1   : > { %1007 = vmatmul.f32.gmra.mxu1 %v851_v59 }
 0x1e9   : > { %1010 = vmatmul.f32.gmra.mxu1 %v852_v60 }
 0x1ee   : > { %v966_v62 = vpop.f32.mrf.mxu1 }
 0x1ef   : > { %v967_v63 = vadd.f32 %v966_v62, %v872_v61 }
 0x1f1   : > { %v1014_v0 = vmax.f32 %v967_v63, 0.0 }
 0x1f3   : > { %3436 = vmatmul.msk.f32.vlgmr.msra.gmra.mxu2 %vm1046_vm0, %v1014_v0  ;;  %3452 = vmatmul.msk.f32.vlgmr.msra.gmra.mxu3 %vm1046_vm0, %v1014_v0 }
 0x1f6   : > { %v969_v2 = vpop.f32.mrf.mxu1 }
 0x1f7   : > { %v970_v3 = vadd.f32 %v969_v2, %v877_v1 }
 0x1f9   : > { %v1015_v4 = vmax.f32 %v970_v3, 0.0 }
 0x1fb   : > { %3437 = vmatmul.msk.f32.gmra.mxu2 %vm1046_vm0, %v1015_v4  ;;  %3453 = vmatmul.msk.f32.gmra.mxu3 %vm1046_vm0, %v1015_v4 }
 0x1fe   : > { %v972_v6 = vpop.f32.mrf.mxu1 }
 0x1ff   : > { %v973_v7 = vadd.f32 %v972_v6, %v882_v5 }
 0x201   : > { %v1016_v8 = vmax.f32 %v973_v7, 0.0 }
 0x203   : > { %3438 = vmatmul.msk.f32.gmra.mxu2 %vm1046_vm0, %v1016_v8  ;;  %3454 = vmatmul.msk.f32.gmra.mxu3 %vm1046_vm0, %v1016_v8 }
 0x206   : > { %v975_v10 = vpop.f32.mrf.mxu1 }
 0x207   : > { %v976_v11 = vadd.f32 %v975_v10, %v887_v9 }
 0x209   : > { %v1017_v12 = vmax.f32 %v976_v11, 0.0 }
 0x20b   : > { %3439 = vmatmul.msk.f32.gmra.mxu2 %vm1046_vm0, %v1017_v12  ;;  %3455 = vmatmul.msk.f32.gmra.mxu3 %vm1046_vm0, %v1017_v12 }
 0x20e   : > { %v978_v14 = vpop.f32.mrf.mxu1 }
 0x20f   : > { %v979_v15 = vadd.f32 %v978_v14, %v892_v13 }
 0x211   : > { %v1018_v16 = vmax.f32 %v979_v15, 0.0 }
 0x213   : > { %3440 = vmatmul.msk.f32.gmra.mxu2 %vm1046_vm0, %v1018_v16  ;;  %3456 = vmatmul.msk.f32.gmra.mxu3 %vm1046_vm0, %v1018_v16 }
 0x216   : > { %v981_v18 = vpop.f32.mrf.mxu1 }
 0x217   : > { %v982_v19 = vadd.f32 %v981_v18, %v897_v17 }
 0x219   : > { %v1019_v20 = vmax.f32 %v982_v19, 0.0 }
 0x21b   : > { %3441 = vmatmul.msk.f32.gmra.mxu2 %vm1046_vm0, %v1019_v20  ;;  %3457 = vmatmul.msk.f32.gmra.mxu3 %vm1046_vm0, %v1019_v20 }
 0x21e   : > { %v984_v22 = vpop.f32.mrf.mxu1 }
 0x21f   : > { %v985_v23 = vadd.f32 %v984_v22, %v902_v21 }
 0x221   : > { %v1020_v24 = vmax.f32 %v985_v23, 0.0 }
 0x223   : > { %3442 = vmatmul.msk.f32.gmra.mxu2 %vm1046_vm0, %v1020_v24  ;;  %3458 = vmatmul.msk.f32.gmra.mxu3 %vm1046_vm0, %v1020_v24 }
 0x226   : > { %v987_v26 = vpop.f32.mrf.mxu1 }
 0x227   : > { %v988_v27 = vadd.f32 %v987_v26, %v907_v25 }
 0x229   : > { %v1021_v29 = vmax.f32 %v988_v27, 0.0 }
 0x22b   : > { %3443 = vmatmul.msk.f32.gmra.mxu2 %vm1046_vm0, %v1021_v29  ;;  %3459 = vmatmul.msk.f32.gmra.mxu3 %vm1046_vm0, %v1021_v29 }
 0x22e   : > { %v990_v31 = vpop.f32.mrf.mxu1 }
 0x22f   : > { %v991_v33 = vadd.f32 %v990_v31, %v912_v32  ;;  %v1225_v32 = vld [vmem:[#allocation7] sm:$0xff]  ;;  %v1226_v31 = vld [vmem:[#allocation7 + $0x8] sm:$0xff] }
 0x231   : > { %v1022_v34 = vmax.f32 %v991_v33, 0.0  ;;  %v1227_v33 = vld [vmem:[#allocation7 + $0x10] sm:$0xff] }
 0x233   : > { %3444 = vmatmul.msk.f32.gmra.mxu2 %vm1046_vm0, %v1022_v34  ;;  %3460 = vmatmul.msk.f32.gmra.mxu3 %vm1046_vm0, %v1022_v34  ;;  %v1228_v34 = vld [vmem:[#allocation7 + $0x18] sm:$0xff] }
 0x236   : > { %v993_v35 = vpop.f32.mrf.mxu1 }
 0x237   : > { %v994_v28 = vadd.f32 %v993_v35, %v917_v30  ;;  %v1229_v30 = vld [vmem:[#allocation7 + $0x20] sm:$0xff]  ;;  %v1230_v35 = vld [vmem:[#allocation7 + $0x28] sm:$0xff] }
 0x239   : > { %v1023_v36 = vmax.f32 %v994_v28, 0.0  ;;  %v1231_v28 = vld [vmem:[#allocation7 + $0x30] sm:$0xff] }
 0x23b   : > { %3445 = vmatmul.msk.f32.gmra.mxu2 %vm1046_vm0, %v1023_v36  ;;  %3461 = vmatmul.msk.f32.gmra.mxu3 %vm1046_vm0, %v1023_v36  ;;  %v1232_v36 = vld [vmem:[#allocation7 + $0x38] sm:$0xff] }
 0x23e   : > { %v996_v38 = vpop.f32.mrf.mxu1 }
 0x23f   : > { %v997_v39 = vadd.f32 %v996_v38, %v922_v37 }
 0x241   : > { %v1024_v40 = vmax.f32 %v997_v39, 0.0 }
 0x243   : > { %3446 = vmatmul.msk.f32.gmra.mxu2 %vm1046_vm0, %v1024_v40  ;;  %3462 = vmatmul.msk.f32.gmra.mxu3 %vm1046_vm0, %v1024_v40 }
 0x246   : > { %v999_v42 = vpop.f32.mrf.mxu1 }
 0x247   : > { %v1000_v43 = vadd.f32 %v999_v42, %v927_v41 }
 0x249   : > { %v1025_v44 = vmax.f32 %v1000_v43, 0.0 }
 0x24b   : > { %3447 = vmatmul.msk.f32.gmra.mxu2 %vm1046_vm0, %v1025_v44  ;;  %3463 = vmatmul.msk.f32.gmra.mxu3 %vm1046_vm0, %v1025_v44 }
 0x24e   : > { %v1002_v46 = vpop.f32.mrf.mxu1 }
 0x24f   : > { %v1003_v47 = vadd.f32 %v1002_v46, %v932_v45 }
 0x251   : > { %v1026_v48 = vmax.f32 %v1003_v47, 0.0 }
 0x253   : > { %3448 = vmatmul.msk.f32.gmra.mxu2 %vm1046_vm0, %v1026_v48  ;;  %3464 = vmatmul.msk.f32.gmra.mxu3 %vm1046_vm0, %v1026_v48 }
 0x256   : > { %v1005_v50 = vpop.f32.mrf.mxu1 }
 0x257   : > { %v1006_v51 = vadd.f32 %v1005_v50, %v937_v49  ;;  %v1279_v49 = vpop.permute.xlu2 %1278  ;;  %v1274_v50 = vpop.permute.xlu0 %1273 }
 0x259   : > { %v1027_v52 = vmax.f32 %v1006_v51, 0.0 }
 0x25b   : > { %3449 = vmatmul.msk.f32.gmra.mxu2 %vm1046_vm0, %v1027_v52  ;;  %3465 = vmatmul.msk.f32.gmra.mxu3 %vm1046_vm0, %v1027_v52 }
 0x25e   : > { %v1008_v54 = vpop.f32.mrf.mxu1 }
 0x25f   : > { %v1009_v55 = vadd.f32 %v1008_v54, %v942_v53  ;;  %v1269_v53 = vpop.permute.xlu1 %1268  ;;  %v1264_v54 = vpop.permute.xlu2 %1263 }
 0x261   : > { %v1028_v56 = vmax.f32 %v1009_v55, 0.0 }
 0x263   : > { %3450 = vmatmul.msk.f32.gmra.mxu2 %vm1046_vm0, %v1028_v56  ;;  %3466 = vmatmul.msk.f32.gmra.mxu3 %vm1046_vm0, %v1028_v56 }
 0x266   : > { %v1011_v58 = vpop.f32.mrf.mxu1 }
 0x267   : > { %v1012_v59 = vadd.f32 %v1011_v58, %v947_v57 }
 0x269   : > { %v1029_v60 = vmax.f32 %v1012_v59, 0.0 }
 0x26b   : > { %3451 = vmatmul.msk.f32.gmra.mxu2 %vm1046_vm0, %v1029_v60  ;;  %3467 = vmatmul.msk.f32.gmra.mxu3 %vm1046_vm0, %v1029_v60 }
 0x276   : > { %v1112_v61 = vpop.f32.mrf.mxu2  ;;  %v1177_v62 = vpop.f32.mrf.mxu3 }
 0x27e   : > { %v1115_v63 = vpop.f32.mrf.mxu2  ;;  %v1180_v0 = vpop.f32.mrf.mxu3 }
 0x286   : > { %v1118_v1 = vpop.f32.mrf.mxu2  ;;  %v1183_v2 = vpop.f32.mrf.mxu3 }
 0x28e   : > { %v1121_v3 = vpop.f32.mrf.mxu2  ;;  %v1186_v4 = vpop.f32.mrf.mxu3 }
 0x296   : > { %v1124_v5 = vpop.f32.mrf.mxu2  ;;  %v1189_v6 = vpop.f32.mrf.mxu3 }
 0x29e   : > { %v1127_v7 = vpop.f32.mrf.mxu2  ;;  %v1192_v8 = vpop.f32.mrf.mxu3 }
 0x2a6   : > { %v1130_v9 = vpop.f32.mrf.mxu2  ;;  %v1195_v10 = vpop.f32.mrf.mxu3 }
 0x2ae   : > { %v1133_v11 = vpop.f32.mrf.mxu2  ;;  %v1198_v12 = vpop.f32.mrf.mxu3 }
 0x2b6   : > { %v1136_v13 = vpop.f32.mrf.mxu2  ;;  %v1201_v14 = vpop.f32.mrf.mxu3 }
 0x2be   : > { %v1139_v15 = vpop.f32.mrf.mxu2  ;;  %v1204_v16 = vpop.f32.mrf.mxu3 }
 0x2c6   : > { %v1142_v17 = vpop.f32.mrf.mxu2  ;;  %v1207_v18 = vpop.f32.mrf.mxu3 }
 0x2ce   : > { %v1145_v19 = vpop.f32.mrf.mxu2  ;;  %v1210_v20 = vpop.f32.mrf.mxu3 }
 0x2d6   : > { %v1148_v21 = vpop.f32.mrf.mxu2  ;;  %v1213_v22 = vpop.f32.mrf.mxu3 }
 0x2de   : > { %v1151_v23 = vpop.f32.mrf.mxu2  ;;  %v1216_v24 = vpop.f32.mrf.mxu3 }
 0x2e6   : > { %v1154_v25 = vpop.f32.mrf.mxu2  ;;  %v1219_v26 = vpop.f32.mrf.mxu3 }
 0x2ee   : > { %v1157_v27 = vpop.f32.mrf.mxu2  ;;  %v1222_v29 = vpop.f32.mrf.mxu3 }
 0x2ef   : > { %1281 = vmatpush.msrb.mxu2 %v1157_v27  ;;  %1322 = vmatpush.msrb.mxu3 %v1222_v29 }
 0x2f1   : > { %1282 = vmatpush.msrb.mxu2 %v1154_v25  ;;  %1323 = vmatpush.msrb.mxu3 %v1219_v26 }
 0x2f3   : > { %1283 = vmatpush.msrb.mxu2 %v1151_v23  ;;  %1324 = vmatpush.msrb.mxu3 %v1216_v24 }
 0x2f5   : > { %1284 = vmatpush.msrb.mxu2 %v1148_v21  ;;  %1325 = vmatpush.msrb.mxu3 %v1213_v22 }
 0x2f7   : > { %1285 = vmatpush.msrb.mxu2 %v1145_v19  ;;  %1326 = vmatpush.msrb.mxu3 %v1210_v20 }
 0x2f9   : > { %1286 = vmatpush.msrb.mxu2 %v1142_v17  ;;  %1327 = vmatpush.msrb.mxu3 %v1207_v18 }
 0x2fb   : > { %1287 = vmatpush.msrb.mxu2 %v1139_v15  ;;  %1328 = vmatpush.msrb.mxu3 %v1204_v16  ;;  %v1249_v15 = vpop.permute.xlu2 %1248 }
 0x2fd   : > { %1288 = vmatpush.msrb.mxu2 %v1136_v13  ;;  %1329 = vmatpush.msrb.mxu3 %v1201_v14 }
 0x2ff   : > { %1289 = vmatpush.msrb.mxu2 %v1133_v11  ;;  %1330 = vmatpush.msrb.mxu3 %v1198_v12 }
 0x301   : > { %1290 = vmatpush.msrb.mxu2 %v1130_v9  ;;  %1331 = vmatpush.msrb.mxu3 %v1195_v10  ;;  %v1254_v10 = vpop.permute.xlu1 %1253 }
 0x303   : > { %1291 = vmatpush.msrb.mxu2 %v1127_v7  ;;  %1332 = vmatpush.msrb.mxu3 %v1192_v8 }
 0x305   : > { %1292 = vmatpush.msrb.mxu2 %v1124_v5  ;;  %1333 = vmatpush.msrb.mxu3 %v1189_v6 }
 0x307   : > { %1293 = vmatpush.msrb.mxu2 %v1121_v3  ;;  %1334 = vmatpush.msrb.mxu3 %v1186_v4 }
 0x309   : > { %1294 = vmatpush.msrb.mxu2 %v1118_v1  ;;  %1335 = vmatpush.msrb.mxu3 %v1183_v2 }
 0x30b   : > { %1295 = vmatpush.msrb.mxu2 %v1115_v63  ;;  %1336 = vmatpush.msrb.mxu3 %v1180_v0 }
 0x30d   : > { %1296 = vmatpush.msrb.mxu2 %v1112_v61  ;;  %1337 = vmatpush.msrb.mxu3 %v1177_v62  ;;  %v1259_v61 = vpop.permute.xlu0 %1258 }
 0x30e   : > { %1297 = vmatmul.f32.vlgmr.msrb.gmra.mxu2 %v1225_v32  ;;  %1338 = vmatmul.f32.vlgmr.msrb.gmra.mxu3 %v1225_v32  ;;  %v1379_v32 = vld [vmem:[#allocation9] sm:$0xff] }
 0x315   : > { %v1244_v20 = vpop.permute.xlu0 %1243 }
 0x316   : > { %1300 = vmatmul.f32.gmra.mxu2 %v1226_v31  ;;  %1341 = vmatmul.f32.gmra.mxu3 %v1226_v31  ;;  %v1380_v31 = vld [vmem:[#allocation9 + $0x8] sm:$0xff] }
 0x31e   : > { %1303 = vmatmul.f32.gmra.mxu2 %v1227_v33  ;;  %1344 = vmatmul.f32.gmra.mxu3 %v1227_v33  ;;  %v1381_v33 = vld [vmem:[#allocation9 + $0x10] sm:$0xff] }
 0x326   : > { %1306 = vmatmul.f32.gmra.mxu2 %v1228_v34  ;;  %1347 = vmatmul.f32.gmra.mxu3 %v1228_v34  ;;  %v1382_v34 = vld [vmem:[#allocation9 + $0x18] sm:$0xff] }
 0x32e   : > { %1309 = vmatmul.f32.gmra.mxu2 %v1229_v30  ;;  %1350 = vmatmul.f32.gmra.mxu3 %v1229_v30  ;;  %v1677_v30 = vld [vmem:[#allocation10 + $0x3c0] sm:$0xff] }
 0x32f   : > { %1813 = vmatpush.msra.mxu2 %v1677_v30  ;;  %v1557_v30 = vld [vmem:[#allocation10] sm:$0xff] }
 0x336   : > { %1312 = vmatmul.f32.gmra.mxu2 %v1230_v35  ;;  %1353 = vmatmul.f32.gmra.mxu3 %v1230_v35  ;;  %v1805_v35 = vld [vmem:[#allocation10 + $0x7c0] sm:$0xff] }
 0x337   : > { %1854 = vmatpush.msra.mxu3 %v1805_v35  ;;  %v1685_v35 = vld [vmem:[#allocation10 + $0x400] sm:$0xff] }
 0x33e   : > { %1315 = vmatmul.f32.gmra.mxu2 %v1231_v28  ;;  %1356 = vmatmul.f32.gmra.mxu3 %v1231_v28  ;;  %v1678_v28 = vld [vmem:[#allocation10 + $0x3c8] sm:$0xff] }
 0x346   : > { %1318 = vmatmul.f32.gmra.mxu2 %v1232_v36  ;;  %1359 = vmatmul.f32.gmra.mxu3 %v1232_v36  ;;  %v1806_v36 = vld [vmem:[#allocation10 + $0x7c8] sm:$0xff] }
 0x391   : > { %v1298_v37 = vpop.f32.mrf.mxu2  ;;  %v1339_v38 = vpop.f32.mrf.mxu3 }
 0x392   : > { %v1299_v21 = vadd.f32 %v1298_v37, %v1244_v20  ;;  %v1340_v22 = vadd.f32 %v1339_v38, %v1244_v20  ;;  %v1669_v37 = vld [vmem:[#allocation10 + $0x380] sm:$0xff] }
 0x393   : > { %v1797_v38 = vld [vmem:[#allocation10 + $0x780] sm:$0xff]  ;;  %1814 = vmatpush.msra.mxu2 %v1669_v37  ;;  %v1398_v37 = vpop.permute.xlu1 %1397 }
 0x394   : > { %v1363_v27 = vmax.f32 %v1299_v21, 0.0  ;;  %v1364_v29 = vmax.f32 %v1340_v22, 0.0  ;;  %1855 = vmatpush.msra.mxu3 %v1797_v38  ;;  %v1581_v20 = vld [vmem:[#allocation10 + $0xc0] sm:$0xff]  ;;  %v1582_v22 = vld [vmem:[#allocation10 + $0xc8] sm:$0xff] }
 0x395   : > { %v1709_v21 = vld [vmem:[#allocation10 + $0x4c0] sm:$0xff] }
 0x399   : > { %v1301_v39 = vpop.f32.mrf.mxu2  ;;  %v1342_v40 = vpop.f32.mrf.mxu3 }
 0x39a   : > { %v1302_v16 = vadd.f32 %v1301_v39, %v1249_v15  ;;  %v1343_v17 = vadd.f32 %v1342_v40, %v1249_v15  ;;  %v1670_v39 = vld [vmem:[#allocation10 + $0x388] sm:$0xff] }
 0x39b   : > { %v1798_v40 = vld [vmem:[#allocation10 + $0x788] sm:$0xff] }
 0x39c   : > { %v1365_v25 = vmax.f32 %v1302_v16, 0.0  ;;  %v1366_v26 = vmax.f32 %v1343_v17, 0.0  ;;  %v1726_v15 = vld [vmem:[#allocation10 + $0x548] sm:$0xff]  ;;  %v1589_v16 = vld [vmem:[#allocation10 + $0x100] sm:$0xff] }
 0x39d   : > { %v1717_v17 = vld [vmem:[#allocation10 + $0x500] sm:$0xff] }
 0x3a1   : > { %v1304_v41 = vpop.f32.mrf.mxu2  ;;  %v1345_v42 = vpop.f32.mrf.mxu3 }
 0x3a2   : > { %v1305_v11 = vadd.f32 %v1304_v41, %v1254_v10  ;;  %v1346_v12 = vadd.f32 %v1345_v42, %v1254_v10  ;;  %v1661_v41 = vld [vmem:[#allocation10 + $0x340] sm:$0xff]  ;;  %v1734_v10 = vld [vmem:[#allocation10 + $0x588] sm:$0xff] }
 0x3a3   : > { %v1789_v42 = vld [vmem:[#allocation10 + $0x740] sm:$0xff]  ;;  %1815 = vmatpush.msra.mxu2 %v1661_v41 }
 0x3a4   : > { %v1367_v23 = vmax.f32 %v1305_v11, 0.0  ;;  %v1368_v24 = vmax.f32 %v1346_v12, 0.0  ;;  %1856 = vmatpush.msra.mxu3 %v1789_v42  ;;  %v1597_v11 = vld [vmem:[#allocation10 + $0x140] sm:$0xff] }
 0x3a5   : > { %v1725_v12 = vld [vmem:[#allocation10 + $0x540] sm:$0xff] }
 0x3a9   : > { %v1307_v43 = vpop.f32.mrf.mxu2  ;;  %v1348_v44 = vpop.f32.mrf.mxu3 }
 0x3aa   : > { %v1308_v6 = vadd.f32 %v1307_v43, %v1259_v61  ;;  %v1349_v7 = vadd.f32 %v1348_v44, %v1259_v61  ;;  %v1662_v43 = vld [vmem:[#allocation10 + $0x348] sm:$0xff] }
 0x3ab   : > { %v1790_v44 = vld [vmem:[#allocation10 + $0x748] sm:$0xff] }
 0x3ac   : > { %v1369_v18 = vmax.f32 %v1308_v6, 0.0  ;;  %v1370_v19 = vmax.f32 %v1349_v7, 0.0  ;;  %v1758_v61 = vld [vmem:[#allocation10 + $0x648] sm:$0xff]  ;;  %v1605_v7 = vld [vmem:[#allocation10 + $0x180] sm:$0xff] }
 0x3ad   : > { %v1742_v6 = vld [vmem:[#allocation10 + $0x5c8] sm:$0xff] }
 0x3b1   : > { %v1310_v45 = vpop.f32.mrf.mxu2  ;;  %v1351_v46 = vpop.f32.mrf.mxu3 }
 0x3b2   : > { %v1311_v2 = vadd.f32 %v1310_v45, %v1264_v54  ;;  %v1352_v3 = vadd.f32 %v1351_v46, %v1264_v54  ;;  %v1653_v45 = vld [vmem:[#allocation10 + $0x300] sm:$0xff] }
 0x3b3   : > { %v1781_v46 = vld [vmem:[#allocation10 + $0x700] sm:$0xff]  ;;  %1816 = vmatpush.msra.mxu2 %v1653_v45  ;;  %v1807_v45 = vld [vmem:[#allocation10 + $0x7d0] sm:$0xff] }
 0x3b4   : > { %v1371_v13 = vmax.f32 %v1311_v2, 0.0  ;;  %v1372_v14 = vmax.f32 %v1352_v3, 0.0  ;;  %1857 = vmatpush.msra.mxu3 %v1781_v46  ;;  %v1637_v54 = vld [vmem:[#allocation10 + $0x280] sm:$0xff]  ;;  %v1750_v2 = vld [vmem:[#allocation10 + $0x608] sm:$0xff]  ;;  %v1680_v46 = vld [vmem:[#allocation10 + $0x3d8] sm:$0xff] }
 0x3b5   : > { %v1613_v3 = vld [vmem:[#allocation10 + $0x1c0] sm:$0xff] }
 0x3b9   : > { %v1313_v47 = vpop.f32.mrf.mxu2  ;;  %v1354_v48 = vpop.f32.mrf.mxu3 }
 0x3ba   : > { %v1314_v62 = vadd.f32 %v1313_v47, %v1269_v53  ;;  %v1355_v63 = vadd.f32 %v1354_v48, %v1269_v53  ;;  %v1383_v47 = vld [vmem:[#allocation9 + $0x20] sm:$0xff]  ;;  %v1654_v48 = vld [vmem:[#allocation10 + $0x308] sm:$0xff] }
 0x3bb   : > { %v1774_v53 = vld [vmem:[#allocation10 + $0x6c8] sm:$0xff] }
 0x3bc   : > { %v1373_v8 = vmax.f32 %v1314_v62, 0.0  ;;  %v1374_v9 = vmax.f32 %v1355_v63, 0.0  ;;  %v1384_v62 = vld [vmem:[#allocation9 + $0x28] sm:$0xff]  ;;  %v1621_v63 = vld [vmem:[#allocation10 + $0x200] sm:$0xff] }
 0x3c1   : > { %v1316_v51 = vpop.f32.mrf.mxu2  ;;  %v1357_v52 = vpop.f32.mrf.mxu3 }
 0x3c2   : > { %v1317_v57 = vadd.f32 %v1316_v51, %v1274_v50  ;;  %v1358_v58 = vadd.f32 %v1357_v52, %v1274_v50  ;;  %v1645_v50 = vld [vmem:[#allocation10 + $0x2c0] sm:$0xff]  ;;  %v1646_v52 = vld [vmem:[#allocation10 + $0x2c8] sm:$0xff] }
 0x3c3   : > { %v1773_v51 = vld [vmem:[#allocation10 + $0x6c0] sm:$0xff]  ;;  %1817 = vmatpush.msra.mxu2 %v1645_v50 }
 0x3c4   : > { %v1375_v4 = vmax.f32 %v1317_v57, 0.0  ;;  %v1376_v5 = vmax.f32 %v1358_v58, 0.0  ;;  %1858 = vmatpush.msra.mxu3 %v1773_v51  ;;  %v1766_v57 = vld [vmem:[#allocation10 + $0x688] sm:$0xff]  ;;  %v1629_v58 = vld [vmem:[#allocation10 + $0x240] sm:$0xff]  ;;  %v1671_v51 = vld [vmem:[#allocation10 + $0x390] sm:$0xff] }
 0x3c5   : > { %1818 = vmatpush.msra.mxu2 %v1637_v54 }
 0x3c7   : > { %1819 = vmatpush.msra.mxu2 %v1629_v58  ;;  %v1791_v58 = vld [vmem:[#allocation10 + $0x750] sm:$0xff] }
 0x3c9   : > { %v1319_v55 = vpop.f32.mrf.mxu2  ;;  %v1360_v56 = vpop.f32.mrf.mxu3  ;;  %1820 = vmatpush.msra.mxu2 %v1621_v63  ;;  %v1655_v63 = vld [vmem:[#allocation10 + $0x310] sm:$0xff] }
 0x3ca   : > { %v1320_v59 = vadd.f32 %v1319_v55, %v1279_v49  ;;  %v1361_v60 = vadd.f32 %v1360_v56, %v1279_v49  ;;  %v1782_v49 = vld [vmem:[#allocation10 + $0x708] sm:$0xff]  ;;  %v1765_v55 = vld [vmem:[#allocation10 + $0x680] sm:$0xff] }
 0x3cb   : > { %v1638_v56 = vld [vmem:[#allocation10 + $0x288] sm:$0xff]  ;;  %1859 = vmatpush.msra.mxu3 %v1765_v55  ;;  %1821 = vmatpush.msra.mxu2 %v1613_v3  ;;  %v1647_v3 = vld [vmem:[#allocation10 + $0x2d0] sm:$0xff] }
 0x3cc   : > { %v1377_v0 = vmax.f32 %v1320_v59, 0.0  ;;  %v1378_v1 = vmax.f32 %v1361_v60, 0.0  ;;  %v1757_v59 = vld [vmem:[#allocation10 + $0x640] sm:$0xff]  ;;  %v1630_v60 = vld [vmem:[#allocation10 + $0x248] sm:$0xff] }
 0x3cd   : > { %1860 = vmatpush.msra.mxu3 %v1757_v59  ;;  %1822 = vmatpush.msra.mxu2 %v1605_v7  ;;  %v1664_v59 = vld [vmem:[#allocation10 + $0x358] sm:$0xff] }
 0x3ce   : > { %1467 = vmatpush.msrb.mxu0 %v1377_v0  ;;  %1508 = vmatpush.msrb.mxu1 %v1378_v1  ;;  %v1749_v0 = vld [vmem:[#allocation10 + $0x600] sm:$0xff]  ;;  %v1622_v1 = vld [vmem:[#allocation10 + $0x208] sm:$0xff]  ;;  %v1776_v7 = vld [vmem:[#allocation10 + $0x6d8] sm:$0xff] }
 0x3cf   : > { %1861 = vmatpush.msra.mxu3 %v1749_v0  ;;  %1823 = vmatpush.msra.mxu2 %v1597_v11  ;;  %v1783_v0 = vld [vmem:[#allocation10 + $0x710] sm:$0xff] }
 0x3d0   : > { %1468 = vmatpush.msrb.mxu0 %v1375_v4  ;;  %1509 = vmatpush.msrb.mxu1 %v1376_v5  ;;  %v1741_v4 = vld [vmem:[#allocation10 + $0x5c0] sm:$0xff]  ;;  %v1614_v5 = vld [vmem:[#allocation10 + $0x1c8] sm:$0xff]  ;;  %v1767_v11 = vld [vmem:[#allocation10 + $0x690] sm:$0xff] }
 0x3d1   : > { %1862 = vmatpush.msra.mxu3 %v1741_v4  ;;  %1824 = vmatpush.msra.mxu2 %v1589_v16  ;;  %v1775_v4 = vld [vmem:[#allocation10 + $0x6d0] sm:$0xff] }
 0x3d2   : > { %1469 = vmatpush.msrb.mxu0 %v1373_v8  ;;  %1510 = vmatpush.msrb.mxu1 %v1374_v9  ;;  %v1733_v8 = vld [vmem:[#allocation10 + $0x580] sm:$0xff]  ;;  %v1606_v9 = vld [vmem:[#allocation10 + $0x188] sm:$0xff] }
 0x3d3   : > { %1863 = vmatpush.msra.mxu3 %v1733_v8  ;;  %1825 = vmatpush.msra.mxu2 %v1581_v20  ;;  %v1632_v20 = vld [vmem:[#allocation10 + $0x258] sm:$0xff] }
 0x3d4   : > { %1470 = vmatpush.msrb.mxu0 %v1371_v13  ;;  %1511 = vmatpush.msrb.mxu1 %v1372_v14  ;;  %v1385_v13 = vld [vmem:[#allocation9 + $0x30] sm:$0xff]  ;;  %v1598_v14 = vld [vmem:[#allocation10 + $0x148] sm:$0xff] }
 0x3d5   : > { %1864 = vmatpush.msra.mxu3 %v1725_v12 }
 0x3d6   : > { %1471 = vmatpush.msrb.mxu0 %v1369_v18  ;;  %1512 = vmatpush.msrb.mxu1 %v1370_v19  ;;  %v1590_v18 = vld [vmem:[#allocation10 + $0x108] sm:$0xff] }
 0x3d7   : > { %v1718_v19 = vld [vmem:[#allocation10 + $0x508] sm:$0xff]  ;;  %1865 = vmatpush.msra.mxu3 %v1717_v17 }
 0x3d8   : > { %1472 = vmatpush.msrb.mxu0 %v1367_v23  ;;  %1513 = vmatpush.msrb.mxu1 %v1368_v24  ;;  %v1710_v23 = vld [vmem:[#allocation10 + $0x4c8] sm:$0xff]  ;;  %v1386_v24 = vld [vmem:[#allocation9 + $0x38] sm:$0xff] }
 0x3d9   : > { %1866 = vmatpush.msra.mxu3 %v1709_v21  ;;  %v1760_v21 = vld [vmem:[#allocation10 + $0x658] sm:$0xff] }
 0x3da   : > { %1473 = vmatpush.msrb.mxu0 %v1365_v25  ;;  %1514 = vmatpush.msrb.mxu1 %v1366_v26  ;;  %v1573_v25 = vld [vmem:[#allocation10 + $0x80] sm:$0xff] }
 0x3db   : > { %v1701_v26 = vld [vmem:[#allocation10 + $0x480] sm:$0xff]  ;;  %1826 = vmatpush.msra.mxu2 %v1573_v25  ;;  %v1624_v25 = vld [vmem:[#allocation10 + $0x218] sm:$0xff] }
 0x3dc   : > { %1474 = vmatpush.msrb.mxu0 %v1363_v27  ;;  %1515 = vmatpush.msrb.mxu1 %v1364_v29  ;;  %v1574_v27 = vld [vmem:[#allocation10 + $0x88] sm:$0xff] }
 0x3dd   : > { %3468 = vmatmul.msk.f32.vlgmr.msrb.gmra.mxu0 %vm1046_vm0, %v1379_v32  ;;  %3476 = vmatmul.msk.f32.vlgmr.msrb.gmra.mxu1 %vm1046_vm0, %v1379_v32  ;;  %v1702_v29 = vld [vmem:[#allocation10 + $0x488] sm:$0xff]  ;;  %v1565_v32 = vld [vmem:[#allocation10 + $0x40] sm:$0xff] }
 0x3de   : > { %1895 = vmatpush.msra.mxu0 %v1678_v28  ;;  %1936 = vmatpush.msra.mxu1 %v1806_v36  ;;  %v1558_v28 = vld [vmem:[#allocation10 + $0x8] sm:$0xff] }
 0x3df   : > { %1867 = vmatpush.msra.mxu3 %v1701_v26  ;;  %1827 = vmatpush.msra.mxu2 %v1565_v32  ;;  %v1686_v36 = vld [vmem:[#allocation10 + $0x408] sm:$0xff]  ;;  %v1752_v26 = vld [vmem:[#allocation10 + $0x618] sm:$0xff]  ;;  %v1615_v32 = vld [vmem:[#allocation10 + $0x1d0] sm:$0xff] }
 0x3e0   : > { %1896 = vmatpush.msra.mxu0 %v1670_v39  ;;  %1937 = vmatpush.msra.mxu1 %v1798_v40 }
 0x3e1   : > { %1828 = vmatpush.msra.mxu2 %v1557_v30  ;;  %v1616_v30 = vld [vmem:[#allocation10 + $0x1d8] sm:$0xff] }
 0x3e2   : > { %1897 = vmatpush.msra.mxu0 %v1662_v43  ;;  %1938 = vmatpush.msra.mxu1 %v1790_v44  ;;  %v1679_v44 = vld [vmem:[#allocation10 + $0x3d0] sm:$0xff] }
 0x3e3   : > { %1977 = vmatpush.msrb.mxu2 %v1679_v44  ;;  %v1727_v44 = vld [vmem:[#allocation10 + $0x550] sm:$0xff] }
 0x3e4   : > { %1898 = vmatpush.msra.mxu0 %v1654_v48  ;;  %1939 = vmatpush.msra.mxu1 %v1782_v49  ;;  %v1808_v48 = vld [vmem:[#allocation10 + $0x7d8] sm:$0xff] }
 0x3e5   : > { %3469 = vmatmul.msk.f32.gmra.mxu0 %vm1046_vm0, %v1380_v31  ;;  %3477 = vmatmul.msk.f32.gmra.mxu1 %vm1046_vm0, %v1380_v31  ;;  %v1693_v31 = vld [vmem:[#allocation10 + $0x440] sm:$0xff] }
 0x3e6   : > { %1899 = vmatpush.msra.mxu0 %v1646_v52  ;;  %1940 = vmatpush.msra.mxu1 %v1774_v53  ;;  %v1799_v52 = vld [vmem:[#allocation10 + $0x790] sm:$0xff]  ;;  %v1672_v53 = vld [vmem:[#allocation10 + $0x398] sm:$0xff] }
 0x3e7   : > { %1868 = vmatpush.msra.mxu3 %v1693_v31  ;;  %1978 = vmatpush.msrb.mxu2 %v1671_v51  ;;  %v1743_v31 = vld [vmem:[#allocation10 + $0x5d0] sm:$0xff] }
 0x3e8   : > { %1900 = vmatpush.msra.mxu0 %v1638_v56  ;;  %1941 = vmatpush.msra.mxu1 %v1766_v57  ;;  %v1800_v56 = vld [vmem:[#allocation10 + $0x798] sm:$0xff]  ;;  %v1663_v57 = vld [vmem:[#allocation10 + $0x350] sm:$0xff] }
 0x3e9   : > { %1869 = vmatpush.msra.mxu3 %v1685_v35  ;;  %1979 = vmatpush.msrb.mxu2 %v1663_v57  ;;  %v1744_v35 = vld [vmem:[#allocation10 + $0x5d8] sm:$0xff]  ;;  %v1719_v51 = vld [vmem:[#allocation10 + $0x510] sm:$0xff] }
 0x3ea   : > { %1901 = vmatpush.msra.mxu0 %v1630_v60  ;;  %1942 = vmatpush.msra.mxu1 %v1758_v61 }
 0x3eb   : > { %2018 = vmatpush.msrb.mxu3 %v1807_v45  ;;  %1980 = vmatpush.msrb.mxu2 %v1655_v63  ;;  %v1712_v63 = vld [vmem:[#allocation10 + $0x4d8] sm:$0xff] }
 0x3ec   : > { %1902 = vmatpush.msra.mxu0 %v1622_v1  ;;  %1943 = vmatpush.msra.mxu1 %v1750_v2  ;;  %v1656_v1 = vld [vmem:[#allocation10 + $0x318] sm:$0xff] }
 0x3ed   : > { %3470 = vmatmul.msk.f32.gmra.mxu0 %vm1046_vm0, %v1381_v33  ;;  %3478 = vmatmul.msk.f32.gmra.mxu1 %vm1046_vm0, %v1381_v33  ;;  %v1566_v33 = vld [vmem:[#allocation10 + $0x48] sm:$0xff]  ;;  %v1784_v2 = vld [vmem:[#allocation10 + $0x718] sm:$0xff] }
 0x3ee   : > { %1903 = vmatpush.msra.mxu0 %v1614_v5  ;;  %1944 = vmatpush.msra.mxu1 %v1742_v6  ;;  %v1408_v5 = vpop.permute.xlu0 %1407  ;;  %v1648_v6 = vld [vmem:[#allocation10 + $0x2d8] sm:$0xff] }
 0x3ef   : > { %2019 = vmatpush.msrb.mxu3 %v1799_v52  ;;  %1981 = vmatpush.msrb.mxu2 %v1647_v3  ;;  %v1576_v3 = vld [vmem:[#allocation10 + $0x98] sm:$0xff] }
 0x3f0   : > { %1904 = vmatpush.msra.mxu0 %v1606_v9  ;;  %1945 = vmatpush.msra.mxu1 %v1734_v10  ;;  %v1639_v10 = vld [vmem:[#allocation10 + $0x290] sm:$0xff] }
 0x3f1   : > { %2020 = vmatpush.msrb.mxu3 %v1791_v58  ;;  %1982 = vmatpush.msrb.mxu2 %v1639_v10  ;;  %v1583_v58 = vld [vmem:[#allocation10 + $0xd0] sm:$0xff] }
 0x3f2   : > { %1905 = vmatpush.msra.mxu0 %v1598_v14  ;;  %1946 = vmatpush.msra.mxu1 %v1726_v15  ;;  %v1640_v14 = vld [vmem:[#allocation10 + $0x298] sm:$0xff] }
 0x3f3   : > { %2021 = vmatpush.msrb.mxu3 %v1783_v0  ;;  %v1768_v15 = vld [vmem:[#allocation10 + $0x698] sm:$0xff]  ;;  %v1575_v0 = vld [vmem:[#allocation10 + $0x90] sm:$0xff] }
 0x3f4   : > { %1906 = vmatpush.msra.mxu0 %v1590_v18  ;;  %1947 = vmatpush.msra.mxu1 %v1718_v19  ;;  %v1631_v18 = vld [vmem:[#allocation10 + $0x250] sm:$0xff] }
 0x3f5   : > { %3471 = vmatmul.msk.f32.gmra.mxu0 %vm1046_vm0, %v1382_v34  ;;  %3479 = vmatmul.msk.f32.gmra.mxu1 %vm1046_vm0, %v1382_v34  ;;  %v1694_v34 = vld [vmem:[#allocation10 + $0x448] sm:$0xff]  ;;  %v1759_v19 = vld [vmem:[#allocation10 + $0x650] sm:$0xff] }
 0x3f6   : > { %1907 = vmatpush.msra.mxu0 %v1582_v22  ;;  %1948 = vmatpush.msra.mxu1 %v1710_v23  ;;  %v1623_v22 = vld [vmem:[#allocation10 + $0x210] sm:$0xff] }
 0x3f7   : > { %2022 = vmatpush.msrb.mxu3 %v1775_v4  ;;  %v1751_v23 = vld [vmem:[#allocation10 + $0x610] sm:$0xff]  ;;  %1983 = vmatpush.msrb.mxu2 %v1631_v18  ;;  %v1704_v4 = vld [vmem:[#allocation10 + $0x498] sm:$0xff] }
 0x3f8   : > { %1908 = vmatpush.msra.mxu0 %v1574_v27  ;;  %1949 = vmatpush.msra.mxu1 %v1702_v29  ;;  %v1687_v18 = vld [vmem:[#allocation10 + $0x410] sm:$0xff] }
 0x3f9   : > { %2023 = vmatpush.msrb.mxu3 %v1767_v11  ;;  %1984 = vmatpush.msrb.mxu2 %v1623_v22  ;;  %v1568_v11 = vld [vmem:[#allocation10 + $0x58] sm:$0xff] }
 0x3fa   : > { %1909 = vmatpush.msra.mxu0 %v1566_v33  ;;  %1950 = vmatpush.msra.mxu1 %v1694_v34 }
 0x3fb   : > { %2024 = vmatpush.msrb.mxu3 %v1759_v19  ;;  %1985 = vmatpush.msrb.mxu2 %v1615_v32  ;;  %v1560_v19 = vld [vmem:[#allocation10 + $0x18] sm:$0xff] }
 0x3fc   : > { %1910 = vmatpush.msra.mxu0 %v1558_v28  ;;  %1951 = vmatpush.msra.mxu1 %v1686_v36 }
 0x3fd   : > { %3472 = vmatmul.msk.f32.gmra.mxu0 %vm1046_vm0, %v1383_v47  ;;  %3480 = vmatmul.msk.f32.gmra.mxu1 %vm1046_vm0, %v1383_v47  ;;  %v1403_v47 = vpop.permute.xlu2 %1402 }
 0x3fe   : > { %2059 = vmatpush.msrb.mxu0 %v1680_v46  ;;  %2100 = vmatpush.msrb.mxu1 %v1808_v48  ;;  %v1600_v46 = vld [vmem:[#allocation10 + $0x158] sm:$0xff] }
 0x3ff   : > { %2025 = vmatpush.msrb.mxu3 %v1751_v23 }
 0x400   : > { %2060 = vmatpush.msrb.mxu0 %v1672_v53  ;;  %2101 = vmatpush.msrb.mxu1 %v1800_v56 }
 0x401   : > { %2026 = vmatpush.msrb.mxu3 %v1743_v31 }
 0x402   : > { %2061 = vmatpush.msrb.mxu0 %v1664_v59  ;;  %v1711_v59 = vld [vmem:[#allocation10 + $0x4d0] sm:$0xff] }
 0x404   : > { %2062 = vmatpush.msrb.mxu0 %v1656_v1  ;;  %v1703_v1 = vld [vmem:[#allocation10 + $0x490] sm:$0xff] }
 0x405   : > { %3473 = vmatmul.msk.f32.gmra.mxu0 %vm1046_vm0, %v1384_v62  ;;  %3481 = vmatmul.msk.f32.gmra.mxu1 %vm1046_vm0, %v1384_v62  ;;  %v1792_v62 = vld [vmem:[#allocation10 + $0x758] sm:$0xff]  ;;  %v1418_v45 = vpop.permute.xlu2 %1417 }
 0x406   : > { %2102 = vmatpush.msrb.mxu1 %v1792_v62  ;;  %2063 = vmatpush.msrb.mxu0 %v1648_v6  ;;  %v1584_v62 = vld [vmem:[#allocation10 + $0xd8] sm:$0xff] }
 0x408   : > { %2103 = vmatpush.msrb.mxu1 %v1784_v2  ;;  %2064 = vmatpush.msrb.mxu0 %v1640_v14  ;;  %v1423_v2 = vpop.permute.xlu0 %1422 }
 0x40a   : > { %2104 = vmatpush.msrb.mxu1 %v1776_v7  ;;  %2065 = vmatpush.msrb.mxu0 %v1632_v20  ;;  %v1567_v7 = vld [vmem:[#allocation10 + $0x50] sm:$0xff]  ;;  %v1688_v20 = vld [vmem:[#allocation10 + $0x418] sm:$0xff] }
 0x40c   : > { %2105 = vmatpush.msrb.mxu1 %v1768_v15  ;;  %2066 = vmatpush.msrb.mxu0 %v1624_v25  ;;  %v1559_v15 = vld [vmem:[#allocation10 + $0x10] sm:$0xff] }
 0x40d   : > { %3474 = vmatmul.msk.f32.gmra.mxu0 %vm1046_vm0, %v1385_v13  ;;  %3482 = vmatmul.msk.f32.gmra.mxu1 %vm1046_vm0, %v1385_v13 }
 0x40e   : > { %2106 = vmatpush.msrb.mxu1 %v1760_v21  ;;  %2067 = vmatpush.msrb.mxu0 %v1616_v30 }
 0x410   : > { %2107 = vmatpush.msrb.mxu1 %v1752_v26 }
 0x412   : > { %2108 = vmatpush.msrb.mxu1 %v1744_v35 }
 0x415   : > { %3475 = vmatmul.msk.f32.gmra.mxu0 %vm1046_vm0, %v1386_v24  ;;  %3483 = vmatmul.msk.f32.gmra.mxu1 %vm1046_vm0, %v1386_v24  ;;  %v1413_v24 = vpop.permute.xlu1 %1412 }
 0x41d   : > { %v1428_v21 = vpop.permute.xlu1 %1427 }
 0x45a   : > { %v1476_v38 = vpop.f32.mrf.mxu0  ;;  %v1517_v39 = vpop.f32.mrf.mxu1 }
 0x45b   : > { %v1477_v40 = vadd.f32 %v1476_v38, %v1398_v37  ;;  %v1518_v41 = vadd.f32 %v1517_v39, %v1398_v37  ;;  %v1607_v37 = vld [vmem:[#allocation10 + $0x190] sm:$0xff]  ;;  %v1608_v39 = vld [vmem:[#allocation10 + $0x198] sm:$0xff] }
 0x45c   : > { %v1735_v38 = vld [vmem:[#allocation10 + $0x590] sm:$0xff]  ;;  %1986 = vmatpush.msrb.mxu2 %v1607_v37  ;;  %2068 = vmatpush.msrb.mxu0 %v1608_v39  ;;  %v1681_v37 = vld [vmem:[#allocation10 + $0x3e0] sm:$0xff]  ;;  %v1682_v39 = vld [vmem:[#allocation10 + $0x3e8] sm:$0xff] }
 0x45d   : > { %v4425_v42 = vmax.f32 %v1477_v40, 0.0  ;;  %v4427_v43 = vmax.f32 %v1518_v41, 0.0  ;;  %v1736_v40 = vld [vmem:[#allocation10 + $0x598] sm:$0xff]  ;;  %v1599_v41 = vld [vmem:[#allocation10 + $0x150] sm:$0xff]  ;;  %2027 = vmatpush.msrb.mxu3 %v1735_v38  ;;  %v1809_v38 = vld [vmem:[#allocation10 + $0x7e0] sm:$0xff] }
 0x45e   : > { %2109 = vmatpush.msrb.mxu1 %v1736_v40  ;;  %1987 = vmatpush.msrb.mxu2 %v1599_v41  ;;  %v1810_v40 = vld [vmem:[#allocation10 + $0x7e8] sm:$0xff]  ;;  %v1673_v41 = vld [vmem:[#allocation10 + $0x3a0] sm:$0xff] }
 0x45f   : > { %1829 = vmatmul.f32.vlgmr.msra.gmra.mxu2 %v4425_v42  ;;  %1870 = vmatmul.f32.vlgmr.msra.gmra.mxu3 %v4427_v43 }
 0x460   : > { %1911 = vmatmul.f32.vlgmr.msra.gmra.mxu0 %v4425_v42  ;;  %1952 = vmatmul.f32.vlgmr.msra.gmra.mxu1 %v4427_v43 }
 0x461   : > { %2028 = vmatpush.msrb.mxu3 %v1727_v44  ;;  %2069 = vmatpush.msrb.mxu0 %v1600_v46  ;;  %v1801_v44 = vld [vmem:[#allocation10 + $0x7a0] sm:$0xff]  ;;  %v1802_v46 = vld [vmem:[#allocation10 + $0x7a8] sm:$0xff] }
 0x462   : > { %v1479_v49 = vpop.f32.mrf.mxu0  ;;  %v1520_v50 = vpop.f32.mrf.mxu1 }
 0x463   : > { %v1480_v54 = vadd.f32 %v1479_v49, %v1403_v47  ;;  %v1521_v55 = vadd.f32 %v1520_v50, %v1403_v47  ;;  %v1728_v47 = vld [vmem:[#allocation10 + $0x558] sm:$0xff]  ;;  %v1591_v50 = vld [vmem:[#allocation10 + $0x110] sm:$0xff]  ;;  %2029 = vmatpush.msrb.mxu3 %v1719_v51  ;;  %v1657_v51 = vld [vmem:[#allocation10 + $0x320] sm:$0xff] }
 0x464   : > { %2110 = vmatpush.msrb.mxu1 %v1728_v47  ;;  %1988 = vmatpush.msrb.mxu2 %v1591_v50  ;;  %v1665_v47 = vld [vmem:[#allocation10 + $0x360] sm:$0xff]  ;;  %v1794_v50 = vld [vmem:[#allocation10 + $0x768] sm:$0xff] }
 0x465   : > { %v4433_v60 = vmax.f32 %v1480_v54, 0.0  ;;  %v4435_v61 = vmax.f32 %v1521_v55, 0.0  ;;  %v1592_v54 = vld [vmem:[#allocation10 + $0x118] sm:$0xff]  ;;  %2030 = vmatpush.msrb.mxu3 %v1711_v59  ;;  %v1650_v59 = vld [vmem:[#allocation10 + $0x2e8] sm:$0xff] }
 0x466   : > { %v1720_v55 = vld [vmem:[#allocation10 + $0x518] sm:$0xff]  ;;  %2070 = vmatpush.msrb.mxu0 %v1592_v54  ;;  %1989 = vmatpush.msrb.mxu2 %v1583_v58  ;;  %v1786_v54 = vld [vmem:[#allocation10 + $0x728] sm:$0xff]  ;;  %v1777_v58 = vld [vmem:[#allocation10 + $0x6e0] sm:$0xff] }
 0x467   : > { %1832 = vmatmul.f32.gmra.mxu2 %v4433_v60  ;;  %1873 = vmatmul.f32.gmra.mxu3 %v4435_v61 }
 0x468   : > { %1914 = vmatmul.f32.gmra.mxu0 %v4433_v60  ;;  %1955 = vmatmul.f32.gmra.mxu1 %v4435_v61 }
 0x469   : > { %2111 = vmatpush.msrb.mxu1 %v1720_v55  ;;  %2071 = vmatpush.msrb.mxu0 %v1584_v62  ;;  %v1649_v55 = vld [vmem:[#allocation10 + $0x2e0] sm:$0xff]  ;;  %v1778_v62 = vld [vmem:[#allocation10 + $0x6e8] sm:$0xff] }
 0x46a   : > { %v1482_v8 = vpop.f32.mrf.mxu0  ;;  %v1523_v9 = vpop.f32.mrf.mxu1  ;;  %1990 = vmatpush.msrb.mxu2 %v1575_v0  ;;  %2031 = vmatpush.msrb.mxu3 %v1703_v1  ;;  %v1769_v0 = vld [vmem:[#allocation10 + $0x6a0] sm:$0xff]  ;;  %v1642_v1 = vld [vmem:[#allocation10 + $0x2a8] sm:$0xff] }
 0x46b   : > { %v1483_v12 = vadd.f32 %v1482_v8, %v1408_v5  ;;  %v1524_v13 = vadd.f32 %v1523_v9, %v1408_v5  ;;  %2112 = vmatpush.msrb.mxu1 %v1712_v63  ;;  %v1695_v8 = vld [vmem:[#allocation10 + $0x450] sm:$0xff]  ;;  %2072 = vmatpush.msrb.mxu0 %v1576_v3  ;;  %v1641_v63 = vld [vmem:[#allocation10 + $0x2a0] sm:$0xff] }
 0x46c   : > { %1991 = vmatpush.msrb.mxu2 %v1567_v7  ;;  %2032 = vmatpush.msrb.mxu3 %v1695_v8  ;;  %v1633_v3 = vld [vmem:[#allocation10 + $0x260] sm:$0xff] }
 0x46d   : > { %v4441_v16 = vmax.f32 %v1483_v12, 0.0  ;;  %v4443_v17 = vmax.f32 %v1524_v13, 0.0  ;;  %v1696_v12 = vld [vmem:[#allocation10 + $0x458] sm:$0xff]  ;;  %2113 = vmatpush.msrb.mxu1 %v1704_v4  ;;  %2073 = vmatpush.msrb.mxu0 %v1568_v11  ;;  %v1761_v4 = vld [vmem:[#allocation10 + $0x660] sm:$0xff] }
 0x46e   : > { %1992 = vmatpush.msrb.mxu2 %v1559_v15  ;;  %2033 = vmatpush.msrb.mxu3 %v1687_v18  ;;  %v1625_v7 = vld [vmem:[#allocation10 + $0x220] sm:$0xff]  ;;  %v1618_v15 = vld [vmem:[#allocation10 + $0x1e8] sm:$0xff] }
 0x46f   : > { %1835 = vmatmul.f32.gmra.mxu2 %v4441_v16  ;;  %1876 = vmatmul.f32.gmra.mxu3 %v4443_v17  ;;  %v1753_v8 = vld [vmem:[#allocation10 + $0x620] sm:$0xff]  ;;  %v1746_v18 = vld [vmem:[#allocation10 + $0x5e8] sm:$0xff] }
 0x470   : > { %1917 = vmatmul.f32.gmra.mxu0 %v4441_v16  ;;  %1958 = vmatmul.f32.gmra.mxu1 %v4443_v17  ;;  %v1617_v11 = vld [vmem:[#allocation10 + $0x1e0] sm:$0xff] }
 0x471   : > { %2114 = vmatpush.msrb.mxu1 %v1696_v12  ;;  %2074 = vmatpush.msrb.mxu0 %v1560_v19  ;;  %v1745_v12 = vld [vmem:[#allocation10 + $0x5e0] sm:$0xff] }
 0x472   : > { %v1485_v27 = vpop.f32.mrf.mxu0  ;;  %v1526_v29 = vpop.f32.mrf.mxu1  ;;  %2141 = vmatpush.msra.mxu2 %v1681_v37  ;;  %2182 = vmatpush.msra.mxu3 %v1809_v38  ;;  %v1609_v19 = vld [vmem:[#allocation10 + $0x1a0] sm:$0xff] }
 0x473   : > { %v1486_v33 = vadd.f32 %v1485_v27, %v1413_v24  ;;  %v1527_v34 = vadd.f32 %v1526_v29, %v1413_v24  ;;  %2115 = vmatpush.msrb.mxu1 %v1688_v20  ;;  %v1433_v29 = vpop.permute.xlu2 %1432  ;;  %2223 = vmatpush.msra.mxu0 %v1682_v39  ;;  %v1737_v20 = vld [vmem:[#allocation10 + $0x5a0] sm:$0xff]  ;;  %v1586_v39 = vld [vmem:[#allocation10 + $0xe8] sm:$0xff] }
 0x474   : > { %2142 = vmatpush.msra.mxu2 %v1673_v41  ;;  %2183 = vmatpush.msra.mxu3 %v1801_v44  ;;  %v1585_v37 = vld [vmem:[#allocation10 + $0xe0] sm:$0xff] }
 0x475   : > { %v4449_v28 = vmax.f32 %v1486_v33, 0.0  ;;  %v4451_v36 = vmax.f32 %v1527_v34, 0.0  ;;  %2264 = vmatpush.msra.mxu1 %v1810_v40  ;;  %v1713_v38 = vld [vmem:[#allocation10 + $0x4e0] sm:$0xff]  ;;  %v1714_v40 = vld [vmem:[#allocation10 + $0x4e8] sm:$0xff] }
 0x476   : > { %2143 = vmatpush.msra.mxu2 %v1665_v47  ;;  %v1577_v41 = vld [vmem:[#allocation10 + $0xa0] sm:$0xff] }
 0x477   : > { %1838 = vmatmul.f32.gmra.mxu2 %v4449_v28  ;;  %1879 = vmatmul.f32.gmra.mxu3 %v4451_v36  ;;  %v1705_v44 = vld [vmem:[#allocation10 + $0x4a0] sm:$0xff] }
 0x478   : > { %1920 = vmatmul.f32.gmra.mxu0 %v4449_v28  ;;  %1961 = vmatmul.f32.gmra.mxu1 %v4451_v36  ;;  %v1569_v47 = vld [vmem:[#allocation10 + $0x60] sm:$0xff] }
 0x479   : > { %2265 = vmatpush.msra.mxu1 %v1802_v46  ;;  %2144 = vmatpush.msra.mxu2 %v1657_v51  ;;  %v1706_v46 = vld [vmem:[#allocation10 + $0x4a8] sm:$0xff]  ;;  %v1561_v51 = vld [vmem:[#allocation10 + $0x20] sm:$0xff] }
 0x47a   : > { %v1488_v48 = vpop.f32.mrf.mxu0  ;;  %v1529_v49 = vpop.f32.mrf.mxu1 }
 0x47b   : > { %v1489_v52 = vadd.f32 %v1488_v48, %v1418_v45  ;;  %v1530_v53 = vadd.f32 %v1529_v49, %v1418_v45  ;;  %v1674_v45 = vld [vmem:[#allocation10 + $0x3a8] sm:$0xff]  ;;  %v1793_v48 = vld [vmem:[#allocation10 + $0x760] sm:$0xff]  ;;  %2266 = vmatpush.msra.mxu1 %v1794_v50  ;;  %2145 = vmatpush.msra.mxu2 %v1649_v55  ;;  %v1811_v55 = vld [vmem:[#allocation10 + $0x7f0] sm:$0xff] }
 0x47c   : > { %v1666_v49 = vld [vmem:[#allocation10 + $0x368] sm:$0xff]  ;;  %2224 = vmatpush.msra.mxu0 %v1674_v45  ;;  %2184 = vmatpush.msra.mxu3 %v1793_v48  ;;  %v1697_v48 = vld [vmem:[#allocation10 + $0x460] sm:$0xff] }
 0x47d   : > { %v4457_v56 = vmax.f32 %v1489_v52, 0.0  ;;  %v4459_v57 = vmax.f32 %v1530_v53, 0.0  ;;  %v1785_v52 = vld [vmem:[#allocation10 + $0x720] sm:$0xff]  ;;  %v1658_v53 = vld [vmem:[#allocation10 + $0x328] sm:$0xff]  ;;  %2267 = vmatpush.msra.mxu1 %v1786_v54  ;;  %2146 = vmatpush.msra.mxu2 %v1641_v63 }
 0x47e   : > { %2225 = vmatpush.msra.mxu0 %v1666_v49  ;;  %2185 = vmatpush.msra.mxu3 %v1785_v52  ;;  %v1578_v45 = vld [vmem:[#allocation10 + $0xa8] sm:$0xff]  ;;  %v1689_v52 = vld [vmem:[#allocation10 + $0x420] sm:$0xff] }
 0x47f   : > { %1841 = vmatmul.f32.gmra.mxu2 %v4457_v56  ;;  %1882 = vmatmul.f32.gmra.mxu3 %v4459_v57  ;;  %v1570_v49 = vld [vmem:[#allocation10 + $0x68] sm:$0xff] }
 0x480   : > { %1923 = vmatmul.f32.gmra.mxu0 %v4457_v56  ;;  %1964 = vmatmul.f32.gmra.mxu1 %v4459_v57  ;;  %v1698_v50 = vld [vmem:[#allocation10 + $0x468] sm:$0xff] }
 0x481   : > { %2226 = vmatpush.msra.mxu0 %v1658_v53  ;;  %2186 = vmatpush.msra.mxu3 %v1777_v58  ;;  %v1562_v53 = vld [vmem:[#allocation10 + $0x28] sm:$0xff]  ;;  %v1803_v58 = vld [vmem:[#allocation10 + $0x7b0] sm:$0xff] }
 0x482   : > { %v1491_v5 = vpop.f32.mrf.mxu0  ;;  %v1532_v6 = vpop.f32.mrf.mxu1  ;;  %2268 = vmatpush.msra.mxu1 %v1778_v62  ;;  %2147 = vmatpush.msra.mxu2 %v1633_v3  ;;  %v1690_v54 = vld [vmem:[#allocation10 + $0x428] sm:$0xff]  ;;  %v1779_v3 = vld [vmem:[#allocation10 + $0x6f0] sm:$0xff] }
 0x483   : > { %v1492_v9 = vadd.f32 %v1491_v5, %v1423_v2  ;;  %v1533_v10 = vadd.f32 %v1532_v6, %v1423_v2  ;;  %v1770_v2 = vld [vmem:[#allocation10 + $0x6a8] sm:$0xff]  ;;  %2227 = vmatpush.msra.mxu0 %v1650_v59  ;;  %2187 = vmatpush.msra.mxu3 %v1769_v0  ;;  %v1795_v59 = vld [vmem:[#allocation10 + $0x770] sm:$0xff] }
 0x484   : > { %2269 = vmatpush.msra.mxu1 %v1770_v2  ;;  %v1634_v5 = vld [vmem:[#allocation10 + $0x268] sm:$0xff]  ;;  %2148 = vmatpush.msra.mxu2 %v1625_v7  ;;  %v1683_v0 = vld [vmem:[#allocation10 + $0x3f0] sm:$0xff] }
 0x485   : > { %v4465_v13 = vmax.f32 %v1492_v9, 0.0  ;;  %v4467_v14 = vmax.f32 %v1533_v10, 0.0  ;;  %2228 = vmatpush.msra.mxu0 %v1642_v1  ;;  %v1762_v6 = vld [vmem:[#allocation10 + $0x668] sm:$0xff]  ;;  %2188 = vmatpush.msra.mxu3 %v1761_v4  ;;  %v1787_v1 = vld [vmem:[#allocation10 + $0x730] sm:$0xff]  ;;  %v1684_v4 = vld [vmem:[#allocation10 + $0x3f8] sm:$0xff] }
 0x486   : > { %v1626_v9 = vld [vmem:[#allocation10 + $0x228] sm:$0xff]  ;;  %2270 = vmatpush.msra.mxu1 %v1762_v6  ;;  %2149 = vmatpush.msra.mxu2 %v1617_v11  ;;  %v1675_v2 = vld [vmem:[#allocation10 + $0x3b0] sm:$0xff] }
 0x487   : > { %1844 = vmatmul.f32.gmra.mxu2 %v4465_v13  ;;  %1885 = vmatmul.f32.gmra.mxu3 %v4467_v14  ;;  %v1754_v10 = vld [vmem:[#allocation10 + $0x628] sm:$0xff] }
 0x488   : > { %1926 = vmatmul.f32.gmra.mxu0 %v4465_v13  ;;  %1967 = vmatmul.f32.gmra.mxu1 %v4467_v14 }
 0x489   : > { %2229 = vmatpush.msra.mxu0 %v1634_v5  ;;  %2189 = vmatpush.msra.mxu3 %v1753_v8  ;;  %v1812_v5 = vld [vmem:[#allocation10 + $0x7f8] sm:$0xff]  ;;  %v1667_v8 = vld [vmem:[#allocation10 + $0x370] sm:$0xff] }
 0x48a   : > { %v1494_v22 = vpop.f32.mrf.mxu0  ;;  %v1535_v23 = vpop.f32.mrf.mxu1  ;;  %2271 = vmatpush.msra.mxu1 %v1754_v10  ;;  %2150 = vmatpush.msra.mxu2 %v1609_v19  ;;  %v1676_v10 = vld [vmem:[#allocation10 + $0x3b8] sm:$0xff] }
 0x48b   : > { %v1495_v24 = vadd.f32 %v1494_v22, %v1428_v21  ;;  %v1536_v25 = vadd.f32 %v1535_v23, %v1428_v21  ;;  %2230 = vmatpush.msra.mxu0 %v1626_v9  ;;  %2190 = vmatpush.msra.mxu3 %v1745_v12  ;;  %v1610_v21 = vld [vmem:[#allocation10 + $0x1a8] sm:$0xff]  ;;  %v1601_v23 = vld [vmem:[#allocation10 + $0x160] sm:$0xff]  ;;  %v1771_v9 = vld [vmem:[#allocation10 + $0x6b0] sm:$0xff] }
 0x48c   : > { %2272 = vmatpush.msra.mxu1 %v1746_v18  ;;  %v1738_v22 = vld [vmem:[#allocation10 + $0x5a8] sm:$0xff]  ;;  %2151 = vmatpush.msra.mxu2 %v1601_v23  ;;  %v1804_v12 = vld [vmem:[#allocation10 + $0x7b8] sm:$0xff] }
 0x48d   : > { %v4473_v26 = vmax.f32 %v1495_v24, 0.0  ;;  %v4475_v27 = vmax.f32 %v1536_v25, 0.0  ;;  %2231 = vmatpush.msra.mxu0 %v1618_v15  ;;  %v1729_v24 = vld [vmem:[#allocation10 + $0x560] sm:$0xff]  ;;  %2191 = vmatpush.msra.mxu3 %v1737_v20  ;;  %v1602_v25 = vld [vmem:[#allocation10 + $0x168] sm:$0xff]  ;;  %v1668_v15 = vld [vmem:[#allocation10 + $0x378] sm:$0xff] }
 0x48e   : > { %2273 = vmatpush.msra.mxu1 %v1738_v22  ;;  %v1796_v20 = vld [vmem:[#allocation10 + $0x778] sm:$0xff]  ;;  %v1763_v22 = vld [vmem:[#allocation10 + $0x670] sm:$0xff] }
 0x48f   : > { %1847 = vmatmul.f32.gmra.mxu2 %v4473_v26  ;;  %1888 = vmatmul.f32.gmra.mxu3 %v4475_v27  ;;  %v1660_v23 = vld [vmem:[#allocation10 + $0x338] sm:$0xff] }
 0x490   : > { %1929 = vmatmul.f32.gmra.mxu0 %v4473_v26  ;;  %1970 = vmatmul.f32.gmra.mxu1 %v4475_v27 }
 0x491   : > { %2232 = vmatpush.msra.mxu0 %v1610_v21  ;;  %2192 = vmatpush.msra.mxu3 %v1729_v24  ;;  %v1659_v21 = vld [vmem:[#allocation10 + $0x330] sm:$0xff]  ;;  %v1788_v24 = vld [vmem:[#allocation10 + $0x738] sm:$0xff] }
 0x492   : > { %v1497_v32 = vpop.f32.mrf.mxu0  ;;  %v1538_v31 = vpop.f32.mrf.mxu1 }
 0x493   : > { %v1498_v33 = vadd.f32 %v1497_v32, %v1433_v29  ;;  %v1539_v34 = vadd.f32 %v1538_v31, %v1433_v29  ;;  %v1730_v29 = vld [vmem:[#allocation10 + $0x568] sm:$0xff]  ;;  %v1593_v32 = vld [vmem:[#allocation10 + $0x120] sm:$0xff]  ;;  %2233 = vmatpush.msra.mxu0 %v1602_v25  ;;  %v1651_v25 = vld [vmem:[#allocation10 + $0x2f0] sm:$0xff] }
 0x494   : > { %v1721_v31 = vld [vmem:[#allocation10 + $0x520] sm:$0xff]  ;;  %2274 = vmatpush.msra.mxu1 %v1730_v29  ;;  %2152 = vmatpush.msra.mxu2 %v1593_v32  ;;  %v1755_v29 = vld [vmem:[#allocation10 + $0x630] sm:$0xff]  ;;  %v1652_v32 = vld [vmem:[#allocation10 + $0x2f8] sm:$0xff] }
 0x495   : > { %v4481_v30 = vmax.f32 %v1498_v33, 0.0  ;;  %v4483_v35 = vmax.f32 %v1539_v34, 0.0  ;;  %v1594_v33 = vld [vmem:[#allocation10 + $0x128] sm:$0xff]  ;;  %2193 = vmatpush.msra.mxu3 %v1721_v31  ;;  %v1780_v31 = vld [vmem:[#allocation10 + $0x6f8] sm:$0xff] }
 0x496   : > { %v1722_v34 = vld [vmem:[#allocation10 + $0x528] sm:$0xff]  ;;  %2234 = vmatpush.msra.mxu0 %v1594_v33  ;;  %2153 = vmatpush.msra.mxu2 %v1585_v37  ;;  %v1643_v37 = vld [vmem:[#allocation10 + $0x2b0] sm:$0xff] }
 0x497   : > { %1850 = vmatmul.f32.gmra.mxu2 %v4481_v30  ;;  %1891 = vmatmul.f32.gmra.mxu3 %v4483_v35 }
 0x498   : > { %1932 = vmatmul.f32.gmra.mxu0 %v4481_v30  ;;  %1973 = vmatmul.f32.gmra.mxu1 %v4483_v35 }
 0x499   : > { %2275 = vmatpush.msra.mxu1 %v1722_v34  ;;  %2194 = vmatpush.msra.mxu3 %v1713_v38  ;;  %v1747_v38 = vld [vmem:[#allocation10 + $0x5f0] sm:$0xff] }
 0x49a   : > { %2235 = vmatpush.msra.mxu0 %v1586_v39  ;;  %2154 = vmatpush.msra.mxu2 %v1577_v41  ;;  %v1644_v39 = vld [vmem:[#allocation10 + $0x2b8] sm:$0xff] }
 0x49b   : > { %2276 = vmatpush.msra.mxu1 %v1714_v40  ;;  %2195 = vmatpush.msra.mxu3 %v1705_v44  ;;  %v1772_v40 = vld [vmem:[#allocation10 + $0x6b8] sm:$0xff] }
 0x49c   : > { %2236 = vmatpush.msra.mxu0 %v1578_v45  ;;  %2155 = vmatpush.msra.mxu2 %v1569_v47  ;;  %v1635_v45 = vld [vmem:[#allocation10 + $0x270] sm:$0xff]  ;;  %v1636_v47 = vld [vmem:[#allocation10 + $0x278] sm:$0xff] }
 0x49d   : > { %2277 = vmatpush.msra.mxu1 %v1706_v46  ;;  %2196 = vmatpush.msra.mxu3 %v1697_v48  ;;  %v1739_v46 = vld [vmem:[#allocation10 + $0x5b0] sm:$0xff]  ;;  %v1764_v48 = vld [vmem:[#allocation10 + $0x678] sm:$0xff] }
 0x49e   : > { %2237 = vmatpush.msra.mxu0 %v1570_v49  ;;  %2156 = vmatpush.msra.mxu2 %v1561_v51  ;;  %v1627_v49 = vld [vmem:[#allocation10 + $0x230] sm:$0xff]  ;;  %v1628_v51 = vld [vmem:[#allocation10 + $0x238] sm:$0xff] }
 0x49f   : > { %1993 = vmatmul.f32.vlgmr.msrb.gmra.mxu2 %v4425_v42  ;;  %2034 = vmatmul.f32.vlgmr.msrb.gmra.mxu3 %v4427_v43 }
 0x4a0   : > { %2075 = vmatmul.f32.vlgmr.msrb.gmra.mxu0 %v4425_v42  ;;  %2116 = vmatmul.f32.vlgmr.msrb.gmra.mxu1 %v4427_v43 }
 0x4a1   : > { %2278 = vmatpush.msra.mxu1 %v1698_v50  ;;  %2197 = vmatpush.msra.mxu3 %v1689_v52  ;;  %v1731_v50 = vld [vmem:[#allocation10 + $0x570] sm:$0xff]  ;;  %v1756_v52 = vld [vmem:[#allocation10 + $0x638] sm:$0xff] }
 0x4a2   : > { %2238 = vmatpush.msra.mxu0 %v1562_v53  ;;  %2305 = vmatpush.msrb.mxu2 %v1683_v0  ;;  %v1748_v0 = vld [vmem:[#allocation10 + $0x5f8] sm:$0xff] }
 0x4a3   : > { %2279 = vmatpush.msra.mxu1 %v1690_v54  ;;  %2346 = vmatpush.msrb.mxu3 %v1811_v55  ;;  %v1619_v55 = vld [vmem:[#allocation10 + $0x1f0] sm:$0xff] }
 0x4a4   : > { %2387 = vmatpush.msrb.mxu0 %v1684_v4  ;;  %2306 = vmatpush.msrb.mxu2 %v1675_v2  ;;  %v1715_v4 = vld [vmem:[#allocation10 + $0x4f0] sm:$0xff] }
 0x4a5   : > { %2347 = vmatpush.msrb.mxu3 %v1803_v58  ;;  %2428 = vmatpush.msrb.mxu1 %v1812_v5  ;;  %v1723_v58 = vld [vmem:[#allocation10 + $0x530] sm:$0xff]  ;;  %v1612_v5 = vld [vmem:[#allocation10 + $0x1b8] sm:$0xff] }
 0x4a6   : > { %2388 = vmatpush.msrb.mxu0 %v1676_v10  ;;  %2307 = vmatpush.msrb.mxu2 %v1667_v8  ;;  %v1707_v8 = vld [vmem:[#allocation10 + $0x4b0] sm:$0xff]  ;;  %v1732_v10 = vld [vmem:[#allocation10 + $0x578] sm:$0xff] }
 0x4a7   : > { %1996 = vmatmul.f32.gmra.mxu2 %v4433_v60  ;;  %2037 = vmatmul.f32.gmra.mxu3 %v4435_v61 }
 0x4a8   : > { %2078 = vmatmul.f32.gmra.mxu0 %v4433_v60  ;;  %2119 = vmatmul.f32.gmra.mxu1 %v4435_v61 }
 0x4a9   : > { %2348 = vmatpush.msrb.mxu3 %v1795_v59  ;;  %2429 = vmatpush.msrb.mxu1 %v1804_v12  ;;  %v1620_v59 = vld [vmem:[#allocation10 + $0x1f8] sm:$0xff] }
 0x4aa   : > { %2389 = vmatpush.msrb.mxu0 %v1668_v15  ;;  %2308 = vmatpush.msrb.mxu2 %v1659_v21  ;;  %v1699_v21 = vld [vmem:[#allocation10 + $0x470] sm:$0xff] }
 0x4ab   : > { %2349 = vmatpush.msrb.mxu3 %v1787_v1  ;;  %2430 = vmatpush.msrb.mxu1 %v1796_v20  ;;  %v1595_v20 = vld [vmem:[#allocation10 + $0x130] sm:$0xff] }
 0x4ac   : > { %2390 = vmatpush.msrb.mxu0 %v1660_v23  ;;  %2309 = vmatpush.msrb.mxu2 %v1651_v25  ;;  %v1724_v23 = vld [vmem:[#allocation10 + $0x538] sm:$0xff] }
 0x4ad   : > { %2350 = vmatpush.msrb.mxu3 %v1779_v3  ;;  %2431 = vmatpush.msrb.mxu1 %v1788_v24  ;;  %v1611_v3 = vld [vmem:[#allocation10 + $0x1b0] sm:$0xff] }
 0x4ae   : > { %2391 = vmatpush.msrb.mxu0 %v1652_v32  ;;  %2310 = vmatpush.msrb.mxu2 %v1643_v37  ;;  %v1691_v32 = vld [vmem:[#allocation10 + $0x430] sm:$0xff]  ;;  %v1716_v37 = vld [vmem:[#allocation10 + $0x4f8] sm:$0xff] }
 0x4af   : > { %1999 = vmatmul.f32.gmra.mxu2 %v4441_v16  ;;  %2040 = vmatmul.f32.gmra.mxu3 %v4443_v17 }
 0x4b0   : > { %2081 = vmatmul.f32.gmra.mxu0 %v4441_v16  ;;  %2122 = vmatmul.f32.gmra.mxu1 %v4443_v17 }
 0x4b1   : > { %2351 = vmatpush.msrb.mxu3 %v1771_v9  ;;  %2432 = vmatpush.msrb.mxu1 %v1780_v31  ;;  %v1604_v9 = vld [vmem:[#allocation10 + $0x178] sm:$0xff] }
 0x4b2   : > { %2392 = vmatpush.msrb.mxu0 %v1644_v39  ;;  %2311 = vmatpush.msrb.mxu2 %v1635_v45  ;;  %v1588_v31 = vld [vmem:[#allocation10 + $0xf8] sm:$0xff] }
 0x4b3   : > { %2352 = vmatpush.msrb.mxu3 %v1763_v22  ;;  %2433 = vmatpush.msrb.mxu1 %v1772_v40  ;;  %v1596_v22 = vld [vmem:[#allocation10 + $0x138] sm:$0xff] }
 0x4b4   : > { %2393 = vmatpush.msrb.mxu0 %v1636_v47  ;;  %2312 = vmatpush.msrb.mxu2 %v1627_v49  ;;  %v1580_v39 = vld [vmem:[#allocation10 + $0xb8] sm:$0xff]  ;;  %v1571_v47 = vld [vmem:[#allocation10 + $0x70] sm:$0xff] }
 0x4b5   : > { %2353 = vmatpush.msrb.mxu3 %v1755_v29  ;;  %2434 = vmatpush.msrb.mxu1 %v1764_v48  ;;  %v1587_v29 = vld [vmem:[#allocation10 + $0xf0] sm:$0xff]  ;;  %v1708_v40 = vld [vmem:[#allocation10 + $0x4b8] sm:$0xff] }
 0x4b6   : > { %2394 = vmatpush.msrb.mxu0 %v1628_v51  ;;  %2313 = vmatpush.msrb.mxu2 %v1619_v55  ;;  %v1572_v48 = vld [vmem:[#allocation10 + $0x78] sm:$0xff] }
 0x4b7   : > { %2002 = vmatmul.f32.gmra.mxu2 %v4449_v28  ;;  %2043 = vmatmul.f32.gmra.mxu3 %v4451_v36  ;;  %v1700_v49 = vld [vmem:[#allocation10 + $0x478] sm:$0xff] }
 0x4b8   : > { %2084 = vmatmul.f32.gmra.mxu0 %v4449_v28  ;;  %2125 = vmatmul.f32.gmra.mxu1 %v4451_v36  ;;  %v1564_v55 = vld [vmem:[#allocation10 + $0x38] sm:$0xff] }
 0x4b9   : > { %2354 = vmatpush.msrb.mxu3 %v1747_v38  ;;  %2435 = vmatpush.msrb.mxu1 %v1756_v52  ;;  %v1579_v38 = vld [vmem:[#allocation10 + $0xb0] sm:$0xff] }
 0x4ba   : > { %2395 = vmatpush.msrb.mxu0 %v1620_v59  ;;  %2314 = vmatpush.msrb.mxu2 %v1611_v3  ;;  %v1563_v52 = vld [vmem:[#allocation10 + $0x30] sm:$0xff] }
 0x4bb   : > { %2355 = vmatpush.msrb.mxu3 %v1739_v46  ;;  %2436 = vmatpush.msrb.mxu1 %v1748_v0 }
 0x4bc   : > { %2396 = vmatpush.msrb.mxu0 %v1612_v5 }
 0x4bd   : > { %2356 = vmatpush.msrb.mxu3 %v1731_v50 }
 0x4be   : > { %2397 = vmatpush.msrb.mxu0 %v1604_v9 }
 0x4bf   : > { %2005 = vmatmul.f32.gmra.mxu2 %v4457_v56  ;;  %2046 = vmatmul.f32.gmra.mxu3 %v4459_v57 }
 0x4c0   : > { %2087 = vmatmul.f32.gmra.mxu0 %v4457_v56  ;;  %2128 = vmatmul.f32.gmra.mxu1 %v4459_v57 }
 0x4c1   : > { %2357 = vmatpush.msrb.mxu3 %v1723_v58  ;;  %2398 = vmatpush.msrb.mxu0 %v1596_v22  ;;  %v1692_v58 = vld [vmem:[#allocation10 + $0x438] sm:$0xff] }
 0x4c3   : > { %2358 = vmatpush.msrb.mxu3 %v1715_v4  ;;  %2399 = vmatpush.msrb.mxu0 %v1588_v31 }
 0x4c5   : > { %2359 = vmatpush.msrb.mxu3 %v1707_v8  ;;  %2400 = vmatpush.msrb.mxu0 %v1580_v39 }
 0x4c7   : > { %2008 = vmatmul.f32.gmra.mxu2 %v4465_v13  ;;  %2049 = vmatmul.f32.gmra.mxu3 %v4467_v14 }
 0x4c8   : > { %2090 = vmatmul.f32.gmra.mxu0 %v4465_v13  ;;  %2131 = vmatmul.f32.gmra.mxu1 %v4467_v14 }
 0x4c9   : > { %2360 = vmatpush.msrb.mxu3 %v1699_v21  ;;  %2401 = vmatpush.msrb.mxu0 %v1572_v48 }
 0x4cb   : > { %2361 = vmatpush.msrb.mxu3 %v1691_v32  ;;  %2402 = vmatpush.msrb.mxu0 %v1564_v55 }
 0x4cf   : > { %2011 = vmatmul.f32.gmra.mxu2 %v4473_v26  ;;  %2052 = vmatmul.f32.gmra.mxu3 %v4475_v27 }
 0x4d0   : > { %2093 = vmatmul.f32.gmra.mxu0 %v4473_v26  ;;  %2134 = vmatmul.f32.gmra.mxu1 %v4475_v27 }
 0x4d7   : > { %2014 = vmatmul.f32.gmra.mxu2 %v4481_v30  ;;  %2055 = vmatmul.f32.gmra.mxu3 %v4483_v35 }
 0x4d8   : > { %2096 = vmatmul.f32.gmra.mxu0 %v4481_v30  ;;  %2137 = vmatmul.f32.gmra.mxu1 %v4483_v35 }
 0x4dd   : > { %v4521_v62 = vpop.f32.mrf.mxu0  ;;  %v4523_v63 = vpop.f32.mrf.mxu1 }
 0x4df   : > { %2157 = vmatmul.f32.vlgmr.msra.gmra.mxu2 %v4425_v42  ;;  %2198 = vmatmul.f32.vlgmr.msra.gmra.mxu3 %v4427_v43 }
 0x4e0   : > { %2239 = vmatmul.f32.vlgmr.msra.gmra.mxu0 %v4425_v42  ;;  %2280 = vmatmul.f32.vlgmr.msra.gmra.mxu1 %v4427_v43 }
 0x4e2   : > { %v1830_v6 = vpop.f32.mrf.mxu2  ;;  %v1871_v7 = vpop.f32.mrf.mxu3 }
 0x4e3   : > { %v4529_v11 = vadd.f32 %v1871_v7, %v1830_v6  ;;  %v1740_v6 = vld [vmem:[#allocation10 + $0x5b8] sm:$0xff]  ;;  %v1603_v7 = vld [vmem:[#allocation10 + $0x170] sm:$0xff] }
 0x4e4   : > { %2437 = vmatpush.msrb.mxu1 %v1740_v6  ;;  %2315 = vmatpush.msrb.mxu2 %v1603_v7 }
 0x4e5   : > { %v4531_v18 = vpop.f32.mrf.mxu0  ;;  %v4533_v19 = vpop.f32.mrf.mxu1 }
 0x4e6   : > { %2438 = vmatpush.msrb.mxu1 %v1732_v10  ;;  %2316 = vmatpush.msrb.mxu2 %v1595_v20 }
 0x4e7   : > { %2160 = vmatmul.f32.gmra.mxu2 %v4433_v60  ;;  %2201 = vmatmul.f32.gmra.mxu3 %v4435_v61 }
 0x4e8   : > { %2242 = vmatmul.f32.gmra.mxu0 %v4433_v60  ;;  %2283 = vmatmul.f32.gmra.mxu1 %v4435_v61 }
 0x4e9   : > { %2439 = vmatpush.msrb.mxu1 %v1724_v23  ;;  %2317 = vmatpush.msrb.mxu2 %v1587_v29 }
 0x4ea   : > { %v4539_v33 = vpop.f32.mrf.mxu2  ;;  %v4541_v34 = vpop.f32.mrf.mxu3 }
 0x4eb   : > { %2440 = vmatpush.msrb.mxu1 %v1716_v37  ;;  %2318 = vmatpush.msrb.mxu2 %v1579_v38 }
 0x4ed   : > { %v4543_v41 = vpop.f32.mrf.mxu0  ;;  %v4545_v44 = vpop.f32.mrf.mxu1  ;;  %2441 = vmatpush.msrb.mxu1 %v1708_v40  ;;  %2319 = vmatpush.msrb.mxu2 %v1571_v47 }
 0x4ef   : > { %2163 = vmatmul.f32.gmra.mxu2 %v4441_v16  ;;  %2204 = vmatmul.f32.gmra.mxu3 %v4443_v17 }
 0x4f0   : > { %2245 = vmatmul.f32.gmra.mxu0 %v4441_v16  ;;  %2286 = vmatmul.f32.gmra.mxu1 %v4443_v17 }
 0x4f1   : > { %2442 = vmatpush.msrb.mxu1 %v1700_v49  ;;  %2320 = vmatpush.msrb.mxu2 %v1563_v52 }
 0x4f2   : > { %v4551_v53 = vpop.f32.mrf.mxu2  ;;  %v4553_v54 = vpop.f32.mrf.mxu3 }
 0x4f3   : > { %2443 = vmatpush.msrb.mxu1 %v1692_v58 }
 0x4f5   : > { %v4555_v1 = vpop.f32.mrf.mxu0  ;;  %v4557_v2 = vpop.f32.mrf.mxu1 }
 0x4f6   : > { %v1963_v38 = vadd.f32 %v4557_v2, %v4555_v1  ;;  %v1957_v1 = vadd.f32 %v4533_v19, %v4531_v18  ;;  %v1878_v2 = vadd.f32 %v4553_v54, %v4551_v53  ;;  %v1875_v18 = vadd.f32 %v4541_v34, %v4539_v33 }
 0x4f7   : > { %2166 = vmatmul.f32.gmra.mxu2 %v4449_v28  ;;  %2207 = vmatmul.f32.gmra.mxu3 %v4451_v36 }
 0x4f8   : > { %2248 = vmatmul.f32.gmra.mxu0 %v4449_v28  ;;  %2289 = vmatmul.f32.gmra.mxu1 %v4451_v36 }
 0x4fa   : > { %v4563_v12 = vpop.f32.mrf.mxu2  ;;  %v4565_v15 = vpop.f32.mrf.mxu3 }
 0x4fd   : > { %v4567_v24 = vpop.f32.mrf.mxu0  ;;  %v4569_v25 = vpop.f32.mrf.mxu1 }
 0x4fe   : > { %v1966_v29 = vadd.f32 %v4569_v25, %v4567_v24  ;;  %v1960_v24 = vadd.f32 %v4545_v44, %v4543_v41  ;;  %v1954_v44 = vadd.f32 %v4523_v63, %v4521_v62 }
 0x4ff   : > { %2169 = vmatmul.f32.gmra.mxu2 %v4457_v56  ;;  %2210 = vmatmul.f32.gmra.mxu3 %v4459_v57 }
 0x500   : > { %2251 = vmatmul.f32.gmra.mxu0 %v4457_v56  ;;  %2292 = vmatmul.f32.gmra.mxu1 %v4459_v57 }
 0x502   : > { %v4575_v45 = vpop.f32.mrf.mxu2  ;;  %v4577_v46 = vpop.f32.mrf.mxu3 }
 0x503   : > { %v1884_v47 = vadd.f32 %v4577_v46, %v4575_v45 }
 0x505   : > { %v1927_v50 = vpop.f32.mrf.mxu0  ;;  %v1968_v51 = vpop.f32.mrf.mxu1 }
 0x506   : > { %v1969_v22 = vadd.f32 %v1968_v51, %v1927_v50 }
 0x507   : > { %2172 = vmatmul.f32.gmra.mxu2 %v4465_v13  ;;  %2213 = vmatmul.f32.gmra.mxu3 %v4467_v14 }
 0x508   : > { %2254 = vmatmul.f32.gmra.mxu0 %v4465_v13  ;;  %2295 = vmatmul.f32.gmra.mxu1 %v4467_v14 }
 0x50a   : > { %v1845_v59 = vpop.f32.mrf.mxu2  ;;  %v1886_v0 = vpop.f32.mrf.mxu3 }
 0x50b   : > { %v1887_v39 = vadd.f32 %v1886_v0, %v1845_v59 }
 0x50d   : > { %v1930_v3 = vpop.f32.mrf.mxu0  ;;  %v1971_v4 = vpop.f32.mrf.mxu1 }
 0x50e   : > { %v1972_v10 = vadd.f32 %v1971_v4, %v1930_v3 }
 0x50f   : > { %2175 = vmatmul.f32.gmra.mxu2 %v4473_v26  ;;  %2216 = vmatmul.f32.gmra.mxu3 %v4475_v27 }
 0x510   : > { %2257 = vmatmul.f32.gmra.mxu0 %v4473_v26  ;;  %2298 = vmatmul.f32.gmra.mxu1 %v4475_v27 }
 0x512   : > { %v1848_v5 = vpop.f32.mrf.mxu2  ;;  %v1889_v6 = vpop.f32.mrf.mxu3 }
 0x513   : > { %v1890_v37 = vadd.f32 %v1889_v6, %v1848_v5  ;;  %v4668_v5 = vld [vmem:[#allocation12] sm:$0xff] }
 0x515   : > { %v1933_v7 = vpop.f32.mrf.mxu0  ;;  %v1974_v8 = vpop.f32.mrf.mxu1 }
 0x516   : > { %v1975_v9 = vadd.f32 %v1974_v8, %v1933_v7 }
 0x517   : > { %2178 = vmatmul.f32.gmra.mxu2 %v4481_v30  ;;  %2219 = vmatmul.f32.gmra.mxu3 %v4483_v35 }
 0x518   : > { %2260 = vmatmul.f32.gmra.mxu0 %v4481_v30  ;;  %2301 = vmatmul.f32.gmra.mxu1 %v4483_v35 }
 0x519   : > { %2598 = vmatpush.msra.mxu3 %v1975_v9 }
 0x51a   : > { %v1851_v20 = vpop.f32.mrf.mxu2  ;;  %v1892_v21 = vpop.f32.mrf.mxu3 }
 0x51b   : > { %2599 = vmatpush.msra.mxu3 %v1972_v10  ;;  %v1893_v23 = vadd.f32 %v1892_v21, %v1851_v20 }
 0x51d   : > { %2600 = vmatpush.msra.mxu3 %v1969_v22  ;;  %v4593_v32 = vpop.f32.mrf.mxu0  ;;  %v4595_v31 = vpop.f32.mrf.mxu1  ;;  %2557 = vmatpush.msra.mxu2 %v1893_v23 }
 0x51e   : > { %v2118_v21 = vadd.f32 %v4595_v31, %v4593_v32 }
 0x51f   : > { %2601 = vmatpush.msra.mxu3 %v1966_v29  ;;  %2321 = vmatmul.f32.vlgmr.msrb.gmra.mxu2 %v4425_v42  ;;  %v4688_v29 = vld [vmem:[#allocation12 + $0x8] sm:$0xff] }
 0x520   : > { %2362 = vmatmul.f32.vlgmr.msrb.gmra.mxu3 %v4427_v43  ;;  %2403 = vmatmul.f32.vlgmr.msrb.gmra.mxu0 %v4425_v42  ;;  %v1881_v42 = vadd.f32 %v4565_v15, %v4563_v12 }
 0x521   : > { %2444 = vmatmul.f32.vlgmr.msrb.gmra.mxu1 %v4427_v43  ;;  %2558 = vmatpush.msra.mxu2 %v1890_v37 }
 0x522   : > { %2602 = vmatpush.msra.mxu3 %v1963_v38  ;;  %v1994_v25 = vpop.f32.mrf.mxu2  ;;  %v2035_v40 = vpop.f32.mrf.mxu3 }
 0x523   : > { %2559 = vmatpush.msra.mxu2 %v1887_v39  ;;  %v4607_v48 = vadd.f32 %v2035_v40, %v1994_v25  ;;  %v4709_v25 = vld [vmem:[#allocation12 + $0x10] sm:$0xff] }
 0x524   : > { %2603 = vmatpush.msra.mxu3 %v1960_v24 }
 0x525   : > { %2560 = vmatpush.msra.mxu2 %v1884_v47  ;;  %v4613_v43 = vpop.f32.mrf.mxu0  ;;  %v4615_v41 = vpop.f32.mrf.mxu1 }
 0x526   : > { %2604 = vmatpush.msra.mxu3 %v1957_v1  ;;  %v2121_v10 = vadd.f32 %v4615_v41, %v4613_v43 }
 0x527   : > { %2561 = vmatpush.msra.mxu2 %v1881_v42  ;;  %v4723_v42 = vld [vmem:[#allocation12 + $0x18] sm:$0xff] }
 0x528   : > { %2605 = vmatpush.msra.mxu3 %v1954_v44  ;;  %2324 = vmatmul.f32.gmra.mxu2 %v4433_v60 }
 0x529   : > { %2365 = vmatmul.f32.gmra.mxu3 %v4435_v61  ;;  %2406 = vmatmul.f32.gmra.mxu0 %v4433_v60 }
 0x52a   : > { %2447 = vmatmul.f32.gmra.mxu1 %v4435_v61  ;;  %2562 = vmatpush.msra.mxu2 %v1878_v2  ;;  %v4627_v19 = vpop.f32.mrf.mxu2  ;;  %v4629_v62 = vpop.f32.mrf.mxu3 }
 0x52b   : > { %v2039_v32 = vadd.f32 %v4629_v62, %v4627_v19 }
 0x52c   : > { %2563 = vmatpush.msra.mxu2 %v1875_v18  ;;  %v4733_v18 = vld [vmem:[#allocation12 + $0x20] sm:$0xff] }
 0x52d   : > { %v4631_v63 = vpop.f32.mrf.mxu0  ;;  %v4633_v53 = vpop.f32.mrf.mxu1 }
 0x52e   : > { %2564 = vmatpush.msra.mxu2 %v4529_v11 }
 0x530   : > { %2327 = vmatmul.f32.gmra.mxu2 %v4441_v16 }
 0x531   : > { %2368 = vmatmul.f32.gmra.mxu3 %v4443_v17  ;;  %2409 = vmatmul.f32.gmra.mxu0 %v4441_v16 }
 0x532   : > { %2450 = vmatmul.f32.gmra.mxu1 %v4443_v17  ;;  %v4640_v60 = vpop.f32.mrf.mxu2  ;;  %v4642_v61 = vpop.f32.mrf.mxu3 }
 0x533   : > { %v2042_v37 = vadd.f32 %v4642_v61, %v4640_v60  ;;  %v4743_v60 = vld [vmem:[#allocation12 + $0x28] sm:$0xff] }
 0x535   : > { %v2085_v33 = vpop.f32.mrf.mxu0  ;;  %v2126_v34 = vpop.f32.mrf.mxu1 }
 0x536   : > { %v2127_v6 = vadd.f32 %v2126_v34, %v2085_v33 }
 0x538   : > { %2330 = vmatmul.f32.gmra.mxu2 %v4449_v28 }
 0x539   : > { %2371 = vmatmul.f32.gmra.mxu3 %v4451_v36  ;;  %2412 = vmatmul.f32.gmra.mxu0 %v4449_v28 }
 0x53a   : > { %2453 = vmatmul.f32.gmra.mxu1 %v4451_v36  ;;  %v2003_v11 = vpop.f32.mrf.mxu2  ;;  %v2044_v54 = vpop.f32.mrf.mxu3 }
 0x53b   : > { %v2045_v20 = vadd.f32 %v2044_v54, %v2003_v11  ;;  %v4753_v54 = vld [vmem:[#allocation12 + $0x30] sm:$0xff] }
 0x53d   : > { %v2088_v12 = vpop.f32.mrf.mxu0  ;;  %v2129_v16 = vpop.f32.mrf.mxu1 }
 0x53e   : > { %v2130_v59 = vadd.f32 %v2129_v16, %v2088_v12 }
 0x540   : > { %2333 = vmatmul.f32.gmra.mxu2 %v4457_v56 }
 0x541   : > { %2374 = vmatmul.f32.gmra.mxu3 %v4459_v57  ;;  %2415 = vmatmul.f32.gmra.mxu0 %v4457_v56 }
 0x542   : > { %2456 = vmatmul.f32.gmra.mxu1 %v4459_v57  ;;  %v2006_v17 = vpop.f32.mrf.mxu2  ;;  %v2047_v15 = vpop.f32.mrf.mxu3 }
 0x543   : > { %v2048_v7 = vadd.f32 %v2047_v15, %v2006_v17 }
 0x545   : > { %v2091_v45 = vpop.f32.mrf.mxu0  ;;  %v2132_v46 = vpop.f32.mrf.mxu1 }
 0x548   : > { %2336 = vmatmul.f32.gmra.mxu2 %v4465_v13 }
 0x549   : > { %2377 = vmatmul.f32.gmra.mxu3 %v4467_v14  ;;  %2418 = vmatmul.f32.gmra.mxu0 %v4465_v13 }
 0x54a   : > { %2459 = vmatmul.f32.gmra.mxu1 %v4467_v14  ;;  %v2009_v28 = vpop.f32.mrf.mxu2  ;;  %v2050_v36 = vpop.f32.mrf.mxu3 }
 0x54d   : > { %v2094_v49 = vpop.f32.mrf.mxu0  ;;  %v2135_v50 = vpop.f32.mrf.mxu1 }
 0x54e   : > { %v2136_v13 = vadd.f32 %v2135_v50, %v2094_v49 }
 0x550   : > { %2339 = vmatmul.f32.gmra.mxu2 %v4473_v26 }
 0x551   : > { %2380 = vmatmul.f32.gmra.mxu3 %v4475_v27  ;;  %2421 = vmatmul.f32.gmra.mxu0 %v4473_v26  ;;  %v2133_v26 = vadd.f32 %v2132_v46, %v2091_v45  ;;  %v4763_v45 = vld [vmem:[#allocation12 + $0x38] sm:$0xff] }
 0x552   : > { %2462 = vmatmul.f32.gmra.mxu1 %v4475_v27  ;;  %v2012_v56 = vpop.f32.mrf.mxu2  ;;  %v2053_v57 = vpop.f32.mrf.mxu3 }
 0x553   : > { %v2054_v0 = vadd.f32 %v2053_v57, %v2012_v56 }
 0x555   : > { %v2097_v51 = vpop.f32.mrf.mxu0  ;;  %v2138_v52 = vpop.f32.mrf.mxu1 }
 0x556   : > { %v2139_v55 = vadd.f32 %v2138_v52, %v2097_v51 }
 0x558   : > { %2342 = vmatmul.f32.gmra.mxu2 %v4481_v30  ;;  %2680 = vmatpush.msra.mxu1 %v2139_v55 }
 0x559   : > { %2383 = vmatmul.f32.gmra.mxu3 %v4483_v35  ;;  %2424 = vmatmul.f32.gmra.mxu0 %v4481_v30  ;;  %v2051_v30 = vadd.f32 %v2050_v36, %v2009_v28 }
 0x55a   : > { %2465 = vmatmul.f32.gmra.mxu1 %v4483_v35  ;;  %v2015_v14 = vpop.f32.mrf.mxu2  ;;  %v2056_v58 = vpop.f32.mrf.mxu3  ;;  %v2124_v35 = vadd.f32 %v4633_v53, %v4631_v63 }
 0x55b   : > { %2681 = vmatpush.msra.mxu1 %v2136_v13  ;;  %v2057_v27 = vadd.f32 %v2056_v58, %v2015_v14 }
 0x55d   : > { %2682 = vmatpush.msra.mxu1 %v2133_v26  ;;  %v4664_v3 = vpop.f32.mrf.mxu0  ;;  %v4666_v4 = vpop.f32.mrf.mxu1  ;;  %2639 = vmatpush.msra.mxu0 %v2057_v27 }
 0x55f   : > { %2683 = vmatpush.msra.mxu1 %v2130_v59  ;;  %2640 = vmatpush.msra.mxu0 %v2054_v0 }
 0x560   : > { %3484 = vmatmul.msk.f32.vlgmr.msra.gmra.mxu2 %vm1046_vm0, %v4668_v5 }
 0x561   : > { %3492 = vmatmul.msk.f32.vlgmr.msra.gmra.mxu3 %vm1046_vm0, %v4668_v5  ;;  %2684 = vmatpush.msra.mxu1 %v2127_v6 }
 0x562   : > { %2641 = vmatpush.msra.mxu0 %v2051_v30  ;;  %v4676_v8 = vpop.f32.mrf.mxu2  ;;  %v4678_v9 = vpop.f32.mrf.mxu3 }
 0x563   : > { %2685 = vmatpush.msra.mxu1 %v2124_v35  ;;  %v2282_v35 = vadd.f32 %v4666_v4, %v4664_v3 }
 0x564   : > { %2642 = vmatpush.msra.mxu0 %v2048_v7 }
 0x565   : > { %2686 = vmatpush.msra.mxu1 %v2121_v10  ;;  %v4684_v22 = vpop.f32.mrf.mxu0  ;;  %v4686_v23 = vpop.f32.mrf.mxu1 }
 0x566   : > { %2643 = vmatpush.msra.mxu0 %v2045_v20  ;;  %v2285_v6 = vadd.f32 %v4686_v23, %v4684_v22 }
 0x567   : > { %2687 = vmatpush.msra.mxu1 %v2118_v21  ;;  %v2200_v21 = vadd.f32 %v4678_v9, %v4676_v8 }
 0x568   : > { %3508 = vmatmul.msk.f32.vlgmr.msra.gmra.mxu1 %vm1046_vm0, %v4668_v5  ;;  %3485 = vmatmul.msk.f32.gmra.mxu2 %vm1046_vm0, %v4688_v29 }
 0x569   : > { %3493 = vmatmul.msk.f32.gmra.mxu3 %vm1046_vm0, %v4688_v29  ;;  %2644 = vmatpush.msra.mxu0 %v2042_v37 }
 0x56a   : > { %v4700_v31 = vpop.f32.mrf.mxu2  ;;  %v4702_v38 = vpop.f32.mrf.mxu3 }
 0x56b   : > { %2645 = vmatpush.msra.mxu0 %v2039_v32  ;;  %v2203_v10 = vadd.f32 %v4702_v38, %v4700_v31 }
 0x56d   : > { %2646 = vmatpush.msra.mxu0 %v4607_v48  ;;  %v4705_v39 = vpop.f32.mrf.mxu0  ;;  %v4707_v24 = vpop.f32.mrf.mxu1 }
 0x56e   : > { %3500 = vmatmul.msk.f32.vlgmr.msra.gmra.mxu0 %vm1046_vm0, %v4668_v5  ;;  %v2288_v26 = vadd.f32 %v4707_v24, %v4705_v39 }
 0x570   : > { %3509 = vmatmul.msk.f32.gmra.mxu1 %vm1046_vm0, %v4688_v29  ;;  %3486 = vmatmul.msk.f32.gmra.mxu2 %vm1046_vm0, %v4709_v25 }
 0x571   : > { %3494 = vmatmul.msk.f32.gmra.mxu3 %vm1046_vm0, %v4709_v25 }
 0x572   : > { %v4719_v40 = vpop.f32.mrf.mxu2  ;;  %v4721_v47 = vpop.f32.mrf.mxu3 }
 0x573   : > { %v2206_v30 = vadd.f32 %v4721_v47, %v4719_v40 }
 0x575   : > { %v2249_v48 = vpop.f32.mrf.mxu0  ;;  %v2290_v1 = vpop.f32.mrf.mxu1 }
 0x576   : > { %3501 = vmatmul.msk.f32.gmra.mxu0 %vm1046_vm0, %v4688_v29  ;;  %v2291_v14 = vadd.f32 %v2290_v1, %v2249_v48 }
 0x578   : > { %3510 = vmatmul.msk.f32.gmra.mxu1 %vm1046_vm0, %v4709_v25  ;;  %3487 = vmatmul.msk.f32.gmra.mxu2 %vm1046_vm0, %v4723_v42 }
 0x579   : > { %3495 = vmatmul.msk.f32.gmra.mxu3 %vm1046_vm0, %v4723_v42 }
 0x57a   : > { %v2167_v43 = vpop.f32.mrf.mxu2  ;;  %v2208_v41 = vpop.f32.mrf.mxu3 }
 0x57b   : > { %v2209_v59 = vadd.f32 %v2208_v41, %v2167_v43 }
 0x57d   : > { %v2252_v44 = vpop.f32.mrf.mxu0  ;;  %v2293_v2 = vpop.f32.mrf.mxu1 }
 0x57e   : > { %3502 = vmatmul.msk.f32.gmra.mxu0 %vm1046_vm0, %v4709_v25  ;;  %v2294_v52 = vadd.f32 %v2293_v2, %v2252_v44 }
 0x580   : > { %3511 = vmatmul.msk.f32.gmra.mxu1 %vm1046_vm0, %v4723_v42  ;;  %3488 = vmatmul.msk.f32.gmra.mxu2 %vm1046_vm0, %v4733_v18 }
 0x581   : > { %3496 = vmatmul.msk.f32.gmra.mxu3 %vm1046_vm0, %v4733_v18 }
 0x582   : > { %v2170_v19 = vpop.f32.mrf.mxu2  ;;  %v2211_v62 = vpop.f32.mrf.mxu3 }
 0x583   : > { %v2212_v58 = vadd.f32 %v2211_v62, %v2170_v19 }
 0x585   : > { %v2255_v63 = vpop.f32.mrf.mxu0  ;;  %v2296_v53 = vpop.f32.mrf.mxu1 }
 0x586   : > { %3503 = vmatmul.msk.f32.gmra.mxu0 %vm1046_vm0, %v4723_v42  ;;  %v2297_v56 = vadd.f32 %v2296_v53, %v2255_v63 }
 0x588   : > { %3512 = vmatmul.msk.f32.gmra.mxu1 %vm1046_vm0, %v4733_v18  ;;  %3489 = vmatmul.msk.f32.gmra.mxu2 %vm1046_vm0, %v4743_v60 }
 0x589   : > { %3497 = vmatmul.msk.f32.gmra.mxu3 %vm1046_vm0, %v4743_v60 }
 0x58a   : > { %v2173_v61 = vpop.f32.mrf.mxu2  ;;  %v2214_v33 = vpop.f32.mrf.mxu3 }
 0x58b   : > { %v2215_v13 = vadd.f32 %v2214_v33, %v2173_v61 }
 0x58d   : > { %v2258_v34 = vpop.f32.mrf.mxu0  ;;  %v2299_v11 = vpop.f32.mrf.mxu1 }
 0x58e   : > { %3504 = vmatmul.msk.f32.gmra.mxu0 %vm1046_vm0, %v4733_v18  ;;  %v2300_v28 = vadd.f32 %v2299_v11, %v2258_v34 }
 0x590   : > { %3513 = vmatmul.msk.f32.gmra.mxu1 %vm1046_vm0, %v4743_v60  ;;  %3490 = vmatmul.msk.f32.gmra.mxu2 %vm1046_vm0, %v4753_v54 }
 0x591   : > { %3498 = vmatmul.msk.f32.gmra.mxu3 %vm1046_vm0, %v4753_v54 }
 0x592   : > { %v2176_v12 = vpop.f32.mrf.mxu2  ;;  %v2217_v16 = vpop.f32.mrf.mxu3 }
 0x593   : > { %v2218_v57 = vadd.f32 %v2217_v16, %v2176_v12 }
 0x595   : > { %v2261_v17 = vpop.f32.mrf.mxu0  ;;  %v2302_v15 = vpop.f32.mrf.mxu1 }
 0x596   : > { %v2303_v46 = vadd.f32 %v2302_v15, %v2261_v17  ;;  %3505 = vmatmul.msk.f32.gmra.mxu0 %vm1046_vm0, %v4743_v60 }
 0x598   : > { %3514 = vmatmul.msk.f32.gmra.mxu1 %vm1046_vm0, %v4753_v54  ;;  %3491 = vmatmul.msk.f32.gmra.mxu2 %vm1046_vm0, %v4763_v45 }
 0x599   : > { %3499 = vmatmul.msk.f32.gmra.mxu3 %vm1046_vm0, %v4763_v45 }
 0x59a   : > { %2762 = vmatpush.msrb.mxu3 %v2303_v46  ;;  %v2179_v36 = vpop.f32.mrf.mxu2  ;;  %v2220_v49 = vpop.f32.mrf.mxu3 }
 0x59b   : > { %v2221_v50 = vadd.f32 %v2220_v49, %v2179_v36 }
 0x59c   : > { %2763 = vmatpush.msrb.mxu3 %v2300_v28 }
 0x59d   : > { %v4773_v51 = vpop.f32.mrf.mxu0  ;;  %2721 = vmatpush.msrb.mxu2 %v2221_v50 }
 0x59e   : > { %2764 = vmatpush.msrb.mxu3 %v2297_v56  ;;  %v4775_v55 = vpop.f32.mrf.mxu1  ;;  %3506 = vmatmul.msk.f32.gmra.mxu0 %vm1046_vm0, %v4753_v54 }
 0x59f   : > { %2722 = vmatpush.msrb.mxu2 %v2218_v57 }
 0x5a0   : > { %2765 = vmatpush.msrb.mxu3 %v2294_v52  ;;  %3515 = vmatmul.msk.f32.gmra.mxu1 %vm1046_vm0, %v4763_v45 }
 0x5a1   : > { %2723 = vmatpush.msrb.mxu2 %v2215_v13 }
 0x5a2   : > { %2766 = vmatpush.msrb.mxu3 %v2291_v14  ;;  %v4783_v27 = vpop.f32.mrf.mxu2  ;;  %v2446_v14 = vadd.f32 %v4775_v55, %v4773_v51 }
 0x5a3   : > { %v4785_v0 = vpop.f32.mrf.mxu3  ;;  %2724 = vmatpush.msrb.mxu2 %v2212_v58 }
 0x5a4   : > { %2767 = vmatpush.msrb.mxu3 %v2288_v26 }
 0x5a5   : > { %2725 = vmatpush.msrb.mxu2 %v2209_v59  ;;  %v2364_v59 = vadd.f32 %v4785_v0, %v4783_v27 }
 0x5a6   : > { %2768 = vmatpush.msrb.mxu3 %v2285_v6  ;;  %v4793_v7 = vpop.f32.mrf.mxu0  ;;  %3507 = vmatmul.msk.f32.gmra.mxu0 %vm1046_vm0, %v4763_v45 }
 0x5a7   : > { %v4799_v20 = vpop.f32.mrf.mxu1  ;;  %2726 = vmatpush.msrb.mxu2 %v2206_v30 }
 0x5a8   : > { %2769 = vmatpush.msrb.mxu3 %v2282_v35  ;;  %v2449_v56 = vadd.f32 %v4799_v20, %v4793_v7 }
 0x5a9   : > { %3524 = vmatmul.msk.f32.vlgmr.msrb.gmra.mxu3 %vm1046_vm0, %v4668_v5  ;;  %2727 = vmatpush.msrb.mxu2 %v2203_v10 }
 0x5ab   : > { %v4805_v3 = vpop.f32.mrf.mxu2  ;;  %2728 = vmatpush.msrb.mxu2 %v2200_v21 }
 0x5ac   : > { %v4807_v4 = vpop.f32.mrf.mxu3  ;;  %3516 = vmatmul.msk.f32.vlgmr.msrb.gmra.mxu2 %vm1046_vm0, %v4668_v5 }
 0x5ad   : > { %v2367_v26 = vadd.f32 %v4807_v4, %v4805_v3 }
 0x5ae   : > { %v2410_v22 = vpop.f32.mrf.mxu0 }
 0x5af   : > { %v2451_v23 = vpop.f32.mrf.mxu1 }
 0x5b0   : > { %v2452_v36 = vadd.f32 %v2451_v23, %v2410_v22 }
 0x5b1   : > { %3525 = vmatmul.msk.f32.gmra.mxu3 %vm1046_vm0, %v4688_v29 }
 0x5b3   : > { %v2328_v37 = vpop.f32.mrf.mxu2 }
 0x5b4   : > { %v2369_v32 = vpop.f32.mrf.mxu3  ;;  %3517 = vmatmul.msk.f32.gmra.mxu2 %vm1046_vm0, %v4688_v29 }
 0x5b5   : > { %v2370_v58 = vadd.f32 %v2369_v32, %v2328_v37 }
 0x5b6   : > { %v2413_v8 = vpop.f32.mrf.mxu0 }
 0x5b7   : > { %v2454_v9 = vpop.f32.mrf.mxu1 }
 0x5b8   : > { %v2455_v46 = vadd.f32 %v2454_v9, %v2413_v8 }
 0x5b9   : > { %3526 = vmatmul.msk.f32.gmra.mxu3 %vm1046_vm0, %v4709_v25 }
 0x5bb   : > { %v2331_v31 = vpop.f32.mrf.mxu2 }
 0x5bc   : > { %v2372_v38 = vpop.f32.mrf.mxu3  ;;  %3518 = vmatmul.msk.f32.gmra.mxu2 %vm1046_vm0, %v4709_v25 }
 0x5bd   : > { %v2373_v52 = vadd.f32 %v2372_v38, %v2331_v31  ;;  %v4899_v38 = vpop.permute.xlu1 %2517 }
 0x5be   : > { %v2416_v39 = vpop.f32.mrf.mxu0 }
 0x5bf   : > { %v2457_v24 = vpop.f32.mrf.mxu1 }
 0x5c0   : > { %v2458_v17 = vadd.f32 %v2457_v24, %v2416_v39  ;;  %v4905_v24 = vpop.permute.xlu2 %2512 }
 0x5c1   : > { %3527 = vmatmul.msk.f32.gmra.mxu3 %vm1046_vm0, %v4723_v42 }
 0x5c3   : > { %v2334_v40 = vpop.f32.mrf.mxu2 }
 0x5c4   : > { %v2375_v47 = vpop.f32.mrf.mxu3  ;;  %3519 = vmatmul.msk.f32.gmra.mxu2 %vm1046_vm0, %v4723_v42 }
 0x5c5   : > { %v2376_v49 = vadd.f32 %v2375_v47, %v2334_v40 }
 0x5c6   : > { %v2419_v48 = vpop.f32.mrf.mxu0 }
 0x5c7   : > { %v2460_v1 = vpop.f32.mrf.mxu1 }
 0x5c8   : > { %v2461_v11 = vadd.f32 %v2460_v1, %v2419_v48 }
 0x5c9   : > { %3528 = vmatmul.msk.f32.gmra.mxu3 %vm1046_vm0, %v4733_v18 }
 0x5cb   : > { %v2337_v43 = vpop.f32.mrf.mxu2 }
 0x5cc   : > { %v2378_v41 = vpop.f32.mrf.mxu3  ;;  %3520 = vmatmul.msk.f32.gmra.mxu2 %vm1046_vm0, %v4733_v18 }
 0x5cd   : > { %v2379_v28 = vadd.f32 %v2378_v41, %v2337_v43 }
 0x5ce   : > { %v2422_v44 = vpop.f32.mrf.mxu0 }
 0x5cf   : > { %v2463_v2 = vpop.f32.mrf.mxu1 }
 0x5d0   : > { %v2464_v33 = vadd.f32 %v2463_v2, %v2422_v44 }
 0x5d1   : > { %3529 = vmatmul.msk.f32.gmra.mxu3 %vm1046_vm0, %v4743_v60 }
 0x5d3   : > { %v2340_v19 = vpop.f32.mrf.mxu2 }
 0x5d4   : > { %v2381_v62 = vpop.f32.mrf.mxu3  ;;  %3521 = vmatmul.msk.f32.gmra.mxu2 %vm1046_vm0, %v4743_v60 }
 0x5d5   : > { %v2382_v15 = vadd.f32 %v2381_v62, %v2340_v19 }
 0x5d6   : > { %v2425_v63 = vpop.f32.mrf.mxu0 }
 0x5d7   : > { %v2466_v53 = vpop.f32.mrf.mxu1 }
 0x5d8   : > { %v2467_v61 = vadd.f32 %v2466_v53, %v2425_v63 }
 0x5d9   : > { %3530 = vmatmul.msk.f32.gmra.mxu3 %vm1046_vm0, %v4753_v54 }
 0x5da   : > { %2844 = vmatpush.msrb.mxu1 %v2467_v61 }
 0x5db   : > { %v2343_v34 = vpop.f32.mrf.mxu2 }
 0x5dc   : > { %2845 = vmatpush.msrb.mxu1 %v2464_v33  ;;  %v2384_v12 = vpop.f32.mrf.mxu3  ;;  %3522 = vmatmul.msk.f32.gmra.mxu2 %vm1046_vm0, %v4753_v54 }
 0x5dd   : > { %v2385_v16 = vadd.f32 %v2384_v12, %v2343_v34 }
 0x5de   : > { %2846 = vmatpush.msrb.mxu1 %v2461_v11 }
 0x5df   : > { %2803 = vmatpush.msrb.mxu0 %v2385_v16 }
 0x5e0   : > { %2847 = vmatpush.msrb.mxu1 %v2458_v17 }
 0x5e1   : > { %3531 = vmatmul.msk.f32.gmra.mxu3 %vm1046_vm0, %v4763_v45  ;;  %2804 = vmatpush.msrb.mxu0 %v2382_v15 }
 0x5e2   : > { %2848 = vmatpush.msrb.mxu1 %v2455_v46 }
 0x5e3   : > { %2805 = vmatpush.msrb.mxu0 %v2379_v28  ;;  %v4837_v50 = vpop.f32.mrf.mxu2 }
 0x5e4   : > { %2849 = vmatpush.msrb.mxu1 %v2452_v36  ;;  %v4841_v57 = vpop.f32.mrf.mxu3  ;;  %3523 = vmatmul.msk.f32.gmra.mxu2 %vm1046_vm0, %v4763_v45 }
 0x5e5   : > { %v4845_v13 = vpop.f32.mrf.mxu1  ;;  %2806 = vmatpush.msrb.mxu0 %v2376_v49 }
 0x5e6   : > { %2850 = vmatpush.msrb.mxu1 %v2449_v56 }
 0x5e7   : > { %2807 = vmatpush.msrb.mxu0 %v2373_v52 }
 0x5e8   : > { %2851 = vmatpush.msrb.mxu1 %v2446_v14  ;;  %v4929_v14 = vpop.permute.xlu2 %2497 }
 0x5e9   : > { %3540 = vmatmul.msk.f32.vlgmr.msrb.gmra.mxu1 %vm1046_vm0, %v4668_v5  ;;  %2808 = vmatpush.msrb.mxu0 %v2370_v58 }
 0x5eb   : > { %v4855_v6 = vpop.f32.mrf.mxu0  ;;  %2809 = vmatpush.msrb.mxu0 %v2367_v26  ;;  %v4857_v30 = vpop.f32.mrf.mxu2 }
 0x5ec   : > { %v4859_v51 = vpop.f32.mrf.mxu3 }
 0x5ed   : > { %v4861_v55 = vpop.f32.mrf.mxu1  ;;  %2810 = vmatpush.msrb.mxu0 %v2364_v59 }
 0x5ee   : > { %3532 = vmatmul.msk.f32.vlgmr.msrb.gmra.mxu0 %vm1046_vm0, %v4668_v5 }
 0x5f1   : > { %3541 = vmatmul.msk.f32.gmra.mxu1 %vm1046_vm0, %v4688_v29 }
 0x5f3   : > { %v4867_v35 = vpop.f32.mrf.mxu0  ;;  %v4869_v7 = vpop.f32.mrf.mxu2 }
 0x5f4   : > { %v4871_v27 = vpop.f32.mrf.mxu3 }
 0x5f5   : > { %v4873_v0 = vpop.f32.mrf.mxu1 }
 0x5f6   : > { %3533 = vmatmul.msk.f32.gmra.mxu0 %vm1046_vm0, %v4688_v29 }
 0x5f9   : > { %3542 = vmatmul.msk.f32.gmra.mxu1 %vm1046_vm0, %v4709_v25 }
 0x5fb   : > { %v4879_v10 = vpop.f32.mrf.mxu0  ;;  %v2575_v5 = vpop.f32.mrf.mxu2 }
 0x5fc   : > { %v2616_v20 = vpop.f32.mrf.mxu3 }
 0x5fd   : > { %v2698_v21 = vpop.f32.mrf.mxu1 }
 0x5fe   : > { %3534 = vmatmul.msk.f32.gmra.mxu0 %vm1046_vm0, %v4709_v25  ;;  %v4897_v25 = vpop.permute.xlu0 %2522 }
 0x601   : > { %3543 = vmatmul.msk.f32.gmra.mxu1 %vm1046_vm0, %v4723_v42 }
 0x603   : > { %v4885_v3 = vpop.f32.mrf.mxu0  ;;  %v2578_v4 = vpop.f32.mrf.mxu2 }
 0x604   : > { %v2619_v22 = vpop.f32.mrf.mxu3 }
 0x605   : > { %v2701_v23 = vpop.f32.mrf.mxu1 }
 0x606   : > { %3535 = vmatmul.msk.f32.gmra.mxu0 %vm1046_vm0, %v4723_v42  ;;  %v4907_v47 = vpop.permute.xlu0 %2507 }
 0x607   : > { %v2579_v16 = vadd.f32 %v2578_v4, %v4907_v47  ;;  %v2620_v17 = vadd.f32 %v2619_v22, %v4907_v47  ;;  %v2702_v46 = vadd.f32 %v2701_v23, %v4907_v47  ;;  %v2573_v22 = vadd.f32 %v4869_v7, %v4929_v14 }
 0x609   : > { %3544 = vmatmul.msk.f32.gmra.mxu1 %vm1046_vm0, %v4733_v18  ;;  %v2910_v23 = vmax.f32 %v2620_v17, 0.0  ;;  %v4981_v17 = vld [vmem:[#allocation13 + $0x8] sm:$0xff] }
 0x60b   : > { %v4891_v29 = vpop.f32.mrf.mxu0  ;;  %v2581_v37 = vpop.f32.mrf.mxu2 }
 0x60c   : > { %v2622_v32 = vpop.f32.mrf.mxu3  ;;  %v2582_v19 = vadd.f32 %v2581_v37, %v4905_v24 }
 0x60d   : > { %v2704_v8 = vpop.f32.mrf.mxu1  ;;  %v2623_v61 = vadd.f32 %v2622_v32, %v4905_v24  ;;  %v2912_v32 = vmax.f32 %v2702_v46, 0.0  ;;  %v4993_v46 = vld [vmem:[#allocation13 + $0x10] sm:$0xff] }
 0x60e   : > { %3536 = vmatmul.msk.f32.gmra.mxu0 %vm1046_vm0, %v4733_v18  ;;  %v2705_v34 = vadd.f32 %v2704_v8, %v4905_v24  ;;  %v4938_v37 = vpop.permute.xlu0 %2492 }
 0x60f   : > { %v2918_v56 = vmax.f32 %v2623_v61, 0.0  ;;  %v2570_v7 = vadd.f32 %v4857_v30, %v4938_v37  ;;  %v2652_v61 = vadd.f32 %v4867_v35, %v4938_v37 }
 0x610   : > { %v2920_v26 = vmax.f32 %v2705_v34, 0.0 }
 0x611   : > { %3545 = vmatmul.msk.f32.gmra.mxu1 %vm1046_vm0, %v4743_v60  ;;  %v2887_v35 = vmax.f32 %v2652_v61, 0.0 }
 0x613   : > { %v2663_v9 = vpop.f32.mrf.mxu0  ;;  %v2584_v31 = vpop.f32.mrf.mxu2 }
 0x614   : > { %v2625_v42 = vpop.f32.mrf.mxu3  ;;  %v2585_v48 = vadd.f32 %v2584_v31, %v4899_v38  ;;  %v2664_v8 = vadd.f32 %v2663_v9, %v4905_v24 }
 0x615   : > { %v2707_v39 = vpop.f32.mrf.mxu1  ;;  %v2626_v41 = vadd.f32 %v2625_v42, %v4899_v38 }
 0x616   : > { %3537 = vmatmul.msk.f32.gmra.mxu0 %vm1046_vm0, %v4743_v60  ;;  %v4913_v60 = vpop.permute.xlu1 %2502  ;;  %v2708_v62 = vadd.f32 %v2707_v39, %v4899_v38  ;;  %v2925_v11 = vmax.f32 %v2585_v48, 0.0  ;;  %v2893_v48 = vmax.f32 %v2573_v22, 0.0 }
 0x617   : > { %v2926_v15 = vmax.f32 %v2626_v41, 0.0  ;;  %v2576_v36 = vadd.f32 %v2575_v5, %v4913_v60  ;;  %v2617_v49 = vadd.f32 %v2616_v20, %v4913_v60  ;;  %v2699_v58 = vadd.f32 %v2698_v21, %v4913_v60 }
 0x618   : > { %v2928_v28 = vmax.f32 %v2708_v62, 0.0  ;;  %v2614_v5 = vadd.f32 %v4871_v27, %v4929_v14  ;;  %v2909_v20 = vmax.f32 %v2579_v16, 0.0  ;;  %v2696_v21 = vadd.f32 %v4873_v0, %v4929_v14 }
 0x619   : > { %3546 = vmatmul.msk.f32.gmra.mxu1 %vm1046_vm0, %v4753_v54  ;;  %v2611_v27 = vadd.f32 %v4859_v51, %v4938_v37  ;;  %v2901_v42 = vmax.f32 %v2576_v36, 0.0  ;;  %v2902_v39 = vmax.f32 %v2617_v49, 0.0  ;;  %v2693_v0 = vadd.f32 %v4861_v55, %v4938_v37  ;;  %v5003_v36 = vld [vmem:[#allocation13 + $0x18] sm:$0xff] }
 0x61a   : > { %v2904_v9 = vmax.f32 %v2699_v58, 0.0  ;;  %v2919_v41 = vmax.f32 %v2664_v8, 0.0 }
 0x61b   : > { %v2666_v18 = vpop.f32.mrf.mxu0  ;;  %v2587_v40 = vpop.f32.mrf.mxu2 }
 0x61c   : > { %v2588_v1 = vadd.f32 %v2587_v40, %v4897_v25  ;;  %v2628_v43 = vpop.f32.mrf.mxu3  ;;  %v2667_v59 = vadd.f32 %v2666_v18, %v4899_v38 }
 0x61d   : > { %v2629_v44 = vadd.f32 %v2628_v43, %v4897_v25  ;;  %v2710_v2 = vpop.f32.mrf.mxu1  ;;  %v2896_v43 = vmax.f32 %v2696_v21, 0.0 }
 0x61e   : > { %v2933_v63 = vmax.f32 %v2588_v1, 0.0  ;;  %v2711_v53 = vadd.f32 %v2710_v2, %v4897_v25  ;;  %3538 = vmatmul.msk.f32.gmra.mxu0 %vm1046_vm0, %v4753_v54  ;;  %v2917_v54 = vmax.f32 %v2582_v19, 0.0  ;;  %v4949_v18 = vpop.permute.xlu1 %2487  ;;  %v2927_v40 = vmax.f32 %v2667_v59, 0.0 }
 0x61f   : > { %v2934_v33 = vmax.f32 %v2629_v44, 0.0  ;;  %v2567_v30 = vadd.f32 %v4837_v50, %v4949_v18  ;;  %v2608_v51 = vadd.f32 %v4841_v57, %v4949_v18  ;;  %v2894_v1 = vmax.f32 %v2614_v5, 0.0 }
 0x620   : > { %v2936_v12 = vmax.f32 %v2711_v53, 0.0  ;;  %2989 = vmatpush.msra.mxu2 %v2933_v63  ;;  %v2690_v55 = vadd.f32 %v4845_v13, %v4949_v18  ;;  %v2886_v44 = vmax.f32 %v2611_v27, 0.0  ;;  %v2658_v2 = vadd.f32 %v4885_v3, %v4913_v60  ;;  %v4967_v13 = vld [vmem:[#allocation13] sm:$0xff] }
 0x621   : > { %3547 = vmatmul.msk.f32.gmra.mxu1 %vm1046_vm0, %v4763_v45  ;;  %3018 = vmatpush.msra.mxu3 %v2934_v33  ;;  %v2888_v50 = vmax.f32 %v2693_v0, 0.0  ;;  %v2877_v62 = vmax.f32 %v2567_v30, 0.0  ;;  %v2878_v63 = vmax.f32 %v2608_v51, 0.0  ;;  %v2655_v53 = vadd.f32 %v4879_v10, %v4929_v14 }
 0x622   : > { %3076 = vmatpush.msra.mxu1 %v2936_v12  ;;  %2990 = vmatpush.msra.mxu2 %v2925_v11  ;;  %v2880_v3 = vmax.f32 %v2690_v55, 0.0  ;;  %v2903_v33 = vmax.f32 %v2658_v2, 0.0  ;;  %v2649_v10 = vadd.f32 %v4855_v6, %v4949_v18 }
 0x623   : > { %v2669_v52 = vpop.f32.mrf.mxu0  ;;  %3019 = vmatpush.msra.mxu3 %v2926_v15  ;;  %v2895_v11 = vmax.f32 %v2655_v53, 0.0 }
 0x624   : > { %v2670_v4 = vadd.f32 %v2669_v52, %v4897_v25  ;;  %3077 = vmatpush.msra.mxu1 %v2928_v28  ;;  %2991 = vmatpush.msra.mxu2 %v2917_v54  ;;  %v2879_v16 = vmax.f32 %v2649_v10, 0.0 }
 0x625   : > { %3020 = vmatpush.msra.mxu3 %v2918_v56 }
 0x626   : > { %v2935_v31 = vmax.f32 %v2670_v4, 0.0  ;;  %3539 = vmatmul.msk.f32.gmra.mxu0 %vm1046_vm0, %v4763_v45  ;;  %3078 = vmatpush.msra.mxu1 %v2920_v26  ;;  %v2661_v45 = vadd.f32 %v4891_v29, %v4907_v47  ;;  %v2885_v29 = vmax.f32 %v2570_v7, 0.0 }
 0x627   : > { %2992 = vmatpush.msra.mxu2 %v2909_v20  ;;  %3021 = vmatpush.msra.mxu3 %v2910_v23 }
 0x628   : > { %3047 = vmatpush.msra.mxu0 %v2935_v31  ;;  %3079 = vmatpush.msra.mxu1 %v2912_v32  ;;  %v2911_v57 = vmax.f32 %v2661_v45, 0.0 }
 0x629   : > { %2993 = vmatpush.msra.mxu2 %v2901_v42  ;;  %3022 = vmatpush.msra.mxu3 %v2902_v39 }
 0x62a   : > { %3048 = vmatpush.msra.mxu0 %v2927_v40  ;;  %3080 = vmatpush.msra.mxu1 %v2904_v9 }
 0x62b   : > { %2994 = vmatpush.msra.mxu2 %v2893_v48  ;;  %3023 = vmatpush.msra.mxu3 %v2894_v1 }
 0x62c   : > { %v4963_v19 = vpop.f32.mrf.mxu3  ;;  %3049 = vmatpush.msra.mxu0 %v2919_v41  ;;  %3081 = vmatpush.msra.mxu1 %v2896_v43 }
 0x62d   : > { %2995 = vmatpush.msra.mxu2 %v2885_v29  ;;  %3024 = vmatpush.msra.mxu3 %v2886_v44 }
 0x62e   : > { %3050 = vmatpush.msra.mxu0 %v2911_v57  ;;  %3082 = vmatpush.msra.mxu1 %v2888_v50  ;;  %v2772_v57 = vadd.f32 %v4963_v19, %v4949_v18 }
 0x62f   : > { %2996 = vmatpush.msra.mxu2 %v2877_v62  ;;  %3025 = vmatpush.msra.mxu3 %v2878_v63  ;;  %v4971_v34 = vpop.f32.mrf.mxu2 }
 0x630   : > { %3548 = vmatmul.msk.f32.vlgmr.msra.gmra.mxu2 %vm1046_vm0, %v4967_v13  ;;  %3552 = vmatmul.msk.f32.vlgmr.msra.gmra.mxu3 %vm1046_vm0, %v4967_v13 }
 0x631   : > { %3051 = vmatpush.msra.mxu0 %v2903_v33  ;;  %3083 = vmatpush.msra.mxu1 %v2880_v3  ;;  %v2731_v33 = vadd.f32 %v4971_v34, %v4949_v18 }
 0x632   : > { %3560 = vmatmul.msk.f32.vlgmr.msra.gmra.mxu1 %vm1046_vm0, %v4967_v13 }
 0x633   : > { %3052 = vmatpush.msra.mxu0 %v2895_v11  ;;  %v2882_v11 = vmax.f32 %v2772_v57, 0.0 }
 0x634   : > { %v2774_v12 = vpop.f32.mrf.mxu3 }
 0x635   : > { %3053 = vmatpush.msra.mxu0 %v2887_v35  ;;  %v2775_v29 = vadd.f32 %v2774_v12, %v4938_v37  ;;  %v2881_v12 = vmax.f32 %v2731_v33, 0.0 }
 0x637   : > { %3054 = vmatpush.msra.mxu0 %v2879_v16  ;;  %v4983_v15 = vpop.f32.mrf.mxu2  ;;  %v2890_v3 = vmax.f32 %v2775_v29, 0.0 }
 0x638   : > { %3556 = vmatmul.msk.f32.vlgmr.msra.gmra.mxu0 %vm1046_vm0, %v4967_v13  ;;  %3549 = vmatmul.msk.f32.gmra.mxu2 %vm1046_vm0, %v4981_v17  ;;  %v2734_v63 = vadd.f32 %v4983_v15, %v4938_v37 }
 0x639   : > { %3553 = vmatmul.msk.f32.gmra.mxu3 %vm1046_vm0, %v4981_v17 }
 0x63a   : > { %3561 = vmatmul.msk.f32.gmra.mxu1 %vm1046_vm0, %v4981_v17  ;;  %v2889_v35 = vmax.f32 %v2734_v63, 0.0 }
 0x63c   : > { %v2777_v6 = vpop.f32.mrf.mxu3 }
 0x63d   : > { %v2778_v48 = vadd.f32 %v2777_v6, %v4929_v14 }
 0x63f   : > { %v2736_v54 = vpop.f32.mrf.mxu2  ;;  %v2898_v62 = vmax.f32 %v2778_v48, 0.0 }
 0x640   : > { %3557 = vmatmul.msk.f32.gmra.mxu0 %vm1046_vm0, %v4981_v17  ;;  %3550 = vmatmul.msk.f32.gmra.mxu2 %vm1046_vm0, %v4993_v46  ;;  %v2737_v2 = vadd.f32 %v2736_v54, %v4929_v14 }
 0x641   : > { %3554 = vmatmul.msk.f32.gmra.mxu3 %vm1046_vm0, %v4993_v46 }
 0x642   : > { %3562 = vmatmul.msk.f32.gmra.mxu1 %vm1046_vm0, %v4993_v46  ;;  %v2897_v10 = vmax.f32 %v2737_v2, 0.0 }
 0x644   : > { %v2780_v28 = vpop.f32.mrf.mxu3 }
 0x645   : > { %v2781_v9 = vadd.f32 %v2780_v28, %v4913_v60 }
 0x647   : > { %v2739_v49 = vpop.f32.mrf.mxu2  ;;  %v2906_v44 = vmax.f32 %v2781_v9, 0.0 }
 0x648   : > { %3558 = vmatmul.msk.f32.gmra.mxu0 %vm1046_vm0, %v4993_v46  ;;  %3551 = vmatmul.msk.f32.gmra.mxu2 %vm1046_vm0, %v5003_v36  ;;  %v2740_v43 = vadd.f32 %v2739_v49, %v4913_v60 }
 0x649   : > { %3555 = vmatmul.msk.f32.gmra.mxu3 %vm1046_vm0, %v5003_v36 }
 0x64a   : > { %3563 = vmatmul.msk.f32.gmra.mxu1 %vm1046_vm0, %v5003_v36  ;;  %v2905_v53 = vmax.f32 %v2740_v43, 0.0 }
 0x64c   : > { %v2783_v56 = vpop.f32.mrf.mxu3 }
 0x64d   : > { %v2784_v27 = vadd.f32 %v2783_v56, %v4907_v47 }
 0x64f   : > { %v2742_v52 = vpop.f32.mrf.mxu2  ;;  %v2914_v1 = vmax.f32 %v2784_v27, 0.0 }
 0x650   : > { %3559 = vmatmul.msk.f32.gmra.mxu0 %vm1046_vm0, %v5003_v36  ;;  %v2743_v30 = vadd.f32 %v2742_v52, %v4907_v47 }
 0x652   : > { %v2913_v50 = vmax.f32 %v2743_v30, 0.0 }
 0x654   : > { %v2786_v58 = vpop.f32.mrf.mxu3 }
 0x655   : > { %v2787_v21 = vadd.f32 %v2786_v58, %v4905_v24 }
 0x657   : > { %v2745_v26 = vpop.f32.mrf.mxu2  ;;  %v2922_v45 = vmax.f32 %v2787_v21, 0.0 }
 0x658   : > { %v2746_v39 = vadd.f32 %v2745_v26, %v4905_v24 }
 0x65a   : > { %v2921_v41 = vmax.f32 %v2746_v39, 0.0 }
 0x65c   : > { %v2789_v59 = vpop.f32.mrf.mxu3 }
 0x65d   : > { %v2790_v5 = vadd.f32 %v2789_v59, %v4899_v38 }
 0x65f   : > { %v2748_v4 = vpop.f32.mrf.mxu2  ;;  %v2930_v42 = vmax.f32 %v2790_v5, 0.0 }
 0x660   : > { %v2749_v31 = vadd.f32 %v2748_v4, %v4899_v38 }
 0x662   : > { %v2929_v51 = vmax.f32 %v2749_v31, 0.0 }
 0x664   : > { %v2792_v22 = vpop.f32.mrf.mxu3 }
 0x665   : > { %v2793_v20 = vadd.f32 %v2792_v22, %v4897_v25 }
 0x666   : > { %v5017_v23 = vpop.f32.mrf.mxu1 }
 0x667   : > { %v2938_v32 = vmax.f32 %v2793_v20, 0.0  ;;  %v2751_v8 = vpop.f32.mrf.mxu2 }
 0x668   : > { %v2752_v7 = vadd.f32 %v2751_v8, %v4897_v25 }
 0x669   : > { %3134 = vmatpush.msrb.mxu3 %v2938_v32 }
 0x66a   : > { %v2937_v0 = vmax.f32 %v2752_v7, 0.0 }
 0x66b   : > { %3135 = vmatpush.msrb.mxu3 %v2930_v42  ;;  %v5025_v40 = vpop.f32.mrf.mxu0 }
 0x66c   : > { %3105 = vmatpush.msrb.mxu2 %v2937_v0 }
 0x66d   : > { %3136 = vmatpush.msrb.mxu3 %v2922_v45 }
 0x66e   : > { %v5030_v55 = vpop.f32.mrf.mxu1  ;;  %3106 = vmatpush.msrb.mxu2 %v2929_v51  ;;  %v2854_v51 = vadd.f32 %v5017_v23, %v4949_v18 }
 0x66f   : > { %3137 = vmatpush.msrb.mxu3 %v2914_v1 }
 0x670   : > { %3107 = vmatpush.msrb.mxu2 %v2921_v41 }
 0x671   : > { %3138 = vmatpush.msrb.mxu3 %v2906_v44 }
 0x672   : > { %3108 = vmatpush.msrb.mxu2 %v2913_v50 }
 0x673   : > { %3139 = vmatpush.msrb.mxu3 %v2898_v62  ;;  %v5038_v61 = vpop.f32.mrf.mxu0 }
 0x674   : > { %3109 = vmatpush.msrb.mxu2 %v2905_v53  ;;  %v2816_v23 = vadd.f32 %v5038_v61, %v4938_v37 }
 0x675   : > { %3140 = vmatpush.msrb.mxu3 %v2890_v3 }
 0x676   : > { %v2859_v19 = vpop.f32.mrf.mxu1  ;;  %3110 = vmatpush.msrb.mxu2 %v2897_v10  ;;  %v2891_v50 = vmax.f32 %v2816_v23, 0.0  ;;  %v5095_v10 = vpop.permute.xlu0 %2956 }
 0x677   : > { %3141 = vmatpush.msrb.mxu3 %v2882_v11  ;;  %v2860_v39 = vadd.f32 %v2859_v19, %v4929_v14 }
 0x678   : > { %3568 = vmatmul.msk.f32.vlgmr.msrb.gmra.mxu3 %vm1046_vm0, %v4967_v13  ;;  %3111 = vmatpush.msrb.mxu2 %v2889_v35 }
 0x679   : > { %v2900_v48 = vmax.f32 %v2860_v39, 0.0 }
 0x67a   : > { %3112 = vmatpush.msrb.mxu2 %v2881_v12 }
 0x67b   : > { %v2818_v16 = vpop.f32.mrf.mxu0  ;;  %3564 = vmatmul.msk.f32.vlgmr.msrb.gmra.mxu2 %vm1046_vm0, %v4967_v13 }
 0x67c   : > { %v2819_v43 = vadd.f32 %v2818_v16, %v4929_v14  ;;  %v2813_v14 = vadd.f32 %v5025_v40, %v4949_v18 }
 0x67e   : > { %v2862_v15 = vpop.f32.mrf.mxu1  ;;  %v2899_v2 = vmax.f32 %v2819_v43, 0.0  ;;  %v2883_v40 = vmax.f32 %v2813_v14, 0.0 }
 0x67f   : > { %v2863_v31 = vadd.f32 %v2862_v15, %v4913_v60 }
 0x680   : > { %3569 = vmatmul.msk.f32.gmra.mxu3 %vm1046_vm0, %v4981_v17 }
 0x683   : > { %v2821_v34 = vpop.f32.mrf.mxu0  ;;  %3565 = vmatmul.msk.f32.gmra.mxu2 %vm1046_vm0, %v4981_v17 }
 0x686   : > { %v2865_v6 = vpop.f32.mrf.mxu1 }
 0x687   : > { %v2866_v5 = vadd.f32 %v2865_v6, %v4907_v47 }
 0x688   : > { %3570 = vmatmul.msk.f32.gmra.mxu3 %vm1046_vm0, %v4993_v46 }
 0x689   : > { %v2916_v0 = vmax.f32 %v2866_v5, 0.0 }
 0x68b   : > { %v2824_v54 = vpop.f32.mrf.mxu0  ;;  %3566 = vmatmul.msk.f32.gmra.mxu2 %vm1046_vm0, %v4993_v46 }
 0x68c   : > { %v2825_v9 = vadd.f32 %v2824_v54, %v4907_v47 }
 0x68e   : > { %v2868_v28 = vpop.f32.mrf.mxu1  ;;  %v2915_v47 = vmax.f32 %v2825_v9, 0.0 }
 0x68f   : > { %v2869_v4 = vadd.f32 %v2868_v28, %v4905_v24  ;;  %v5111_v28 = vpop.permute.xlu1 %2961 }
 0x690   : > { %3571 = vmatmul.msk.f32.gmra.mxu3 %vm1046_vm0, %v5003_v36 }
 0x691   : > { %v2924_v7 = vmax.f32 %v2869_v4, 0.0 }
 0x693   : > { %v2827_v49 = vpop.f32.mrf.mxu0  ;;  %3567 = vmatmul.msk.f32.gmra.mxu2 %vm1046_vm0, %v5003_v36 }
 0x694   : > { %v2828_v27 = vadd.f32 %v2827_v49, %v4905_v24  ;;  %v2822_v24 = vadd.f32 %v2821_v34, %v4913_v60  ;;  %v5075_v60 = vpop.permute.xlu2 %2951 }
 0x696   : > { %v2871_v56 = vpop.f32.mrf.mxu1  ;;  %v2923_v30 = vmax.f32 %v2828_v27, 0.0  ;;  %v2907_v41 = vmax.f32 %v2822_v24, 0.0 }
 0x697   : > { %v2872_v26 = vadd.f32 %v2871_v56, %v4899_v38 }
 0x699   : > { %v2932_v20 = vmax.f32 %v2872_v26, 0.0 }
 0x69b   : > { %v2830_v52 = vpop.f32.mrf.mxu0 }
 0x69c   : > { %v2831_v32 = vadd.f32 %v2830_v52, %v4899_v38  ;;  %v2908_v38 = vmax.f32 %v2863_v31, 0.0 }
 0x69e   : > { %v2874_v58 = vpop.f32.mrf.mxu1  ;;  %v2931_v45 = vmax.f32 %v2831_v32, 0.0  ;;  %v5125_v32 = vpop.permute.xlu2 %2966 }
 0x69f   : > { %v2875_v59 = vadd.f32 %v2874_v58, %v4897_v25 }
 0x6a1   : > { %v2940_v22 = vmax.f32 %v2875_v59, 0.0 }
 0x6a3   : > { %3192 = vmatpush.msrb.mxu1 %v2940_v22  ;;  %3592 = vmatpush.msra.mxu3 %v2940_v22  ;;  %v2833_v21 = vpop.f32.mrf.mxu0 }
 0x6a4   : > { %v2834_v8 = vadd.f32 %v2833_v21, %v4897_v25  ;;  %v2857_v25 = vadd.f32 %v5030_v55, %v4938_v37  ;;  %v2884_v55 = vmax.f32 %v2854_v51, 0.0 }
 0x6a5   : > { %3193 = vmatpush.msrb.mxu1 %v2932_v20  ;;  %3593 = vmatpush.msra.mxu3 %v2932_v20 }
 0x6a6   : > { %v2939_v42 = vmax.f32 %v2834_v8, 0.0  ;;  %v2892_v1 = vmax.f32 %v2857_v25, 0.0 }
 0x6a7   : > { %3194 = vmatpush.msrb.mxu1 %v2924_v7  ;;  %3594 = vmatpush.msra.mxu3 %v2924_v7 }
 0x6a8   : > { %3163 = vmatpush.msrb.mxu0 %v2939_v42  ;;  %3584 = vmatpush.msra.mxu2 %v2939_v42 }
 0x6a9   : > { %3195 = vmatpush.msrb.mxu1 %v2916_v0  ;;  %3595 = vmatpush.msra.mxu3 %v2916_v0 }
 0x6aa   : > { %3164 = vmatpush.msrb.mxu0 %v2931_v45  ;;  %3585 = vmatpush.msra.mxu2 %v2931_v45 }
 0x6ab   : > { %3196 = vmatpush.msrb.mxu1 %v2908_v38  ;;  %3596 = vmatpush.msra.mxu3 %v2908_v38 }
 0x6ac   : > { %3165 = vmatpush.msrb.mxu0 %v2923_v30  ;;  %3586 = vmatpush.msra.mxu2 %v2923_v30 }
 0x6ad   : > { %3197 = vmatpush.msrb.mxu1 %v2900_v48  ;;  %3597 = vmatpush.msra.mxu3 %v2900_v48 }
 0x6ae   : > { %3166 = vmatpush.msrb.mxu0 %v2915_v47  ;;  %3587 = vmatpush.msra.mxu2 %v2915_v47 }
 0x6af   : > { %v3085_v29 = vpop.f32.mrf.mxu1  ;;  %3198 = vmatpush.msrb.mxu1 %v2892_v1  ;;  %3598 = vmatpush.msra.mxu3 %v2892_v1 }
 0x6b0   : > { %v3086_v44 = vadd.f32 %v3085_v29, %v5075_v60  ;;  %3167 = vmatpush.msrb.mxu0 %v2907_v41  ;;  %3588 = vmatpush.msra.mxu2 %v2907_v41 }
 0x6b1   : > { %3199 = vmatpush.msrb.mxu1 %v2884_v55  ;;  %3599 = vmatpush.msra.mxu3 %v2884_v55 }
 0x6b2   : > { %v3216_v37 = vmax.f32 %v3086_v44, 0.0  ;;  %3576 = vmatmul.msk.f32.vlgmr.msrb.gmra.mxu1 %vm1046_vm0, %v4967_v13  ;;  %3579 = vmatmul.msk.f32.vlgmr.msra.gmra.mxu3 %vm1046_vm0, %v5003_v36 }
 0x6b3   : > { %3168 = vmatpush.msrb.mxu0 %v2899_v2  ;;  %3589 = vmatpush.msra.mxu2 %v2899_v2  ;;  %v2998_v57 = vpop.f32.mrf.mxu2  ;;  %v3027_v62 = vpop.f32.mrf.mxu3 }
 0x6b4   : > { %3248 = vst [vmem:[%s5083_s19 + $0x18] sm:$0xff] %v3216_v37  ;;  %v2999_v63 = vadd.f32 %v2998_v57, %v5075_v60  ;;  %v3028_v18 = vadd.f32 %v3027_v62, %v5075_v60 }
 0x6b5   : > { %v3056_v53 = vpop.f32.mrf.mxu0  ;;  %3169 = vmatpush.msrb.mxu0 %v2891_v50  ;;  %3590 = vmatpush.msra.mxu2 %v2891_v50 }
 0x6b6   : > { %v3213_v3 = vmax.f32 %v2999_v63, 0.0  ;;  %v3214_v61 = vmax.f32 %v3028_v18, 0.0  ;;  %v3057_v33 = vadd.f32 %v3056_v53, %v5075_v60 }
 0x6b7   : > { %v3088_v11 = vpop.f32.mrf.mxu1  ;;  %3170 = vmatpush.msrb.mxu0 %v2883_v40  ;;  %3591 = vmatpush.msra.mxu2 %v2883_v40 }
 0x6b8   : > { %3245 = vst [vmem:[%s5083_s19] sm:$0xff] %v3213_v3  ;;  %v3215_v35 = vmax.f32 %v3057_v33, 0.0  ;;  %v3089_v19 = vadd.f32 %v3088_v11, %v5095_v10  ;;  %3572 = vmatmul.msk.f32.vlgmr.msrb.gmra.mxu0 %vm1046_vm0, %v4967_v13  ;;  %3575 = vmatmul.msk.f32.vlgmr.msra.gmra.mxu2 %vm1046_vm0, %v5003_v36 }
 0x6b9   : > { %3246 = vst [vmem:[%s5083_s19 + $0x8] sm:$0xff] %v3214_v61 }
 0x6ba   : > { %3247 = vst [vmem:[%s5083_s19 + $0x10] sm:$0xff] %v3215_v35  ;;  %v3224_v12 = vmax.f32 %v3089_v19, 0.0  ;;  %3577 = vmatmul.msk.f32.gmra.mxu1 %vm1046_vm0, %v4981_v17 }
 0x6bb   : > { %v3001_v16 = vpop.f32.mrf.mxu2 }
 0x6bc   : > { %3256 = vst [vmem:[%s5083_s19 + $0x58] sm:$0xff] %v3224_v12  ;;  %v3002_v15 = vadd.f32 %v3001_v16, %v5095_v10  ;;  %v3030_v34 = vpop.f32.mrf.mxu3 }
 0x6bd   : > { %v3031_v6 = vadd.f32 %v3030_v34, %v5095_v10  ;;  %v3059_v13 = vpop.f32.mrf.mxu0 }
 0x6be   : > { %v3221_v54 = vmax.f32 %v3002_v15, 0.0  ;;  %v3060_v36 = vadd.f32 %v3059_v13, %v5095_v10 }
 0x6bf   : > { %v3222_v49 = vmax.f32 %v3031_v6, 0.0  ;;  %v3091_v56 = vpop.f32.mrf.mxu1 }
 0x6c0   : > { %3253 = vst [vmem:[%s5083_s19 + $0x40] sm:$0xff] %v3221_v54  ;;  %v3223_v52 = vmax.f32 %v3060_v36, 0.0  ;;  %v3092_v58 = vadd.f32 %v3091_v56, %v5111_v28  ;;  %3573 = vmatmul.msk.f32.gmra.mxu0 %vm1046_vm0, %v4981_v17 }
 0x6c1   : > { %3254 = vst [vmem:[%s5083_s19 + $0x48] sm:$0xff] %v3222_v49 }
 0x6c2   : > { %3255 = vst [vmem:[%s5083_s19 + $0x50] sm:$0xff] %v3223_v52  ;;  %v3232_v26 = vmax.f32 %v3092_v58, 0.0  ;;  %3578 = vmatmul.msk.f32.gmra.mxu1 %vm1046_vm0, %v4993_v46 }
 0x6c3   : > { %v3004_v59 = vpop.f32.mrf.mxu2 }
 0x6c4   : > { %3264 = vst [vmem:[%s5083_s19 + $0x98] sm:$0xff] %v3232_v26  ;;  %v3005_v4 = vadd.f32 %v3004_v59, %v5111_v28  ;;  %v3033_v22 = vpop.f32.mrf.mxu3 }
 0x6c5   : > { %v3034_v5 = vadd.f32 %v3033_v22, %v5111_v28  ;;  %v3062_v20 = vpop.f32.mrf.mxu0 }
 0x6c6   : > { %v3229_v21 = vmax.f32 %v3005_v4, 0.0  ;;  %v3063_v17 = vadd.f32 %v3062_v20, %v5111_v28 }
 0x6c7   : > { %v3230_v8 = vmax.f32 %v3034_v5, 0.0  ;;  %v3094_v31 = vpop.f32.mrf.mxu1 }
 0x6c8   : > { %3261 = vst [vmem:[%s5083_s19 + $0x80] sm:$0xff] %v3229_v21  ;;  %v3231_v7 = vmax.f32 %v3063_v17, 0.0  ;;  %v3095_v27 = vadd.f32 %v3094_v31, %v5125_v32  ;;  %3574 = vmatmul.msk.f32.gmra.mxu0 %vm1046_vm0, %v4993_v46 }
 0x6c9   : > { %3262 = vst [vmem:[%s5083_s19 + $0x88] sm:$0xff] %v3230_v8 }
 0x6ca   : > { %3263 = vst [vmem:[%s5083_s19 + $0x90] sm:$0xff] %v3231_v7  ;;  %v3240_v42 = vmax.f32 %v3095_v27, 0.0 }
 0x6cb   : > { %v3007_v39 = vpop.f32.mrf.mxu2 }
 0x6cc   : > { %3272 = vst [vmem:[%s5083_s19 + $0xd8] sm:$0xff] %v3240_v42  ;;  %v3008_v0 = vadd.f32 %v3007_v39, %v5125_v32  ;;  %v3036_v9 = vpop.f32.mrf.mxu3 }
 0x6cd   : > { %v3037_v45 = vadd.f32 %v3036_v9, %v5125_v32  ;;  %v3065_v25 = vpop.f32.mrf.mxu0 }
 0x6ce   : > { %v3237_v38 = vmax.f32 %v3008_v0, 0.0  ;;  %v3066_v24 = vadd.f32 %v3065_v25, %v5125_v32 }
 0x6cf   : > { %v3238_v30 = vmax.f32 %v3037_v45, 0.0 }
 0x6d0   : > { %3269 = vst [vmem:[%s5083_s19 + $0xc0] sm:$0xff] %v3237_v38  ;;  %v3239_v46 = vmax.f32 %v3066_v24, 0.0 }
 0x6d1   : > { %3270 = vst [vmem:[%s5083_s19 + $0xc8] sm:$0xff] %v3238_v30 }
 0x6d2   : > { %3271 = vst [vmem:[%s5083_s19 + $0xd0] sm:$0xff] %v3239_v46 }
 0x6fb   : > { %v3143_v51 = vpop.f32.mrf.mxu3 }
 0x6fc   : > { %v3144_v48 = vadd.f32 %v3143_v51, %v5075_v60 }
 0x6fe   : > { %v3218_v47 = vmax.f32 %v3144_v48, 0.0  ;;  %v3114_v1 = vpop.f32.mrf.mxu2 }
 0x6ff   : > { %v3115_v43 = vadd.f32 %v3114_v1, %v5075_v60 }
 0x700   : > { %3250 = vst [vmem:[%s5083_s19 + $0x28] sm:$0xff] %v3218_v47 }
 0x701   : > { %v3217_v41 = vmax.f32 %v3115_v43, 0.0 }
 0x703   : > { %3249 = vst [vmem:[%s5083_s19 + $0x20] sm:$0xff] %v3217_v41  ;;  %v3146_v55 = vpop.f32.mrf.mxu3 }
 0x704   : > { %v3147_v23 = vadd.f32 %v3146_v55, %v5095_v10 }
 0x706   : > { %v3226_v29 = vmax.f32 %v3147_v23, 0.0  ;;  %v3117_v44 = vpop.f32.mrf.mxu2 }
 0x707   : > { %v3118_v14 = vadd.f32 %v3117_v44, %v5095_v10 }
 0x708   : > { %3258 = vst [vmem:[%s5083_s19 + $0x68] sm:$0xff] %v3226_v29 }
 0x709   : > { %v3225_v2 = vmax.f32 %v3118_v14, 0.0 }
 0x70b   : > { %3257 = vst [vmem:[%s5083_s19 + $0x60] sm:$0xff] %v3225_v2  ;;  %v3149_v37 = vpop.f32.mrf.mxu3 }
 0x70c   : > { %v3150_v50 = vadd.f32 %v3149_v37, %v5111_v28 }
 0x70e   : > { %v3234_v57 = vmax.f32 %v3150_v50, 0.0  ;;  %v3120_v62 = vpop.f32.mrf.mxu2 }
 0x70f   : > { %v3121_v63 = vadd.f32 %v3120_v62, %v5111_v28 }
 0x710   : > { %3266 = vst [vmem:[%s5083_s19 + $0xa8] sm:$0xff] %v3234_v57 }
 0x711   : > { %v3233_v18 = vmax.f32 %v3121_v63, 0.0 }
 0x713   : > { %3265 = vst [vmem:[%s5083_s19 + $0xa0] sm:$0xff] %v3233_v18  ;;  %v3152_v40 = vpop.f32.mrf.mxu3 }
 0x714   : > { %v3153_v53 = vadd.f32 %v3152_v40, %v5125_v32 }
 0x716   : > { %v3242_v3 = vmax.f32 %v3153_v53, 0.0  ;;  %v3123_v61 = vpop.f32.mrf.mxu2 }
 0x717   : > { %v3124_v33 = vadd.f32 %v3123_v61, %v5125_v32 }
 0x718   : > { %3274 = vst [vmem:[%s5083_s19 + $0xe8] sm:$0xff] %v3242_v3 }
 0x719   : > { %v3241_v11 = vmax.f32 %v3124_v33, 0.0 }
 0x71b   : > { %3273 = vst [vmem:[%s5083_s19 + $0xe0] sm:$0xff] %v3241_v11 }
 0x72f   : > { %v3201_v35 = vpop.f32.mrf.mxu1 }
 0x730   : > { %v3202_v19 = vadd.f32 %v3201_v35, %v5075_v60 }
 0x732   : > { %v3220_v12 = vmax.f32 %v3202_v19, 0.0 }
 0x734   : > { %3252 = vst [vmem:[%s5083_s19 + $0x38] sm:$0xff] %v3220_v12 }
 0x735   : > { %v3172_v16 = vpop.f32.mrf.mxu0  ;;  %v3210_v15 = vpop.f32.mrf.mxu3 }
 0x736   : > { %v3173_v34 = vadd.f32 %v3172_v16, %v5075_v60  ;;  %v3211_v6 = vadd.f32 %v3210_v15, %v5125_v32 }
 0x737   : > { %v3204_v13 = vpop.f32.mrf.mxu1 }
 0x738   : > { %v3219_v54 = vmax.f32 %v3173_v34, 0.0  ;;  %v3244_v36 = vmax.f32 %v3211_v6, 0.0  ;;  %v3205_v49 = vadd.f32 %v3204_v13, %v5095_v10 }
 0x73a   : > { %3251 = vst [vmem:[%s5083_s19 + $0x30] sm:$0xff] %v3219_v54  ;;  %v3228_v56 = vmax.f32 %v3205_v49, 0.0 }
 0x73b   : > { %3276 = vst [vmem:[%s5083_s19 + $0xf8] sm:$0xff] %v3244_v36  ;;  %v3181_v52 = vpop.f32.mrf.mxu2 }
 0x73c   : > { %3260 = vst [vmem:[%s5083_s19 + $0x78] sm:$0xff] %v3228_v56  ;;  %v3182_v58 = vadd.f32 %v3181_v52, %v5125_v32 }
 0x73d   : > { %v3175_v26 = vpop.f32.mrf.mxu0 }
 0x73e   : > { %v3243_v60 = vmax.f32 %v3182_v58, 0.0  ;;  %v3176_v59 = vadd.f32 %v3175_v26, %v5095_v10 }
 0x73f   : > { %v3207_v4 = vpop.f32.mrf.mxu1 }
 0x740   : > { %3275 = vst [vmem:[%s5083_s19 + $0xf0] sm:$0xff] %v3243_v60  ;;  %v3227_v22 = vmax.f32 %v3176_v59, 0.0  ;;  %v3208_v5 = vadd.f32 %v3207_v4, %v5111_v28 }
 0x742   : > { %3259 = vst [vmem:[%s5083_s19 + $0x70] sm:$0xff] %v3227_v22  ;;  %v3236_v20 = vmax.f32 %v3208_v5, 0.0 }
 0x744   : > { %3268 = vst [vmem:[%s5083_s19 + $0xb8] sm:$0xff] %v3236_v20 }
 0x745   : > { %v3178_v21 = vpop.f32.mrf.mxu0 }
 0x746   : > { %v3179_v17 = vadd.f32 %v3178_v21, %v5111_v28 }
 0x748   : > { %v3235_v8 = vmax.f32 %v3179_v17, 0.0 }
 0x74a   : > { %3267 = vst [vmem:[%s5083_s19 + $0xb0] sm:$0xff] %v3235_v8 }
 0x74b PF: > { %s5203_s24 = sld [smem:[#allocation20_spill]] }
 0x751   : > { %s30_s18 = sadd.s32 1, %s5203_s24  }
 0x752   : > { %p27_p7 = scmp.ge.s32.totalorder %s30_s18, 4  }
 0x754   :  { %29 = sbr.rel (!%p27_p7) target bundleno = 10 (0xa), region = 143 }
 0x759   :  { %3298 = vsyncpa [#allocation3], 1 }
 0x75a   :  { %3300 = vsyncpa [#allocation3 + $0x1], 1 }
 0x75b   :  { %3301 = vsyncpa [#allocation5], 1 }
 0x75c   :  { %3302 = vsyncpa [#allocation8], 1 }
 0x75d   :  { %3303 = vsyncpa [#allocation11], 1 }
 0x75e   :  { %3304 = vsyncpa [#allocation14], 1 }

// kernel: decoder_occupancy_block.5
= control target key start
LH: loop header
LB: loop body
LE: loop exit
PB: predicated region body
PF: predicated region fallthrough
CT: control target
= control target key end

     0   :  { %8 = vsyncpa [#allocation3], 0  ;;  %s8492_s0 = inlined_call_operand.vmem [shape: f32[2,32,32,32], index: 0, kind: input, shape index: {}]   ;;  %s8493_s1 = inlined_call_operand.hbm [shape: f32[64,32], index: 1, kind: input, shape index: {}, may-alias: {1,2}]   ;;  %s8494_s2 = inlined_call_operand.hbm [shape: f32[64,32], index: 2, kind: input, shape index: {}, may-alias: {1,2}]   ;;  %s8495_s3 = inlined_call_operand.vmem [shape: f32[2,32,64,64], index: 3, kind: output, shape index: {}]  }
   0x1   :  { %9 = vsyncpa [#allocation5], 0  ;;  %s5568_s12 = smov 0  }
   0x2 LB: > { %s125_s15 = sshll.u32 %s8493_s1, 4  ;;  %s4508_s16 = sadd.s32 4294967295, %s5542_s12   ;;  %s5542_s12 = sphi %s5568_s12, %s15_s12   ;;  %s126_s15 = int_to_ptr.hbm [resolvable:$true] %s125_s15 }
   0x3   : > { %p4510_p0 = scmp.ge.s32.totalorder %s5542_s12, 1  ;;  %p114_p1 = scmp.lt.s32.totalorder %s5542_s12, 3 }
   0x4   : > { %p5436_p2 = scmp.eq.s32.totalorder %s4508_s16, 0  ;;  %s5544_s18 = smov [#allocation2]  }
   0x5   : > { %p5579_p3 = pnand %p4510_p0, %p114_p1  ;;  %s127_s19 = sshll.u32 %s5544_s18, 4  ;;  %s128_s19 = int_to_ptr.vmem [resolvable:$true] %s127_s19 }
   0x6   : > { %s139_s22 = sshll.u32 %s8494_s2, 4  ;;  %s5545_s23 = smov [#allocation4]   ;;  %s140_s22 = int_to_ptr.hbm [resolvable:$true] %s139_s22 }
   0x7   : > { %p5429_p4 = pneg %p5579_p3  ;;  %s141_s24 = sshll.u32 %s5545_s23, 4  ;;  %s142_s24 = int_to_ptr.vmem [resolvable:$true] %s141_s24 }
   0x8   : > { %s5546_s25 = smov 128   ;;  %s5547_s26 = smov 8  }
   0x9   : > { %p5430_p5 = pnand %p5436_p2, %p5429_p4  ;;  %165 = sbr.rel (%p5579_p3) target bundleno = 1190 (0x4a6), region = 32 }
   0xb   : > { %5432 = dma.hbm_to_vmem [thread:$0]  (!%p5430_p5), %s126_s15, 1024, %s128_s19, [#allocation3], %s5546_s25, %s5546_s25, %s5547_s26  }
   0xc   : > { %5435 = dma.hbm_to_vmem [thread:$0]  (!%p5430_p5), %s140_s22, 1024, %s142_s24, [#allocation5], %s5546_s25, %s5546_s25, %s5547_s26  }
   0xe   : > { %5533 = dma.done.wait (%p5436_p2), [#allocation3], 1024  }
   0xf   : > { %5535 = vsyncadd (%p5436_p2), [#allocation3], 4294966272 }
  0x10   : > { %5537 = dma.done.wait (%p5436_p2), [#allocation5], 1024  }
  0x11   : > { %5539 = vsyncadd (%p5436_p2), [#allocation5], 4294966272  ;;  %p195_p6 = scmp.lt.s32.totalorder %s4508_s16, 1  ;;  %vm349_vm0 = vcmask 261120   ;;  %v5635_v18 = vld [vmem:[#allocation2] sm:$0xff]  ;;  %v5661_v27 = vld [vmem:[#allocation2 + $0x8] sm:$0xff] }
  0x12   : > { %v5679_v30 = vld [vmem:[#allocation2 + $0x10] sm:$0xff]  ;;  %v5697_v35 = vld [vmem:[#allocation2 + $0x18] sm:$0xff]  ;;  %v5707_v36 = vld [vmem:[#allocation2 + $0x20] sm:$0xff]  ;;  %vm4174_vm1 = vcmask 523264  }
  0x13   : > { %s8788_s16 = smov (!%p195_p6, %s4508_s16), 1  ;;  %v5725_v41 = vld [vmem:[#allocation2 + $0x28] sm:$0xff]  ;;  %v5735_v42 = vld [vmem:[#allocation2 + $0x30] sm:$0xff]  ;;  %v5753_v47 = vld [vmem:[#allocation2 + $0x38] sm:$0xff] }
  0x14   : > { %s5419_s27 = sshll.u32 %s8788_s16, 10  ;;  %s5420_s4 = sshll.u32 %s8788_s16, 11 }
  0x15   : > { %s5601_s30 = scalar_lea.vmem %s8492_s0, %s5419_s27  ;;  %s7315_s7 = scalar_lea.vmem %s8495_s3, %s5420_s4 }
  0x16   : > { %v208_v0 = vld [vmem:[%s5601_s30 + $0x18] sm:$0xff]  ;;  %v207_v4 = vld [vmem:[%s5601_s30 + $0x10] sm:$0xff]  ;;  %v206_v8 = vld [vmem:[%s5601_s30 + $0x8] sm:$0xff] }
  0x17   : > { %v212_v1 = vld [vmem:[%s5601_s30 + $0x38] sm:$0xff]  ;;  %4521 = vmatpush.xpose.msk.msra.mxu0 %vm349_vm0, %v208_v0  ;;  %v211_v5 = vld [vmem:[%s5601_s30 + $0x30] sm:$0xff]  ;;  %v210_v9 = vld [vmem:[%s5601_s30 + $0x28] sm:$0xff] }
  0x18   : > { %v216_v2 = vld [vmem:[%s5601_s30 + $0x58] sm:$0xff]  ;;  %4533 = vmatpush.xpose.msk.msra.mxu1 %vm349_vm0, %v212_v1  ;;  %v215_v6 = vld [vmem:[%s5601_s30 + $0x50] sm:$0xff]  ;;  %v214_v10 = vld [vmem:[%s5601_s30 + $0x48] sm:$0xff] }
  0x19   : > { %v220_v3 = vld [vmem:[%s5601_s30 + $0x78] sm:$0xff]  ;;  %4545 = vmatpush.xpose.msk.msra.mxu2 %vm349_vm0, %v216_v2  ;;  %v219_v7 = vld [vmem:[%s5601_s30 + $0x70] sm:$0xff]  ;;  %v218_v11 = vld [vmem:[%s5601_s30 + $0x68] sm:$0xff] }
  0x1a   : > { %4557 = vmatpush.xpose.msk.msra.mxu3 %vm349_vm0, %v220_v3  ;;  %v205_v12 = vld [vmem:[%s5601_s30] sm:$0xff]  ;;  %v232_v16 = vld [vmem:[%s5601_s30 + $0xd8] sm:$0xff]  ;;  %v231_v21 = vld [vmem:[%s5601_s30 + $0xd0] sm:$0xff] }
  0x1b   : > { %4522 = vmatpush.xpose.msk.msra.mxu0 %vm349_vm0, %v207_v4  ;;  %v209_v13 = vld [vmem:[%s5601_s30 + $0x20] sm:$0xff]  ;;  %v236_v17 = vld [vmem:[%s5601_s30 + $0xf8] sm:$0xff]  ;;  %v235_v22 = vld [vmem:[%s5601_s30 + $0xf0] sm:$0xff] }
  0x1c   : > { %4534 = vmatpush.xpose.msk.msra.mxu1 %vm349_vm0, %v211_v5  ;;  %v213_v14 = vld [vmem:[%s5601_s30 + $0x40] sm:$0xff]  ;;  %v224_v19 = vld [vmem:[%s5601_s30 + $0x98] sm:$0xff]  ;;  %v223_v23 = vld [vmem:[%s5601_s30 + $0x90] sm:$0xff] }
  0x1d   : > { %4546 = vmatpush.xpose.msk.msra.mxu2 %vm349_vm0, %v215_v6  ;;  %v217_v15 = vld [vmem:[%s5601_s30 + $0x60] sm:$0xff]  ;;  %v228_v20 = vld [vmem:[%s5601_s30 + $0xb8] sm:$0xff]  ;;  %v227_v24 = vld [vmem:[%s5601_s30 + $0xb0] sm:$0xff] }
  0x1e   : > { %4558 = vmatpush.xpose.msk.msra.mxu3 %vm349_vm0, %v219_v7  ;;  %v230_v25 = vld [vmem:[%s5601_s30 + $0xc8] sm:$0xff]  ;;  %v229_v31 = vld [vmem:[%s5601_s30 + $0xc0] sm:$0xff]  ;;  %v248_v37 = vld [vmem:[%s5601_s30 + $0x158] sm:$0xff] }
  0x1f   : > { %4523 = vmatpush.xpose.msk.msra.mxu0 %vm349_vm0, %v206_v8  ;;  %v234_v26 = vld [vmem:[%s5601_s30 + $0xe8] sm:$0xff]  ;;  %v233_v32 = vld [vmem:[%s5601_s30 + $0xe0] sm:$0xff]  ;;  %v252_v38 = vld [vmem:[%s5601_s30 + $0x178] sm:$0xff] }
  0x20   : > { %4535 = vmatpush.xpose.msk.msra.mxu1 %vm349_vm0, %v210_v9  ;;  %v222_v28 = vld [vmem:[%s5601_s30 + $0x88] sm:$0xff]  ;;  %v221_v33 = vld [vmem:[%s5601_s30 + $0x80] sm:$0xff]  ;;  %v240_v39 = vld [vmem:[%s5601_s30 + $0x118] sm:$0xff] }
  0x21   : > { %4547 = vmatpush.xpose.msk.msra.mxu2 %vm349_vm0, %v214_v10  ;;  %v226_v29 = vld [vmem:[%s5601_s30 + $0xa8] sm:$0xff]  ;;  %v225_v34 = vld [vmem:[%s5601_s30 + $0xa0] sm:$0xff]  ;;  %v244_v40 = vld [vmem:[%s5601_s30 + $0x138] sm:$0xff] }
  0x22   : > { %4559 = vmatpush.xpose.msk.msra.mxu3 %vm349_vm0, %v218_v11  ;;  %v247_v43 = vld [vmem:[%s5601_s30 + $0x150] sm:$0xff]  ;;  %v246_v48 = vld [vmem:[%s5601_s30 + $0x148] sm:$0xff]  ;;  %v245_v52 = vld [vmem:[%s5601_s30 + $0x140] sm:$0xff] }
  0x23   : > { %4524 = vmatpush.xpose.msk.msra.mxu0 %vm349_vm0, %v205_v12  ;;  %v251_v44 = vld [vmem:[%s5601_s30 + $0x170] sm:$0xff]  ;;  %v250_v49 = vld [vmem:[%s5601_s30 + $0x168] sm:$0xff]  ;;  %v249_v53 = vld [vmem:[%s5601_s30 + $0x160] sm:$0xff] }
  0x24   : > { %4536 = vmatpush.xpose.msk.msra.mxu1 %vm349_vm0, %v209_v13  ;;  %v239_v45 = vld [vmem:[%s5601_s30 + $0x110] sm:$0xff]  ;;  %v238_v50 = vld [vmem:[%s5601_s30 + $0x108] sm:$0xff]  ;;  %v237_v54 = vld [vmem:[%s5601_s30 + $0x100] sm:$0xff] }
  0x25   : > { %4548 = vmatpush.xpose.msk.msra.mxu2 %vm349_vm0, %v213_v14  ;;  %v243_v46 = vld [vmem:[%s5601_s30 + $0x130] sm:$0xff]  ;;  %v242_v51 = vld [vmem:[%s5601_s30 + $0x128] sm:$0xff]  ;;  %v241_v55 = vld [vmem:[%s5601_s30 + $0x120] sm:$0xff] }
  0x26   : > { %4560 = vmatpush.xpose.msk.msra.mxu3 %vm349_vm0, %v217_v15  ;;  %4525 = vmatmul.msk.f32.vlgmr.msra.gmra.mxu0 %vm349_vm0, %v5635_v18  ;;  %v264_v56 = vld [vmem:[%s5601_s30 + $0x1d8] sm:$0xff]  ;;  %v263_v60 = vld [vmem:[%s5601_s30 + $0x1d0] sm:$0xff]  ;;  %v262_v2 = vld [vmem:[%s5601_s30 + $0x1c8] sm:$0xff] }
  0x27   : > { %4537 = vmatmul.msk.f32.vlgmr.msra.gmra.mxu1 %vm349_vm0, %v5635_v18  ;;  %4569 = vmatpush.xpose.msk.msrb.mxu0 %vm349_vm0, %v224_v19  ;;  %v268_v57 = vld [vmem:[%s5601_s30 + $0x1f8] sm:$0xff]  ;;  %v267_v61 = vld [vmem:[%s5601_s30 + $0x1f0] sm:$0xff]  ;;  %v266_v3 = vld [vmem:[%s5601_s30 + $0x1e8] sm:$0xff] }
  0x28   : > { %4549 = vmatmul.msk.f32.vlgmr.msra.gmra.mxu2 %vm349_vm0, %v5635_v18  ;;  %4581 = vmatpush.xpose.msk.msrb.mxu1 %vm349_vm0, %v228_v20  ;;  %v256_v58 = vld [vmem:[%s5601_s30 + $0x198] sm:$0xff]  ;;  %v255_v62 = vld [vmem:[%s5601_s30 + $0x190] sm:$0xff]  ;;  %v254_v6 = vld [vmem:[%s5601_s30 + $0x188] sm:$0xff] }
  0x29   : > { %4593 = vmatpush.xpose.msk.msrb.mxu2 %vm349_vm0, %v232_v16  ;;  %4561 = vmatmul.msk.f32.vlgmr.msra.gmra.mxu3 %vm349_vm0, %v5635_v18  ;;  %v260_v59 = vld [vmem:[%s5601_s30 + $0x1b8] sm:$0xff]  ;;  %v259_v63 = vld [vmem:[%s5601_s30 + $0x1b0] sm:$0xff]  ;;  %v258_v7 = vld [vmem:[%s5601_s30 + $0x1a8] sm:$0xff] }
  0x2a   : > { %4605 = vmatpush.xpose.msk.msrb.mxu3 %vm349_vm0, %v236_v17  ;;  %v261_v14 = vld [vmem:[%s5601_s30 + $0x1c0] sm:$0xff] }
  0x2b   : > { %4570 = vmatpush.xpose.msk.msrb.mxu0 %vm349_vm0, %v223_v23  ;;  %v265_v15 = vld [vmem:[%s5601_s30 + $0x1e0] sm:$0xff] }
  0x2c   : > { %4582 = vmatpush.xpose.msk.msrb.mxu1 %vm349_vm0, %v227_v24  ;;  %v253_v19 = vld [vmem:[%s5601_s30 + $0x180] sm:$0xff] }
  0x2d   : > { %4594 = vmatpush.xpose.msk.msrb.mxu2 %vm349_vm0, %v231_v21  ;;  %v257_v20 = vld [vmem:[%s5601_s30 + $0x1a0] sm:$0xff] }
  0x2e   : > { %4606 = vmatpush.xpose.msk.msrb.mxu3 %vm349_vm0, %v235_v22  ;;  %4526 = vmatmul.msk.f32.gmra.mxu0 %vm349_vm0, %v5661_v27 }
  0x2f   : > { %4538 = vmatmul.msk.f32.gmra.mxu1 %vm349_vm0, %v5661_v27  ;;  %4571 = vmatpush.xpose.msk.msrb.mxu0 %vm349_vm0, %v222_v28  ;;  %v280_v28 = vld [vmem:[%s5601_s30 + $0x258] sm:$0xff] }
  0x30   : > { %4550 = vmatmul.msk.f32.gmra.mxu2 %vm349_vm0, %v5661_v27  ;;  %4583 = vmatpush.xpose.msk.msrb.mxu1 %vm349_vm0, %v226_v29  ;;  %v284_v29 = vld [vmem:[%s5601_s30 + $0x278] sm:$0xff] }
  0x31   : > { %4595 = vmatpush.xpose.msk.msrb.mxu2 %vm349_vm0, %v230_v25  ;;  %4562 = vmatmul.msk.f32.gmra.mxu3 %vm349_vm0, %v5661_v27 }
  0x32   : > { %4607 = vmatpush.xpose.msk.msrb.mxu3 %vm349_vm0, %v234_v26 }
  0x33   : > { %4572 = vmatpush.xpose.msk.msrb.mxu0 %vm349_vm0, %v221_v33  ;;  %v272_v33 = vld [vmem:[%s5601_s30 + $0x218] sm:$0xff] }
  0x34   : > { %4584 = vmatpush.xpose.msk.msrb.mxu1 %vm349_vm0, %v225_v34  ;;  %v276_v34 = vld [vmem:[%s5601_s30 + $0x238] sm:$0xff] }
  0x35   : > { %4596 = vmatpush.xpose.msk.msrb.mxu2 %vm349_vm0, %v229_v31 }
  0x36   : > { %4527 = vmatmul.msk.f32.gmra.mxu0 %vm349_vm0, %v5679_v30  ;;  %4608 = vmatpush.xpose.msk.msrb.mxu3 %vm349_vm0, %v233_v32 }
  0x37   : > { %4539 = vmatmul.msk.f32.gmra.mxu1 %vm349_vm0, %v5679_v30  ;;  %4617 = vmatpush.xpose.msk.msra.mxu0 %vm349_vm0, %v240_v39 }
  0x38   : > { %4551 = vmatmul.msk.f32.gmra.mxu2 %vm349_vm0, %v5679_v30  ;;  %4629 = vmatpush.xpose.msk.msra.mxu1 %vm349_vm0, %v244_v40 }
  0x39   : > { %4563 = vmatmul.msk.f32.gmra.mxu3 %vm349_vm0, %v5679_v30  ;;  %4641 = vmatpush.xpose.msk.msra.mxu2 %vm349_vm0, %v248_v37 }
  0x3a   : > { %4653 = vmatpush.xpose.msk.msra.mxu3 %vm349_vm0, %v252_v38 }
  0x3b   : > { %4618 = vmatpush.xpose.msk.msra.mxu0 %vm349_vm0, %v239_v45  ;;  %v279_v45 = vld [vmem:[%s5601_s30 + $0x250] sm:$0xff] }
  0x3c   : > { %4630 = vmatpush.xpose.msk.msra.mxu1 %vm349_vm0, %v243_v46  ;;  %v283_v46 = vld [vmem:[%s5601_s30 + $0x270] sm:$0xff] }
  0x3d   : > { %4642 = vmatpush.xpose.msk.msra.mxu2 %vm349_vm0, %v247_v43 }
  0x3e   : > { %4528 = vmatmul.msk.f32.gmra.mxu0 %vm349_vm0, %v5697_v35  ;;  %4654 = vmatpush.xpose.msk.msra.mxu3 %vm349_vm0, %v251_v44 }
  0x3f   : > { %4540 = vmatmul.msk.f32.gmra.mxu1 %vm349_vm0, %v5697_v35  ;;  %4619 = vmatpush.xpose.msk.msra.mxu0 %vm349_vm0, %v238_v50  ;;  %v271_v50 = vld [vmem:[%s5601_s30 + $0x210] sm:$0xff] }
  0x40   : > { %4552 = vmatmul.msk.f32.gmra.mxu2 %vm349_vm0, %v5697_v35  ;;  %4631 = vmatpush.xpose.msk.msra.mxu1 %vm349_vm0, %v242_v51  ;;  %v275_v51 = vld [vmem:[%s5601_s30 + $0x230] sm:$0xff] }
  0x41   : > { %4564 = vmatmul.msk.f32.gmra.mxu3 %vm349_vm0, %v5697_v35  ;;  %4643 = vmatpush.xpose.msk.msra.mxu2 %vm349_vm0, %v246_v48 }
  0x42   : > { %4655 = vmatpush.xpose.msk.msra.mxu3 %vm349_vm0, %v250_v49 }
  0x43   : > { %4620 = vmatpush.xpose.msk.msra.mxu0 %vm349_vm0, %v237_v54 }
  0x44   : > { %4632 = vmatpush.xpose.msk.msra.mxu1 %vm349_vm0, %v241_v55 }
  0x45   : > { %4644 = vmatpush.xpose.msk.msra.mxu2 %vm349_vm0, %v245_v52 }
  0x46   : > { %4529 = vmatmul.msk.f32.gmra.mxu0 %vm349_vm0, %v5707_v36  ;;  %4656 = vmatpush.xpose.msk.msra.mxu3 %vm349_vm0, %v249_v53 }
  0x47   : > { %4541 = vmatmul.msk.f32.gmra.mxu1 %vm349_vm0, %v5707_v36 }
  0x48   : > { %4553 = vmatmul.msk.f32.gmra.mxu2 %vm349_vm0, %v5707_v36 }
  0x49   : > { %4565 = vmatmul.msk.f32.gmra.mxu3 %vm349_vm0, %v5707_v36 }
  0x4e   : > { %4530 = vmatmul.msk.f32.gmra.mxu0 %vm349_vm0, %v5725_v41 }
  0x4f   : > { %4542 = vmatmul.msk.f32.gmra.mxu1 %vm349_vm0, %v5725_v41 }
  0x50   : > { %4554 = vmatmul.msk.f32.gmra.mxu2 %vm349_vm0, %v5725_v41 }
  0x51   : > { %4566 = vmatmul.msk.f32.gmra.mxu3 %vm349_vm0, %v5725_v41 }
  0x56   : > { %4531 = vmatmul.msk.f32.gmra.mxu0 %vm349_vm0, %v5735_v42 }
  0x57   : > { %4543 = vmatmul.msk.f32.gmra.mxu1 %vm349_vm0, %v5735_v42 }
  0x58   : > { %4555 = vmatmul.msk.f32.gmra.mxu2 %vm349_vm0, %v5735_v42 }
  0x59   : > { %4567 = vmatmul.msk.f32.gmra.mxu3 %vm349_vm0, %v5735_v42 }
  0x5e   : > { %4532 = vmatmul.msk.f32.gmra.mxu0 %vm349_vm0, %v5753_v47 }
  0x5f   : > { %4544 = vmatmul.msk.f32.gmra.mxu1 %vm349_vm0, %v5753_v47 }
  0x60   : > { %4556 = vmatmul.msk.f32.gmra.mxu2 %vm349_vm0, %v5753_v47 }
  0x61   : > { %4568 = vmatmul.msk.f32.gmra.mxu3 %vm349_vm0, %v5753_v47 }
  0x66   : > { %4573 = vmatmul.msk.f32.vlgmr.msrb.gmra.mxu0 %vm349_vm0, %v5635_v18 }
  0x67   : > { %4585 = vmatmul.msk.f32.vlgmr.msrb.gmra.mxu1 %vm349_vm0, %v5635_v18  ;;  %4665 = vmatpush.xpose.msk.msrb.mxu0 %vm349_vm0, %v256_v58  ;;  %v278_v58 = vld [vmem:[%s5601_s30 + $0x248] sm:$0xff] }
  0x68   : > { %4597 = vmatmul.msk.f32.vlgmr.msrb.gmra.mxu2 %vm349_vm0, %v5635_v18  ;;  %4677 = vmatpush.xpose.msk.msrb.mxu1 %vm349_vm0, %v260_v59  ;;  %v282_v59 = vld [vmem:[%s5601_s30 + $0x268] sm:$0xff] }
  0x69   : > { %4609 = vmatmul.msk.f32.vlgmr.msrb.gmra.mxu3 %vm349_vm0, %v5635_v18  ;;  %4689 = vmatpush.xpose.msk.msrb.mxu2 %vm349_vm0, %v264_v56 }
  0x6a   : > { %4701 = vmatpush.xpose.msk.msrb.mxu3 %vm349_vm0, %v268_v57 }
  0x6b   : > { %4666 = vmatpush.xpose.msk.msrb.mxu0 %vm349_vm0, %v255_v62  ;;  %v270_v62 = vld [vmem:[%s5601_s30 + $0x208] sm:$0xff] }
  0x6c   : > { %4678 = vmatpush.xpose.msk.msrb.mxu1 %vm349_vm0, %v259_v63  ;;  %v274_v63 = vld [vmem:[%s5601_s30 + $0x228] sm:$0xff] }
  0x6d   : > { %4690 = vmatpush.xpose.msk.msrb.mxu2 %vm349_vm0, %v263_v60 }
  0x6e   : > { %4574 = vmatmul.msk.f32.gmra.mxu0 %vm349_vm0, %v5661_v27  ;;  %4702 = vmatpush.xpose.msk.msrb.mxu3 %vm349_vm0, %v267_v61 }
  0x6f   : > { %4586 = vmatmul.msk.f32.gmra.mxu1 %vm349_vm0, %v5661_v27  ;;  %4667 = vmatpush.xpose.msk.msrb.mxu0 %vm349_vm0, %v254_v6 }
  0x70   : > { %4598 = vmatmul.msk.f32.gmra.mxu2 %vm349_vm0, %v5661_v27  ;;  %4679 = vmatpush.xpose.msk.msrb.mxu1 %vm349_vm0, %v258_v7 }
  0x71   : > { %4610 = vmatmul.msk.f32.gmra.mxu3 %vm349_vm0, %v5661_v27  ;;  %4691 = vmatpush.xpose.msk.msrb.mxu2 %vm349_vm0, %v262_v2 }
  0x72   : > { %4703 = vmatpush.xpose.msk.msrb.mxu3 %vm349_vm0, %v266_v3 }
  0x73   : > { %4668 = vmatpush.xpose.msk.msrb.mxu0 %vm349_vm0, %v253_v19  ;;  %v277_v19 = vld [vmem:[%s5601_s30 + $0x240] sm:$0xff] }
  0x74   : > { %4680 = vmatpush.xpose.msk.msrb.mxu1 %vm349_vm0, %v257_v20  ;;  %v281_v20 = vld [vmem:[%s5601_s30 + $0x260] sm:$0xff] }
  0x75   : > { %4692 = vmatpush.xpose.msk.msrb.mxu2 %vm349_vm0, %v261_v14 }
  0x76   : > { %4575 = vmatmul.msk.f32.gmra.mxu0 %vm349_vm0, %v5679_v30  ;;  %4704 = vmatpush.xpose.msk.msrb.mxu3 %vm349_vm0, %v265_v15 }
  0x77   : > { %4587 = vmatmul.msk.f32.gmra.mxu1 %vm349_vm0, %v5679_v30 }
  0x78   : > { %4599 = vmatmul.msk.f32.gmra.mxu2 %vm349_vm0, %v5679_v30 }
  0x79   : > { %4611 = vmatmul.msk.f32.gmra.mxu3 %vm349_vm0, %v5679_v30 }
  0x7e   : > { %4576 = vmatmul.msk.f32.gmra.mxu0 %vm349_vm0, %v5697_v35 }
  0x7f   : > { %4588 = vmatmul.msk.f32.gmra.mxu1 %vm349_vm0, %v5697_v35 }
  0x80   : > { %4600 = vmatmul.msk.f32.gmra.mxu2 %vm349_vm0, %v5697_v35 }
  0x81   : > { %4612 = vmatmul.msk.f32.gmra.mxu3 %vm349_vm0, %v5697_v35 }
  0x86   : > { %4577 = vmatmul.msk.f32.gmra.mxu0 %vm349_vm0, %v5707_v36 }
  0x87   : > { %4589 = vmatmul.msk.f32.gmra.mxu1 %vm349_vm0, %v5707_v36 }
  0x88   : > { %4601 = vmatmul.msk.f32.gmra.mxu2 %vm349_vm0, %v5707_v36 }
  0x89   : > { %4613 = vmatmul.msk.f32.gmra.mxu3 %vm349_vm0, %v5707_v36 }
  0x8e   : > { %4578 = vmatmul.msk.f32.gmra.mxu0 %vm349_vm0, %v5725_v41 }
  0x8f   : > { %4590 = vmatmul.msk.f32.gmra.mxu1 %vm349_vm0, %v5725_v41 }
  0x90   : > { %4602 = vmatmul.msk.f32.gmra.mxu2 %vm349_vm0, %v5725_v41 }
  0x91   : > { %4614 = vmatmul.msk.f32.gmra.mxu3 %vm349_vm0, %v5725_v41 }
  0x96   : > { %4579 = vmatmul.msk.f32.gmra.mxu0 %vm349_vm0, %v5735_v42 }
  0x97   : > { %4591 = vmatmul.msk.f32.gmra.mxu1 %vm349_vm0, %v5735_v42 }
  0x98   : > { %4603 = vmatmul.msk.f32.gmra.mxu2 %vm349_vm0, %v5735_v42 }
  0x99   : > { %4615 = vmatmul.msk.f32.gmra.mxu3 %vm349_vm0, %v5735_v42 }
  0x9e   : > { %4580 = vmatmul.msk.f32.gmra.mxu0 %vm349_vm0, %v5753_v47 }
  0x9f   : > { %4592 = vmatmul.msk.f32.gmra.mxu1 %vm349_vm0, %v5753_v47 }
  0xa0   : > { %4604 = vmatmul.msk.f32.gmra.mxu2 %vm349_vm0, %v5753_v47 }
  0xa1   : > { %4616 = vmatmul.msk.f32.gmra.mxu3 %vm349_vm0, %v5753_v47 }
  0xa3   : > { %v5859_v0 = vpop.f32.mrf.mxu0 }
  0xa4   : > { %v5861_v1 = vpop.f32.mrf.mxu1 }
  0xa6   : > { %4621 = vmatmul.msk.f32.vlgmr.msra.gmra.mxu0 %vm349_vm0, %v5635_v18 }
  0xa7   : > { %4633 = vmatmul.msk.f32.vlgmr.msra.gmra.mxu1 %vm349_vm0, %v5635_v18  ;;  %4713 = vmatpush.xpose.msk.msra.mxu0 %vm349_vm0, %v272_v33  ;;  %v269_v33 = vld [vmem:[%s5601_s30 + $0x200] sm:$0xff] }
  0xa8   : > { %4645 = vmatmul.msk.f32.vlgmr.msra.gmra.mxu2 %vm349_vm0, %v5635_v18  ;;  %4725 = vmatpush.xpose.msk.msra.mxu1 %vm349_vm0, %v276_v34  ;;  %v273_v34 = vld [vmem:[%s5601_s30 + $0x220] sm:$0xff] }
  0xa9   : > { %4657 = vmatmul.msk.f32.vlgmr.msra.gmra.mxu3 %vm349_vm0, %v5635_v18  ;;  %4737 = vmatpush.xpose.msk.msra.mxu2 %vm349_vm0, %v280_v28 }
  0xaa   : > { %4749 = vmatpush.xpose.msk.msra.mxu3 %vm349_vm0, %v284_v29 }
  0xab   : > { %v5875_v4 = vpop.f32.mrf.mxu2  ;;  %v5881_v8 = vpop.f32.mrf.mxu0  ;;  %4714 = vmatpush.xpose.msk.msra.mxu0 %vm349_vm0, %v271_v50 }
  0xac   : > { %v5877_v5 = vpop.f32.mrf.mxu3  ;;  %v5883_v9 = vpop.f32.mrf.mxu1  ;;  %4726 = vmatpush.xpose.msk.msra.mxu1 %vm349_vm0, %v275_v51 }
  0xad   : > { %4738 = vmatpush.xpose.msk.msra.mxu2 %vm349_vm0, %v279_v45 }
  0xae   : > { %4622 = vmatmul.msk.f32.gmra.mxu0 %vm349_vm0, %v5661_v27  ;;  %4750 = vmatpush.xpose.msk.msra.mxu3 %vm349_vm0, %v283_v46 }
  0xaf   : > { %4634 = vmatmul.msk.f32.gmra.mxu1 %vm349_vm0, %v5661_v27  ;;  %4715 = vmatpush.xpose.msk.msra.mxu0 %vm349_vm0, %v270_v62  ;;  %v296_v62 = vld [vmem:[%s5601_s30 + $0x2d8] sm:$0xff] }
  0xb0   : > { %4646 = vmatmul.msk.f32.gmra.mxu2 %vm349_vm0, %v5661_v27  ;;  %4727 = vmatpush.xpose.msk.msra.mxu1 %vm349_vm0, %v274_v63  ;;  %v300_v63 = vld [vmem:[%s5601_s30 + $0x2f8] sm:$0xff] }
  0xb1   : > { %4658 = vmatmul.msk.f32.gmra.mxu3 %vm349_vm0, %v5661_v27  ;;  %4739 = vmatpush.xpose.msk.msra.mxu2 %vm349_vm0, %v278_v58 }
  0xb2   : > { %4751 = vmatpush.xpose.msk.msra.mxu3 %vm349_vm0, %v282_v59 }
  0xb3   : > { %v5895_v10 = vpop.f32.mrf.mxu2  ;;  %v5899_v12 = vpop.f32.mrf.mxu0  ;;  %4716 = vmatpush.xpose.msk.msra.mxu0 %vm349_vm0, %v269_v33  ;;  %v288_v33 = vld [vmem:[%s5601_s30 + $0x298] sm:$0xff] }
  0xb4   : > { %v5897_v11 = vpop.f32.mrf.mxu3  ;;  %v5901_v13 = vpop.f32.mrf.mxu1  ;;  %4728 = vmatpush.xpose.msk.msra.mxu1 %vm349_vm0, %v273_v34  ;;  %v292_v34 = vld [vmem:[%s5601_s30 + $0x2b8] sm:$0xff] }
  0xb5   : > { %4740 = vmatpush.xpose.msk.msra.mxu2 %vm349_vm0, %v277_v19 }
  0xb6   : > { %4623 = vmatmul.msk.f32.gmra.mxu0 %vm349_vm0, %v5679_v30  ;;  %4752 = vmatpush.xpose.msk.msra.mxu3 %vm349_vm0, %v281_v20 }
  0xb7   : > { %4635 = vmatmul.msk.f32.gmra.mxu1 %vm349_vm0, %v5679_v30 }
  0xb8   : > { %4647 = vmatmul.msk.f32.gmra.mxu2 %vm349_vm0, %v5679_v30 }
  0xb9   : > { %4659 = vmatmul.msk.f32.gmra.mxu3 %vm349_vm0, %v5679_v30 }
  0xbb   : > { %v5915_v16 = vpop.f32.mrf.mxu2  ;;  %v5921_v21 = vpop.f32.mrf.mxu0 }
  0xbc   : > { %v5917_v17 = vpop.f32.mrf.mxu3  ;;  %v5923_v22 = vpop.f32.mrf.mxu1 }
  0xbe   : > { %4624 = vmatmul.msk.f32.gmra.mxu0 %vm349_vm0, %v5697_v35 }
  0xbf   : > { %4636 = vmatmul.msk.f32.gmra.mxu1 %vm349_vm0, %v5697_v35 }
  0xc0   : > { %4648 = vmatmul.msk.f32.gmra.mxu2 %vm349_vm0, %v5697_v35 }
  0xc1   : > { %4660 = vmatmul.msk.f32.gmra.mxu3 %vm349_vm0, %v5697_v35 }
  0xc3   : > { %v5935_v23 = vpop.f32.mrf.mxu2  ;;  %v5939_v25 = vpop.f32.mrf.mxu0 }
  0xc4   : > { %v5937_v24 = vpop.f32.mrf.mxu3  ;;  %v5941_v26 = vpop.f32.mrf.mxu1 }
  0xc6   : > { %4625 = vmatmul.msk.f32.gmra.mxu0 %vm349_vm0, %v5707_v36 }
  0xc7   : > { %4637 = vmatmul.msk.f32.gmra.mxu1 %vm349_vm0, %v5707_v36 }
  0xc8   : > { %4649 = vmatmul.msk.f32.gmra.mxu2 %vm349_vm0, %v5707_v36 }
  0xc9   : > { %4661 = vmatmul.msk.f32.gmra.mxu3 %vm349_vm0, %v5707_v36 }
  0xcb   : > { %v5955_v31 = vpop.f32.mrf.mxu2  ;;  %v5961_v37 = vpop.f32.mrf.mxu0 }
  0xcc   : > { %v5957_v32 = vpop.f32.mrf.mxu3  ;;  %v5963_v38 = vpop.f32.mrf.mxu1 }
  0xce   : > { %4626 = vmatmul.msk.f32.gmra.mxu0 %vm349_vm0, %v5725_v41 }
  0xcf   : > { %4638 = vmatmul.msk.f32.gmra.mxu1 %vm349_vm0, %v5725_v41 }
  0xd0   : > { %4650 = vmatmul.msk.f32.gmra.mxu2 %vm349_vm0, %v5725_v41 }
  0xd1   : > { %4662 = vmatmul.msk.f32.gmra.mxu3 %vm349_vm0, %v5725_v41 }
  0xd3   : > { %v5975_v39 = vpop.f32.mrf.mxu2  ;;  %v5979_v43 = vpop.f32.mrf.mxu0 }
  0xd4   : > { %v5977_v40 = vpop.f32.mrf.mxu3  ;;  %v5981_v44 = vpop.f32.mrf.mxu1 }
  0xd6   : > { %4627 = vmatmul.msk.f32.gmra.mxu0 %vm349_vm0, %v5735_v42 }
  0xd7   : > { %4639 = vmatmul.msk.f32.gmra.mxu1 %vm349_vm0, %v5735_v42 }
  0xd8   : > { %4651 = vmatmul.msk.f32.gmra.mxu2 %vm349_vm0, %v5735_v42 }
  0xd9   : > { %4663 = vmatmul.msk.f32.gmra.mxu3 %vm349_vm0, %v5735_v42 }
  0xdb   : > { %v5995_v48 = vpop.f32.mrf.mxu2  ;;  %v6001_v52 = vpop.f32.mrf.mxu0 }
  0xdc   : > { %v5997_v49 = vpop.f32.mrf.mxu3  ;;  %v6003_v53 = vpop.f32.mrf.mxu1 }
  0xde   : > { %4628 = vmatmul.msk.f32.gmra.mxu0 %vm349_vm0, %v5753_v47 }
  0xdf   : > { %4640 = vmatmul.msk.f32.gmra.mxu1 %vm349_vm0, %v5753_v47 }
  0xe0   : > { %4652 = vmatmul.msk.f32.gmra.mxu2 %vm349_vm0, %v5753_v47 }
  0xe1   : > { %4664 = vmatmul.msk.f32.gmra.mxu3 %vm349_vm0, %v5753_v47 }
  0xe3   : > { %v6015_v54 = vpop.f32.mrf.mxu2  ;;  %v6019_v56 = vpop.f32.mrf.mxu0 }
  0xe4   : > { %v6017_v55 = vpop.f32.mrf.mxu3  ;;  %8497 = vst [vmem:[#allocation8_spill] sm:$0xff] %v6019_v56  ;;  %v6021_v57 = vpop.f32.mrf.mxu1  ;;  %v299_v56 = vld [vmem:[%s5601_s30 + $0x2f0] sm:$0xff] }
  0xe5   : > { %8498 = vst [vmem:[#allocation9_spill] sm:$0xff] %v6021_v57  ;;  %v295_v57 = vld [vmem:[%s5601_s30 + $0x2d0] sm:$0xff] }
  0xe6   : > { %4669 = vmatmul.msk.f32.vlgmr.msrb.gmra.mxu0 %vm349_vm0, %v5635_v18 }
  0xe7   : > { %4681 = vmatmul.msk.f32.vlgmr.msrb.gmra.mxu1 %vm349_vm0, %v5635_v18  ;;  %4761 = vmatpush.xpose.msk.msrb.mxu0 %vm349_vm0, %v288_v33 }
  0xe8   : > { %4693 = vmatmul.msk.f32.vlgmr.msrb.gmra.mxu2 %vm349_vm0, %v5635_v18  ;;  %4773 = vmatpush.xpose.msk.msrb.mxu1 %vm349_vm0, %v292_v34 }
  0xe9   : > { %4705 = vmatmul.msk.f32.vlgmr.msrb.gmra.mxu3 %vm349_vm0, %v5635_v18  ;;  %4785 = vmatpush.xpose.msk.msrb.mxu2 %vm349_vm0, %v296_v62 }
  0xea   : > { %4797 = vmatpush.xpose.msk.msrb.mxu3 %vm349_vm0, %v300_v63 }
  0xeb   : > { %v6035_v60 = vpop.f32.mrf.mxu2  ;;  %v6041_v2 = vpop.f32.mrf.mxu0 }
  0xec   : > { %8499 = vst [vmem:[#allocation10_spill] sm:$0xff] %v6035_v60  ;;  %v6037_v61 = vpop.f32.mrf.mxu3  ;;  %v6043_v3 = vpop.f32.mrf.mxu1 }
  0xed   : > { %8500 = vst [vmem:[#allocation11_spill] sm:$0xff] %v6037_v61  ;;  %4786 = vmatpush.xpose.msk.msrb.mxu2 %vm349_vm0, %v295_v57 }
  0xee   : > { %8501 = vst [vmem:[#allocation12_spill] sm:$0xff] %v6041_v2  ;;  %4670 = vmatmul.msk.f32.gmra.mxu0 %vm349_vm0, %v5661_v27  ;;  %4798 = vmatpush.xpose.msk.msrb.mxu3 %vm349_vm0, %v299_v56  ;;  %v291_v2 = vld [vmem:[%s5601_s30 + $0x2b0] sm:$0xff] }
  0xef   : > { %8502 = vst [vmem:[#allocation13_spill] sm:$0xff] %v6043_v3  ;;  %4682 = vmatmul.msk.f32.gmra.mxu1 %vm349_vm0, %v5661_v27  ;;  %v287_v3 = vld [vmem:[%s5601_s30 + $0x290] sm:$0xff] }
  0xf0   : > { %4694 = vmatmul.msk.f32.gmra.mxu2 %vm349_vm0, %v5661_v27  ;;  %4762 = vmatpush.xpose.msk.msrb.mxu0 %vm349_vm0, %v287_v3 }
  0xf1   : > { %4706 = vmatmul.msk.f32.gmra.mxu3 %vm349_vm0, %v5661_v27  ;;  %4774 = vmatpush.xpose.msk.msrb.mxu1 %vm349_vm0, %v291_v2 }
  0xf3   : > { %v6055_v6 = vpop.f32.mrf.mxu2  ;;  %v6059_v14 = vpop.f32.mrf.mxu0 }
  0xf4   : > { %8503 = vst [vmem:[#allocation14_spill] sm:$0xff] %v6055_v6  ;;  %v6057_v7 = vpop.f32.mrf.mxu3  ;;  %v6061_v15 = vpop.f32.mrf.mxu1 }
  0xf5   : > { %8504 = vst [vmem:[#allocation15_spill] sm:$0xff] %v6057_v7 }
  0xf6   : > { %8505 = vst [vmem:[#allocation16_spill] sm:$0xff] %v6059_v14  ;;  %4671 = vmatmul.msk.f32.gmra.mxu0 %vm349_vm0, %v5679_v30  ;;  %v298_v14 = vld [vmem:[%s5601_s30 + $0x2e8] sm:$0xff] }
  0xf7   : > { %8506 = vst [vmem:[#allocation17_spill] sm:$0xff] %v6061_v15  ;;  %4683 = vmatmul.msk.f32.gmra.mxu1 %vm349_vm0, %v5679_v30  ;;  %v294_v15 = vld [vmem:[%s5601_s30 + $0x2c8] sm:$0xff]  ;;  %4799 = vmatpush.xpose.msk.msrb.mxu3 %vm349_vm0, %v298_v14 }
  0xf8   : > { %4695 = vmatmul.msk.f32.gmra.mxu2 %vm349_vm0, %v5679_v30 }
  0xf9   : > { %4707 = vmatmul.msk.f32.gmra.mxu3 %vm349_vm0, %v5679_v30  ;;  %4787 = vmatpush.xpose.msk.msrb.mxu2 %vm349_vm0, %v294_v15 }
  0xfb   : > { %v6075_v28 = vpop.f32.mrf.mxu2  ;;  %v6081_v45 = vpop.f32.mrf.mxu0 }
  0xfc   : > { %8507 = vst [vmem:[#allocation18_spill] sm:$0xff] %v6075_v28  ;;  %v6077_v29 = vpop.f32.mrf.mxu3  ;;  %v6083_v46 = vpop.f32.mrf.mxu1 }
  0xfd   : > { %8508 = vst [vmem:[#allocation19_spill] sm:$0xff] %v6077_v29 }
  0xfe   : > { %8509 = vst [vmem:[#allocation20_spill] sm:$0xff] %v6081_v45  ;;  %4672 = vmatmul.msk.f32.gmra.mxu0 %vm349_vm0, %v5697_v35 }
  0xff   : > { %8510 = vst [vmem:[#allocation21_spill] sm:$0xff] %v6083_v46  ;;  %4684 = vmatmul.msk.f32.gmra.mxu1 %vm349_vm0, %v5697_v35 }
 0x100   : > { %4696 = vmatmul.msk.f32.gmra.mxu2 %vm349_vm0, %v5697_v35 }
 0x101   : > { %4708 = vmatmul.msk.f32.gmra.mxu3 %vm349_vm0, %v5697_v35 }
 0x103   : > { %v6095_v50 = vpop.f32.mrf.mxu2  ;;  %v6099_v58 = vpop.f32.mrf.mxu0 }
 0x104   : > { %8511 = vst [vmem:[#allocation22_spill] sm:$0xff] %v6095_v50  ;;  %v6097_v51 = vpop.f32.mrf.mxu3  ;;  %v6101_v59 = vpop.f32.mrf.mxu1  ;;  %v290_v50 = vld [vmem:[%s5601_s30 + $0x2a8] sm:$0xff] }
 0x105   : > { %8512 = vst [vmem:[#allocation23_spill] sm:$0xff] %v6097_v51  ;;  %v286_v51 = vld [vmem:[%s5601_s30 + $0x288] sm:$0xff]  ;;  %4775 = vmatpush.xpose.msk.msrb.mxu1 %vm349_vm0, %v290_v50 }
 0x106   : > { %4673 = vmatmul.msk.f32.gmra.mxu0 %vm349_vm0, %v5707_v36 }
 0x107   : > { %4685 = vmatmul.msk.f32.gmra.mxu1 %vm349_vm0, %v5707_v36  ;;  %4763 = vmatpush.xpose.msk.msrb.mxu0 %vm349_vm0, %v286_v51 }
 0x108   : > { %4697 = vmatmul.msk.f32.gmra.mxu2 %vm349_vm0, %v5707_v36 }
 0x109   : > { %4709 = vmatmul.msk.f32.gmra.mxu3 %vm349_vm0, %v5707_v36 }
 0x10b   : > { %v6115_v19 = vpop.f32.mrf.mxu2  ;;  %v6121_v61 = vpop.f32.mrf.mxu0 }
 0x10c   : > { %v6117_v20 = vpop.f32.mrf.mxu3  ;;  %v6123_v60 = vpop.f32.mrf.mxu1 }
 0x10e   : > { %4674 = vmatmul.msk.f32.gmra.mxu0 %vm349_vm0, %v5725_v41 }
 0x10f   : > { %4686 = vmatmul.msk.f32.gmra.mxu1 %vm349_vm0, %v5725_v41 }
 0x110   : > { %4698 = vmatmul.msk.f32.gmra.mxu2 %vm349_vm0, %v5725_v41 }
 0x111   : > { %4710 = vmatmul.msk.f32.gmra.mxu3 %vm349_vm0, %v5725_v41 }
 0x113   : > { %v6135_v62 = vpop.f32.mrf.mxu2  ;;  %v6139_v33 = vpop.f32.mrf.mxu0 }
 0x114   : > { %v6137_v63 = vpop.f32.mrf.mxu3  ;;  %v6141_v34 = vpop.f32.mrf.mxu1 }
 0x116   : > { %4675 = vmatmul.msk.f32.gmra.mxu0 %vm349_vm0, %v5735_v42 }
 0x117   : > { %4687 = vmatmul.msk.f32.gmra.mxu1 %vm349_vm0, %v5735_v42 }
 0x118   : > { %4699 = vmatmul.msk.f32.gmra.mxu2 %vm349_vm0, %v5735_v42 }
 0x119   : > { %4711 = vmatmul.msk.f32.gmra.mxu3 %vm349_vm0, %v5735_v42 }
 0x11b   : > { %v6155_v7 = vpop.f32.mrf.mxu2  ;;  %v6161_v29 = vpop.f32.mrf.mxu0 }
 0x11c   : > { %v6157_v6 = vpop.f32.mrf.mxu3  ;;  %v6163_v28 = vpop.f32.mrf.mxu1 }
 0x11e   : > { %4676 = vmatmul.msk.f32.gmra.mxu0 %vm349_vm0, %v5753_v47 }
 0x11f   : > { %4688 = vmatmul.msk.f32.gmra.mxu1 %vm349_vm0, %v5753_v47 }
 0x120   : > { %4700 = vmatmul.msk.f32.gmra.mxu2 %vm349_vm0, %v5753_v47 }
 0x121   : > { %4712 = vmatmul.msk.f32.gmra.mxu3 %vm349_vm0, %v5753_v47 }
 0x123   : > { %v6175_v56 = vpop.f32.mrf.mxu2  ;;  %v6179_v3 = vpop.f32.mrf.mxu0 }
 0x124   : > { %v6177_v57 = vpop.f32.mrf.mxu3  ;;  %8513 = vst [vmem:[#allocation24_spill] sm:$0xff] %v6179_v3  ;;  %v6181_v2 = vpop.f32.mrf.mxu1 }
 0x125   : > { %8514 = vst [vmem:[#allocation25_spill] sm:$0xff] %v6181_v2 }
 0x126   : > { %4717 = vmatmul.msk.f32.vlgmr.msra.gmra.mxu0 %vm349_vm0, %v5635_v18 }
 0x127   : > { %4729 = vmatmul.msk.f32.vlgmr.msra.gmra.mxu1 %vm349_vm0, %v5635_v18 }
 0x128   : > { %4741 = vmatmul.msk.f32.vlgmr.msra.gmra.mxu2 %vm349_vm0, %v5635_v18 }
 0x129   : > { %4753 = vmatmul.msk.f32.vlgmr.msra.gmra.mxu3 %vm349_vm0, %v5635_v18 }
 0x12b   : > { %v6195_v3 = vpop.f32.mrf.mxu2  ;;  %v6201_v46 = vpop.f32.mrf.mxu0 }
 0x12c   : > { %8515 = vst [vmem:[#allocation26_spill] sm:$0xff] %v6195_v3  ;;  %v6197_v2 = vpop.f32.mrf.mxu3  ;;  %v6203_v45 = vpop.f32.mrf.mxu1  ;;  %v297_v3 = vld [vmem:[%s5601_s30 + $0x2e0] sm:$0xff] }
 0x12d   : > { %8516 = vst [vmem:[#allocation27_spill] sm:$0xff] %v6197_v2  ;;  %v293_v2 = vld [vmem:[%s5601_s30 + $0x2c0] sm:$0xff]  ;;  %4800 = vmatpush.xpose.msk.msrb.mxu3 %vm349_vm0, %v297_v3 }
 0x12e   : > { %8517 = vst [vmem:[#allocation28_spill] sm:$0xff] %v6201_v46  ;;  %4718 = vmatmul.msk.f32.gmra.mxu0 %vm349_vm0, %v5661_v27  ;;  %4788 = vmatpush.xpose.msk.msrb.mxu2 %vm349_vm0, %v293_v2  ;;  %v289_v46 = vld [vmem:[%s5601_s30 + $0x2a0] sm:$0xff] }
 0x12f   : > { %8518 = vst [vmem:[#allocation29_spill] sm:$0xff] %v6203_v45  ;;  %4730 = vmatmul.msk.f32.gmra.mxu1 %vm349_vm0, %v5661_v27  ;;  %v285_v45 = vld [vmem:[%s5601_s30 + $0x280] sm:$0xff] }
 0x130   : > { %4742 = vmatmul.msk.f32.gmra.mxu2 %vm349_vm0, %v5661_v27  ;;  %4764 = vmatpush.xpose.msk.msrb.mxu0 %vm349_vm0, %v285_v45 }
 0x131   : > { %4754 = vmatmul.msk.f32.gmra.mxu3 %vm349_vm0, %v5661_v27  ;;  %4776 = vmatpush.xpose.msk.msrb.mxu1 %vm349_vm0, %v289_v46 }
 0x133   : > { %v6215_v14 = vpop.f32.mrf.mxu2  ;;  %v6219_v51 = vpop.f32.mrf.mxu0 }
 0x134   : > { %8519 = vst [vmem:[#allocation30_spill] sm:$0xff] %v6215_v14  ;;  %v6217_v15 = vpop.f32.mrf.mxu3  ;;  %v6221_v50 = vpop.f32.mrf.mxu1 }
 0x135   : > { %8520 = vst [vmem:[#allocation31_spill] sm:$0xff] %v6217_v15 }
 0x136   : > { %8521 = vst [vmem:[#allocation32_spill] sm:$0xff] %v6219_v51  ;;  %4719 = vmatmul.msk.f32.gmra.mxu0 %vm349_vm0, %v5679_v30 }
 0x137   : > { %8522 = vst [vmem:[#allocation33_spill] sm:$0xff] %v6221_v50  ;;  %4731 = vmatmul.msk.f32.gmra.mxu1 %vm349_vm0, %v5679_v30 }
 0x138   : > { %4743 = vmatmul.msk.f32.gmra.mxu2 %vm349_vm0, %v5679_v30 }
 0x139   : > { %4755 = vmatmul.msk.f32.gmra.mxu3 %vm349_vm0, %v5679_v30 }
 0x13b   : > { %v6235_v15 = vpop.f32.mrf.mxu2  ;;  %v6241_v50 = vpop.f32.mrf.mxu0 }
 0x13c   : > { %8523 = vst [vmem:[#allocation34_spill] sm:$0xff] %v6235_v15  ;;  %v6237_v14 = vpop.f32.mrf.mxu3  ;;  %v6243_v51 = vpop.f32.mrf.mxu1  ;;  %v316_v15 = vld [vmem:[%s5601_s30 + $0x378] sm:$0xff] }
 0x13d   : > { %8524 = vst [vmem:[#allocation35_spill] sm:$0xff] %v6237_v14  ;;  %v312_v14 = vld [vmem:[%s5601_s30 + $0x358] sm:$0xff]  ;;  %4845 = vmatpush.xpose.msk.msra.mxu3 %vm349_vm0, %v316_v15 }
 0x13e   : > { %8525 = vst [vmem:[#allocation36_spill] sm:$0xff] %v6241_v50  ;;  %4720 = vmatmul.msk.f32.gmra.mxu0 %vm349_vm0, %v5697_v35  ;;  %4833 = vmatpush.xpose.msk.msra.mxu2 %vm349_vm0, %v312_v14  ;;  %v308_v50 = vld [vmem:[%s5601_s30 + $0x338] sm:$0xff] }
 0x13f   : > { %8526 = vst [vmem:[#allocation37_spill] sm:$0xff] %v6243_v51  ;;  %4732 = vmatmul.msk.f32.gmra.mxu1 %vm349_vm0, %v5697_v35  ;;  %v304_v51 = vld [vmem:[%s5601_s30 + $0x318] sm:$0xff] }
 0x140   : > { %4744 = vmatmul.msk.f32.gmra.mxu2 %vm349_vm0, %v5697_v35  ;;  %4809 = vmatpush.xpose.msk.msra.mxu0 %vm349_vm0, %v304_v51 }
 0x141   : > { %4756 = vmatmul.msk.f32.gmra.mxu3 %vm349_vm0, %v5697_v35  ;;  %4821 = vmatpush.xpose.msk.msra.mxu1 %vm349_vm0, %v308_v50 }
 0x143   : > { %v6255_v3 = vpop.f32.mrf.mxu2  ;;  %v6259_v45 = vpop.f32.mrf.mxu0 }
 0x144   : > { %8527 = vst [vmem:[#allocation38_spill] sm:$0xff] %v6255_v3  ;;  %v6257_v2 = vpop.f32.mrf.mxu3  ;;  %v6261_v46 = vpop.f32.mrf.mxu1 }
 0x145   : > { %8528 = vst [vmem:[#allocation39_spill] sm:$0xff] %v6257_v2 }
 0x146   : > { %8529 = vst [vmem:[#allocation40_spill] sm:$0xff] %v6259_v45  ;;  %4721 = vmatmul.msk.f32.gmra.mxu0 %vm349_vm0, %v5707_v36 }
 0x147   : > { %8530 = vst [vmem:[#allocation41_spill] sm:$0xff] %v6261_v46  ;;  %4733 = vmatmul.msk.f32.gmra.mxu1 %vm349_vm0, %v5707_v36 }
 0x148   : > { %4745 = vmatmul.msk.f32.gmra.mxu2 %vm349_vm0, %v5707_v36 }
 0x149   : > { %4757 = vmatmul.msk.f32.gmra.mxu3 %vm349_vm0, %v5707_v36 }
 0x14b   : > { %v6275_v2 = vpop.f32.mrf.mxu2  ;;  %v6281_v46 = vpop.f32.mrf.mxu0 }
 0x14c   : > { %8531 = vst [vmem:[#allocation42_spill] sm:$0xff] %v6275_v2  ;;  %v6277_v3 = vpop.f32.mrf.mxu3  ;;  %v6283_v45 = vpop.f32.mrf.mxu1  ;;  %v315_v2 = vld [vmem:[%s5601_s30 + $0x370] sm:$0xff] }
 0x14d   : > { %8532 = vst [vmem:[#allocation43_spill] sm:$0xff] %v6277_v3  ;;  %v311_v3 = vld [vmem:[%s5601_s30 + $0x350] sm:$0xff]  ;;  %4846 = vmatpush.xpose.msk.msra.mxu3 %vm349_vm0, %v315_v2 }
 0x14e   : > { %8533 = vst [vmem:[#allocation44_spill] sm:$0xff] %v6281_v46  ;;  %4722 = vmatmul.msk.f32.gmra.mxu0 %vm349_vm0, %v5725_v41  ;;  %4834 = vmatpush.xpose.msk.msra.mxu2 %vm349_vm0, %v311_v3  ;;  %v307_v46 = vld [vmem:[%s5601_s30 + $0x330] sm:$0xff] }
 0x14f   : > { %8534 = vst [vmem:[#allocation45_spill] sm:$0xff] %v6283_v45  ;;  %4734 = vmatmul.msk.f32.gmra.mxu1 %vm349_vm0, %v5725_v41  ;;  %v303_v45 = vld [vmem:[%s5601_s30 + $0x310] sm:$0xff] }
 0x150   : > { %4746 = vmatmul.msk.f32.gmra.mxu2 %vm349_vm0, %v5725_v41  ;;  %4810 = vmatpush.xpose.msk.msra.mxu0 %vm349_vm0, %v303_v45 }
 0x151   : > { %4758 = vmatmul.msk.f32.gmra.mxu3 %vm349_vm0, %v5725_v41  ;;  %4822 = vmatpush.xpose.msk.msra.mxu1 %vm349_vm0, %v307_v46 }
 0x153   : > { %v6295_v14 = vpop.f32.mrf.mxu2  ;;  %v6299_v51 = vpop.f32.mrf.mxu0 }
 0x154   : > { %8535 = vst [vmem:[#allocation46_spill] sm:$0xff] %v6295_v14  ;;  %v6297_v15 = vpop.f32.mrf.mxu3  ;;  %v6301_v50 = vpop.f32.mrf.mxu1 }
 0x155   : > { %8536 = vst [vmem:[#allocation47_spill] sm:$0xff] %v6297_v15 }
 0x156   : > { %8537 = vst [vmem:[#allocation48_spill] sm:$0xff] %v6299_v51  ;;  %4723 = vmatmul.msk.f32.gmra.mxu0 %vm349_vm0, %v5735_v42 }
 0x157   : > { %8538 = vst [vmem:[#allocation49_spill] sm:$0xff] %v6301_v50  ;;  %4735 = vmatmul.msk.f32.gmra.mxu1 %vm349_vm0, %v5735_v42 }
 0x158   : > { %4747 = vmatmul.msk.f32.gmra.mxu2 %vm349_vm0, %v5735_v42 }
 0x159   : > { %4759 = vmatmul.msk.f32.gmra.mxu3 %vm349_vm0, %v5735_v42 }
 0x15b   : > { %v6315_v15 = vpop.f32.mrf.mxu2  ;;  %v6321_v50 = vpop.f32.mrf.mxu0 }
 0x15c   : > { %8539 = vst [vmem:[#allocation50_spill] sm:$0xff] %v6315_v15  ;;  %v6317_v14 = vpop.f32.mrf.mxu3  ;;  %v6323_v51 = vpop.f32.mrf.mxu1  ;;  %v314_v15 = vld [vmem:[%s5601_s30 + $0x368] sm:$0xff] }
 0x15d   : > { %8540 = vst [vmem:[#allocation51_spill] sm:$0xff] %v6317_v14  ;;  %v310_v14 = vld [vmem:[%s5601_s30 + $0x348] sm:$0xff]  ;;  %4847 = vmatpush.xpose.msk.msra.mxu3 %vm349_vm0, %v314_v15 }
 0x15e   : > { %8541 = vst [vmem:[#allocation52_spill] sm:$0xff] %v6321_v50  ;;  %4724 = vmatmul.msk.f32.gmra.mxu0 %vm349_vm0, %v5753_v47  ;;  %4835 = vmatpush.xpose.msk.msra.mxu2 %vm349_vm0, %v310_v14 }
 0x15f   : > { %8542 = vst [vmem:[#allocation53_spill] sm:$0xff] %v6323_v51  ;;  %4736 = vmatmul.msk.f32.gmra.mxu1 %vm349_vm0, %v5753_v47 }
 0x160   : > { %4748 = vmatmul.msk.f32.gmra.mxu2 %vm349_vm0, %v5753_v47 }
 0x161   : > { %4760 = vmatmul.msk.f32.gmra.mxu3 %vm349_vm0, %v5753_v47 }
 0x163   : > { %v6335_v3 = vpop.f32.mrf.mxu2  ;;  %v6339_v45 = vpop.f32.mrf.mxu0 }
 0x164   : > { %8543 = vst [vmem:[#allocation54_spill] sm:$0xff] %v6335_v3  ;;  %v6337_v2 = vpop.f32.mrf.mxu3  ;;  %v6341_v46 = vpop.f32.mrf.mxu1  ;;  %v306_v3 = vld [vmem:[%s5601_s30 + $0x328] sm:$0xff] }
 0x165   : > { %8544 = vst [vmem:[#allocation55_spill] sm:$0xff] %v6337_v2  ;;  %v302_v2 = vld [vmem:[%s5601_s30 + $0x308] sm:$0xff]  ;;  %4823 = vmatpush.xpose.msk.msra.mxu1 %vm349_vm0, %v306_v3 }
 0x166   : > { %8545 = vst [vmem:[#allocation56_spill] sm:$0xff] %v6339_v45  ;;  %4765 = vmatmul.msk.f32.vlgmr.msrb.gmra.mxu0 %vm349_vm0, %v5635_v18 }
 0x167   : > { %8546 = vst [vmem:[#allocation57_spill] sm:$0xff] %v6341_v46  ;;  %4777 = vmatmul.msk.f32.vlgmr.msrb.gmra.mxu1 %vm349_vm0, %v5635_v18  ;;  %4811 = vmatpush.xpose.msk.msra.mxu0 %vm349_vm0, %v302_v2  ;;  %v313_v2 = vld [vmem:[%s5601_s30 + $0x360] sm:$0xff] }
 0x168   : > { %4789 = vmatmul.msk.f32.vlgmr.msrb.gmra.mxu2 %vm349_vm0, %v5635_v18  ;;  %4848 = vmatpush.xpose.msk.msra.mxu3 %vm349_vm0, %v313_v2 }
 0x169   : > { %4801 = vmatmul.msk.f32.vlgmr.msrb.gmra.mxu3 %vm349_vm0, %v5635_v18 }
 0x16b   : > { %v6355_v45 = vpop.f32.mrf.mxu2  ;;  %v6361_v51 = vpop.f32.mrf.mxu0 }
 0x16c   : > { %8547 = vst [vmem:[#allocation58_spill] sm:$0xff] %v6355_v45  ;;  %v6357_v46 = vpop.f32.mrf.mxu3  ;;  %v6363_v50 = vpop.f32.mrf.mxu1  ;;  %v305_v45 = vld [vmem:[%s5601_s30 + $0x320] sm:$0xff] }
 0x16d   : > { %8548 = vst [vmem:[#allocation59_spill] sm:$0xff] %v6357_v46  ;;  %v301_v46 = vld [vmem:[%s5601_s30 + $0x300] sm:$0xff]  ;;  %4824 = vmatpush.xpose.msk.msra.mxu1 %vm349_vm0, %v305_v45  ;;  %v319_v45 = vld [vmem:[%s5601_s30 + $0x390] sm:$0xff] }
 0x16e   : > { %8549 = vst [vmem:[#allocation60_spill] sm:$0xff] %v6361_v51  ;;  %4766 = vmatmul.msk.f32.gmra.mxu0 %vm349_vm0, %v5661_v27 }
 0x16f   : > { %8550 = vst [vmem:[#allocation61_spill] sm:$0xff] %v6363_v50  ;;  %4778 = vmatmul.msk.f32.gmra.mxu1 %vm349_vm0, %v5661_v27  ;;  %4812 = vmatpush.xpose.msk.msra.mxu0 %vm349_vm0, %v301_v46 }
 0x170   : > { %4790 = vmatmul.msk.f32.gmra.mxu2 %vm349_vm0, %v5661_v27 }
 0x171   : > { %4802 = vmatmul.msk.f32.gmra.mxu3 %vm349_vm0, %v5661_v27  ;;  %v309_v27 = vld [vmem:[%s5601_s30 + $0x340] sm:$0xff] }
 0x172   : > { %4836 = vmatpush.xpose.msk.msra.mxu2 %vm349_vm0, %v309_v27  ;;  %v332_v27 = vld [vmem:[%s5601_s30 + $0x3f8] sm:$0xff] }
 0x173   : > { %v6375_v18 = vpop.f32.mrf.mxu2  ;;  %v6379_v15 = vpop.f32.mrf.mxu0  ;;  %4893 = vmatpush.xpose.msk.msrb.mxu3 %vm349_vm0, %v332_v27  ;;  %v322_v27 = vld [vmem:[%s5601_s30 + $0x3a8] sm:$0xff] }
 0x174   : > { %8551 = vst [vmem:[#allocation62_spill] sm:$0xff] %v6375_v18  ;;  %v6377_v14 = vpop.f32.mrf.mxu3  ;;  %v6381_v3 = vpop.f32.mrf.mxu1  ;;  %v324_v18 = vld [vmem:[%s5601_s30 + $0x3b8] sm:$0xff] }
 0x175   : > { %8552 = vst [vmem:[#allocation63_spill] sm:$0xff] %v6377_v14  ;;  %v320_v14 = vld [vmem:[%s5601_s30 + $0x398] sm:$0xff]  ;;  %4869 = vmatpush.xpose.msk.msrb.mxu1 %vm349_vm0, %v324_v18  ;;  %v327_v18 = vld [vmem:[%s5601_s30 + $0x3d0] sm:$0xff] }
 0x176   : > { %8553 = vst [vmem:[#allocation64_spill] sm:$0xff] %v6379_v15  ;;  %4767 = vmatmul.msk.f32.gmra.mxu0 %vm349_vm0, %v5679_v30  ;;  %v326_v15 = vld [vmem:[%s5601_s30 + $0x3c8] sm:$0xff] }
 0x177   : > { %8554 = vst [vmem:[#allocation65_spill] sm:$0xff] %v6381_v3  ;;  %4779 = vmatmul.msk.f32.gmra.mxu1 %vm349_vm0, %v5679_v30  ;;  %4857 = vmatpush.xpose.msk.msrb.mxu0 %vm349_vm0, %v320_v14  ;;  %v331_v14 = vld [vmem:[%s5601_s30 + $0x3f0] sm:$0xff] }
 0x178   : > { %4791 = vmatmul.msk.f32.gmra.mxu2 %vm349_vm0, %v5679_v30  ;;  %4894 = vmatpush.xpose.msk.msrb.mxu3 %vm349_vm0, %v331_v14  ;;  %v325_v14 = vld [vmem:[%s5601_s30 + $0x3c0] sm:$0xff] }
 0x179   : > { %4803 = vmatmul.msk.f32.gmra.mxu3 %vm349_vm0, %v5679_v30  ;;  %v328_v30 = vld [vmem:[%s5601_s30 + $0x3d8] sm:$0xff] }
 0x17a   : > { %4881 = vmatpush.xpose.msk.msrb.mxu2 %vm349_vm0, %v328_v30  ;;  %v318_v30 = vld [vmem:[%s5601_s30 + $0x388] sm:$0xff] }
 0x17b   : > { %v6402_v50 = vpop.f32.mrf.mxu2  ;;  %v6409_v2 = vpop.f32.mrf.mxu0  ;;  %4858 = vmatpush.xpose.msk.msrb.mxu0 %vm349_vm0, %v319_v45 }
 0x17c   : > { %8555 = vst [vmem:[#allocation66_spill] sm:$0xff] %v6402_v50  ;;  %v6404_v51 = vpop.f32.mrf.mxu3  ;;  %v6411_v46 = vpop.f32.mrf.mxu1  ;;  %v323_v50 = vld [vmem:[%s5601_s30 + $0x3b0] sm:$0xff] }
 0x17d   : > { %8556 = vst [vmem:[#allocation67_spill] sm:$0xff] %v6404_v51  ;;  %4870 = vmatpush.xpose.msk.msrb.mxu1 %vm349_vm0, %v323_v50  ;;  %v317_v50 = vld [vmem:[%s5601_s30 + $0x380] sm:$0xff] }
 0x17e   : > { %8557 = vst [vmem:[#allocation68_spill] sm:$0xff] %v6409_v2  ;;  %4768 = vmatmul.msk.f32.gmra.mxu0 %vm349_vm0, %v5697_v35  ;;  %4882 = vmatpush.xpose.msk.msrb.mxu2 %vm349_vm0, %v327_v18  ;;  %v321_v18 = vld [vmem:[%s5601_s30 + $0x3a0] sm:$0xff] }
 0x17f   : > { %8558 = vst [vmem:[#allocation69_spill] sm:$0xff] %v6411_v46  ;;  %4780 = vmatmul.msk.f32.gmra.mxu1 %vm349_vm0, %v5697_v35  ;;  %4859 = vmatpush.xpose.msk.msrb.mxu0 %vm349_vm0, %v318_v30 }
 0x180   : > { %4792 = vmatmul.msk.f32.gmra.mxu2 %vm349_vm0, %v5697_v35 }
 0x181   : > { %4804 = vmatmul.msk.f32.gmra.mxu3 %vm349_vm0, %v5697_v35  ;;  %v330_v35 = vld [vmem:[%s5601_s30 + $0x3e8] sm:$0xff]  ;;  %4871 = vmatpush.xpose.msk.msrb.mxu1 %vm349_vm0, %v322_v27 }
 0x182   : > { %4883 = vmatpush.xpose.msk.msrb.mxu2 %vm349_vm0, %v326_v15  ;;  %4895 = vmatpush.xpose.msk.msrb.mxu3 %vm349_vm0, %v330_v35 }
 0x183   : > { %v6433_v51 = vpop.f32.mrf.mxu2  ;;  %v6439_v46 = vpop.f32.mrf.mxu0  ;;  %4860 = vmatpush.xpose.msk.msrb.mxu0 %vm349_vm0, %v317_v50 }
 0x184   : > { %8559 = vst [vmem:[#allocation70_spill] sm:$0xff] %v6433_v51  ;;  %v6435_v3 = vpop.f32.mrf.mxu3  ;;  %v6441_v45 = vpop.f32.mrf.mxu1 }
 0x185   : > { %8560 = vst [vmem:[#allocation71_spill] sm:$0xff] %v6435_v3  ;;  %v329_v3 = vld [vmem:[%s5601_s30 + $0x3e0] sm:$0xff]  ;;  %4872 = vmatpush.xpose.msk.msrb.mxu1 %vm349_vm0, %v321_v18 }
 0x186   : > { %8561 = vst [vmem:[#allocation72_spill] sm:$0xff] %v6439_v46  ;;  %4769 = vmatmul.msk.f32.gmra.mxu0 %vm349_vm0, %v5707_v36  ;;  %4884 = vmatpush.xpose.msk.msrb.mxu2 %vm349_vm0, %v325_v14  ;;  %v6519_v46 = vld [vmem:[#allocation2] sm:$0xff] }
 0x187   : > { %8562 = vst [vmem:[#allocation73_spill] sm:$0xff] %v6441_v45  ;;  %4781 = vmatmul.msk.f32.gmra.mxu1 %vm349_vm0, %v5707_v36  ;;  %4896 = vmatpush.xpose.msk.msrb.mxu3 %vm349_vm0, %v329_v3 }
 0x188   : > { %4793 = vmatmul.msk.f32.gmra.mxu2 %vm349_vm0, %v5707_v36 }
 0x189   : > { %4805 = vmatmul.msk.f32.gmra.mxu3 %vm349_vm0, %v5707_v36 }
 0x18b   : > { %v6463_v15 = vpop.f32.mrf.mxu2  ;;  %v6467_v27 = vpop.f32.mrf.mxu0 }
 0x18c   : > { %8563 = vst [vmem:[#allocation74_spill] sm:$0xff] %v6463_v15  ;;  %v6465_v30 = vpop.f32.mrf.mxu3  ;;  %v6469_v35 = vpop.f32.mrf.mxu1 }
 0x18d   : > { %8564 = vst [vmem:[#allocation75_spill] sm:$0xff] %v6465_v30 }
 0x18e   : > { %4770 = vmatmul.msk.f32.gmra.mxu0 %vm349_vm0, %v5725_v41 }
 0x18f   : > { %4782 = vmatmul.msk.f32.gmra.mxu1 %vm349_vm0, %v5725_v41 }
 0x190   : > { %4794 = vmatmul.msk.f32.gmra.mxu2 %vm349_vm0, %v5725_v41 }
 0x191   : > { %4806 = vmatmul.msk.f32.gmra.mxu3 %vm349_vm0, %v5725_v41 }
 0x193   : > { %v6479_v36 = vpop.f32.mrf.mxu2  ;;  %v6483_v50 = vpop.f32.mrf.mxu0 }
 0x194   : > { %v6481_v3 = vpop.f32.mrf.mxu3  ;;  %v6485_v18 = vpop.f32.mrf.mxu1 }
 0x195   : > { %8565 = vst [vmem:[#allocation76_spill] sm:$0xff] %v6481_v3 }
 0x196   : > { %4771 = vmatmul.msk.f32.gmra.mxu0 %vm349_vm0, %v5735_v42 }
 0x197   : > { %4783 = vmatmul.msk.f32.gmra.mxu1 %vm349_vm0, %v5735_v42 }
 0x198   : > { %4795 = vmatmul.msk.f32.gmra.mxu2 %vm349_vm0, %v5735_v42 }
 0x199   : > { %4807 = vmatmul.msk.f32.gmra.mxu3 %vm349_vm0, %v5735_v42 }
 0x19b   : > { %v6495_v41 = vpop.f32.mrf.mxu2  ;;  %v6499_v51 = vpop.f32.mrf.mxu0 }
 0x19c   : > { %v6497_v14 = vpop.f32.mrf.mxu3  ;;  %v6501_v2 = vpop.f32.mrf.mxu1 }
 0x19e   : > { %4772 = vmatmul.msk.f32.gmra.mxu0 %vm349_vm0, %v5753_v47 }
 0x19f   : > { %4784 = vmatmul.msk.f32.gmra.mxu1 %vm349_vm0, %v5753_v47 }
 0x1a0   : > { %4796 = vmatmul.msk.f32.gmra.mxu2 %vm349_vm0, %v5753_v47 }
 0x1a1   : > { %4808 = vmatmul.msk.f32.gmra.mxu3 %vm349_vm0, %v5753_v47 }
 0x1a3   : > { %v6511_v42 = vpop.f32.mrf.mxu2  ;;  %v6515_v15 = vpop.f32.mrf.mxu0 }
 0x1a4   : > { %v6513_v30 = vpop.f32.mrf.mxu3  ;;  %8566 = vst [vmem:[#allocation77_spill] sm:$0xff] %v6515_v15  ;;  %v6517_v45 = vpop.f32.mrf.mxu1 }
 0x1a5   : > { %8567 = vst [vmem:[#allocation78_spill] sm:$0xff] %v6517_v45 }
 0x1a6   : > { %4813 = vmatmul.msk.f32.vlgmr.msra.gmra.mxu0 %vm349_vm0, %v6519_v46 }
 0x1a7   : > { %4825 = vmatmul.msk.f32.vlgmr.msra.gmra.mxu1 %vm349_vm0, %v6519_v46  ;;  %4905 = vmatpush.xpose.msk.msra.mxu0 %vm349_vm0, %v6001_v52  ;;  %v6553_v52 = vld [vmem:[#allocation2 + $0x8] sm:$0xff] }
 0x1a8   : > { %4837 = vmatmul.msk.f32.vlgmr.msra.gmra.mxu2 %vm349_vm0, %v6519_v46  ;;  %4921 = vmatpush.xpose.msk.msra.mxu1 %vm349_vm0, %v6003_v53 }
 0x1a9   : > { %4849 = vmatmul.msk.f32.vlgmr.msra.gmra.mxu3 %vm349_vm0, %v6519_v46  ;;  %4937 = vmatpush.xpose.msk.msra.mxu2 %vm349_vm0, %v6015_v54  ;;  %v6709_v54 = vld [vmem:[#allocation2 + $0x38] sm:$0xff] }
 0x1aa   : > { %4953 = vmatpush.xpose.msk.msra.mxu3 %vm349_vm0, %v6017_v55 }
 0x1ab   : > { %v6537_v47 = vpop.f32.mrf.mxu2  ;;  %v6541_v15 = vpop.f32.mrf.mxu0  ;;  %4906 = vmatpush.xpose.msk.msra.mxu0 %vm349_vm0, %v5979_v43 }
 0x1ac   : > { %8568 = vst [vmem:[#allocation79_spill] sm:$0xff] %v6537_v47  ;;  %v6539_v45 = vpop.f32.mrf.mxu3  ;;  %v6543_v3 = vpop.f32.mrf.mxu1  ;;  %4922 = vmatpush.xpose.msk.msra.mxu1 %vm349_vm0, %v5981_v44 }
 0x1ad   : > { %8569 = vst [vmem:[#allocation80_spill] sm:$0xff] %v6539_v45  ;;  %4938 = vmatpush.xpose.msk.msra.mxu2 %vm349_vm0, %v5995_v48 }
 0x1ae   : > { %8570 = vst [vmem:[#allocation81_spill] sm:$0xff] %v6543_v3  ;;  %4954 = vmatpush.xpose.msk.msra.mxu3 %vm349_vm0, %v5997_v49  ;;  %4814 = vmatmul.msk.f32.gmra.mxu0 %vm349_vm0, %v6553_v52 }
 0x1af   : > { %4826 = vmatmul.msk.f32.gmra.mxu1 %vm349_vm0, %v6553_v52  ;;  %4907 = vmatpush.xpose.msk.msra.mxu0 %vm349_vm0, %v5961_v37  ;;  %v6587_v37 = vld [vmem:[#allocation2 + $0x10] sm:$0xff] }
 0x1b0   : > { %4838 = vmatmul.msk.f32.gmra.mxu2 %vm349_vm0, %v6553_v52  ;;  %4923 = vmatpush.xpose.msk.msra.mxu1 %vm349_vm0, %v5963_v38 }
 0x1b1   : > { %4850 = vmatmul.msk.f32.gmra.mxu3 %vm349_vm0, %v6553_v52  ;;  %4939 = vmatpush.xpose.msk.msra.mxu2 %vm349_vm0, %v5975_v39 }
 0x1b2   : > { %4955 = vmatpush.xpose.msk.msra.mxu3 %vm349_vm0, %v5977_v40 }
 0x1b3   : > { %v6571_v43 = vpop.f32.mrf.mxu2  ;;  %v6575_v48 = vpop.f32.mrf.mxu0  ;;  %4908 = vmatpush.xpose.msk.msra.mxu0 %vm349_vm0, %v5939_v25 }
 0x1b4   : > { %8571 = vst [vmem:[#allocation82_spill] sm:$0xff] %v6571_v43  ;;  %v6573_v44 = vpop.f32.mrf.mxu3  ;;  %v6577_v49 = vpop.f32.mrf.mxu1  ;;  %4924 = vmatpush.xpose.msk.msra.mxu1 %vm349_vm0, %v5941_v26 }
 0x1b5   : > { %8572 = vst [vmem:[#allocation83_spill] sm:$0xff] %v6573_v44  ;;  %4940 = vmatpush.xpose.msk.msra.mxu2 %vm349_vm0, %v5955_v31 }
 0x1b6   : > { %4956 = vmatpush.xpose.msk.msra.mxu3 %vm349_vm0, %v5957_v32  ;;  %4815 = vmatmul.msk.f32.gmra.mxu0 %vm349_vm0, %v6587_v37 }
 0x1b7   : > { %4827 = vmatmul.msk.f32.gmra.mxu1 %vm349_vm0, %v6587_v37  ;;  %4909 = vmatpush.xpose.msk.msra.mxu0 %vm349_vm0, %v5921_v21  ;;  %v6621_v21 = vld [vmem:[#allocation2 + $0x18] sm:$0xff] }
 0x1b8   : > { %4839 = vmatmul.msk.f32.gmra.mxu2 %vm349_vm0, %v6587_v37  ;;  %4925 = vmatpush.xpose.msk.msra.mxu1 %vm349_vm0, %v5923_v22 }
 0x1b9   : > { %4851 = vmatmul.msk.f32.gmra.mxu3 %vm349_vm0, %v6587_v37  ;;  %4941 = vmatpush.xpose.msk.msra.mxu2 %vm349_vm0, %v5935_v23 }
 0x1ba   : > { %4957 = vmatpush.xpose.msk.msra.mxu3 %vm349_vm0, %v5937_v24  ;;  %v6691_v24 = vld [vmem:[#allocation2 + $0x30] sm:$0xff] }
 0x1bb   : > { %v6605_v25 = vpop.f32.mrf.mxu2  ;;  %v6609_v31 = vpop.f32.mrf.mxu0  ;;  %4910 = vmatpush.xpose.msk.msra.mxu0 %vm349_vm0, %v5899_v12 }
 0x1bc   : > { %v6607_v26 = vpop.f32.mrf.mxu3  ;;  %v6611_v32 = vpop.f32.mrf.mxu1  ;;  %4926 = vmatpush.xpose.msk.msra.mxu1 %vm349_vm0, %v5901_v13 }
 0x1bd   : > { %4942 = vmatpush.xpose.msk.msra.mxu2 %vm349_vm0, %v5915_v16 }
 0x1be   : > { %4958 = vmatpush.xpose.msk.msra.mxu3 %vm349_vm0, %v5917_v17  ;;  %4816 = vmatmul.msk.f32.gmra.mxu0 %vm349_vm0, %v6621_v21 }
 0x1bf   : > { %4828 = vmatmul.msk.f32.gmra.mxu1 %vm349_vm0, %v6621_v21  ;;  %4911 = vmatpush.xpose.msk.msra.mxu0 %vm349_vm0, %v5881_v8  ;;  %v6655_v8 = vld [vmem:[#allocation2 + $0x20] sm:$0xff] }
 0x1c0   : > { %4840 = vmatmul.msk.f32.gmra.mxu2 %vm349_vm0, %v6621_v21  ;;  %4927 = vmatpush.xpose.msk.msra.mxu1 %vm349_vm0, %v5883_v9  ;;  %v6673_v9 = vld [vmem:[#allocation2 + $0x28] sm:$0xff] }
 0x1c1   : > { %4852 = vmatmul.msk.f32.gmra.mxu3 %vm349_vm0, %v6621_v21  ;;  %4943 = vmatpush.xpose.msk.msra.mxu2 %vm349_vm0, %v5895_v10 }
 0x1c2   : > { %4959 = vmatpush.xpose.msk.msra.mxu3 %vm349_vm0, %v5897_v11 }
 0x1c3   : > { %v6639_v12 = vpop.f32.mrf.mxu2  ;;  %v6643_v16 = vpop.f32.mrf.mxu0  ;;  %4912 = vmatpush.xpose.msk.msra.mxu0 %vm349_vm0, %v5859_v0 }
 0x1c4   : > { %v6641_v13 = vpop.f32.mrf.mxu3  ;;  %v6645_v17 = vpop.f32.mrf.mxu1  ;;  %4928 = vmatpush.xpose.msk.msra.mxu1 %vm349_vm0, %v5861_v1 }
 0x1c5   : > { %4944 = vmatpush.xpose.msk.msra.mxu2 %vm349_vm0, %v5875_v4 }
 0x1c6   : > { %4960 = vmatpush.xpose.msk.msra.mxu3 %vm349_vm0, %v5877_v5  ;;  %4817 = vmatmul.msk.f32.gmra.mxu0 %vm349_vm0, %v6655_v8 }
 0x1c7   : > { %4829 = vmatmul.msk.f32.gmra.mxu1 %vm349_vm0, %v6655_v8 }
 0x1c8   : > { %4841 = vmatmul.msk.f32.gmra.mxu2 %vm349_vm0, %v6655_v8 }
 0x1c9   : > { %4853 = vmatmul.msk.f32.gmra.mxu3 %vm349_vm0, %v6655_v8 }
 0x1cb   : > { %v6665_v0 = vpop.f32.mrf.mxu2  ;;  %v6669_v4 = vpop.f32.mrf.mxu0 }
 0x1cc   : > { %v6667_v1 = vpop.f32.mrf.mxu3  ;;  %v6671_v5 = vpop.f32.mrf.mxu1 }
 0x1ce   : > { %4818 = vmatmul.msk.f32.gmra.mxu0 %vm349_vm0, %v6673_v9 }
 0x1cf   : > { %4830 = vmatmul.msk.f32.gmra.mxu1 %vm349_vm0, %v6673_v9 }
 0x1d0   : > { %4842 = vmatmul.msk.f32.gmra.mxu2 %vm349_vm0, %v6673_v9 }
 0x1d1   : > { %4854 = vmatmul.msk.f32.gmra.mxu3 %vm349_vm0, %v6673_v9 }
 0x1d3   : > { %v6683_v10 = vpop.f32.mrf.mxu2  ;;  %v6687_v22 = vpop.f32.mrf.mxu0 }
 0x1d4   : > { %v6685_v11 = vpop.f32.mrf.mxu3  ;;  %v6689_v23 = vpop.f32.mrf.mxu1 }
 0x1d6   : > { %4819 = vmatmul.msk.f32.gmra.mxu0 %vm349_vm0, %v6691_v24 }
 0x1d7   : > { %4831 = vmatmul.msk.f32.gmra.mxu1 %vm349_vm0, %v6691_v24 }
 0x1d8   : > { %4843 = vmatmul.msk.f32.gmra.mxu2 %vm349_vm0, %v6691_v24 }
 0x1d9   : > { %4855 = vmatmul.msk.f32.gmra.mxu3 %vm349_vm0, %v6691_v24 }
 0x1db   : > { %v6701_v38 = vpop.f32.mrf.mxu2  ;;  %v6705_v40 = vpop.f32.mrf.mxu0 }
 0x1dc   : > { %v6703_v39 = vpop.f32.mrf.mxu3  ;;  %v6707_v53 = vpop.f32.mrf.mxu1 }
 0x1de   : > { %4820 = vmatmul.msk.f32.gmra.mxu0 %vm349_vm0, %v6709_v54 }
 0x1df   : > { %4832 = vmatmul.msk.f32.gmra.mxu1 %vm349_vm0, %v6709_v54 }
 0x1e0   : > { %4844 = vmatmul.msk.f32.gmra.mxu2 %vm349_vm0, %v6709_v54 }
 0x1e1   : > { %4856 = vmatmul.msk.f32.gmra.mxu3 %vm349_vm0, %v6709_v54 }
 0x1e3   : > { %v6719_v55 = vpop.f32.mrf.mxu2  ;;  %v6723_v47 = vpop.f32.mrf.mxu0 }
 0x1e4   : > { %v6721_v45 = vpop.f32.mrf.mxu3  ;;  %8573 = vst [vmem:[#allocation84_spill] sm:$0xff] %v6723_v47  ;;  %v6725_v44 = vpop.f32.mrf.mxu1 }
 0x1e5   : > { %8574 = vst [vmem:[#allocation85_spill] sm:$0xff] %v6725_v44 }
 0x1e6   : > { %4861 = vmatmul.msk.f32.vlgmr.msrb.gmra.mxu0 %vm349_vm0, %v6519_v46 }
 0x1e7   : > { %4873 = vmatmul.msk.f32.vlgmr.msrb.gmra.mxu1 %vm349_vm0, %v6519_v46  ;;  %4969 = vmatpush.xpose.msk.msrb.mxu0 %vm349_vm0, %v6161_v29 }
 0x1e8   : > { %4885 = vmatmul.msk.f32.vlgmr.msrb.gmra.mxu2 %vm349_vm0, %v6519_v46  ;;  %4985 = vmatpush.xpose.msk.msrb.mxu1 %vm349_vm0, %v6163_v28 }
 0x1e9   : > { %4897 = vmatmul.msk.f32.vlgmr.msrb.gmra.mxu3 %vm349_vm0, %v6519_v46  ;;  %5001 = vmatpush.xpose.msk.msrb.mxu2 %vm349_vm0, %v6175_v56  ;;  %v8593_v56 = vld [vmem:[#allocation18_spill] sm:$0xff]  ;;  %v8595_v46 = vld [vmem:[#allocation12_spill] sm:$0xff] }
 0x1ea   : > { %5017 = vmatpush.xpose.msk.msrb.mxu3 %vm349_vm0, %v6177_v57  ;;  %v8594_v57 = vld [vmem:[#allocation19_spill] sm:$0xff] }
 0x1eb   : > { %v6743_v44 = vpop.f32.mrf.mxu2  ;;  %v6747_v43 = vpop.f32.mrf.mxu0  ;;  %4970 = vmatpush.xpose.msk.msrb.mxu0 %vm349_vm0, %v6139_v33  ;;  %v8591_v33 = vld [vmem:[#allocation16_spill] sm:$0xff] }
 0x1ec   : > { %8575 = vst [vmem:[#allocation86_spill] sm:$0xff] %v6743_v44  ;;  %v6745_v47 = vpop.f32.mrf.mxu3  ;;  %v6749_v3 = vpop.f32.mrf.mxu1  ;;  %4986 = vmatpush.xpose.msk.msrb.mxu1 %vm349_vm0, %v6141_v34  ;;  %v8592_v34 = vld [vmem:[#allocation17_spill] sm:$0xff] }
 0x1ed   : > { %8576 = vst [vmem:[#allocation87_spill] sm:$0xff] %v6745_v47  ;;  %5002 = vmatpush.xpose.msk.msrb.mxu2 %vm349_vm0, %v6155_v7 }
 0x1ee   : > { %8577 = vst [vmem:[#allocation88_spill] sm:$0xff] %v6747_v43  ;;  %5018 = vmatpush.xpose.msk.msrb.mxu3 %vm349_vm0, %v6157_v6  ;;  %4862 = vmatmul.msk.f32.gmra.mxu0 %vm349_vm0, %v6553_v52 }
 0x1ef   : > { %8578 = vst [vmem:[#allocation89_spill] sm:$0xff] %v6749_v3  ;;  %4874 = vmatmul.msk.f32.gmra.mxu1 %vm349_vm0, %v6553_v52  ;;  %4971 = vmatpush.xpose.msk.msrb.mxu0 %vm349_vm0, %v6121_v61  ;;  %v8584_v61 = vld [vmem:[#allocation21_spill] sm:$0xff] }
 0x1f0   : > { %4886 = vmatmul.msk.f32.gmra.mxu2 %vm349_vm0, %v6553_v52  ;;  %4987 = vmatpush.xpose.msk.msrb.mxu1 %vm349_vm0, %v6123_v60  ;;  %v8583_v60 = vld [vmem:[#allocation20_spill] sm:$0xff] }
 0x1f1   : > { %4898 = vmatmul.msk.f32.gmra.mxu3 %vm349_vm0, %v6553_v52  ;;  %5003 = vmatpush.xpose.msk.msrb.mxu2 %vm349_vm0, %v6135_v62  ;;  %v8596_v52 = vld [vmem:[#allocation13_spill] sm:$0xff] }
 0x1f2   : > { %5019 = vmatpush.xpose.msk.msrb.mxu3 %vm349_vm0, %v6137_v63 }
 0x1f3   : > { %v6775_v6 = vpop.f32.mrf.mxu2  ;;  %v6779_v28 = vpop.f32.mrf.mxu0  ;;  %4972 = vmatpush.xpose.msk.msrb.mxu0 %vm349_vm0, %v6099_v58  ;;  %v8585_v58 = vld [vmem:[#allocation22_spill] sm:$0xff] }
 0x1f4   : > { %8579 = vst [vmem:[#allocation90_spill] sm:$0xff] %v6775_v6  ;;  %v6777_v7 = vpop.f32.mrf.mxu3  ;;  %v6781_v29 = vpop.f32.mrf.mxu1  ;;  %4988 = vmatpush.xpose.msk.msrb.mxu1 %vm349_vm0, %v6101_v59  ;;  %v8586_v59 = vld [vmem:[#allocation23_spill] sm:$0xff]  ;;  %v6915_v6 = vld [vmem:[#allocation4] sm:$0xff] }
 0x1f5   : > { %8580 = vst [vmem:[#allocation91_spill] sm:$0xff] %v6777_v7  ;;  %5004 = vmatpush.xpose.msk.msrb.mxu2 %vm349_vm0, %v6115_v19 }
 0x1f6   : > { %8581 = vst [vmem:[#allocation92_spill] sm:$0xff] %v6779_v28  ;;  %5020 = vmatpush.xpose.msk.msrb.mxu3 %vm349_vm0, %v6117_v20  ;;  %4863 = vmatmul.msk.f32.gmra.mxu0 %vm349_vm0, %v6587_v37  ;;  %v6941_v28 = vld [vmem:[#allocation4 + $0x8] sm:$0xff] }
 0x1f7   : > { %8582 = vst [vmem:[#allocation93_spill] sm:$0xff] %v6781_v29  ;;  %4875 = vmatmul.msk.f32.gmra.mxu1 %vm349_vm0, %v6587_v37  ;;  %4973 = vmatpush.xpose.msk.msrb.mxu0 %vm349_vm0, %v8583_v60  ;;  %v8598_v60 = vld [vmem:[#allocation15_spill] sm:$0xff] }
 0x1f8   : > { %4887 = vmatmul.msk.f32.gmra.mxu2 %vm349_vm0, %v6587_v37  ;;  %4989 = vmatpush.xpose.msk.msrb.mxu1 %vm349_vm0, %v8584_v61 }
 0x1f9   : > { %4899 = vmatmul.msk.f32.gmra.mxu3 %vm349_vm0, %v6587_v37  ;;  %5005 = vmatpush.xpose.msk.msrb.mxu2 %vm349_vm0, %v8585_v58  ;;  %v8597_v37 = vld [vmem:[#allocation14_spill] sm:$0xff] }
 0x1fa   : > { %5021 = vmatpush.xpose.msk.msrb.mxu3 %vm349_vm0, %v8586_v59 }
 0x1fb   : > { %v6807_v19 = vpop.f32.mrf.mxu2  ;;  %v6811_v62 = vpop.f32.mrf.mxu0  ;;  %4974 = vmatpush.xpose.msk.msrb.mxu0 %vm349_vm0, %v8591_v33 }
 0x1fc   : > { %8587 = vst [vmem:[#allocation20_spill] sm:$0xff] %v6807_v19  ;;  %v6809_v20 = vpop.f32.mrf.mxu3  ;;  %v6813_v63 = vpop.f32.mrf.mxu1  ;;  %4990 = vmatpush.xpose.msk.msrb.mxu1 %vm349_vm0, %v8592_v34  ;;  %v8602_v34 = vld [vmem:[#allocation9_spill] sm:$0xff] }
 0x1fd   : > { %8588 = vst [vmem:[#allocation21_spill] sm:$0xff] %v6809_v20  ;;  %5006 = vmatpush.xpose.msk.msrb.mxu2 %vm349_vm0, %v8593_v56  ;;  %v8603_v56 = vld [vmem:[#allocation10_spill] sm:$0xff]  ;;  %v8609_v20 = vld [vmem:[#allocation53_spill] sm:$0xff] }
 0x1fe   : > { %8589 = vst [vmem:[#allocation22_spill] sm:$0xff] %v6811_v62  ;;  %5022 = vmatpush.xpose.msk.msrb.mxu3 %vm349_vm0, %v8594_v57  ;;  %4864 = vmatmul.msk.f32.gmra.mxu0 %vm349_vm0, %v6621_v21  ;;  %v8604_v57 = vld [vmem:[#allocation11_spill] sm:$0xff] }
 0x1ff   : > { %8590 = vst [vmem:[#allocation23_spill] sm:$0xff] %v6813_v63  ;;  %4876 = vmatmul.msk.f32.gmra.mxu1 %vm349_vm0, %v6621_v21  ;;  %4975 = vmatpush.xpose.msk.msrb.mxu0 %vm349_vm0, %v8595_v46 }
 0x200   : > { %4888 = vmatmul.msk.f32.gmra.mxu2 %vm349_vm0, %v6621_v21  ;;  %4991 = vmatpush.xpose.msk.msrb.mxu1 %vm349_vm0, %v8596_v52 }
 0x201   : > { %4900 = vmatmul.msk.f32.gmra.mxu3 %vm349_vm0, %v6621_v21  ;;  %5007 = vmatpush.xpose.msk.msrb.mxu2 %vm349_vm0, %v8597_v37  ;;  %v8601_v21 = vld [vmem:[#allocation8_spill] sm:$0xff] }
 0x202   : > { %5023 = vmatpush.xpose.msk.msrb.mxu3 %vm349_vm0, %v8598_v60 }
 0x203   : > { %v6839_v61 = vpop.f32.mrf.mxu2  ;;  %v6843_v59 = vpop.f32.mrf.mxu0  ;;  %4976 = vmatpush.xpose.msk.msrb.mxu0 %vm349_vm0, %v8601_v21 }
 0x204   : > { %8599 = vst [vmem:[#allocation16_spill] sm:$0xff] %v6839_v61  ;;  %v6841_v58 = vpop.f32.mrf.mxu3  ;;  %v6845_v33 = vpop.f32.mrf.mxu1  ;;  %4992 = vmatpush.xpose.msk.msrb.mxu1 %vm349_vm0, %v8602_v34 }
 0x205   : > { %8600 = vst [vmem:[#allocation17_spill] sm:$0xff] %v6841_v58  ;;  %5008 = vmatpush.xpose.msk.msrb.mxu2 %vm349_vm0, %v8603_v56 }
 0x206   : > { %5024 = vmatpush.xpose.msk.msrb.mxu3 %vm349_vm0, %v8604_v57  ;;  %4865 = vmatmul.msk.f32.gmra.mxu0 %vm349_vm0, %v6655_v8 }
 0x207   : > { %4877 = vmatmul.msk.f32.gmra.mxu1 %vm349_vm0, %v6655_v8 }
 0x208   : > { %4889 = vmatmul.msk.f32.gmra.mxu2 %vm349_vm0, %v6655_v8 }
 0x209   : > { %4901 = vmatmul.msk.f32.gmra.mxu3 %vm349_vm0, %v6655_v8 }
 0x20b   : > { %v6863_v46 = vpop.f32.mrf.mxu2  ;;  %v6867_v37 = vpop.f32.mrf.mxu0 }
 0x20c   : > { %v6865_v52 = vpop.f32.mrf.mxu3  ;;  %v6869_v60 = vpop.f32.mrf.mxu1 }
 0x20d   : > { %8605 = vst [vmem:[#allocation18_spill] sm:$0xff] %v6865_v52 }
 0x20e   : > { %4866 = vmatmul.msk.f32.gmra.mxu0 %vm349_vm0, %v6673_v9 }
 0x20f   : > { %4878 = vmatmul.msk.f32.gmra.mxu1 %vm349_vm0, %v6673_v9 }
 0x210   : > { %4890 = vmatmul.msk.f32.gmra.mxu2 %vm349_vm0, %v6673_v9 }
 0x211   : > { %4902 = vmatmul.msk.f32.gmra.mxu3 %vm349_vm0, %v6673_v9 }
 0x213   : > { %v6879_v8 = vpop.f32.mrf.mxu2  ;;  %v6883_v34 = vpop.f32.mrf.mxu0 }
 0x214   : > { %v6881_v21 = vpop.f32.mrf.mxu3  ;;  %v6885_v56 = vpop.f32.mrf.mxu1 }
 0x216   : > { %4867 = vmatmul.msk.f32.gmra.mxu0 %vm349_vm0, %v6691_v24 }
 0x217   : > { %4879 = vmatmul.msk.f32.gmra.mxu1 %vm349_vm0, %v6691_v24 }
 0x218   : > { %4891 = vmatmul.msk.f32.gmra.mxu2 %vm349_vm0, %v6691_v24 }
 0x219   : > { %4903 = vmatmul.msk.f32.gmra.mxu3 %vm349_vm0, %v6691_v24 }
 0x21b   : > { %v6895_v9 = vpop.f32.mrf.mxu2  ;;  %v6899_v47 = vpop.f32.mrf.mxu0 }
 0x21c   : > { %v6897_v57 = vpop.f32.mrf.mxu3  ;;  %v6901_v44 = vpop.f32.mrf.mxu1 }
 0x21e   : > { %4868 = vmatmul.msk.f32.gmra.mxu0 %vm349_vm0, %v6709_v54 }
 0x21f   : > { %4880 = vmatmul.msk.f32.gmra.mxu1 %vm349_vm0, %v6709_v54 }
 0x220   : > { %4892 = vmatmul.msk.f32.gmra.mxu2 %vm349_vm0, %v6709_v54 }
 0x221   : > { %4904 = vmatmul.msk.f32.gmra.mxu3 %vm349_vm0, %v6709_v54  ;;  %v8608_v54 = vld [vmem:[#allocation52_spill] sm:$0xff] }
 0x223   : > { %v6911_v24 = vpop.f32.mrf.mxu2  ;;  %v6917_v3 = vpop.f32.mrf.mxu0 }
 0x224   : > { %v6913_v7 = vpop.f32.mrf.mxu3  ;;  %8606 = vst [vmem:[#allocation19_spill] sm:$0xff] %v6917_v3  ;;  %v6919_v43 = vpop.f32.mrf.mxu1  ;;  %v8610_v3 = vld [vmem:[#allocation54_spill] sm:$0xff] }
 0x225   : > { %8607 = vst [vmem:[#allocation12_spill] sm:$0xff] %v6919_v43  ;;  %v8611_v43 = vld [vmem:[#allocation55_spill] sm:$0xff] }
 0x226   : > { %4913 = vmatmul.msk.f32.vlgmr.msra.gmra.mxu0 %vm349_vm0, %v6915_v6 }
 0x227   : > { %4929 = vmatmul.msk.f32.vlgmr.msra.gmra.mxu1 %vm349_vm0, %v6915_v6  ;;  %5033 = vmatpush.xpose.msk.msra.mxu0 %vm349_vm0, %v8608_v54  ;;  %v8616_v54 = vld [vmem:[#allocation48_spill] sm:$0xff] }
 0x228   : > { %4945 = vmatmul.msk.f32.vlgmr.msra.gmra.mxu2 %vm349_vm0, %v6915_v6  ;;  %5049 = vmatpush.xpose.msk.msra.mxu1 %vm349_vm0, %v8609_v20  ;;  %v8617_v20 = vld [vmem:[#allocation49_spill] sm:$0xff] }
 0x229   : > { %4961 = vmatmul.msk.f32.vlgmr.msra.gmra.mxu3 %vm349_vm0, %v6915_v6  ;;  %5065 = vmatpush.xpose.msk.msra.mxu2 %vm349_vm0, %v8610_v3  ;;  %v8618_v3 = vld [vmem:[#allocation50_spill] sm:$0xff] }
 0x22a   : > { %5081 = vmatpush.xpose.msk.msra.mxu3 %vm349_vm0, %v8611_v43  ;;  %v8619_v43 = vld [vmem:[#allocation51_spill] sm:$0xff] }
 0x22b   : > { %v6937_v19 = vpop.f32.mrf.mxu2  ;;  %v6943_v58 = vpop.f32.mrf.mxu0  ;;  %5034 = vmatpush.xpose.msk.msra.mxu0 %vm349_vm0, %v8616_v54  ;;  %v8620_v54 = vld [vmem:[#allocation44_spill] sm:$0xff] }
 0x22c   : > { %8612 = vst [vmem:[#allocation13_spill] sm:$0xff] %v6937_v19  ;;  %v6939_v29 = vpop.f32.mrf.mxu3  ;;  %v6945_v61 = vpop.f32.mrf.mxu1  ;;  %5050 = vmatpush.xpose.msk.msra.mxu1 %vm349_vm0, %v8617_v20  ;;  %v8621_v20 = vld [vmem:[#allocation45_spill] sm:$0xff] }
 0x22d   : > { %8613 = vst [vmem:[#allocation14_spill] sm:$0xff] %v6939_v29  ;;  %5066 = vmatpush.xpose.msk.msra.mxu2 %vm349_vm0, %v8618_v3  ;;  %v8622_v3 = vld [vmem:[#allocation46_spill] sm:$0xff] }
 0x22e   : > { %8614 = vst [vmem:[#allocation15_spill] sm:$0xff] %v6943_v58  ;;  %5082 = vmatpush.xpose.msk.msra.mxu3 %vm349_vm0, %v8619_v43  ;;  %4914 = vmatmul.msk.f32.gmra.mxu0 %vm349_vm0, %v6941_v28  ;;  %v8623_v43 = vld [vmem:[#allocation47_spill] sm:$0xff] }
 0x22f   : > { %8615 = vst [vmem:[#allocation8_spill] sm:$0xff] %v6945_v61  ;;  %4930 = vmatmul.msk.f32.gmra.mxu1 %vm349_vm0, %v6941_v28  ;;  %5035 = vmatpush.xpose.msk.msra.mxu0 %vm349_vm0, %v8620_v54  ;;  %v6975_v61 = vld [vmem:[#allocation4 + $0x10] sm:$0xff]  ;;  %v8628_v54 = vld [vmem:[#allocation40_spill] sm:$0xff] }
 0x230   : > { %4946 = vmatmul.msk.f32.gmra.mxu2 %vm349_vm0, %v6941_v28  ;;  %5051 = vmatpush.xpose.msk.msra.mxu1 %vm349_vm0, %v8621_v20  ;;  %v8629_v20 = vld [vmem:[#allocation41_spill] sm:$0xff] }
 0x231   : > { %4962 = vmatmul.msk.f32.gmra.mxu3 %vm349_vm0, %v6941_v28  ;;  %5067 = vmatpush.xpose.msk.msra.mxu2 %vm349_vm0, %v8622_v3  ;;  %v8630_v3 = vld [vmem:[#allocation42_spill] sm:$0xff] }
 0x232   : > { %5083 = vmatpush.xpose.msk.msra.mxu3 %vm349_vm0, %v8623_v43  ;;  %v8631_v43 = vld [vmem:[#allocation43_spill] sm:$0xff] }
 0x233   : > { %v6971_v29 = vpop.f32.mrf.mxu2  ;;  %v6977_v58 = vpop.f32.mrf.mxu0  ;;  %5036 = vmatpush.xpose.msk.msra.mxu0 %vm349_vm0, %v8628_v54  ;;  %v8632_v54 = vld [vmem:[#allocation36_spill] sm:$0xff] }
 0x234   : > { %8624 = vst [vmem:[#allocation9_spill] sm:$0xff] %v6971_v29  ;;  %v6973_v19 = vpop.f32.mrf.mxu3  ;;  %v6979_v63 = vpop.f32.mrf.mxu1  ;;  %5052 = vmatpush.xpose.msk.msra.mxu1 %vm349_vm0, %v8629_v20  ;;  %v8633_v20 = vld [vmem:[#allocation37_spill] sm:$0xff] }
 0x235   : > { %8625 = vst [vmem:[#allocation10_spill] sm:$0xff] %v6973_v19  ;;  %5068 = vmatpush.xpose.msk.msra.mxu2 %vm349_vm0, %v8630_v3  ;;  %v8634_v3 = vld [vmem:[#allocation38_spill] sm:$0xff] }
 0x236   : > { %8626 = vst [vmem:[#allocation11_spill] sm:$0xff] %v6977_v58  ;;  %5084 = vmatpush.xpose.msk.msra.mxu3 %vm349_vm0, %v8631_v43  ;;  %4915 = vmatmul.msk.f32.gmra.mxu0 %vm349_vm0, %v6975_v61  ;;  %v8635_v43 = vld [vmem:[#allocation39_spill] sm:$0xff] }
 0x237   : > { %8627 = vst [vmem:[#allocation52_spill] sm:$0xff] %v6979_v63  ;;  %4931 = vmatmul.msk.f32.gmra.mxu1 %vm349_vm0, %v6975_v61  ;;  %5037 = vmatpush.xpose.msk.msra.mxu0 %vm349_vm0, %v8632_v54  ;;  %v7009_v63 = vld [vmem:[#allocation4 + $0x18] sm:$0xff]  ;;  %v8640_v54 = vld [vmem:[#allocation32_spill] sm:$0xff] }
 0x238   : > { %4947 = vmatmul.msk.f32.gmra.mxu2 %vm349_vm0, %v6975_v61  ;;  %5053 = vmatpush.xpose.msk.msra.mxu1 %vm349_vm0, %v8633_v20  ;;  %v8641_v20 = vld [vmem:[#allocation33_spill] sm:$0xff] }
 0x239   : > { %4963 = vmatmul.msk.f32.gmra.mxu3 %vm349_vm0, %v6975_v61  ;;  %5069 = vmatpush.xpose.msk.msra.mxu2 %vm349_vm0, %v8634_v3  ;;  %v8642_v3 = vld [vmem:[#allocation34_spill] sm:$0xff] }
 0x23a   : > { %5085 = vmatpush.xpose.msk.msra.mxu3 %vm349_vm0, %v8635_v43  ;;  %v8643_v43 = vld [vmem:[#allocation35_spill] sm:$0xff] }
 0x23b   : > { %v7005_v19 = vpop.f32.mrf.mxu2  ;;  %v7011_v58 = vpop.f32.mrf.mxu0  ;;  %5038 = vmatpush.xpose.msk.msra.mxu0 %vm349_vm0, %v8640_v54  ;;  %v8644_v54 = vld [vmem:[#allocation28_spill] sm:$0xff] }
 0x23c   : > { %8636 = vst [vmem:[#allocation53_spill] sm:$0xff] %v7005_v19  ;;  %v7007_v29 = vpop.f32.mrf.mxu3  ;;  %v7013_v62 = vpop.f32.mrf.mxu1  ;;  %5054 = vmatpush.xpose.msk.msra.mxu1 %vm349_vm0, %v8641_v20  ;;  %v8645_v20 = vld [vmem:[#allocation29_spill] sm:$0xff] }
 0x23d   : > { %8637 = vst [vmem:[#allocation54_spill] sm:$0xff] %v7007_v29  ;;  %5070 = vmatpush.xpose.msk.msra.mxu2 %vm349_vm0, %v8642_v3  ;;  %v8646_v3 = vld [vmem:[#allocation30_spill] sm:$0xff] }
 0x23e   : > { %8638 = vst [vmem:[#allocation55_spill] sm:$0xff] %v7011_v58  ;;  %5086 = vmatpush.xpose.msk.msra.mxu3 %vm349_vm0, %v8643_v43  ;;  %4916 = vmatmul.msk.f32.gmra.mxu0 %vm349_vm0, %v7009_v63  ;;  %v8647_v43 = vld [vmem:[#allocation31_spill] sm:$0xff] }
 0x23f   : > { %8639 = vst [vmem:[#allocation48_spill] sm:$0xff] %v7013_v62  ;;  %4932 = vmatmul.msk.f32.gmra.mxu1 %vm349_vm0, %v7009_v63  ;;  %5039 = vmatpush.xpose.msk.msra.mxu0 %vm349_vm0, %v8644_v54  ;;  %v7043_v62 = vld [vmem:[#allocation4 + $0x20] sm:$0xff] }
 0x240   : > { %4948 = vmatmul.msk.f32.gmra.mxu2 %vm349_vm0, %v7009_v63  ;;  %5055 = vmatpush.xpose.msk.msra.mxu1 %vm349_vm0, %v8645_v20  ;;  %v8652_v54 = vld [vmem:[#allocation24_spill] sm:$0xff]  ;;  %v8653_v20 = vld [vmem:[#allocation25_spill] sm:$0xff] }
 0x241   : > { %4964 = vmatmul.msk.f32.gmra.mxu3 %vm349_vm0, %v7009_v63  ;;  %5071 = vmatpush.xpose.msk.msra.mxu2 %vm349_vm0, %v8646_v3  ;;  %v8654_v3 = vld [vmem:[#allocation26_spill] sm:$0xff] }
 0x242   : > { %5087 = vmatpush.xpose.msk.msra.mxu3 %vm349_vm0, %v8647_v43  ;;  %v8655_v43 = vld [vmem:[#allocation27_spill] sm:$0xff] }
 0x243   : > { %v7039_v29 = vpop.f32.mrf.mxu2  ;;  %v7045_v58 = vpop.f32.mrf.mxu0  ;;  %5040 = vmatpush.xpose.msk.msra.mxu0 %vm349_vm0, %v8652_v54 }
 0x244   : > { %8648 = vst [vmem:[#allocation49_spill] sm:$0xff] %v7039_v29  ;;  %v7041_v19 = vpop.f32.mrf.mxu3  ;;  %v7047_v52 = vpop.f32.mrf.mxu1  ;;  %5056 = vmatpush.xpose.msk.msra.mxu1 %vm349_vm0, %v8653_v20 }
 0x245   : > { %8649 = vst [vmem:[#allocation50_spill] sm:$0xff] %v7041_v19  ;;  %5072 = vmatpush.xpose.msk.msra.mxu2 %vm349_vm0, %v8654_v3  ;;  %v7069_v3 = vld [vmem:[#allocation4 + $0x28] sm:$0xff] }
 0x246   : > { %8650 = vst [vmem:[#allocation51_spill] sm:$0xff] %v7045_v58  ;;  %5088 = vmatpush.xpose.msk.msra.mxu3 %vm349_vm0, %v8655_v43  ;;  %4917 = vmatmul.msk.f32.gmra.mxu0 %vm349_vm0, %v7043_v62 }
 0x247   : > { %8651 = vst [vmem:[#allocation44_spill] sm:$0xff] %v7047_v52  ;;  %4933 = vmatmul.msk.f32.gmra.mxu1 %vm349_vm0, %v7043_v62 }
 0x248   : > { %4949 = vmatmul.msk.f32.gmra.mxu2 %vm349_vm0, %v7043_v62 }
 0x249   : > { %4965 = vmatmul.msk.f32.gmra.mxu3 %vm349_vm0, %v7043_v62 }
 0x24b   : > { %v7065_v54 = vpop.f32.mrf.mxu2  ;;  %v7071_v19 = vpop.f32.mrf.mxu0 }
 0x24c   : > { %8656 = vst [vmem:[#allocation45_spill] sm:$0xff] %v7065_v54  ;;  %v7067_v20 = vpop.f32.mrf.mxu3  ;;  %v7073_v43 = vpop.f32.mrf.mxu1  ;;  %v7087_v54 = vld [vmem:[#allocation4 + $0x30] sm:$0xff] }
 0x24d   : > { %8657 = vst [vmem:[#allocation46_spill] sm:$0xff] %v7067_v20 }
 0x24e   : > { %8658 = vst [vmem:[#allocation47_spill] sm:$0xff] %v7071_v19  ;;  %4918 = vmatmul.msk.f32.gmra.mxu0 %vm349_vm0, %v7069_v3 }
 0x24f   : > { %8659 = vst [vmem:[#allocation40_spill] sm:$0xff] %v7073_v43  ;;  %4934 = vmatmul.msk.f32.gmra.mxu1 %vm349_vm0, %v7069_v3  ;;  %v7105_v43 = vld [vmem:[#allocation4 + $0x38] sm:$0xff] }
 0x250   : > { %4950 = vmatmul.msk.f32.gmra.mxu2 %vm349_vm0, %v7069_v3 }
 0x251   : > { %4966 = vmatmul.msk.f32.gmra.mxu3 %vm349_vm0, %v7069_v3 }
 0x253   : > { %v7083_v29 = vpop.f32.mrf.mxu2  ;;  %v7089_v52 = vpop.f32.mrf.mxu0 }
 0x254   : > { %8660 = vst [vmem:[#allocation41_spill] sm:$0xff] %v7083_v29  ;;  %v7085_v20 = vpop.f32.mrf.mxu3  ;;  %v7091_v58 = vpop.f32.mrf.mxu1 }
 0x255   : > { %8661 = vst [vmem:[#allocation42_spill] sm:$0xff] %v7085_v20 }
 0x256   : > { %8662 = vst [vmem:[#allocation43_spill] sm:$0xff] %v7089_v52  ;;  %4919 = vmatmul.msk.f32.gmra.mxu0 %vm349_vm0, %v7087_v54 }
 0x257   : > { %8663 = vst [vmem:[#allocation36_spill] sm:$0xff] %v7091_v58  ;;  %4935 = vmatmul.msk.f32.gmra.mxu1 %vm349_vm0, %v7087_v54 }
 0x258   : > { %4951 = vmatmul.msk.f32.gmra.mxu2 %vm349_vm0, %v7087_v54 }
 0x259   : > { %4967 = vmatmul.msk.f32.gmra.mxu3 %vm349_vm0, %v7087_v54 }
 0x25b   : > { %v7101_v29 = vpop.f32.mrf.mxu2  ;;  %v7107_v19 = vpop.f32.mrf.mxu0 }
 0x25c   : > { %8664 = vst [vmem:[#allocation37_spill] sm:$0xff] %v7101_v29  ;;  %v7103_v20 = vpop.f32.mrf.mxu3  ;;  %v7109_v58 = vpop.f32.mrf.mxu1 }
 0x25d   : > { %8665 = vst [vmem:[#allocation38_spill] sm:$0xff] %v7103_v20 }
 0x25e   : > { %8666 = vst [vmem:[#allocation39_spill] sm:$0xff] %v7107_v19  ;;  %4920 = vmatmul.msk.f32.gmra.mxu0 %vm349_vm0, %v7105_v43 }
 0x25f   : > { %4936 = vmatmul.msk.f32.gmra.mxu1 %vm349_vm0, %v7105_v43 }
 0x260   : > { %4952 = vmatmul.msk.f32.gmra.mxu2 %vm349_vm0, %v7105_v43 }
 0x261   : > { %4968 = vmatmul.msk.f32.gmra.mxu3 %vm349_vm0, %v7105_v43 }
 0x263   : > { %v7119_v29 = vpop.f32.mrf.mxu2  ;;  %v7123_v52 = vpop.f32.mrf.mxu0 }
 0x264   : > { %8667 = vst [vmem:[#allocation32_spill] sm:$0xff] %v7119_v29  ;;  %v7121_v20 = vpop.f32.mrf.mxu3  ;;  %v7125_v19 = vpop.f32.mrf.mxu1 }
 0x265   : > { %8668 = vst [vmem:[#allocation33_spill] sm:$0xff] %v7121_v20 }
 0x266   : > { %8669 = vst [vmem:[#allocation34_spill] sm:$0xff] %v7123_v52  ;;  %4977 = vmatmul.msk.f32.vlgmr.msrb.gmra.mxu0 %vm349_vm0, %v6915_v6 }
 0x267   : > { %8670 = vst [vmem:[#allocation35_spill] sm:$0xff] %v7125_v19  ;;  %4993 = vmatmul.msk.f32.vlgmr.msrb.gmra.mxu1 %vm349_vm0, %v6915_v6  ;;  %5097 = vmatpush.xpose.msk.msrb.mxu0 %vm349_vm0, %v6499_v51  ;;  %v8675_v51 = vld [vmem:[#allocation76_spill] sm:$0xff] }
 0x268   : > { %5009 = vmatmul.msk.f32.vlgmr.msrb.gmra.mxu2 %vm349_vm0, %v6915_v6  ;;  %5113 = vmatpush.xpose.msk.msrb.mxu1 %vm349_vm0, %v6501_v2 }
 0x269   : > { %5025 = vmatmul.msk.f32.vlgmr.msrb.gmra.mxu3 %vm349_vm0, %v6915_v6  ;;  %5129 = vmatpush.xpose.msk.msrb.mxu2 %vm349_vm0, %v6511_v42  ;;  %v8685_v42 = vld [vmem:[#allocation69_spill] sm:$0xff] }
 0x26a   : > { %5145 = vmatpush.xpose.msk.msrb.mxu3 %vm349_vm0, %v6513_v30 }
 0x26b   : > { %v7143_v19 = vpop.f32.mrf.mxu2  ;;  %v7147_v20 = vpop.f32.mrf.mxu0  ;;  %5098 = vmatpush.xpose.msk.msrb.mxu0 %vm349_vm0, %v6483_v50 }
 0x26c   : > { %8671 = vst [vmem:[#allocation28_spill] sm:$0xff] %v7143_v19  ;;  %v7145_v52 = vpop.f32.mrf.mxu3  ;;  %v7149_v29 = vpop.f32.mrf.mxu1  ;;  %5114 = vmatpush.xpose.msk.msrb.mxu1 %vm349_vm0, %v6485_v18  ;;  %v8692_v19 = vld [vmem:[#allocation64_spill] sm:$0xff] }
 0x26d   : > { %8672 = vst [vmem:[#allocation29_spill] sm:$0xff] %v7145_v52  ;;  %5130 = vmatpush.xpose.msk.msrb.mxu2 %vm349_vm0, %v6495_v41  ;;  %v8680_v41 = vld [vmem:[#allocation72_spill] sm:$0xff] }
 0x26e   : > { %8673 = vst [vmem:[#allocation30_spill] sm:$0xff] %v7147_v20  ;;  %5146 = vmatpush.xpose.msk.msrb.mxu3 %vm349_vm0, %v6497_v14  ;;  %4978 = vmatmul.msk.f32.gmra.mxu0 %vm349_vm0, %v6941_v28  ;;  %v8684_v14 = vld [vmem:[#allocation68_spill] sm:$0xff] }
 0x26f   : > { %8674 = vst [vmem:[#allocation31_spill] sm:$0xff] %v7149_v29  ;;  %4994 = vmatmul.msk.f32.gmra.mxu1 %vm349_vm0, %v6941_v28  ;;  %5099 = vmatpush.xpose.msk.msrb.mxu0 %vm349_vm0, %v6467_v27  ;;  %v8681_v27 = vld [vmem:[#allocation73_spill] sm:$0xff]  ;;  %v8704_v20 = vld [vmem:[#allocation56_spill] sm:$0xff] }
 0x270   : > { %5010 = vmatmul.msk.f32.gmra.mxu2 %vm349_vm0, %v6941_v28  ;;  %5115 = vmatpush.xpose.msk.msrb.mxu1 %vm349_vm0, %v6469_v35  ;;  %v8682_v35 = vld [vmem:[#allocation74_spill] sm:$0xff] }
 0x271   : > { %5026 = vmatmul.msk.f32.gmra.mxu3 %vm349_vm0, %v6941_v28  ;;  %5131 = vmatpush.xpose.msk.msrb.mxu2 %vm349_vm0, %v6479_v36  ;;  %v8683_v36 = vld [vmem:[#allocation75_spill] sm:$0xff] }
 0x272   : > { %5147 = vmatpush.xpose.msk.msrb.mxu3 %vm349_vm0, %v8675_v51  ;;  %v8686_v51 = vld [vmem:[#allocation70_spill] sm:$0xff] }
 0x273   : > { %v7175_v2 = vpop.f32.mrf.mxu2  ;;  %v7179_v50 = vpop.f32.mrf.mxu0  ;;  %5100 = vmatpush.xpose.msk.msrb.mxu0 %vm349_vm0, %v8680_v41  ;;  %v8687_v41 = vld [vmem:[#allocation71_spill] sm:$0xff] }
 0x274   : > { %8676 = vst [vmem:[#allocation24_spill] sm:$0xff] %v7175_v2  ;;  %v7177_v30 = vpop.f32.mrf.mxu3  ;;  %v7181_v18 = vpop.f32.mrf.mxu1  ;;  %5116 = vmatpush.xpose.msk.msrb.mxu1 %vm349_vm0, %v8681_v27 }
 0x275   : > { %8677 = vst [vmem:[#allocation25_spill] sm:$0xff] %v7177_v30  ;;  %5132 = vmatpush.xpose.msk.msrb.mxu2 %vm349_vm0, %v8682_v35 }
 0x276   : > { %8678 = vst [vmem:[#allocation26_spill] sm:$0xff] %v7179_v50  ;;  %5148 = vmatpush.xpose.msk.msrb.mxu3 %vm349_vm0, %v8683_v36  ;;  %4979 = vmatmul.msk.f32.gmra.mxu0 %vm349_vm0, %v6975_v61 }
 0x277   : > { %8679 = vst [vmem:[#allocation27_spill] sm:$0xff] %v7181_v18  ;;  %4995 = vmatmul.msk.f32.gmra.mxu1 %vm349_vm0, %v6975_v61  ;;  %5101 = vmatpush.xpose.msk.msrb.mxu0 %vm349_vm0, %v8684_v14  ;;  %v8693_v14 = vld [vmem:[#allocation65_spill] sm:$0xff] }
 0x278   : > { %5011 = vmatmul.msk.f32.gmra.mxu2 %vm349_vm0, %v6975_v61  ;;  %5117 = vmatpush.xpose.msk.msrb.mxu1 %vm349_vm0, %v8685_v42  ;;  %v8694_v42 = vld [vmem:[#allocation66_spill] sm:$0xff] }
 0x279   : > { %5027 = vmatmul.msk.f32.gmra.mxu3 %vm349_vm0, %v6975_v61  ;;  %5133 = vmatpush.xpose.msk.msrb.mxu2 %vm349_vm0, %v8686_v51  ;;  %v8695_v51 = vld [vmem:[#allocation67_spill] sm:$0xff] }
 0x27a   : > { %5149 = vmatpush.xpose.msk.msrb.mxu3 %vm349_vm0, %v8687_v41  ;;  %v8697_v41 = vld [vmem:[#allocation61_spill] sm:$0xff] }
 0x27b   : > { %v7207_v27 = vpop.f32.mrf.mxu2  ;;  %v7211_v36 = vpop.f32.mrf.mxu0  ;;  %5102 = vmatpush.xpose.msk.msrb.mxu0 %vm349_vm0, %v8692_v19  ;;  %v8696_v19 = vld [vmem:[#allocation60_spill] sm:$0xff] }
 0x27c   : > { %8688 = vst [vmem:[#allocation76_spill] sm:$0xff] %v7207_v27  ;;  %v7209_v35 = vpop.f32.mrf.mxu3  ;;  %v7213_v52 = vpop.f32.mrf.mxu1  ;;  %5118 = vmatpush.xpose.msk.msrb.mxu1 %vm349_vm0, %v8693_v14  ;;  %v8698_v14 = vld [vmem:[#allocation62_spill] sm:$0xff] }
 0x27d   : > { %8689 = vst [vmem:[#allocation72_spill] sm:$0xff] %v7209_v35  ;;  %5134 = vmatpush.xpose.msk.msrb.mxu2 %vm349_vm0, %v8694_v42  ;;  %v8699_v42 = vld [vmem:[#allocation63_spill] sm:$0xff] }
 0x27e   : > { %8690 = vst [vmem:[#allocation73_spill] sm:$0xff] %v7211_v36  ;;  %5150 = vmatpush.xpose.msk.msrb.mxu3 %vm349_vm0, %v8695_v51  ;;  %4980 = vmatmul.msk.f32.gmra.mxu0 %vm349_vm0, %v7009_v63 }
 0x27f   : > { %8691 = vst [vmem:[#allocation74_spill] sm:$0xff] %v7213_v52  ;;  %4996 = vmatmul.msk.f32.gmra.mxu1 %vm349_vm0, %v7009_v63  ;;  %5103 = vmatpush.xpose.msk.msrb.mxu0 %vm349_vm0, %v8696_v19  ;;  %v8705_v19 = vld [vmem:[#allocation57_spill] sm:$0xff] }
 0x280   : > { %5012 = vmatmul.msk.f32.gmra.mxu2 %vm349_vm0, %v7009_v63  ;;  %5119 = vmatpush.xpose.msk.msrb.mxu1 %vm349_vm0, %v8697_v41  ;;  %v8706_v41 = vld [vmem:[#allocation58_spill] sm:$0xff] }
 0x281   : > { %5028 = vmatmul.msk.f32.gmra.mxu3 %vm349_vm0, %v7009_v63  ;;  %5135 = vmatpush.xpose.msk.msrb.mxu2 %vm349_vm0, %v8698_v14  ;;  %v8707_v14 = vld [vmem:[#allocation59_spill] sm:$0xff] }
 0x282   : > { %5151 = vmatpush.xpose.msk.msrb.mxu3 %vm349_vm0, %v8699_v42 }
 0x283   : > { %v7239_v51 = vpop.f32.mrf.mxu2  ;;  %v7243_v2 = vpop.f32.mrf.mxu0  ;;  %5104 = vmatpush.xpose.msk.msrb.mxu0 %vm349_vm0, %v8704_v20 }
 0x284   : > { %8700 = vst [vmem:[#allocation75_spill] sm:$0xff] %v7239_v51  ;;  %v7241_v30 = vpop.f32.mrf.mxu3  ;;  %v7245_v29 = vpop.f32.mrf.mxu1  ;;  %5120 = vmatpush.xpose.msk.msrb.mxu1 %vm349_vm0, %v8705_v19 }
 0x285   : > { %8701 = vst [vmem:[#allocation68_spill] sm:$0xff] %v7241_v30  ;;  %5136 = vmatpush.xpose.msk.msrb.mxu2 %vm349_vm0, %v8706_v41 }
 0x286   : > { %8702 = vst [vmem:[#allocation69_spill] sm:$0xff] %v7243_v2  ;;  %5152 = vmatpush.xpose.msk.msrb.mxu3 %vm349_vm0, %v8707_v14  ;;  %4981 = vmatmul.msk.f32.gmra.mxu0 %vm349_vm0, %v7043_v62 }
 0x287   : > { %8703 = vst [vmem:[#allocation70_spill] sm:$0xff] %v7245_v29  ;;  %4997 = vmatmul.msk.f32.gmra.mxu1 %vm349_vm0, %v7043_v62 }
 0x288   : > { %5013 = vmatmul.msk.f32.gmra.mxu2 %vm349_vm0, %v7043_v62 }
 0x289   : > { %5029 = vmatmul.msk.f32.gmra.mxu3 %vm349_vm0, %v7043_v62 }
 0x28b   : > { %v7263_v20 = vpop.f32.mrf.mxu2  ;;  %v7267_v19 = vpop.f32.mrf.mxu0 }
 0x28c   : > { %8708 = vst [vmem:[#allocation71_spill] sm:$0xff] %v7263_v20  ;;  %v7265_v42 = vpop.f32.mrf.mxu3  ;;  %v7269_v41 = vpop.f32.mrf.mxu1 }
 0x28d   : > { %8709 = vst [vmem:[#allocation64_spill] sm:$0xff] %v7265_v42 }
 0x28e   : > { %4982 = vmatmul.msk.f32.gmra.mxu0 %vm349_vm0, %v7069_v3 }
 0x28f   : > { %4998 = vmatmul.msk.f32.gmra.mxu1 %vm349_vm0, %v7069_v3 }
 0x290   : > { %5014 = vmatmul.msk.f32.gmra.mxu2 %vm349_vm0, %v7069_v3 }
 0x291   : > { %5030 = vmatmul.msk.f32.gmra.mxu3 %vm349_vm0, %v7069_v3 }
 0x293   : > { %v7279_v14 = vpop.f32.mrf.mxu2  ;;  %v7283_v27 = vpop.f32.mrf.mxu0 }
 0x294   : > { %v7281_v35 = vpop.f32.mrf.mxu3  ;;  %v7285_v18 = vpop.f32.mrf.mxu1 }
 0x295   : > { %8710 = vst [vmem:[#allocation65_spill] sm:$0xff] %v7281_v35 }
 0x296   : > { %4983 = vmatmul.msk.f32.gmra.mxu0 %vm349_vm0, %v7087_v54 }
 0x297   : > { %4999 = vmatmul.msk.f32.gmra.mxu1 %vm349_vm0, %v7087_v54 }
 0x298   : > { %5015 = vmatmul.msk.f32.gmra.mxu2 %vm349_vm0, %v7087_v54 }
 0x299   : > { %5031 = vmatmul.msk.f32.gmra.mxu3 %vm349_vm0, %v7087_v54 }
 0x29b   : > { %v7295_v50 = vpop.f32.mrf.mxu2  ;;  %v7299_v51 = vpop.f32.mrf.mxu0 }
 0x29c   : > { %v7297_v30 = vpop.f32.mrf.mxu3  ;;  %v7301_v52 = vpop.f32.mrf.mxu1 }
 0x29e   : > { %4984 = vmatmul.msk.f32.gmra.mxu0 %vm349_vm0, %v7105_v43 }
 0x29f   : > { %5000 = vmatmul.msk.f32.gmra.mxu1 %vm349_vm0, %v7105_v43 }
 0x2a0   : > { %5016 = vmatmul.msk.f32.gmra.mxu2 %vm349_vm0, %v7105_v43 }
 0x2a1   : > { %5032 = vmatmul.msk.f32.gmra.mxu3 %vm349_vm0, %v7105_v43 }
 0x2a3   : > { %v7317_v36 = vpop.f32.mrf.mxu2  ;;  %v2135_v20 = vpop.f32.mrf.mxu0 }
 0x2a4   : > { %v7319_v42 = vpop.f32.mrf.mxu3  ;;  %v2200_v29 = vpop.f32.mrf.mxu1  ;;  %4175 = vst.msk [vmem:[%s7315_s7] sm:$0xff] %vm4174_vm1, %v2135_v20 }
 0x2a5   : > { %4183 = vst.msk [vmem:[%s7315_s7 + $0x40] sm:$0xff] %vm4174_vm1, %v2200_v29 }
 0x2a6   : > { %5041 = vmatmul.msk.f32.vlgmr.msra.gmra.mxu0 %vm349_vm0, %v6915_v6 }
 0x2a7   : > { %5057 = vmatmul.msk.f32.vlgmr.msra.gmra.mxu1 %vm349_vm0, %v6915_v6  ;;  %5161 = vmatpush.xpose.msk.msra.mxu0 %vm349_vm0, %v6705_v40 }
 0x2a8   : > { %5073 = vmatmul.msk.f32.vlgmr.msra.gmra.mxu2 %vm349_vm0, %v6915_v6  ;;  %5177 = vmatpush.xpose.msk.msra.mxu1 %vm349_vm0, %v6707_v53 }
 0x2a9   : > { %5089 = vmatmul.msk.f32.vlgmr.msra.gmra.mxu3 %vm349_vm0, %v6915_v6  ;;  %5193 = vmatpush.xpose.msk.msra.mxu2 %vm349_vm0, %v6719_v55 }
 0x2aa   : > { %5209 = vmatpush.xpose.msk.msra.mxu3 %vm349_vm0, %v6721_v45 }
 0x2ab   : > { %v2265_v29 = vpop.f32.mrf.mxu2  ;;  %v2138_v2 = vpop.f32.mrf.mxu0  ;;  %5162 = vmatpush.xpose.msk.msra.mxu0 %vm349_vm0, %v6687_v22 }
 0x2ac   : > { %v2330_v20 = vpop.f32.mrf.mxu3  ;;  %4191 = vst.msk [vmem:[%s7315_s7 + $0x80] sm:$0xff] %vm4174_vm1, %v2265_v29  ;;  %v2203_v35 = vpop.f32.mrf.mxu1  ;;  %5178 = vmatpush.xpose.msk.msra.mxu1 %vm349_vm0, %v6689_v23 }
 0x2ad   : > { %4199 = vst.msk [vmem:[%s7315_s7 + $0xc0] sm:$0xff] %vm4174_vm1, %v2330_v20  ;;  %5194 = vmatpush.xpose.msk.msra.mxu2 %vm349_vm0, %v6701_v38 }
 0x2ae   : > { %5210 = vmatpush.xpose.msk.msra.mxu3 %vm349_vm0, %v6703_v39  ;;  %4176 = vst.msk [vmem:[%s7315_s7 + $0x8] sm:$0xff] %vm4174_vm1, %v2138_v2  ;;  %5042 = vmatmul.msk.f32.gmra.mxu0 %vm349_vm0, %v6941_v28 }
 0x2af   : > { %5058 = vmatmul.msk.f32.gmra.mxu1 %vm349_vm0, %v6941_v28  ;;  %4184 = vst.msk [vmem:[%s7315_s7 + $0x48] sm:$0xff] %vm4174_vm1, %v2203_v35  ;;  %5163 = vmatpush.xpose.msk.msra.mxu0 %vm349_vm0, %v6669_v4  ;;  %v8716_v4 = vld [vmem:[#allocation79_spill] sm:$0xff] }
 0x2b0   : > { %5074 = vmatmul.msk.f32.gmra.mxu2 %vm349_vm0, %v6941_v28  ;;  %5179 = vmatpush.xpose.msk.msra.mxu1 %vm349_vm0, %v6671_v5  ;;  %v8717_v5 = vld [vmem:[#allocation80_spill] sm:$0xff] }
 0x2b1   : > { %5090 = vmatmul.msk.f32.gmra.mxu3 %vm349_vm0, %v6941_v28  ;;  %5195 = vmatpush.xpose.msk.msra.mxu2 %vm349_vm0, %v6683_v10 }
 0x2b2   : > { %5211 = vmatpush.xpose.msk.msra.mxu3 %vm349_vm0, %v6685_v11 }
 0x2b3   : > { %v2268_v45 = vpop.f32.mrf.mxu2  ;;  %v2141_v23 = vpop.f32.mrf.mxu0  ;;  %5164 = vmatpush.xpose.msk.msra.mxu0 %vm349_vm0, %v6643_v16 }
 0x2b4   : > { %v2333_v22 = vpop.f32.mrf.mxu3  ;;  %4192 = vst.msk [vmem:[%s7315_s7 + $0x88] sm:$0xff] %vm4174_vm1, %v2268_v45  ;;  %v2206_v38 = vpop.f32.mrf.mxu1  ;;  %5180 = vmatpush.xpose.msk.msra.mxu1 %vm349_vm0, %v6645_v17 }
 0x2b5   : > { %4200 = vst.msk [vmem:[%s7315_s7 + $0xc8] sm:$0xff] %vm4174_vm1, %v2333_v22  ;;  %5196 = vmatpush.xpose.msk.msra.mxu2 %vm349_vm0, %v6665_v0 }
 0x2b6   : > { %5212 = vmatpush.xpose.msk.msra.mxu3 %vm349_vm0, %v6667_v1  ;;  %4177 = vst.msk [vmem:[%s7315_s7 + $0x10] sm:$0xff] %vm4174_vm1, %v2141_v23  ;;  %5043 = vmatmul.msk.f32.gmra.mxu0 %vm349_vm0, %v6975_v61 }
 0x2b7   : > { %5059 = vmatmul.msk.f32.gmra.mxu1 %vm349_vm0, %v6975_v61  ;;  %4185 = vst.msk [vmem:[%s7315_s7 + $0x50] sm:$0xff] %vm4174_vm1, %v2206_v38  ;;  %5165 = vmatpush.xpose.msk.msra.mxu0 %vm349_vm0, %v6609_v31 }
 0x2b8   : > { %5075 = vmatmul.msk.f32.gmra.mxu2 %vm349_vm0, %v6975_v61  ;;  %5181 = vmatpush.xpose.msk.msra.mxu1 %vm349_vm0, %v6611_v32 }
 0x2b9   : > { %5091 = vmatmul.msk.f32.gmra.mxu3 %vm349_vm0, %v6975_v61  ;;  %5197 = vmatpush.xpose.msk.msra.mxu2 %vm349_vm0, %v6639_v12 }
 0x2ba   : > { %5213 = vmatpush.xpose.msk.msra.mxu3 %vm349_vm0, %v6641_v13  ;;  %v8715_v13 = vld [vmem:[#allocation78_spill] sm:$0xff] }
 0x2bb   : > { %v2271_v16 = vpop.f32.mrf.mxu2  ;;  %v2144_v0 = vpop.f32.mrf.mxu0  ;;  %5166 = vmatpush.xpose.msk.msra.mxu0 %vm349_vm0, %v6575_v48  ;;  %v8711_v48 = vld [vmem:[#allocation81_spill] sm:$0xff] }
 0x2bc   : > { %v2336_v17 = vpop.f32.mrf.mxu3  ;;  %4193 = vst.msk [vmem:[%s7315_s7 + $0x90] sm:$0xff] %vm4174_vm1, %v2271_v16  ;;  %v2209_v1 = vpop.f32.mrf.mxu1  ;;  %5182 = vmatpush.xpose.msk.msra.mxu1 %vm349_vm0, %v6577_v49  ;;  %v8712_v49 = vld [vmem:[#allocation82_spill] sm:$0xff] }
 0x2bd   : > { %4201 = vst.msk [vmem:[%s7315_s7 + $0xd0] sm:$0xff] %vm4174_vm1, %v2336_v17  ;;  %5198 = vmatpush.xpose.msk.msra.mxu2 %vm349_vm0, %v6605_v25  ;;  %v8713_v25 = vld [vmem:[#allocation83_spill] sm:$0xff] }
 0x2be   : > { %5214 = vmatpush.xpose.msk.msra.mxu3 %vm349_vm0, %v6607_v26  ;;  %4178 = vst.msk [vmem:[%s7315_s7 + $0x18] sm:$0xff] %vm4174_vm1, %v2144_v0  ;;  %5044 = vmatmul.msk.f32.gmra.mxu0 %vm349_vm0, %v7009_v63 }
 0x2bf   : > { %5060 = vmatmul.msk.f32.gmra.mxu1 %vm349_vm0, %v7009_v63  ;;  %4186 = vst.msk [vmem:[%s7315_s7 + $0x58] sm:$0xff] %vm4174_vm1, %v2209_v1  ;;  %5167 = vmatpush.xpose.msk.msra.mxu0 %vm349_vm0, %v6541_v15  ;;  %v8714_v15 = vld [vmem:[#allocation77_spill] sm:$0xff] }
 0x2c0   : > { %5076 = vmatmul.msk.f32.gmra.mxu2 %vm349_vm0, %v7009_v63  ;;  %5183 = vmatpush.xpose.msk.msra.mxu1 %vm349_vm0, %v8711_v48 }
 0x2c1   : > { %5092 = vmatmul.msk.f32.gmra.mxu3 %vm349_vm0, %v7009_v63  ;;  %5199 = vmatpush.xpose.msk.msra.mxu2 %vm349_vm0, %v8712_v49 }
 0x2c2   : > { %5215 = vmatpush.xpose.msk.msra.mxu3 %vm349_vm0, %v8713_v25  ;;  %v8725_v25 = vld [vmem:[#allocation20_spill] sm:$0xff] }
 0x2c3   : > { %v2274_v26 = vpop.f32.mrf.mxu2  ;;  %v2147_v32 = vpop.f32.mrf.mxu0  ;;  %5168 = vmatpush.xpose.msk.msra.mxu0 %vm349_vm0, %v8714_v15  ;;  %v8730_v15 = vld [vmem:[#allocation91_spill] sm:$0xff] }
 0x2c4   : > { %v2339_v31 = vpop.f32.mrf.mxu3  ;;  %4194 = vst.msk [vmem:[%s7315_s7 + $0x98] sm:$0xff] %vm4174_vm1, %v2274_v26  ;;  %v2212_v12 = vpop.f32.mrf.mxu1  ;;  %5184 = vmatpush.xpose.msk.msra.mxu1 %vm349_vm0, %v8715_v13  ;;  %v8726_v26 = vld [vmem:[#allocation21_spill] sm:$0xff] }
 0x2c5   : > { %4202 = vst.msk [vmem:[%s7315_s7 + $0xd8] sm:$0xff] %vm4174_vm1, %v2339_v31  ;;  %5200 = vmatpush.xpose.msk.msra.mxu2 %vm349_vm0, %v8716_v4  ;;  %v8727_v31 = vld [vmem:[#allocation88_spill] sm:$0xff] }
 0x2c6   : > { %5216 = vmatpush.xpose.msk.msra.mxu3 %vm349_vm0, %v8717_v5  ;;  %4179 = vst.msk [vmem:[%s7315_s7 + $0x20] sm:$0xff] %vm4174_vm1, %v2147_v32  ;;  %5045 = vmatmul.msk.f32.gmra.mxu0 %vm349_vm0, %v7043_v62  ;;  %v8728_v32 = vld [vmem:[#allocation89_spill] sm:$0xff] }
 0x2c7   : > { %5061 = vmatmul.msk.f32.gmra.mxu1 %vm349_vm0, %v7043_v62  ;;  %4187 = vst.msk [vmem:[%s7315_s7 + $0x60] sm:$0xff] %vm4174_vm1, %v2212_v12  ;;  %v8729_v12 = vld [vmem:[#allocation90_spill] sm:$0xff] }
 0x2c8   : > { %5077 = vmatmul.msk.f32.gmra.mxu2 %vm349_vm0, %v7043_v62 }
 0x2c9   : > { %5093 = vmatmul.msk.f32.gmra.mxu3 %vm349_vm0, %v7043_v62 }
 0x2cb   : > { %v2277_v10 = vpop.f32.mrf.mxu2  ;;  %v2150_v39 = vpop.f32.mrf.mxu0 }
 0x2cc   : > { %v2342_v11 = vpop.f32.mrf.mxu3  ;;  %4195 = vst.msk [vmem:[%s7315_s7 + $0xa0] sm:$0xff] %vm4174_vm1, %v2277_v10  ;;  %v2215_v40 = vpop.f32.mrf.mxu1 }
 0x2cd   : > { %4203 = vst.msk [vmem:[%s7315_s7 + $0xe0] sm:$0xff] %vm4174_vm1, %v2342_v11  ;;  %v8731_v11 = vld [vmem:[#allocation84_spill] sm:$0xff] }
 0x2ce   : > { %4180 = vst.msk [vmem:[%s7315_s7 + $0x28] sm:$0xff] %vm4174_vm1, %v2150_v39  ;;  %5046 = vmatmul.msk.f32.gmra.mxu0 %vm349_vm0, %v7069_v3  ;;  %v8732_v39 = vld [vmem:[#allocation85_spill] sm:$0xff] }
 0x2cf   : > { %5062 = vmatmul.msk.f32.gmra.mxu1 %vm349_vm0, %v7069_v3  ;;  %4188 = vst.msk [vmem:[%s7315_s7 + $0x68] sm:$0xff] %vm4174_vm1, %v2215_v40  ;;  %v8733_v40 = vld [vmem:[#allocation86_spill] sm:$0xff] }
 0x2d0   : > { %5078 = vmatmul.msk.f32.gmra.mxu2 %vm349_vm0, %v7069_v3 }
 0x2d1   : > { %5094 = vmatmul.msk.f32.gmra.mxu3 %vm349_vm0, %v7069_v3 }
 0x2d3   : > { %v2280_v53 = vpop.f32.mrf.mxu2  ;;  %v2153_v2 = vpop.f32.mrf.mxu0 }
 0x2d4   : > { %v2345_v55 = vpop.f32.mrf.mxu3  ;;  %4196 = vst.msk [vmem:[%s7315_s7 + $0xa8] sm:$0xff] %vm4174_vm1, %v2280_v53  ;;  %v2218_v35 = vpop.f32.mrf.mxu1  ;;  %v8734_v53 = vld [vmem:[#allocation87_spill] sm:$0xff] }
 0x2d5   : > { %4204 = vst.msk [vmem:[%s7315_s7 + $0xe8] sm:$0xff] %vm4174_vm1, %v2345_v55 }
 0x2d6   : > { %4181 = vst.msk [vmem:[%s7315_s7 + $0x30] sm:$0xff] %vm4174_vm1, %v2153_v2  ;;  %5047 = vmatmul.msk.f32.gmra.mxu0 %vm349_vm0, %v7087_v54 }
 0x2d7   : > { %5063 = vmatmul.msk.f32.gmra.mxu1 %vm349_vm0, %v7087_v54  ;;  %4189 = vst.msk [vmem:[%s7315_s7 + $0x70] sm:$0xff] %vm4174_vm1, %v2218_v35 }
 0x2d8   : > { %5079 = vmatmul.msk.f32.gmra.mxu2 %vm349_vm0, %v7087_v54 }
 0x2d9   : > { %5095 = vmatmul.msk.f32.gmra.mxu3 %vm349_vm0, %v7087_v54 }
 0x2db   : > { %v2283_v29 = vpop.f32.mrf.mxu2  ;;  %v2156_v45 = vpop.f32.mrf.mxu0 }
 0x2dc   : > { %v2348_v20 = vpop.f32.mrf.mxu3  ;;  %4197 = vst.msk [vmem:[%s7315_s7 + $0xb0] sm:$0xff] %vm4174_vm1, %v2283_v29  ;;  %v2221_v22 = vpop.f32.mrf.mxu1 }
 0x2dd   : > { %4205 = vst.msk [vmem:[%s7315_s7 + $0xf0] sm:$0xff] %vm4174_vm1, %v2348_v20 }
 0x2de   : > { %4182 = vst.msk [vmem:[%s7315_s7 + $0x38] sm:$0xff] %vm4174_vm1, %v2156_v45  ;;  %5048 = vmatmul.msk.f32.gmra.mxu0 %vm349_vm0, %v7105_v43 }
 0x2df   : > { %5064 = vmatmul.msk.f32.gmra.mxu1 %vm349_vm0, %v7105_v43  ;;  %4190 = vst.msk [vmem:[%s7315_s7 + $0x78] sm:$0xff] %vm4174_vm1, %v2221_v22 }
 0x2e0   : > { %5080 = vmatmul.msk.f32.gmra.mxu2 %vm349_vm0, %v7105_v43 }
 0x2e1   : > { %5096 = vmatmul.msk.f32.gmra.mxu3 %vm349_vm0, %v7105_v43 }
 0x2e3   : > { %v2286_v23 = vpop.f32.mrf.mxu2  ;;  %v2395_v16 = vpop.f32.mrf.mxu0 }
 0x2e4   : > { %v2351_v38 = vpop.f32.mrf.mxu3  ;;  %4198 = vst.msk [vmem:[%s7315_s7 + $0xb8] sm:$0xff] %vm4174_vm1, %v2286_v23  ;;  %v2460_v17 = vpop.f32.mrf.mxu1 }
 0x2e5   : > { %4206 = vst.msk [vmem:[%s7315_s7 + $0xf8] sm:$0xff] %vm4174_vm1, %v2351_v38 }
 0x2e6   : > { %4207 = vst.msk [vmem:[%s7315_s7 + $0x100] sm:$0xff] %vm4174_vm1, %v2395_v16  ;;  %5105 = vmatmul.msk.f32.vlgmr.msrb.gmra.mxu0 %vm349_vm0, %v6915_v6 }
 0x2e7   : > { %5121 = vmatmul.msk.f32.vlgmr.msrb.gmra.mxu1 %vm349_vm0, %v6915_v6  ;;  %4215 = vst.msk [vmem:[%s7315_s7 + $0x140] sm:$0xff] %vm4174_vm1, %v2460_v17  ;;  %5225 = vmatpush.xpose.msk.msrb.mxu0 %vm349_vm0, %v6899_v47 }
 0x2e8   : > { %5137 = vmatmul.msk.f32.vlgmr.msrb.gmra.mxu2 %vm349_vm0, %v6915_v6  ;;  %5241 = vmatpush.xpose.msk.msrb.mxu1 %vm349_vm0, %v6901_v44 }
 0x2e9   : > { %5153 = vmatmul.msk.f32.vlgmr.msrb.gmra.mxu3 %vm349_vm0, %v6915_v6  ;;  %5257 = vmatpush.xpose.msk.msrb.mxu2 %vm349_vm0, %v6911_v24  ;;  %v8724_v24 = vld [vmem:[#allocation93_spill] sm:$0xff] }
 0x2ea   : > { %5273 = vmatpush.xpose.msk.msrb.mxu3 %vm349_vm0, %v6913_v7 }
 0x2eb   : > { %v2525_v0 = vpop.f32.mrf.mxu2  ;;  %v2398_v48 = vpop.f32.mrf.mxu0  ;;  %5226 = vmatpush.xpose.msk.msrb.mxu0 %vm349_vm0, %v6883_v34 }
 0x2ec   : > { %v2590_v1 = vpop.f32.mrf.mxu3  ;;  %4223 = vst.msk [vmem:[%s7315_s7 + $0x180] sm:$0xff] %vm4174_vm1, %v2525_v0  ;;  %v2463_v49 = vpop.f32.mrf.mxu1  ;;  %5242 = vmatpush.xpose.msk.msrb.mxu1 %vm349_vm0, %v6885_v56 }
 0x2ed   : > { %4231 = vst.msk [vmem:[%s7315_s7 + $0x1c0] sm:$0xff] %vm4174_vm1, %v2590_v1  ;;  %5258 = vmatpush.xpose.msk.msrb.mxu2 %vm349_vm0, %v6895_v9 }
 0x2ee   : > { %5274 = vmatpush.xpose.msk.msrb.mxu3 %vm349_vm0, %v6897_v57  ;;  %4208 = vst.msk [vmem:[%s7315_s7 + $0x108] sm:$0xff] %vm4174_vm1, %v2398_v48  ;;  %5106 = vmatmul.msk.f32.gmra.mxu0 %vm349_vm0, %v6941_v28  ;;  %v8723_v57 = vld [vmem:[#allocation92_spill] sm:$0xff] }
 0x2ef   : > { %5122 = vmatmul.msk.f32.gmra.mxu1 %vm349_vm0, %v6941_v28  ;;  %4216 = vst.msk [vmem:[%s7315_s7 + $0x148] sm:$0xff] %vm4174_vm1, %v2463_v49  ;;  %5227 = vmatpush.xpose.msk.msrb.mxu0 %vm349_vm0, %v6867_v37  ;;  %v8718_v37 = vld [vmem:[#allocation18_spill] sm:$0xff] }
 0x2f0   : > { %5138 = vmatmul.msk.f32.gmra.mxu2 %vm349_vm0, %v6941_v28  ;;  %5243 = vmatpush.xpose.msk.msrb.mxu1 %vm349_vm0, %v6869_v60  ;;  %v8722_v60 = vld [vmem:[#allocation17_spill] sm:$0xff] }
 0x2f1   : > { %5154 = vmatmul.msk.f32.gmra.mxu3 %vm349_vm0, %v6941_v28  ;;  %5259 = vmatpush.xpose.msk.msrb.mxu2 %vm349_vm0, %v6879_v8 }
 0x2f2   : > { %5275 = vmatpush.xpose.msk.msrb.mxu3 %vm349_vm0, %v6881_v21 }
 0x2f3   : > { %v2528_v47 = vpop.f32.mrf.mxu2  ;;  %v2401_v7 = vpop.f32.mrf.mxu0  ;;  %5228 = vmatpush.xpose.msk.msrb.mxu0 %vm349_vm0, %v6843_v59  ;;  %v8719_v59 = vld [vmem:[#allocation22_spill] sm:$0xff] }
 0x2f4   : > { %v2593_v44 = vpop.f32.mrf.mxu3  ;;  %4224 = vst.msk [vmem:[%s7315_s7 + $0x188] sm:$0xff] %vm4174_vm1, %v2528_v47  ;;  %v2466_v34 = vpop.f32.mrf.mxu1  ;;  %5244 = vmatpush.xpose.msk.msrb.mxu1 %vm349_vm0, %v6845_v33  ;;  %v8720_v33 = vld [vmem:[#allocation23_spill] sm:$0xff] }
 0x2f5   : > { %4232 = vst.msk [vmem:[%s7315_s7 + $0x1c8] sm:$0xff] %vm4174_vm1, %v2593_v44  ;;  %5260 = vmatpush.xpose.msk.msrb.mxu2 %vm349_vm0, %v6863_v46  ;;  %v8721_v46 = vld [vmem:[#allocation16_spill] sm:$0xff]  ;;  %v8735_v44 = vld [vmem:[#allocation39_spill] sm:$0xff] }
 0x2f6   : > { %5276 = vmatpush.xpose.msk.msrb.mxu3 %vm349_vm0, %v8718_v37  ;;  %4209 = vst.msk [vmem:[%s7315_s7 + $0x110] sm:$0xff] %vm4174_vm1, %v2401_v7  ;;  %5107 = vmatmul.msk.f32.gmra.mxu0 %vm349_vm0, %v6975_v61  ;;  %v8736_v7 = vld [vmem:[#allocation32_spill] sm:$0xff] }
 0x2f7   : > { %5123 = vmatmul.msk.f32.gmra.mxu1 %vm349_vm0, %v6975_v61  ;;  %4217 = vst.msk [vmem:[%s7315_s7 + $0x150] sm:$0xff] %vm4174_vm1, %v2466_v34  ;;  %5229 = vmatpush.xpose.msk.msrb.mxu0 %vm349_vm0, %v8719_v59  ;;  %v8737_v34 = vld [vmem:[#allocation33_spill] sm:$0xff] }
 0x2f8   : > { %5139 = vmatmul.msk.f32.gmra.mxu2 %vm349_vm0, %v6975_v61  ;;  %5245 = vmatpush.xpose.msk.msrb.mxu1 %vm349_vm0, %v8720_v33 }
 0x2f9   : > { %5155 = vmatmul.msk.f32.gmra.mxu3 %vm349_vm0, %v6975_v61  ;;  %5261 = vmatpush.xpose.msk.msrb.mxu2 %vm349_vm0, %v8721_v46 }
 0x2fa   : > { %5277 = vmatpush.xpose.msk.msrb.mxu3 %vm349_vm0, %v8722_v60  ;;  %v8739_v60 = vld [vmem:[#allocation36_spill] sm:$0xff] }
 0x2fb   : > { %v2531_v8 = vpop.f32.mrf.mxu2  ;;  %v2404_v56 = vpop.f32.mrf.mxu0  ;;  %5230 = vmatpush.xpose.msk.msrb.mxu0 %vm349_vm0, %v8723_v57  ;;  %v8745_v57 = vld [vmem:[#allocation42_spill] sm:$0xff] }
 0x2fc   : > { %v2596_v21 = vpop.f32.mrf.mxu3  ;;  %4225 = vst.msk [vmem:[%s7315_s7 + $0x190] sm:$0xff] %vm4174_vm1, %v2531_v8  ;;  %v2469_v9 = vpop.f32.mrf.mxu1  ;;  %5246 = vmatpush.xpose.msk.msrb.mxu1 %vm349_vm0, %v8724_v24  ;;  %v8741_v8 = vld [vmem:[#allocation38_spill] sm:$0xff] }
 0x2fd   : > { %4233 = vst.msk [vmem:[%s7315_s7 + $0x1d0] sm:$0xff] %vm4174_vm1, %v2596_v21  ;;  %5262 = vmatpush.xpose.msk.msrb.mxu2 %vm349_vm0, %v8725_v25  ;;  %v8742_v21 = vld [vmem:[#allocation47_spill] sm:$0xff] }
 0x2fe   : > { %5278 = vmatpush.xpose.msk.msrb.mxu3 %vm349_vm0, %v8726_v26  ;;  %4210 = vst.msk [vmem:[%s7315_s7 + $0x118] sm:$0xff] %vm4174_vm1, %v2404_v56  ;;  %5108 = vmatmul.msk.f32.gmra.mxu0 %vm349_vm0, %v7009_v63  ;;  %v8743_v56 = vld [vmem:[#allocation40_spill] sm:$0xff] }
 0x2ff   : > { %5124 = vmatmul.msk.f32.gmra.mxu1 %vm349_vm0, %v7009_v63  ;;  %4218 = vst.msk [vmem:[%s7315_s7 + $0x158] sm:$0xff] %vm4174_vm1, %v2469_v9  ;;  %5231 = vmatpush.xpose.msk.msrb.mxu0 %vm349_vm0, %v8727_v31  ;;  %v8744_v9 = vld [vmem:[#allocation41_spill] sm:$0xff] }
 0x300   : > { %5140 = vmatmul.msk.f32.gmra.mxu2 %vm349_vm0, %v7009_v63  ;;  %5247 = vmatpush.xpose.msk.msrb.mxu1 %vm349_vm0, %v8728_v32  ;;  %v8747_v32 = vld [vmem:[#allocation44_spill] sm:$0xff] }
 0x301   : > { %5156 = vmatmul.msk.f32.gmra.mxu3 %vm349_vm0, %v7009_v63  ;;  %5263 = vmatpush.xpose.msk.msrb.mxu2 %vm349_vm0, %v8729_v12  ;;  %v8748_v12 = vld [vmem:[#allocation45_spill] sm:$0xff] }
 0x302   : > { %5279 = vmatpush.xpose.msk.msrb.mxu3 %vm349_vm0, %v8730_v15  ;;  %v8749_v15 = vld [vmem:[#allocation46_spill] sm:$0xff] }
 0x303   : > { %v2534_v13 = vpop.f32.mrf.mxu2  ;;  %v2407_v5 = vpop.f32.mrf.mxu0  ;;  %5232 = vmatpush.xpose.msk.msrb.mxu0 %vm349_vm0, %v8731_v11 }
 0x304   : > { %v2599_v4 = vpop.f32.mrf.mxu3  ;;  %4226 = vst.msk [vmem:[%s7315_s7 + $0x198] sm:$0xff] %vm4174_vm1, %v2534_v13  ;;  %v2472_v10 = vpop.f32.mrf.mxu1  ;;  %5248 = vmatpush.xpose.msk.msrb.mxu1 %vm349_vm0, %v8732_v39  ;;  %v8750_v13 = vld [vmem:[#allocation55_spill] sm:$0xff] }
 0x305   : > { %4234 = vst.msk [vmem:[%s7315_s7 + $0x1d8] sm:$0xff] %vm4174_vm1, %v2599_v4  ;;  %5264 = vmatpush.xpose.msk.msrb.mxu2 %vm349_vm0, %v8733_v40  ;;  %v8751_v4 = vld [vmem:[#allocation48_spill] sm:$0xff] }
 0x306   : > { %5280 = vmatpush.xpose.msk.msrb.mxu3 %vm349_vm0, %v8734_v53  ;;  %4211 = vst.msk [vmem:[%s7315_s7 + $0x120] sm:$0xff] %vm4174_vm1, %v2407_v5  ;;  %5109 = vmatmul.msk.f32.gmra.mxu0 %vm349_vm0, %v7043_v62  ;;  %v8752_v5 = vld [vmem:[#allocation49_spill] sm:$0xff] }
 0x307   : > { %5125 = vmatmul.msk.f32.gmra.mxu1 %vm349_vm0, %v7043_v62  ;;  %4219 = vst.msk [vmem:[%s7315_s7 + $0x160] sm:$0xff] %vm4174_vm1, %v2472_v10  ;;  %v8753_v10 = vld [vmem:[#allocation50_spill] sm:$0xff] }
 0x308   : > { %5141 = vmatmul.msk.f32.gmra.mxu2 %vm349_vm0, %v7043_v62 }
 0x309   : > { %5157 = vmatmul.msk.f32.gmra.mxu3 %vm349_vm0, %v7043_v62 }
 0x30b   : > { %v2537_v55 = vpop.f32.mrf.mxu2  ;;  %v2410_v35 = vpop.f32.mrf.mxu0 }
 0x30c   : > { %v2602_v2 = vpop.f32.mrf.mxu3  ;;  %4227 = vst.msk [vmem:[%s7315_s7 + $0x1a0] sm:$0xff] %vm4174_vm1, %v2537_v55  ;;  %v2475_v29 = vpop.f32.mrf.mxu1  ;;  %v8755_v55 = vld [vmem:[#allocation52_spill] sm:$0xff] }
 0x30d   : > { %4235 = vst.msk [vmem:[%s7315_s7 + $0x1e0] sm:$0xff] %vm4174_vm1, %v2602_v2  ;;  %v8756_v2 = vld [vmem:[#allocation53_spill] sm:$0xff] }
 0x30e   : > { %4212 = vst.msk [vmem:[%s7315_s7 + $0x128] sm:$0xff] %vm4174_vm1, %v2410_v35  ;;  %5110 = vmatmul.msk.f32.gmra.mxu0 %vm349_vm0, %v7069_v3  ;;  %v8757_v35 = vld [vmem:[#allocation54_spill] sm:$0xff] }
 0x30f   : > { %5126 = vmatmul.msk.f32.gmra.mxu1 %vm349_vm0, %v7069_v3  ;;  %4220 = vst.msk [vmem:[%s7315_s7 + $0x168] sm:$0xff] %vm4174_vm1, %v2475_v29  ;;  %v8758_v29 = vld [vmem:[#allocation15_spill] sm:$0xff] }
 0x310   : > { %5142 = vmatmul.msk.f32.gmra.mxu2 %vm349_vm0, %v7069_v3 }
 0x311   : > { %5158 = vmatmul.msk.f32.gmra.mxu3 %vm349_vm0, %v7069_v3 }
 0x313   : > { %v2540_v20 = vpop.f32.mrf.mxu2  ;;  %v2413_v22 = vpop.f32.mrf.mxu0 }
 0x314   : > { %v2605_v45 = vpop.f32.mrf.mxu3  ;;  %4228 = vst.msk [vmem:[%s7315_s7 + $0x1a8] sm:$0xff] %vm4174_vm1, %v2540_v20  ;;  %v2478_v23 = vpop.f32.mrf.mxu1  ;;  %v8759_v20 = vld [vmem:[#allocation8_spill] sm:$0xff] }
 0x315   : > { %4236 = vst.msk [vmem:[%s7315_s7 + $0x1e8] sm:$0xff] %vm4174_vm1, %v2605_v45  ;;  %v8760_v45 = vld [vmem:[#allocation9_spill] sm:$0xff] }
 0x316   : > { %4213 = vst.msk [vmem:[%s7315_s7 + $0x130] sm:$0xff] %vm4174_vm1, %v2413_v22  ;;  %5111 = vmatmul.msk.f32.gmra.mxu0 %vm349_vm0, %v7087_v54  ;;  %v8761_v22 = vld [vmem:[#allocation10_spill] sm:$0xff] }
 0x317   : > { %5127 = vmatmul.msk.f32.gmra.mxu1 %vm349_vm0, %v7087_v54  ;;  %4221 = vst.msk [vmem:[%s7315_s7 + $0x170] sm:$0xff] %vm4174_vm1, %v2478_v23 }
 0x318   : > { %5143 = vmatmul.msk.f32.gmra.mxu2 %vm349_vm0, %v7087_v54 }
 0x319   : > { %5159 = vmatmul.msk.f32.gmra.mxu3 %vm349_vm0, %v7087_v54 }
 0x31b   : > { %v2543_v38 = vpop.f32.mrf.mxu2  ;;  %v2416_v17 = vpop.f32.mrf.mxu0 }
 0x31c   : > { %v2608_v16 = vpop.f32.mrf.mxu3  ;;  %4229 = vst.msk [vmem:[%s7315_s7 + $0x1b0] sm:$0xff] %vm4174_vm1, %v2543_v38  ;;  %v2481_v0 = vpop.f32.mrf.mxu1 }
 0x31d   : > { %4237 = vst.msk [vmem:[%s7315_s7 + $0x1f0] sm:$0xff] %vm4174_vm1, %v2608_v16 }
 0x31e   : > { %4214 = vst.msk [vmem:[%s7315_s7 + $0x138] sm:$0xff] %vm4174_vm1, %v2416_v17  ;;  %5112 = vmatmul.msk.f32.gmra.mxu0 %vm349_vm0, %v7105_v43  ;;  %v8762_v17 = vld [vmem:[#allocation19_spill] sm:$0xff] }
 0x31f   : > { %5128 = vmatmul.msk.f32.gmra.mxu1 %vm349_vm0, %v7105_v43  ;;  %4222 = vst.msk [vmem:[%s7315_s7 + $0x178] sm:$0xff] %vm4174_vm1, %v2481_v0  ;;  %v8763_v0 = vld [vmem:[#allocation12_spill] sm:$0xff] }
 0x320   : > { %5144 = vmatmul.msk.f32.gmra.mxu2 %vm349_vm0, %v7105_v43 }
 0x321   : > { %5160 = vmatmul.msk.f32.gmra.mxu3 %vm349_vm0, %v7105_v43 }
 0x323   : > { %v2546_v1 = vpop.f32.mrf.mxu2  ;;  %v2655_v49 = vpop.f32.mrf.mxu0 }
 0x324   : > { %v2611_v48 = vpop.f32.mrf.mxu3  ;;  %4230 = vst.msk [vmem:[%s7315_s7 + $0x1b8] sm:$0xff] %vm4174_vm1, %v2546_v1  ;;  %v2720_v47 = vpop.f32.mrf.mxu1  ;;  %v8764_v1 = vld [vmem:[#allocation13_spill] sm:$0xff] }
 0x325   : > { %4238 = vst.msk [vmem:[%s7315_s7 + $0x1f8] sm:$0xff] %vm4174_vm1, %v2611_v48  ;;  %v8765_v48 = vld [vmem:[#allocation14_spill] sm:$0xff] }
 0x326   : > { %4239 = vst.msk [vmem:[%s7315_s7 + $0x200] sm:$0xff] %vm4174_vm1, %v2655_v49  ;;  %5169 = vmatmul.msk.f32.vlgmr.msra.gmra.mxu0 %vm349_vm0, %v6915_v6 }
 0x327   : > { %5185 = vmatmul.msk.f32.vlgmr.msra.gmra.mxu1 %vm349_vm0, %v6915_v6  ;;  %4247 = vst.msk [vmem:[%s7315_s7 + $0x240] sm:$0xff] %vm4174_vm1, %v2720_v47  ;;  %5289 = vmatpush.xpose.msk.msra.mxu0 %vm349_vm0, %v8735_v44 }
 0x328   : > { %5201 = vmatmul.msk.f32.vlgmr.msra.gmra.mxu2 %vm349_vm0, %v6915_v6  ;;  %5305 = vmatpush.xpose.msk.msra.mxu1 %vm349_vm0, %v7109_v58  ;;  %v8740_v58 = vld [vmem:[#allocation37_spill] sm:$0xff] }
 0x329   : > { %5217 = vmatmul.msk.f32.vlgmr.msra.gmra.mxu3 %vm349_vm0, %v6915_v6  ;;  %5321 = vmatpush.xpose.msk.msra.mxu2 %vm349_vm0, %v8736_v7  ;;  %v8738_v6 = vld [vmem:[#allocation43_spill] sm:$0xff] }
 0x32a   : > { %5337 = vmatpush.xpose.msk.msra.mxu3 %vm349_vm0, %v8737_v34 }
 0x32b   : > { %v2785_v37 = vpop.f32.mrf.mxu2  ;;  %v2658_v33 = vpop.f32.mrf.mxu0  ;;  %5290 = vmatpush.xpose.msk.msra.mxu0 %vm349_vm0, %v8738_v6 }
 0x32c   : > { %v2850_v59 = vpop.f32.mrf.mxu3  ;;  %4255 = vst.msk [vmem:[%s7315_s7 + $0x280] sm:$0xff] %vm4174_vm1, %v2785_v37  ;;  %v2723_v46 = vpop.f32.mrf.mxu1  ;;  %5306 = vmatpush.xpose.msk.msra.mxu1 %vm349_vm0, %v8739_v60 }
 0x32d   : > { %4263 = vst.msk [vmem:[%s7315_s7 + $0x2c0] sm:$0xff] %vm4174_vm1, %v2850_v59  ;;  %5322 = vmatpush.xpose.msk.msra.mxu2 %vm349_vm0, %v8740_v58 }
 0x32e   : > { %5338 = vmatpush.xpose.msk.msra.mxu3 %vm349_vm0, %v8741_v8  ;;  %4240 = vst.msk [vmem:[%s7315_s7 + $0x208] sm:$0xff] %vm4174_vm1, %v2658_v33  ;;  %5170 = vmatmul.msk.f32.gmra.mxu0 %vm349_vm0, %v6941_v28 }
 0x32f   : > { %5186 = vmatmul.msk.f32.gmra.mxu1 %vm349_vm0, %v6941_v28  ;;  %4248 = vst.msk [vmem:[%s7315_s7 + $0x248] sm:$0xff] %vm4174_vm1, %v2723_v46  ;;  %5291 = vmatpush.xpose.msk.msra.mxu0 %vm349_vm0, %v8742_v21  ;;  %v7899_v21 = vld [vmem:[#allocation4] sm:$0xff] }
 0x330   : > { %5202 = vmatmul.msk.f32.gmra.mxu2 %vm349_vm0, %v6941_v28  ;;  %5307 = vmatpush.xpose.msk.msra.mxu1 %vm349_vm0, %v8743_v56 }
 0x331   : > { %5218 = vmatmul.msk.f32.gmra.mxu3 %vm349_vm0, %v6941_v28  ;;  %5323 = vmatpush.xpose.msk.msra.mxu2 %vm349_vm0, %v8744_v9  ;;  %v8746_v28 = vld [vmem:[#allocation51_spill] sm:$0xff] }
 0x332   : > { %5339 = vmatpush.xpose.msk.msra.mxu3 %vm349_vm0, %v8745_v57 }
 0x333   : > { %v2788_v24 = vpop.f32.mrf.mxu2  ;;  %v2661_v26 = vpop.f32.mrf.mxu0  ;;  %5292 = vmatpush.xpose.msk.msra.mxu0 %vm349_vm0, %v8746_v28 }
 0x334   : > { %v2853_v25 = vpop.f32.mrf.mxu3  ;;  %4256 = vst.msk [vmem:[%s7315_s7 + $0x288] sm:$0xff] %vm4174_vm1, %v2788_v24  ;;  %v2726_v31 = vpop.f32.mrf.mxu1  ;;  %5308 = vmatpush.xpose.msk.msra.mxu1 %vm349_vm0, %v8747_v32  ;;  %v8771_v24 = vld [vmem:[#allocation73_spill] sm:$0xff] }
 0x335   : > { %4264 = vst.msk [vmem:[%s7315_s7 + $0x2c8] sm:$0xff] %vm4174_vm1, %v2853_v25  ;;  %5324 = vmatpush.xpose.msk.msra.mxu2 %vm349_vm0, %v8748_v12  ;;  %v8772_v25 = vld [vmem:[#allocation74_spill] sm:$0xff] }
 0x336   : > { %5340 = vmatpush.xpose.msk.msra.mxu3 %vm349_vm0, %v8749_v15  ;;  %4241 = vst.msk [vmem:[%s7315_s7 + $0x210] sm:$0xff] %vm4174_vm1, %v2661_v26  ;;  %5171 = vmatmul.msk.f32.gmra.mxu0 %vm349_vm0, %v6975_v61  ;;  %v8773_v26 = vld [vmem:[#allocation75_spill] sm:$0xff] }
 0x337   : > { %5187 = vmatmul.msk.f32.gmra.mxu1 %vm349_vm0, %v6975_v61  ;;  %4249 = vst.msk [vmem:[%s7315_s7 + $0x250] sm:$0xff] %vm4174_vm1, %v2726_v31  ;;  %5293 = vmatpush.xpose.msk.msra.mxu0 %vm349_vm0, %v8750_v13  ;;  %v8774_v31 = vld [vmem:[#allocation68_spill] sm:$0xff]  ;;  %v8775_v13 = vld [vmem:[#allocation26_spill] sm:$0xff] }
 0x338   : > { %5203 = vmatmul.msk.f32.gmra.mxu2 %vm349_vm0, %v6975_v61  ;;  %5309 = vmatpush.xpose.msk.msra.mxu1 %vm349_vm0, %v8751_v4  ;;  %v8776_v4 = vld [vmem:[#allocation27_spill] sm:$0xff] }
 0x339   : > { %5219 = vmatmul.msk.f32.gmra.mxu3 %vm349_vm0, %v6975_v61  ;;  %5325 = vmatpush.xpose.msk.msra.mxu2 %vm349_vm0, %v8752_v5  ;;  %v8754_v61 = vld [vmem:[#allocation11_spill] sm:$0xff]  ;;  %v8777_v5 = vld [vmem:[#allocation76_spill] sm:$0xff] }
 0x33a   : > { %5341 = vmatpush.xpose.msk.msra.mxu3 %vm349_vm0, %v8753_v10  ;;  %v8778_v10 = vld [vmem:[#allocation72_spill] sm:$0xff] }
 0x33b   : > { %v2791_v11 = vpop.f32.mrf.mxu2  ;;  %v2664_v40 = vpop.f32.mrf.mxu0  ;;  %5294 = vmatpush.xpose.msk.msra.mxu0 %vm349_vm0, %v8754_v61  ;;  %v8782_v61 = vld [vmem:[#allocation25_spill] sm:$0xff] }
 0x33c   : > { %v2856_v39 = vpop.f32.mrf.mxu3  ;;  %4257 = vst.msk [vmem:[%s7315_s7 + $0x290] sm:$0xff] %vm4174_vm1, %v2791_v11  ;;  %v2729_v53 = vpop.f32.mrf.mxu1  ;;  %5310 = vmatpush.xpose.msk.msra.mxu1 %vm349_vm0, %v8755_v55  ;;  %v8003_v11 = vld [vmem:[#allocation4 + $0x18] sm:$0xff] }
 0x33d   : > { %4265 = vst.msk [vmem:[%s7315_s7 + $0x2d0] sm:$0xff] %vm4174_vm1, %v2856_v39  ;;  %5326 = vmatpush.xpose.msk.msra.mxu2 %vm349_vm0, %v8756_v2  ;;  %v8779_v39 = vld [vmem:[#allocation30_spill] sm:$0xff] }
 0x33e   : > { %5342 = vmatpush.xpose.msk.msra.mxu3 %vm349_vm0, %v8757_v35  ;;  %4242 = vst.msk [vmem:[%s7315_s7 + $0x218] sm:$0xff] %vm4174_vm1, %v2664_v40  ;;  %5172 = vmatmul.msk.f32.gmra.mxu0 %vm349_vm0, %v7009_v63  ;;  %v8780_v40 = vld [vmem:[#allocation31_spill] sm:$0xff] }
 0x33f   : > { %5188 = vmatmul.msk.f32.gmra.mxu1 %vm349_vm0, %v7009_v63  ;;  %4250 = vst.msk [vmem:[%s7315_s7 + $0x258] sm:$0xff] %vm4174_vm1, %v2729_v53  ;;  %5295 = vmatpush.xpose.msk.msra.mxu0 %vm349_vm0, %v8758_v29  ;;  %v8781_v53 = vld [vmem:[#allocation24_spill] sm:$0xff] }
 0x340   : > { %5204 = vmatmul.msk.f32.gmra.mxu2 %vm349_vm0, %v7009_v63  ;;  %5311 = vmatpush.xpose.msk.msra.mxu1 %vm349_vm0, %v8759_v20  ;;  %v8783_v20 = vld [vmem:[#allocation34_spill] sm:$0xff] }
 0x341   : > { %5220 = vmatmul.msk.f32.gmra.mxu3 %vm349_vm0, %v7009_v63  ;;  %5327 = vmatpush.xpose.msk.msra.mxu2 %vm349_vm0, %v8760_v45  ;;  %v8784_v45 = vld [vmem:[#allocation35_spill] sm:$0xff] }
 0x342   : > { %5343 = vmatpush.xpose.msk.msra.mxu3 %vm349_vm0, %v8761_v22  ;;  %v8785_v22 = vld [vmem:[#allocation28_spill] sm:$0xff] }
 0x343   : > { %v2794_v23 = vpop.f32.mrf.mxu2  ;;  %v2667_v16 = vpop.f32.mrf.mxu0  ;;  %5296 = vmatpush.xpose.msk.msra.mxu0 %vm349_vm0, %v8762_v17 }
 0x344   : > { %v2859_v38 = vpop.f32.mrf.mxu3  ;;  %4258 = vst.msk [vmem:[%s7315_s7 + $0x298] sm:$0xff] %vm4174_vm1, %v2794_v23  ;;  %v2732_v63 = vpop.f32.mrf.mxu1  ;;  %5312 = vmatpush.xpose.msk.msra.mxu1 %vm349_vm0, %v8763_v0  ;;  %v8786_v23 = vld [vmem:[#allocation29_spill] sm:$0xff] }
 0x345   : > { %4266 = vst.msk [vmem:[%s7315_s7 + $0x2d8] sm:$0xff] %vm4174_vm1, %v2859_v38  ;;  %5328 = vmatpush.xpose.msk.msra.mxu2 %vm349_vm0, %v8764_v1  ;;  %v8037_v38 = vld [vmem:[#allocation4 + $0x20] sm:$0xff]  ;;  %v8055_v1 = vld [vmem:[#allocation4 + $0x28] sm:$0xff] }
 0x346   : > { %5344 = vmatpush.xpose.msk.msra.mxu3 %vm349_vm0, %v8765_v48  ;;  %4243 = vst.msk [vmem:[%s7315_s7 + $0x220] sm:$0xff] %vm4174_vm1, %v2667_v16  ;;  %5173 = vmatmul.msk.f32.gmra.mxu0 %vm349_vm0, %v7043_v62 }
 0x347   : > { %5189 = vmatmul.msk.f32.gmra.mxu1 %vm349_vm0, %v7043_v62  ;;  %4251 = vst.msk [vmem:[%s7315_s7 + $0x260] sm:$0xff] %vm4174_vm1, %v2732_v63 }
 0x348   : > { %5205 = vmatmul.msk.f32.gmra.mxu2 %vm349_vm0, %v7043_v62 }
 0x349   : > { %5221 = vmatmul.msk.f32.gmra.mxu3 %vm349_vm0, %v7043_v62 }
 0x34b   : > { %v2797_v49 = vpop.f32.mrf.mxu2  ;;  %v2670_v44 = vpop.f32.mrf.mxu0 }
 0x34c   : > { %v2862_v47 = vpop.f32.mrf.mxu3  ;;  %4259 = vst.msk [vmem:[%s7315_s7 + $0x2a0] sm:$0xff] %vm4174_vm1, %v2797_v49  ;;  %v2735_v7 = vpop.f32.mrf.mxu1 }
 0x34d   : > { %4267 = vst.msk [vmem:[%s7315_s7 + $0x2e0] sm:$0xff] %vm4174_vm1, %v2862_v47 }
 0x34e   : > { %4244 = vst.msk [vmem:[%s7315_s7 + $0x228] sm:$0xff] %vm4174_vm1, %v2670_v44  ;;  %5174 = vmatmul.msk.f32.gmra.mxu0 %vm349_vm0, %v7069_v3 }
 0x34f   : > { %5190 = vmatmul.msk.f32.gmra.mxu1 %vm349_vm0, %v7069_v3  ;;  %4252 = vst.msk [vmem:[%s7315_s7 + $0x268] sm:$0xff] %vm4174_vm1, %v2735_v7  ;;  %v8073_v7 = vld [vmem:[#allocation4 + $0x30] sm:$0xff] }
 0x350   : > { %5206 = vmatmul.msk.f32.gmra.mxu2 %vm349_vm0, %v7069_v3 }
 0x351   : > { %5222 = vmatmul.msk.f32.gmra.mxu3 %vm349_vm0, %v7069_v3 }
 0x353   : > { %v2800_v62 = vpop.f32.mrf.mxu2  ;;  %v2673_v37 = vpop.f32.mrf.mxu0 }
 0x354   : > { %v2865_v34 = vpop.f32.mrf.mxu3  ;;  %4260 = vst.msk [vmem:[%s7315_s7 + $0x2a8] sm:$0xff] %vm4174_vm1, %v2800_v62  ;;  %v2738_v59 = vpop.f32.mrf.mxu1 }
 0x355   : > { %4268 = vst.msk [vmem:[%s7315_s7 + $0x2e8] sm:$0xff] %vm4174_vm1, %v2865_v34 }
 0x356   : > { %4245 = vst.msk [vmem:[%s7315_s7 + $0x230] sm:$0xff] %vm4174_vm1, %v2673_v37  ;;  %5175 = vmatmul.msk.f32.gmra.mxu0 %vm349_vm0, %v7087_v54 }
 0x357   : > { %5191 = vmatmul.msk.f32.gmra.mxu1 %vm349_vm0, %v7087_v54  ;;  %4253 = vst.msk [vmem:[%s7315_s7 + $0x270] sm:$0xff] %vm4174_vm1, %v2738_v59 }
 0x358   : > { %5207 = vmatmul.msk.f32.gmra.mxu2 %vm349_vm0, %v7087_v54 }
 0x359   : > { %5223 = vmatmul.msk.f32.gmra.mxu3 %vm349_vm0, %v7087_v54 }
 0x35b   : > { %v2803_v3 = vpop.f32.mrf.mxu2  ;;  %v2676_v46 = vpop.f32.mrf.mxu0 }
 0x35c   : > { %v2868_v33 = vpop.f32.mrf.mxu3  ;;  %4261 = vst.msk [vmem:[%s7315_s7 + $0x2b0] sm:$0xff] %vm4174_vm1, %v2803_v3  ;;  %v2741_v6 = vpop.f32.mrf.mxu1  ;;  %v8091_v3 = vld [vmem:[#allocation4 + $0x38] sm:$0xff] }
 0x35d   : > { %4269 = vst.msk [vmem:[%s7315_s7 + $0x2f0] sm:$0xff] %vm4174_vm1, %v2868_v33 }
 0x35e   : > { %4246 = vst.msk [vmem:[%s7315_s7 + $0x238] sm:$0xff] %vm4174_vm1, %v2676_v46  ;;  %5176 = vmatmul.msk.f32.gmra.mxu0 %vm349_vm0, %v7105_v43 }
 0x35f   : > { %5192 = vmatmul.msk.f32.gmra.mxu1 %vm349_vm0, %v7105_v43  ;;  %4254 = vst.msk [vmem:[%s7315_s7 + $0x278] sm:$0xff] %vm4174_vm1, %v2741_v6 }
 0x360   : > { %5208 = vmatmul.msk.f32.gmra.mxu2 %vm349_vm0, %v7105_v43 }
 0x361   : > { %5224 = vmatmul.msk.f32.gmra.mxu3 %vm349_vm0, %v7105_v43 }
 0x363   : > { %v2806_v54 = vpop.f32.mrf.mxu2  ;;  %v2915_v58 = vpop.f32.mrf.mxu0 }
 0x364   : > { %v2871_v60 = vpop.f32.mrf.mxu3  ;;  %4262 = vst.msk [vmem:[%s7315_s7 + $0x2b8] sm:$0xff] %vm4174_vm1, %v2806_v54  ;;  %v2980_v8 = vpop.f32.mrf.mxu1 }
 0x365   : > { %4270 = vst.msk [vmem:[%s7315_s7 + $0x2f8] sm:$0xff] %vm4174_vm1, %v2871_v60 }
 0x366   : > { %4271 = vst.msk [vmem:[%s7315_s7 + $0x300] sm:$0xff] %vm4174_vm1, %v2915_v58  ;;  %5233 = vmatmul.msk.f32.vlgmr.msrb.gmra.mxu0 %vm349_vm0, %v7899_v21 }
 0x367   : > { %5249 = vmatmul.msk.f32.vlgmr.msrb.gmra.mxu1 %vm349_vm0, %v7899_v21  ;;  %4279 = vst.msk [vmem:[%s7315_s7 + $0x340] sm:$0xff] %vm4174_vm1, %v2980_v8  ;;  %5353 = vmatpush.xpose.msk.msrb.mxu0 %vm349_vm0, %v7299_v51  ;;  %v8767_v51 = vld [vmem:[#allocation69_spill] sm:$0xff] }
 0x368   : > { %5265 = vmatmul.msk.f32.vlgmr.msrb.gmra.mxu2 %vm349_vm0, %v7899_v21  ;;  %5369 = vmatpush.xpose.msk.msrb.mxu1 %vm349_vm0, %v7301_v52  ;;  %v7935_v52 = vld [vmem:[#allocation4 + $0x8] sm:$0xff] }
 0x369   : > { %5281 = vmatmul.msk.f32.vlgmr.msrb.gmra.mxu3 %vm349_vm0, %v7899_v21  ;;  %5385 = vmatpush.xpose.msk.msrb.mxu2 %vm349_vm0, %v7317_v36 }
 0x36a   : > { %5401 = vmatpush.xpose.msk.msrb.mxu3 %vm349_vm0, %v7319_v42  ;;  %v8768_v42 = vld [vmem:[#allocation70_spill] sm:$0xff] }
 0x36b   : > { %v3045_v43 = vpop.f32.mrf.mxu2  ;;  %v2918_v9 = vpop.f32.mrf.mxu0  ;;  %5354 = vmatpush.xpose.msk.msrb.mxu0 %vm349_vm0, %v7283_v27 }
 0x36c   : > { %v3110_v56 = vpop.f32.mrf.mxu3  ;;  %4287 = vst.msk [vmem:[%s7315_s7 + $0x380] sm:$0xff] %vm4174_vm1, %v3045_v43  ;;  %v2983_v57 = vpop.f32.mrf.mxu1  ;;  %5370 = vmatpush.xpose.msk.msrb.mxu1 %vm349_vm0, %v7285_v18 }
 0x36d   : > { %4295 = vst.msk [vmem:[%s7315_s7 + $0x3c0] sm:$0xff] %vm4174_vm1, %v3110_v56  ;;  %5386 = vmatpush.xpose.msk.msrb.mxu2 %vm349_vm0, %v7295_v50 }
 0x36e   : > { %5402 = vmatpush.xpose.msk.msrb.mxu3 %vm349_vm0, %v7297_v30  ;;  %4272 = vst.msk [vmem:[%s7315_s7 + $0x308] sm:$0xff] %vm4174_vm1, %v2918_v9  ;;  %5234 = vmatmul.msk.f32.gmra.mxu0 %vm349_vm0, %v7935_v52  ;;  %v8766_v30 = vld [vmem:[#allocation65_spill] sm:$0xff] }
 0x36f   : > { %4280 = vst.msk [vmem:[%s7315_s7 + $0x348] sm:$0xff] %vm4174_vm1, %v2983_v57  ;;  %5250 = vmatmul.msk.f32.gmra.mxu1 %vm349_vm0, %v7935_v52  ;;  %5355 = vmatpush.xpose.msk.msrb.mxu0 %vm349_vm0, %v7267_v19  ;;  %v8769_v19 = vld [vmem:[#allocation71_spill] sm:$0xff] }
 0x370   : > { %5266 = vmatmul.msk.f32.gmra.mxu2 %vm349_vm0, %v7935_v52  ;;  %5371 = vmatpush.xpose.msk.msrb.mxu1 %vm349_vm0, %v7269_v41  ;;  %v8770_v41 = vld [vmem:[#allocation64_spill] sm:$0xff] }
 0x371   : > { %5282 = vmatmul.msk.f32.gmra.mxu3 %vm349_vm0, %v7935_v52  ;;  %5387 = vmatpush.xpose.msk.msrb.mxu2 %vm349_vm0, %v7279_v14  ;;  %v7969_v14 = vld [vmem:[#allocation4 + $0x10] sm:$0xff] }
 0x372   : > { %5403 = vmatpush.xpose.msk.msrb.mxu3 %vm349_vm0, %v8766_v30 }
 0x373   : > { %v3048_v50 = vpop.f32.mrf.mxu2  ;;  %v2921_v27 = vpop.f32.mrf.mxu0  ;;  %5356 = vmatpush.xpose.msk.msrb.mxu0 %vm349_vm0, %v8767_v51 }
 0x374   : > { %v3113_v18 = vpop.f32.mrf.mxu3  ;;  %4288 = vst.msk [vmem:[%s7315_s7 + $0x388] sm:$0xff] %vm4174_vm1, %v3048_v50  ;;  %v2986_v36 = vpop.f32.mrf.mxu1  ;;  %5372 = vmatpush.xpose.msk.msrb.mxu1 %vm349_vm0, %v8768_v42 }
 0x375   : > { %4296 = vst.msk [vmem:[%s7315_s7 + $0x3c8] sm:$0xff] %vm4174_vm1, %v3113_v18  ;;  %5388 = vmatpush.xpose.msk.msrb.mxu2 %vm349_vm0, %v8769_v19 }
 0x376   : > { %5404 = vmatpush.xpose.msk.msrb.mxu3 %vm349_vm0, %v8770_v41  ;;  %4273 = vst.msk [vmem:[%s7315_s7 + $0x310] sm:$0xff] %vm4174_vm1, %v2921_v27  ;;  %5235 = vmatmul.msk.f32.gmra.mxu0 %vm349_vm0, %v7969_v14 }
 0x377   : > { %4281 = vst.msk [vmem:[%s7315_s7 + $0x350] sm:$0xff] %vm4174_vm1, %v2986_v36  ;;  %5251 = vmatmul.msk.f32.gmra.mxu1 %vm349_vm0, %v7969_v14  ;;  %5357 = vmatpush.xpose.msk.msrb.mxu0 %vm349_vm0, %v8771_v24 }
 0x378   : > { %5267 = vmatmul.msk.f32.gmra.mxu2 %vm349_vm0, %v7969_v14  ;;  %5373 = vmatpush.xpose.msk.msrb.mxu1 %vm349_vm0, %v8772_v25 }
 0x379   : > { %5283 = vmatmul.msk.f32.gmra.mxu3 %vm349_vm0, %v7969_v14  ;;  %5389 = vmatpush.xpose.msk.msrb.mxu2 %vm349_vm0, %v8773_v26 }
 0x37a   : > { %5405 = vmatpush.xpose.msk.msrb.mxu3 %vm349_vm0, %v8774_v31 }
 0x37b   : > { %v3051_v28 = vpop.f32.mrf.mxu2  ;;  %v2924_v12 = vpop.f32.mrf.mxu0  ;;  %5358 = vmatpush.xpose.msk.msrb.mxu0 %vm349_vm0, %v8775_v13 }
 0x37c   : > { %v3116_v32 = vpop.f32.mrf.mxu3  ;;  %4289 = vst.msk [vmem:[%s7315_s7 + $0x390] sm:$0xff] %vm4174_vm1, %v3051_v28  ;;  %v2989_v15 = vpop.f32.mrf.mxu1  ;;  %5374 = vmatpush.xpose.msk.msrb.mxu1 %vm349_vm0, %v8776_v4 }
 0x37d   : > { %4297 = vst.msk [vmem:[%s7315_s7 + $0x3d0] sm:$0xff] %vm4174_vm1, %v3116_v32  ;;  %5390 = vmatpush.xpose.msk.msrb.mxu2 %vm349_vm0, %v8777_v5 }
 0x37e   : > { %5406 = vmatpush.xpose.msk.msrb.mxu3 %vm349_vm0, %v8778_v10  ;;  %4274 = vst.msk [vmem:[%s7315_s7 + $0x318] sm:$0xff] %vm4174_vm1, %v2924_v12  ;;  %5236 = vmatmul.msk.f32.gmra.mxu0 %vm349_vm0, %v8003_v11 }
 0x37f   : > { %4282 = vst.msk [vmem:[%s7315_s7 + $0x358] sm:$0xff] %vm4174_vm1, %v2989_v15  ;;  %5252 = vmatmul.msk.f32.gmra.mxu1 %vm349_vm0, %v8003_v11  ;;  %5359 = vmatpush.xpose.msk.msrb.mxu0 %vm349_vm0, %v8779_v39 }
 0x380   : > { %5268 = vmatmul.msk.f32.gmra.mxu2 %vm349_vm0, %v8003_v11  ;;  %5375 = vmatpush.xpose.msk.msrb.mxu1 %vm349_vm0, %v8780_v40 }
 0x381   : > { %5284 = vmatmul.msk.f32.gmra.mxu3 %vm349_vm0, %v8003_v11  ;;  %5391 = vmatpush.xpose.msk.msrb.mxu2 %vm349_vm0, %v8781_v53 }
 0x382   : > { %5407 = vmatpush.xpose.msk.msrb.mxu3 %vm349_vm0, %v8782_v61 }
 0x383   : > { %v3054_v55 = vpop.f32.mrf.mxu2  ;;  %v2927_v35 = vpop.f32.mrf.mxu0  ;;  %5360 = vmatpush.xpose.msk.msrb.mxu0 %vm349_vm0, %v8783_v20 }
 0x384   : > { %v3119_v2 = vpop.f32.mrf.mxu3  ;;  %4290 = vst.msk [vmem:[%s7315_s7 + $0x398] sm:$0xff] %vm4174_vm1, %v3054_v55  ;;  %v2992_v29 = vpop.f32.mrf.mxu1  ;;  %5376 = vmatpush.xpose.msk.msrb.mxu1 %vm349_vm0, %v8784_v45 }
 0x385   : > { %4298 = vst.msk [vmem:[%s7315_s7 + $0x3d8] sm:$0xff] %vm4174_vm1, %v3119_v2  ;;  %5392 = vmatpush.xpose.msk.msrb.mxu2 %vm349_vm0, %v8785_v22 }
 0x386   : > { %5408 = vmatpush.xpose.msk.msrb.mxu3 %vm349_vm0, %v8786_v23  ;;  %4275 = vst.msk [vmem:[%s7315_s7 + $0x320] sm:$0xff] %vm4174_vm1, %v2927_v35  ;;  %5237 = vmatmul.msk.f32.gmra.mxu0 %vm349_vm0, %v8037_v38 }
 0x387   : > { %4283 = vst.msk [vmem:[%s7315_s7 + $0x360] sm:$0xff] %vm4174_vm1, %v2992_v29  ;;  %5253 = vmatmul.msk.f32.gmra.mxu1 %vm349_vm0, %v8037_v38 }
 0x388   : > { %5269 = vmatmul.msk.f32.gmra.mxu2 %vm349_vm0, %v8037_v38 }
 0x389   : > { %5285 = vmatmul.msk.f32.gmra.mxu3 %vm349_vm0, %v8037_v38 }
 0x38b   : > { %v3057_v16 = vpop.f32.mrf.mxu2  ;;  %v2930_v17 = vpop.f32.mrf.mxu0 }
 0x38c   : > { %v3122_v63 = vpop.f32.mrf.mxu3  ;;  %4291 = vst.msk [vmem:[%s7315_s7 + $0x3a0] sm:$0xff] %vm4174_vm1, %v3057_v16  ;;  %v2995_v0 = vpop.f32.mrf.mxu1 }
 0x38d   : > { %4299 = vst.msk [vmem:[%s7315_s7 + $0x3e0] sm:$0xff] %vm4174_vm1, %v3122_v63 }
 0x38e   : > { %4276 = vst.msk [vmem:[%s7315_s7 + $0x328] sm:$0xff] %vm4174_vm1, %v2930_v17  ;;  %5238 = vmatmul.msk.f32.gmra.mxu0 %vm349_vm0, %v8055_v1 }
 0x38f   : > { %4284 = vst.msk [vmem:[%s7315_s7 + $0x368] sm:$0xff] %vm4174_vm1, %v2995_v0  ;;  %5254 = vmatmul.msk.f32.gmra.mxu1 %vm349_vm0, %v8055_v1 }
 0x390   : > { %5270 = vmatmul.msk.f32.gmra.mxu2 %vm349_vm0, %v8055_v1 }
 0x391   : > { %5286 = vmatmul.msk.f32.gmra.mxu3 %vm349_vm0, %v8055_v1 }
 0x393   : > { %v3060_v48 = vpop.f32.mrf.mxu2  ;;  %v2933_v47 = vpop.f32.mrf.mxu0 }
 0x394   : > { %v3125_v49 = vpop.f32.mrf.mxu3  ;;  %4292 = vst.msk [vmem:[%s7315_s7 + $0x3a8] sm:$0xff] %vm4174_vm1, %v3060_v48  ;;  %v2998_v44 = vpop.f32.mrf.mxu1 }
 0x395   : > { %4300 = vst.msk [vmem:[%s7315_s7 + $0x3e8] sm:$0xff] %vm4174_vm1, %v3125_v49 }
 0x396   : > { %4277 = vst.msk [vmem:[%s7315_s7 + $0x330] sm:$0xff] %vm4174_vm1, %v2933_v47  ;;  %5239 = vmatmul.msk.f32.gmra.mxu0 %vm349_vm0, %v8073_v7 }
 0x397   : > { %4285 = vst.msk [vmem:[%s7315_s7 + $0x370] sm:$0xff] %vm4174_vm1, %v2998_v44  ;;  %5255 = vmatmul.msk.f32.gmra.mxu1 %vm349_vm0, %v8073_v7 }
 0x398   : > { %5271 = vmatmul.msk.f32.gmra.mxu2 %vm349_vm0, %v8073_v7 }
 0x399   : > { %5287 = vmatmul.msk.f32.gmra.mxu3 %vm349_vm0, %v8073_v7 }
 0x39b   : > { %v3063_v62 = vpop.f32.mrf.mxu2  ;;  %v2936_v37 = vpop.f32.mrf.mxu0 }
 0x39c   : > { %v3128_v34 = vpop.f32.mrf.mxu3  ;;  %4293 = vst.msk [vmem:[%s7315_s7 + $0x3b0] sm:$0xff] %vm4174_vm1, %v3063_v62  ;;  %v3001_v59 = vpop.f32.mrf.mxu1 }
 0x39d   : > { %4301 = vst.msk [vmem:[%s7315_s7 + $0x3f0] sm:$0xff] %vm4174_vm1, %v3128_v34 }
 0x39e   : > { %4278 = vst.msk [vmem:[%s7315_s7 + $0x338] sm:$0xff] %vm4174_vm1, %v2936_v37  ;;  %5240 = vmatmul.msk.f32.gmra.mxu0 %vm349_vm0, %v8091_v3 }
 0x39f   : > { %4286 = vst.msk [vmem:[%s7315_s7 + $0x378] sm:$0xff] %vm4174_vm1, %v3001_v59  ;;  %5256 = vmatmul.msk.f32.gmra.mxu1 %vm349_vm0, %v8091_v3 }
 0x3a0   : > { %5272 = vmatmul.msk.f32.gmra.mxu2 %vm349_vm0, %v8091_v3 }
 0x3a1   : > { %5288 = vmatmul.msk.f32.gmra.mxu3 %vm349_vm0, %v8091_v3 }
 0x3a3   : > { %v3066_v33 = vpop.f32.mrf.mxu2  ;;  %v3175_v6 = vpop.f32.mrf.mxu0 }
 0x3a4   : > { %v3131_v46 = vpop.f32.mrf.mxu3  ;;  %4294 = vst.msk [vmem:[%s7315_s7 + $0x3b8] sm:$0xff] %vm4174_vm1, %v3066_v33  ;;  %v3240_v54 = vpop.f32.mrf.mxu1 }
 0x3a5   : > { %4302 = vst.msk [vmem:[%s7315_s7 + $0x3f8] sm:$0xff] %vm4174_vm1, %v3131_v46 }
 0x3a6   : > { %4303 = vst.msk [vmem:[%s7315_s7 + $0x400] sm:$0xff] %vm4174_vm1, %v3175_v6  ;;  %5297 = vmatmul.msk.f32.vlgmr.msra.gmra.mxu0 %vm349_vm0, %v7899_v21 }
 0x3a7   : > { %4311 = vst.msk [vmem:[%s7315_s7 + $0x440] sm:$0xff] %vm4174_vm1, %v3240_v54  ;;  %5313 = vmatmul.msk.f32.vlgmr.msra.gmra.mxu1 %vm349_vm0, %v7899_v21 }
 0x3a8   : > { %5329 = vmatmul.msk.f32.vlgmr.msra.gmra.mxu2 %vm349_vm0, %v7899_v21 }
 0x3a9   : > { %5345 = vmatmul.msk.f32.vlgmr.msra.gmra.mxu3 %vm349_vm0, %v7899_v21 }
 0x3ab   : > { %v3305_v60 = vpop.f32.mrf.mxu2  ;;  %v3178_v8 = vpop.f32.mrf.mxu0 }
 0x3ac   : > { %v3370_v58 = vpop.f32.mrf.mxu3  ;;  %4319 = vst.msk [vmem:[%s7315_s7 + $0x480] sm:$0xff] %vm4174_vm1, %v3305_v60  ;;  %v3243_v43 = vpop.f32.mrf.mxu1 }
 0x3ad   : > { %4327 = vst.msk [vmem:[%s7315_s7 + $0x4c0] sm:$0xff] %vm4174_vm1, %v3370_v58 }
 0x3ae   : > { %4304 = vst.msk [vmem:[%s7315_s7 + $0x408] sm:$0xff] %vm4174_vm1, %v3178_v8  ;;  %5298 = vmatmul.msk.f32.gmra.mxu0 %vm349_vm0, %v7935_v52 }
 0x3af   : > { %4312 = vst.msk [vmem:[%s7315_s7 + $0x448] sm:$0xff] %vm4174_vm1, %v3243_v43  ;;  %5314 = vmatmul.msk.f32.gmra.mxu1 %vm349_vm0, %v7935_v52 }
 0x3b0   : > { %5330 = vmatmul.msk.f32.gmra.mxu2 %vm349_vm0, %v7935_v52 }
 0x3b1   : > { %5346 = vmatmul.msk.f32.gmra.mxu3 %vm349_vm0, %v7935_v52 }
 0x3b3   : > { %v3308_v56 = vpop.f32.mrf.mxu2  ;;  %v3181_v57 = vpop.f32.mrf.mxu0 }
 0x3b4   : > { %v3373_v9 = vpop.f32.mrf.mxu3  ;;  %4320 = vst.msk [vmem:[%s7315_s7 + $0x488] sm:$0xff] %vm4174_vm1, %v3308_v56  ;;  %v3246_v30 = vpop.f32.mrf.mxu1 }
 0x3b5   : > { %4328 = vst.msk [vmem:[%s7315_s7 + $0x4c8] sm:$0xff] %vm4174_vm1, %v3373_v9 }
 0x3b6   : > { %4305 = vst.msk [vmem:[%s7315_s7 + $0x410] sm:$0xff] %vm4174_vm1, %v3181_v57  ;;  %5299 = vmatmul.msk.f32.gmra.mxu0 %vm349_vm0, %v7969_v14 }
 0x3b7   : > { %4313 = vst.msk [vmem:[%s7315_s7 + $0x450] sm:$0xff] %vm4174_vm1, %v3246_v30  ;;  %5315 = vmatmul.msk.f32.gmra.mxu1 %vm349_vm0, %v7969_v14 }
 0x3b8   : > { %5331 = vmatmul.msk.f32.gmra.mxu2 %vm349_vm0, %v7969_v14 }
 0x3b9   : > { %5347 = vmatmul.msk.f32.gmra.mxu3 %vm349_vm0, %v7969_v14 }
 0x3bb   : > { %v3311_v50 = vpop.f32.mrf.mxu2  ;;  %v3184_v27 = vpop.f32.mrf.mxu0 }
 0x3bc   : > { %v3376_v18 = vpop.f32.mrf.mxu3  ;;  %4321 = vst.msk [vmem:[%s7315_s7 + $0x490] sm:$0xff] %vm4174_vm1, %v3311_v50  ;;  %v3249_v36 = vpop.f32.mrf.mxu1 }
 0x3bd   : > { %4329 = vst.msk [vmem:[%s7315_s7 + $0x4d0] sm:$0xff] %vm4174_vm1, %v3376_v18 }
 0x3be   : > { %4306 = vst.msk [vmem:[%s7315_s7 + $0x418] sm:$0xff] %vm4174_vm1, %v3184_v27  ;;  %5300 = vmatmul.msk.f32.gmra.mxu0 %vm349_vm0, %v8003_v11 }
 0x3bf   : > { %4314 = vst.msk [vmem:[%s7315_s7 + $0x458] sm:$0xff] %vm4174_vm1, %v3249_v36  ;;  %5316 = vmatmul.msk.f32.gmra.mxu1 %vm349_vm0, %v8003_v11 }
 0x3c0   : > { %5332 = vmatmul.msk.f32.gmra.mxu2 %vm349_vm0, %v8003_v11 }
 0x3c1   : > { %5348 = vmatmul.msk.f32.gmra.mxu3 %vm349_vm0, %v8003_v11 }
 0x3c3   : > { %v3314_v51 = vpop.f32.mrf.mxu2  ;;  %v3187_v19 = vpop.f32.mrf.mxu0 }
 0x3c4   : > { %v3379_v42 = vpop.f32.mrf.mxu3  ;;  %4322 = vst.msk [vmem:[%s7315_s7 + $0x498] sm:$0xff] %vm4174_vm1, %v3314_v51  ;;  %v3252_v41 = vpop.f32.mrf.mxu1 }
 0x3c5   : > { %4330 = vst.msk [vmem:[%s7315_s7 + $0x4d8] sm:$0xff] %vm4174_vm1, %v3379_v42 }
 0x3c6   : > { %4307 = vst.msk [vmem:[%s7315_s7 + $0x420] sm:$0xff] %vm4174_vm1, %v3187_v19  ;;  %5301 = vmatmul.msk.f32.gmra.mxu0 %vm349_vm0, %v8037_v38 }
 0x3c7   : > { %4315 = vst.msk [vmem:[%s7315_s7 + $0x460] sm:$0xff] %vm4174_vm1, %v3252_v41  ;;  %5317 = vmatmul.msk.f32.gmra.mxu1 %vm349_vm0, %v8037_v38 }
 0x3c8   : > { %5333 = vmatmul.msk.f32.gmra.mxu2 %vm349_vm0, %v8037_v38 }
 0x3c9   : > { %5349 = vmatmul.msk.f32.gmra.mxu3 %vm349_vm0, %v8037_v38 }
 0x3cb   : > { %v3317_v24 = vpop.f32.mrf.mxu2  ;;  %v3190_v26 = vpop.f32.mrf.mxu0 }
 0x3cc   : > { %v3382_v25 = vpop.f32.mrf.mxu3  ;;  %4323 = vst.msk [vmem:[%s7315_s7 + $0x4a0] sm:$0xff] %vm4174_vm1, %v3317_v24  ;;  %v3255_v31 = vpop.f32.mrf.mxu1 }
 0x3cd   : > { %4331 = vst.msk [vmem:[%s7315_s7 + $0x4e0] sm:$0xff] %vm4174_vm1, %v3382_v25 }
 0x3ce   : > { %4308 = vst.msk [vmem:[%s7315_s7 + $0x428] sm:$0xff] %vm4174_vm1, %v3190_v26  ;;  %5302 = vmatmul.msk.f32.gmra.mxu0 %vm349_vm0, %v8055_v1 }
 0x3cf   : > { %4316 = vst.msk [vmem:[%s7315_s7 + $0x468] sm:$0xff] %vm4174_vm1, %v3255_v31  ;;  %5318 = vmatmul.msk.f32.gmra.mxu1 %vm349_vm0, %v8055_v1 }
 0x3d0   : > { %5334 = vmatmul.msk.f32.gmra.mxu2 %vm349_vm0, %v8055_v1 }
 0x3d1   : > { %5350 = vmatmul.msk.f32.gmra.mxu3 %vm349_vm0, %v8055_v1 }
 0x3d3   : > { %v3320_v28 = vpop.f32.mrf.mxu2  ;;  %v3193_v12 = vpop.f32.mrf.mxu0 }
 0x3d4   : > { %v3385_v32 = vpop.f32.mrf.mxu3  ;;  %4324 = vst.msk [vmem:[%s7315_s7 + $0x4a8] sm:$0xff] %vm4174_vm1, %v3320_v28  ;;  %v3258_v15 = vpop.f32.mrf.mxu1 }
 0x3d5   : > { %4332 = vst.msk [vmem:[%s7315_s7 + $0x4e8] sm:$0xff] %vm4174_vm1, %v3385_v32 }
 0x3d6   : > { %4309 = vst.msk [vmem:[%s7315_s7 + $0x430] sm:$0xff] %vm4174_vm1, %v3193_v12  ;;  %5303 = vmatmul.msk.f32.gmra.mxu0 %vm349_vm0, %v8073_v7 }
 0x3d7   : > { %4317 = vst.msk [vmem:[%s7315_s7 + $0x470] sm:$0xff] %vm4174_vm1, %v3258_v15  ;;  %5319 = vmatmul.msk.f32.gmra.mxu1 %vm349_vm0, %v8073_v7 }
 0x3d8   : > { %5335 = vmatmul.msk.f32.gmra.mxu2 %vm349_vm0, %v8073_v7 }
 0x3d9   : > { %5351 = vmatmul.msk.f32.gmra.mxu3 %vm349_vm0, %v8073_v7 }
 0x3db   : > { %v3323_v13 = vpop.f32.mrf.mxu2  ;;  %v3196_v5 = vpop.f32.mrf.mxu0 }
 0x3dc   : > { %v3388_v4 = vpop.f32.mrf.mxu3  ;;  %4325 = vst.msk [vmem:[%s7315_s7 + $0x4b0] sm:$0xff] %vm4174_vm1, %v3323_v13  ;;  %v3261_v10 = vpop.f32.mrf.mxu1 }
 0x3dd   : > { %4333 = vst.msk [vmem:[%s7315_s7 + $0x4f0] sm:$0xff] %vm4174_vm1, %v3388_v4 }
 0x3de   : > { %4310 = vst.msk [vmem:[%s7315_s7 + $0x438] sm:$0xff] %vm4174_vm1, %v3196_v5  ;;  %5304 = vmatmul.msk.f32.gmra.mxu0 %vm349_vm0, %v8091_v3 }
 0x3df   : > { %4318 = vst.msk [vmem:[%s7315_s7 + $0x478] sm:$0xff] %vm4174_vm1, %v3261_v10  ;;  %5320 = vmatmul.msk.f32.gmra.mxu1 %vm349_vm0, %v8091_v3 }
 0x3e0   : > { %5336 = vmatmul.msk.f32.gmra.mxu2 %vm349_vm0, %v8091_v3 }
 0x3e1   : > { %5352 = vmatmul.msk.f32.gmra.mxu3 %vm349_vm0, %v8091_v3 }
 0x3e3   : > { %v3326_v39 = vpop.f32.mrf.mxu2  ;;  %v3435_v53 = vpop.f32.mrf.mxu0 }
 0x3e4   : > { %v3391_v40 = vpop.f32.mrf.mxu3  ;;  %4326 = vst.msk [vmem:[%s7315_s7 + $0x4b8] sm:$0xff] %vm4174_vm1, %v3326_v39  ;;  %v3500_v61 = vpop.f32.mrf.mxu1 }
 0x3e5   : > { %4334 = vst.msk [vmem:[%s7315_s7 + $0x4f8] sm:$0xff] %vm4174_vm1, %v3391_v40 }
 0x3e6   : > { %4335 = vst.msk [vmem:[%s7315_s7 + $0x500] sm:$0xff] %vm4174_vm1, %v3435_v53  ;;  %5361 = vmatmul.msk.f32.vlgmr.msrb.gmra.mxu0 %vm349_vm0, %v7899_v21 }
 0x3e7   : > { %4343 = vst.msk [vmem:[%s7315_s7 + $0x540] sm:$0xff] %vm4174_vm1, %v3500_v61  ;;  %5377 = vmatmul.msk.f32.vlgmr.msrb.gmra.mxu1 %vm349_vm0, %v7899_v21 }
 0x3e8   : > { %5393 = vmatmul.msk.f32.vlgmr.msrb.gmra.mxu2 %vm349_vm0, %v7899_v21 }
 0x3e9   : > { %5409 = vmatmul.msk.f32.vlgmr.msrb.gmra.mxu3 %vm349_vm0, %v7899_v21 }
 0x3eb   : > { %v3565_v55 = vpop.f32.mrf.mxu2  ;;  %v3438_v35 = vpop.f32.mrf.mxu0 }
 0x3ec   : > { %v3630_v2 = vpop.f32.mrf.mxu3  ;;  %4351 = vst.msk [vmem:[%s7315_s7 + $0x580] sm:$0xff] %vm4174_vm1, %v3565_v55  ;;  %v3503_v29 = vpop.f32.mrf.mxu1 }
 0x3ed   : > { %4359 = vst.msk [vmem:[%s7315_s7 + $0x5c0] sm:$0xff] %vm4174_vm1, %v3630_v2 }
 0x3ee   : > { %4336 = vst.msk [vmem:[%s7315_s7 + $0x508] sm:$0xff] %vm4174_vm1, %v3438_v35  ;;  %5362 = vmatmul.msk.f32.gmra.mxu0 %vm349_vm0, %v7935_v52 }
 0x3ef   : > { %4344 = vst.msk [vmem:[%s7315_s7 + $0x548] sm:$0xff] %vm4174_vm1, %v3503_v29  ;;  %5378 = vmatmul.msk.f32.gmra.mxu1 %vm349_vm0, %v7935_v52 }
 0x3f0   : > { %5394 = vmatmul.msk.f32.gmra.mxu2 %vm349_vm0, %v7935_v52 }
 0x3f1   : > { %5410 = vmatmul.msk.f32.gmra.mxu3 %vm349_vm0, %v7935_v52 }
 0x3f3   : > { %v3568_v21 = vpop.f32.mrf.mxu2  ;;  %v3441_v45 = vpop.f32.mrf.mxu0 }
 0x3f4   : > { %v3633_v20 = vpop.f32.mrf.mxu3  ;;  %4352 = vst.msk [vmem:[%s7315_s7 + $0x588] sm:$0xff] %vm4174_vm1, %v3568_v21  ;;  %v3506_v22 = vpop.f32.mrf.mxu1 }
 0x3f5   : > { %4360 = vst.msk [vmem:[%s7315_s7 + $0x5c8] sm:$0xff] %vm4174_vm1, %v3633_v20 }
 0x3f6   : > { %4337 = vst.msk [vmem:[%s7315_s7 + $0x510] sm:$0xff] %vm4174_vm1, %v3441_v45  ;;  %5363 = vmatmul.msk.f32.gmra.mxu0 %vm349_vm0, %v7969_v14 }
 0x3f7   : > { %4345 = vst.msk [vmem:[%s7315_s7 + $0x550] sm:$0xff] %vm4174_vm1, %v3506_v22  ;;  %5379 = vmatmul.msk.f32.gmra.mxu1 %vm349_vm0, %v7969_v14 }
 0x3f8   : > { %5395 = vmatmul.msk.f32.gmra.mxu2 %vm349_vm0, %v7969_v14 }
 0x3f9   : > { %5411 = vmatmul.msk.f32.gmra.mxu3 %vm349_vm0, %v7969_v14 }
 0x3fb   : > { %v3571_v52 = vpop.f32.mrf.mxu2  ;;  %v3444_v16 = vpop.f32.mrf.mxu0 }
 0x3fc   : > { %v3636_v23 = vpop.f32.mrf.mxu3  ;;  %4353 = vst.msk [vmem:[%s7315_s7 + $0x590] sm:$0xff] %vm4174_vm1, %v3571_v52  ;;  %v3509_v63 = vpop.f32.mrf.mxu1 }
 0x3fd   : > { %4361 = vst.msk [vmem:[%s7315_s7 + $0x5d0] sm:$0xff] %vm4174_vm1, %v3636_v23 }
 0x3fe   : > { %4338 = vst.msk [vmem:[%s7315_s7 + $0x518] sm:$0xff] %vm4174_vm1, %v3444_v16  ;;  %5364 = vmatmul.msk.f32.gmra.mxu0 %vm349_vm0, %v8003_v11 }
 0x3ff   : > { %4346 = vst.msk [vmem:[%s7315_s7 + $0x558] sm:$0xff] %vm4174_vm1, %v3509_v63  ;;  %5380 = vmatmul.msk.f32.gmra.mxu1 %vm349_vm0, %v8003_v11 }
 0x400   : > { %5396 = vmatmul.msk.f32.gmra.mxu2 %vm349_vm0, %v8003_v11 }
 0x401   : > { %5412 = vmatmul.msk.f32.gmra.mxu3 %vm349_vm0, %v8003_v11 }
 0x403   : > { %v3574_v14 = vpop.f32.mrf.mxu2  ;;  %v3447_v0 = vpop.f32.mrf.mxu0 }
 0x404   : > { %v3639_v17 = vpop.f32.mrf.mxu3  ;;  %4354 = vst.msk [vmem:[%s7315_s7 + $0x598] sm:$0xff] %vm4174_vm1, %v3574_v14  ;;  %v3512_v48 = vpop.f32.mrf.mxu1 }
 0x405   : > { %4362 = vst.msk [vmem:[%s7315_s7 + $0x5d8] sm:$0xff] %vm4174_vm1, %v3639_v17 }
 0x406   : > { %4339 = vst.msk [vmem:[%s7315_s7 + $0x520] sm:$0xff] %vm4174_vm1, %v3447_v0  ;;  %5365 = vmatmul.msk.f32.gmra.mxu0 %vm349_vm0, %v8037_v38 }
 0x407   : > { %4347 = vst.msk [vmem:[%s7315_s7 + $0x560] sm:$0xff] %vm4174_vm1, %v3512_v48  ;;  %5381 = vmatmul.msk.f32.gmra.mxu1 %vm349_vm0, %v8037_v38 }
 0x408   : > { %5397 = vmatmul.msk.f32.gmra.mxu2 %vm349_vm0, %v8037_v38 }
 0x409   : > { %5413 = vmatmul.msk.f32.gmra.mxu3 %vm349_vm0, %v8037_v38 }
 0x40b   : > { %v3577_v11 = vpop.f32.mrf.mxu2  ;;  %v3450_v47 = vpop.f32.mrf.mxu0 }
 0x40c   : > { %v3642_v49 = vpop.f32.mrf.mxu3  ;;  %4355 = vst.msk [vmem:[%s7315_s7 + $0x5a0] sm:$0xff] %vm4174_vm1, %v3577_v11  ;;  %v3515_v44 = vpop.f32.mrf.mxu1 }
 0x40d   : > { %4363 = vst.msk [vmem:[%s7315_s7 + $0x5e0] sm:$0xff] %vm4174_vm1, %v3642_v49 }
 0x40e   : > { %4340 = vst.msk [vmem:[%s7315_s7 + $0x528] sm:$0xff] %vm4174_vm1, %v3450_v47  ;;  %5366 = vmatmul.msk.f32.gmra.mxu0 %vm349_vm0, %v8055_v1 }
 0x40f   : > { %4348 = vst.msk [vmem:[%s7315_s7 + $0x568] sm:$0xff] %vm4174_vm1, %v3515_v44  ;;  %5382 = vmatmul.msk.f32.gmra.mxu1 %vm349_vm0, %v8055_v1 }
 0x410   : > { %5398 = vmatmul.msk.f32.gmra.mxu2 %vm349_vm0, %v8055_v1 }
 0x411   : > { %5414 = vmatmul.msk.f32.gmra.mxu3 %vm349_vm0, %v8055_v1 }
 0x413   : > { %v3580_v38 = vpop.f32.mrf.mxu2  ;;  %v3453_v34 = vpop.f32.mrf.mxu0 }
 0x414   : > { %v3645_v62 = vpop.f32.mrf.mxu3  ;;  %4356 = vst.msk [vmem:[%s7315_s7 + $0x5a8] sm:$0xff] %vm4174_vm1, %v3580_v38  ;;  %v3518_v37 = vpop.f32.mrf.mxu1 }
 0x415   : > { %4364 = vst.msk [vmem:[%s7315_s7 + $0x5e8] sm:$0xff] %vm4174_vm1, %v3645_v62 }
 0x416   : > { %4341 = vst.msk [vmem:[%s7315_s7 + $0x530] sm:$0xff] %vm4174_vm1, %v3453_v34  ;;  %5367 = vmatmul.msk.f32.gmra.mxu0 %vm349_vm0, %v8073_v7 }
 0x417   : > { %4349 = vst.msk [vmem:[%s7315_s7 + $0x570] sm:$0xff] %vm4174_vm1, %v3518_v37  ;;  %5383 = vmatmul.msk.f32.gmra.mxu1 %vm349_vm0, %v8073_v7 }
 0x418   : > { %5399 = vmatmul.msk.f32.gmra.mxu2 %vm349_vm0, %v8073_v7 }
 0x419   : > { %5415 = vmatmul.msk.f32.gmra.mxu3 %vm349_vm0, %v8073_v7 }
 0x41b   : > { %v3583_v1 = vpop.f32.mrf.mxu2  ;;  %v3456_v33 = vpop.f32.mrf.mxu0 }
 0x41c   : > { %v3648_v59 = vpop.f32.mrf.mxu3  ;;  %4357 = vst.msk [vmem:[%s7315_s7 + $0x5b0] sm:$0xff] %vm4174_vm1, %v3583_v1  ;;  %v3521_v46 = vpop.f32.mrf.mxu1 }
 0x41d   : > { %4365 = vst.msk [vmem:[%s7315_s7 + $0x5f0] sm:$0xff] %vm4174_vm1, %v3648_v59 }
 0x41e   : > { %4342 = vst.msk [vmem:[%s7315_s7 + $0x538] sm:$0xff] %vm4174_vm1, %v3456_v33  ;;  %5368 = vmatmul.msk.f32.gmra.mxu0 %vm349_vm0, %v8091_v3 }
 0x41f   : > { %4350 = vst.msk [vmem:[%s7315_s7 + $0x578] sm:$0xff] %vm4174_vm1, %v3521_v46  ;;  %5384 = vmatmul.msk.f32.gmra.mxu1 %vm349_vm0, %v8091_v3 }
 0x420   : > { %5400 = vmatmul.msk.f32.gmra.mxu2 %vm349_vm0, %v8091_v3 }
 0x421   : > { %5416 = vmatmul.msk.f32.gmra.mxu3 %vm349_vm0, %v8091_v3 }
 0x423   : > { %v3586_v7 = vpop.f32.mrf.mxu2  ;;  %v3695_v54 = vpop.f32.mrf.mxu0 }
 0x424   : > { %v3651_v6 = vpop.f32.mrf.mxu3  ;;  %4358 = vst.msk [vmem:[%s7315_s7 + $0x5b8] sm:$0xff] %vm4174_vm1, %v3586_v7  ;;  %v3760_v60 = vpop.f32.mrf.mxu1 }
 0x425   : > { %4366 = vst.msk [vmem:[%s7315_s7 + $0x5f8] sm:$0xff] %vm4174_vm1, %v3651_v6 }
 0x426   : > { %4367 = vst.msk [vmem:[%s7315_s7 + $0x600] sm:$0xff] %vm4174_vm1, %v3695_v54 }
 0x427   : > { %4375 = vst.msk [vmem:[%s7315_s7 + $0x640] sm:$0xff] %vm4174_vm1, %v3760_v60 }
 0x42b   : > { %v3825_v58 = vpop.f32.mrf.mxu2  ;;  %v3698_v3 = vpop.f32.mrf.mxu0 }
 0x42c   : > { %v3890_v8 = vpop.f32.mrf.mxu3  ;;  %4383 = vst.msk [vmem:[%s7315_s7 + $0x680] sm:$0xff] %vm4174_vm1, %v3825_v58  ;;  %v3763_v43 = vpop.f32.mrf.mxu1 }
 0x42d   : > { %4391 = vst.msk [vmem:[%s7315_s7 + $0x6c0] sm:$0xff] %vm4174_vm1, %v3890_v8 }
 0x42e   : > { %4368 = vst.msk [vmem:[%s7315_s7 + $0x608] sm:$0xff] %vm4174_vm1, %v3698_v3 }
 0x42f   : > { %4376 = vst.msk [vmem:[%s7315_s7 + $0x648] sm:$0xff] %vm4174_vm1, %v3763_v43 }
 0x433   : > { %v3828_v56 = vpop.f32.mrf.mxu2  ;;  %v3701_v57 = vpop.f32.mrf.mxu0 }
 0x434   : > { %v3893_v9 = vpop.f32.mrf.mxu3  ;;  %4384 = vst.msk [vmem:[%s7315_s7 + $0x688] sm:$0xff] %vm4174_vm1, %v3828_v56  ;;  %v3766_v30 = vpop.f32.mrf.mxu1 }
 0x435   : > { %4392 = vst.msk [vmem:[%s7315_s7 + $0x6c8] sm:$0xff] %vm4174_vm1, %v3893_v9 }
 0x436   : > { %4369 = vst.msk [vmem:[%s7315_s7 + $0x610] sm:$0xff] %vm4174_vm1, %v3701_v57 }
 0x437   : > { %4377 = vst.msk [vmem:[%s7315_s7 + $0x650] sm:$0xff] %vm4174_vm1, %v3766_v30 }
 0x43b   : > { %v3831_v50 = vpop.f32.mrf.mxu2  ;;  %v3704_v27 = vpop.f32.mrf.mxu0 }
 0x43c   : > { %v3896_v18 = vpop.f32.mrf.mxu3  ;;  %4385 = vst.msk [vmem:[%s7315_s7 + $0x690] sm:$0xff] %vm4174_vm1, %v3831_v50  ;;  %v3769_v36 = vpop.f32.mrf.mxu1 }
 0x43d   : > { %4393 = vst.msk [vmem:[%s7315_s7 + $0x6d0] sm:$0xff] %vm4174_vm1, %v3896_v18 }
 0x43e   : > { %4370 = vst.msk [vmem:[%s7315_s7 + $0x618] sm:$0xff] %vm4174_vm1, %v3704_v27 }
 0x43f   : > { %4378 = vst.msk [vmem:[%s7315_s7 + $0x658] sm:$0xff] %vm4174_vm1, %v3769_v36 }
 0x443   : > { %v3834_v51 = vpop.f32.mrf.mxu2  ;;  %v3707_v19 = vpop.f32.mrf.mxu0 }
 0x444   : > { %v3899_v42 = vpop.f32.mrf.mxu3  ;;  %4386 = vst.msk [vmem:[%s7315_s7 + $0x698] sm:$0xff] %vm4174_vm1, %v3834_v51  ;;  %v3772_v41 = vpop.f32.mrf.mxu1 }
 0x445   : > { %4394 = vst.msk [vmem:[%s7315_s7 + $0x6d8] sm:$0xff] %vm4174_vm1, %v3899_v42 }
 0x446   : > { %4371 = vst.msk [vmem:[%s7315_s7 + $0x620] sm:$0xff] %vm4174_vm1, %v3707_v19 }
 0x447   : > { %4379 = vst.msk [vmem:[%s7315_s7 + $0x660] sm:$0xff] %vm4174_vm1, %v3772_v41 }
 0x44b   : > { %v3837_v24 = vpop.f32.mrf.mxu2  ;;  %v3710_v26 = vpop.f32.mrf.mxu0 }
 0x44c   : > { %v3902_v25 = vpop.f32.mrf.mxu3  ;;  %4387 = vst.msk [vmem:[%s7315_s7 + $0x6a0] sm:$0xff] %vm4174_vm1, %v3837_v24  ;;  %v3775_v31 = vpop.f32.mrf.mxu1 }
 0x44d   : > { %4395 = vst.msk [vmem:[%s7315_s7 + $0x6e0] sm:$0xff] %vm4174_vm1, %v3902_v25 }
 0x44e   : > { %4372 = vst.msk [vmem:[%s7315_s7 + $0x628] sm:$0xff] %vm4174_vm1, %v3710_v26 }
 0x44f   : > { %4380 = vst.msk [vmem:[%s7315_s7 + $0x668] sm:$0xff] %vm4174_vm1, %v3775_v31 }
 0x453   : > { %v3840_v28 = vpop.f32.mrf.mxu2  ;;  %v3713_v12 = vpop.f32.mrf.mxu0 }
 0x454   : > { %v3905_v32 = vpop.f32.mrf.mxu3  ;;  %4388 = vst.msk [vmem:[%s7315_s7 + $0x6a8] sm:$0xff] %vm4174_vm1, %v3840_v28  ;;  %v3778_v15 = vpop.f32.mrf.mxu1 }
 0x455   : > { %4396 = vst.msk [vmem:[%s7315_s7 + $0x6e8] sm:$0xff] %vm4174_vm1, %v3905_v32 }
 0x456   : > { %4373 = vst.msk [vmem:[%s7315_s7 + $0x630] sm:$0xff] %vm4174_vm1, %v3713_v12 }
 0x457   : > { %4381 = vst.msk [vmem:[%s7315_s7 + $0x670] sm:$0xff] %vm4174_vm1, %v3778_v15 }
 0x45b   : > { %v3843_v13 = vpop.f32.mrf.mxu2  ;;  %v3716_v5 = vpop.f32.mrf.mxu0 }
 0x45c   : > { %v3908_v4 = vpop.f32.mrf.mxu3  ;;  %4389 = vst.msk [vmem:[%s7315_s7 + $0x6b0] sm:$0xff] %vm4174_vm1, %v3843_v13  ;;  %v3781_v10 = vpop.f32.mrf.mxu1 }
 0x45d   : > { %4397 = vst.msk [vmem:[%s7315_s7 + $0x6f0] sm:$0xff] %vm4174_vm1, %v3908_v4 }
 0x45e   : > { %4374 = vst.msk [vmem:[%s7315_s7 + $0x638] sm:$0xff] %vm4174_vm1, %v3716_v5 }
 0x45f   : > { %4382 = vst.msk [vmem:[%s7315_s7 + $0x678] sm:$0xff] %vm4174_vm1, %v3781_v10 }
 0x463   : > { %v3846_v39 = vpop.f32.mrf.mxu2  ;;  %v3955_v53 = vpop.f32.mrf.mxu0 }
 0x464   : > { %v3911_v40 = vpop.f32.mrf.mxu3  ;;  %4390 = vst.msk [vmem:[%s7315_s7 + $0x6b8] sm:$0xff] %vm4174_vm1, %v3846_v39  ;;  %v4020_v61 = vpop.f32.mrf.mxu1 }
 0x465   : > { %4398 = vst.msk [vmem:[%s7315_s7 + $0x6f8] sm:$0xff] %vm4174_vm1, %v3911_v40 }
 0x466   : > { %4399 = vst.msk [vmem:[%s7315_s7 + $0x700] sm:$0xff] %vm4174_vm1, %v3955_v53 }
 0x467   : > { %4407 = vst.msk [vmem:[%s7315_s7 + $0x740] sm:$0xff] %vm4174_vm1, %v4020_v61 }
 0x46b   : > { %v4085_v55 = vpop.f32.mrf.mxu2  ;;  %v3958_v35 = vpop.f32.mrf.mxu0 }
 0x46c   : > { %v4150_v2 = vpop.f32.mrf.mxu3  ;;  %4415 = vst.msk [vmem:[%s7315_s7 + $0x780] sm:$0xff] %vm4174_vm1, %v4085_v55  ;;  %v4023_v29 = vpop.f32.mrf.mxu1 }
 0x46d   : > { %4423 = vst.msk [vmem:[%s7315_s7 + $0x7c0] sm:$0xff] %vm4174_vm1, %v4150_v2 }
 0x46e   : > { %4400 = vst.msk [vmem:[%s7315_s7 + $0x708] sm:$0xff] %vm4174_vm1, %v3958_v35 }
 0x46f   : > { %4408 = vst.msk [vmem:[%s7315_s7 + $0x748] sm:$0xff] %vm4174_vm1, %v4023_v29 }
 0x473   : > { %v4088_v21 = vpop.f32.mrf.mxu2  ;;  %v3961_v45 = vpop.f32.mrf.mxu0 }
 0x474   : > { %v4153_v20 = vpop.f32.mrf.mxu3  ;;  %4416 = vst.msk [vmem:[%s7315_s7 + $0x788] sm:$0xff] %vm4174_vm1, %v4088_v21  ;;  %v4026_v22 = vpop.f32.mrf.mxu1 }
 0x475   : > { %4424 = vst.msk [vmem:[%s7315_s7 + $0x7c8] sm:$0xff] %vm4174_vm1, %v4153_v20 }
 0x476   : > { %4401 = vst.msk [vmem:[%s7315_s7 + $0x710] sm:$0xff] %vm4174_vm1, %v3961_v45 }
 0x477   : > { %4409 = vst.msk [vmem:[%s7315_s7 + $0x750] sm:$0xff] %vm4174_vm1, %v4026_v22 }
 0x47b   : > { %v4091_v52 = vpop.f32.mrf.mxu2  ;;  %v3964_v16 = vpop.f32.mrf.mxu0 }
 0x47c   : > { %v4156_v23 = vpop.f32.mrf.mxu3  ;;  %4417 = vst.msk [vmem:[%s7315_s7 + $0x790] sm:$0xff] %vm4174_vm1, %v4091_v52  ;;  %v4029_v63 = vpop.f32.mrf.mxu1 }
 0x47d   : > { %4425 = vst.msk [vmem:[%s7315_s7 + $0x7d0] sm:$0xff] %vm4174_vm1, %v4156_v23 }
 0x47e   : > { %4402 = vst.msk [vmem:[%s7315_s7 + $0x718] sm:$0xff] %vm4174_vm1, %v3964_v16 }
 0x47f   : > { %4410 = vst.msk [vmem:[%s7315_s7 + $0x758] sm:$0xff] %vm4174_vm1, %v4029_v63 }
 0x483   : > { %v4094_v14 = vpop.f32.mrf.mxu2  ;;  %v3967_v0 = vpop.f32.mrf.mxu0 }
 0x484   : > { %v4159_v17 = vpop.f32.mrf.mxu3  ;;  %4418 = vst.msk [vmem:[%s7315_s7 + $0x798] sm:$0xff] %vm4174_vm1, %v4094_v14  ;;  %v4032_v48 = vpop.f32.mrf.mxu1 }
 0x485   : > { %4426 = vst.msk [vmem:[%s7315_s7 + $0x7d8] sm:$0xff] %vm4174_vm1, %v4159_v17 }
 0x486   : > { %4403 = vst.msk [vmem:[%s7315_s7 + $0x720] sm:$0xff] %vm4174_vm1, %v3967_v0 }
 0x487   : > { %4411 = vst.msk [vmem:[%s7315_s7 + $0x760] sm:$0xff] %vm4174_vm1, %v4032_v48 }
 0x48b   : > { %v4097_v11 = vpop.f32.mrf.mxu2  ;;  %v3970_v47 = vpop.f32.mrf.mxu0 }
 0x48c   : > { %v4162_v49 = vpop.f32.mrf.mxu3  ;;  %4419 = vst.msk [vmem:[%s7315_s7 + $0x7a0] sm:$0xff] %vm4174_vm1, %v4097_v11  ;;  %v4035_v44 = vpop.f32.mrf.mxu1 }
 0x48d   : > { %4427 = vst.msk [vmem:[%s7315_s7 + $0x7e0] sm:$0xff] %vm4174_vm1, %v4162_v49 }
 0x48e   : > { %4404 = vst.msk [vmem:[%s7315_s7 + $0x728] sm:$0xff] %vm4174_vm1, %v3970_v47 }
 0x48f   : > { %4412 = vst.msk [vmem:[%s7315_s7 + $0x768] sm:$0xff] %vm4174_vm1, %v4035_v44 }
 0x493   : > { %v4100_v38 = vpop.f32.mrf.mxu2  ;;  %v3973_v34 = vpop.f32.mrf.mxu0 }
 0x494   : > { %v4165_v62 = vpop.f32.mrf.mxu3  ;;  %4420 = vst.msk [vmem:[%s7315_s7 + $0x7a8] sm:$0xff] %vm4174_vm1, %v4100_v38  ;;  %v4038_v37 = vpop.f32.mrf.mxu1 }
 0x495   : > { %4428 = vst.msk [vmem:[%s7315_s7 + $0x7e8] sm:$0xff] %vm4174_vm1, %v4165_v62 }
 0x496   : > { %4405 = vst.msk [vmem:[%s7315_s7 + $0x730] sm:$0xff] %vm4174_vm1, %v3973_v34 }
 0x497   : > { %4413 = vst.msk [vmem:[%s7315_s7 + $0x770] sm:$0xff] %vm4174_vm1, %v4038_v37 }
 0x49b   : > { %v4103_v1 = vpop.f32.mrf.mxu2  ;;  %v3976_v33 = vpop.f32.mrf.mxu0 }
 0x49c   : > { %v4168_v59 = vpop.f32.mrf.mxu3  ;;  %4421 = vst.msk [vmem:[%s7315_s7 + $0x7b0] sm:$0xff] %vm4174_vm1, %v4103_v1  ;;  %v4041_v46 = vpop.f32.mrf.mxu1 }
 0x49d   : > { %4429 = vst.msk [vmem:[%s7315_s7 + $0x7f0] sm:$0xff] %vm4174_vm1, %v4168_v59 }
 0x49e   : > { %4406 = vst.msk [vmem:[%s7315_s7 + $0x738] sm:$0xff] %vm4174_vm1, %v3976_v33 }
 0x49f   : > { %4414 = vst.msk [vmem:[%s7315_s7 + $0x778] sm:$0xff] %vm4174_vm1, %v4041_v46 }
 0x4a3   : > { %v4106_v7 = vpop.f32.mrf.mxu2 }
 0x4a4   : > { %v4171_v6 = vpop.f32.mrf.mxu3  ;;  %4422 = vst.msk [vmem:[%s7315_s7 + $0x7b8] sm:$0xff] %vm4174_vm1, %v4106_v7 }
 0x4a5   : > { %4430 = vst.msk [vmem:[%s7315_s7 + $0x7f8] sm:$0xff] %vm4174_vm1, %v4171_v6 }
 0x4a6 PF: > { %s15_s12 = sadd.s32 1, %s5542_s12  }
 0x4a7   : > { %p12_p7 = scmp.ge.s32.totalorder %s15_s12, 4  }
 0x4a9   :  { %14 = sbr.rel (!%p12_p7) target bundleno = 2 (0x2), region = 71 }
 0x4ae   :  { %4452 = vsyncpa [#allocation3], 1 }
 0x4af   :  { %4454 = vsyncpa [#allocation3 + $0x1], 1 }
 0x4b0   :  { %4455 = vsyncpa [#allocation5], 1 }

// kernel: decoder_occupancy_block.6
= control target key start
LH: loop header
LB: loop body
LE: loop exit
PB: predicated region body
PF: predicated region fallthrough
CT: control target
= control target key end

     0   :  { %s3770_s24 = smov 0   ;;  %s5514_s0 = inlined_call_operand.vmem [shape: f32[2,32,4096], index: 0, kind: input, shape index: {}]   ;;  %s5515_s1 = inlined_call_operand.vmem [shape: f32[32,32], index: 1, kind: input, shape index: {}]   ;;  %s5516_s2 = inlined_call_operand.vmem [shape: f32[32,1], index: 2, kind: input, shape index: {}]   ;;  %s5517_s3 = inlined_call_operand.vmem [shape: f32[32,32], index: 3, kind: input, shape index: {}]   ;;  %s5518_s4 = inlined_call_operand.vmem [shape: f32[32,1], index: 4, kind: input, shape index: {}]   ;;  %s5519_s5 = inlined_call_operand.vmem [shape: f32[2,32], index: 5, kind: input, shape index: {}]   ;;  %s5520_s6 = inlined_call_operand.vmem [shape: f32[2,1], index: 6, kind: input, shape index: {}]   ;;  %s5521_s7 = inlined_call_operand.vmem [shape: f32[2,2,4096], index: 7, kind: output, shape index: {}]  }
   0x1 LB: > { %s3404_s25 = sadd.s32 4294967295, %s3727_s24   ;;  %p3408_p0 = scmp.ge.s32.totalorder %s3727_s24, 1  ;;  %s3727_s24 = sphi %s3770_s24, %s17_s24  }
   0x2   : > { %p237_p1 = scmp.lt.s32.totalorder %s3727_s24, 3 }
   0x4   : > { %p238_p2 = pnand %p3408_p0, %p237_p1 }
   0x5   : > { %p269_p3 = scmp.lt.s32.totalorder (!%p238_p2), %s3404_s25, 1 }
   0x6   : > { %241 = sbr.rel (%p238_p2) target bundleno = 830 (0x33e), region = 48 }
   0xb   : > { %v412_v0 = vld [vmem:[%s5516_s2 + $0x8] sm:$0xff]  ;;  %v3729_v1 = vmov 0   ;;  %s5523_s25 = smov (!%p269_p3, %s3404_s25), 1  ;;  %v3808_v18 = vld [vmem:[%s5515_s1] sm:$0xff]  ;;  %vm435_vm0 = vcmask 261120   ;;  %v414_v30 = vld [vmem:[%s5516_s2 + $0x18] sm:$0xff] }
   0xc   : > { %3715 = vset.pattern.permute.xlu1 %v3729_v1  ;;  %3714 = vset.pattern.permute.xlu0 %v3729_v1  ;;  %s3703_s28 = sshll.u32 %s5523_s25, 10  ;;  %v411_v25 = vld [vmem:[%s5516_s2] sm:$0xff]  ;;  %v3837_v31 = vld [vmem:[%s5515_s1 + $0x8] sm:$0xff]  ;;  %v413_v42 = vld [vmem:[%s5516_s2 + $0x10] sm:$0xff]  ;;  %s3704_s9 = sshll.u32 %s5523_s25, 6  ;;  %vm3306_vm1 = vcmask 1041408  }
   0xd   : > { %422 = vperm.xlu1 %3715, %v412_v0   ;;  %3716 = vset.pattern.permute.xlu2 %v3729_v1  ;;  %s3787_s8 = scalar_lea.vmem %s5514_s0, %s3703_s28  ;;  %v3864_v44 = vld [vmem:[%s5515_s1 + $0x10] sm:$0xff]  ;;  %v3882_v50 = vld [vmem:[%s5515_s1 + $0x18] sm:$0xff]  ;;  %vm3308_vm2 = vcmask 1045508   ;;  %vm3310_vm3 = vcmask 1043456   ;;  %s5445_s12 = scalar_lea.vmem %s5521_s7, %s3704_s9 }
   0xe   : > { %v375_v2 = vld [vmem:[%s3787_s8 + $0x300] sm:$0xff]  ;;  %v376_v3 = vld [vmem:[%s3787_s8 + $0x308] sm:$0xff]  ;;  %v377_v4 = vld [vmem:[%s3787_s8 + $0x310] sm:$0xff]  ;;  %432 = vperm.xlu0 %3714, %v414_v30  }
   0xf   : > { %460 = vmatpush.msra.mxu0 %v375_v2  ;;  %489 = vmatpush.msra.mxu1 %v376_v3  ;;  %v378_v5 = vld [vmem:[%s3787_s8 + $0x318] sm:$0xff]  ;;  %v343_v6 = vld [vmem:[%s3787_s8 + $0x200] sm:$0xff]  ;;  %v344_v7 = vld [vmem:[%s3787_s8 + $0x208] sm:$0xff] }
  0x10   : > { %518 = vmatpush.msra.mxu2 %v377_v4  ;;  %547 = vmatpush.msra.mxu3 %v378_v5  ;;  %v345_v8 = vld [vmem:[%s3787_s8 + $0x210] sm:$0xff]  ;;  %v346_v9 = vld [vmem:[%s3787_s8 + $0x218] sm:$0xff]  ;;  %v311_v10 = vld [vmem:[%s3787_s8 + $0x100] sm:$0xff] }
  0x11   : > { %461 = vmatpush.msra.mxu0 %v343_v6  ;;  %490 = vmatpush.msra.mxu1 %v344_v7  ;;  %v312_v11 = vld [vmem:[%s3787_s8 + $0x108] sm:$0xff]  ;;  %v313_v12 = vld [vmem:[%s3787_s8 + $0x110] sm:$0xff]  ;;  %v314_v13 = vld [vmem:[%s3787_s8 + $0x118] sm:$0xff] }
  0x12   : > { %519 = vmatpush.msra.mxu2 %v345_v8  ;;  %548 = vmatpush.msra.mxu3 %v346_v9  ;;  %v279_v14 = vld [vmem:[%s3787_s8] sm:$0xff]  ;;  %v280_v15 = vld [vmem:[%s3787_s8 + $0x8] sm:$0xff]  ;;  %v281_v16 = vld [vmem:[%s3787_s8 + $0x10] sm:$0xff] }
  0x13   : > { %462 = vmatpush.msra.mxu0 %v311_v10  ;;  %491 = vmatpush.msra.mxu1 %v312_v11  ;;  %v282_v17 = vld [vmem:[%s3787_s8 + $0x18] sm:$0xff]  ;;  %v381_v19 = vld [vmem:[%s3787_s8 + $0x330] sm:$0xff]  ;;  %v380_v21 = vld [vmem:[%s3787_s8 + $0x328] sm:$0xff] }
  0x14   : > { %520 = vmatpush.msra.mxu2 %v313_v12  ;;  %549 = vmatpush.msra.mxu3 %v314_v13  ;;  %v382_v20 = vld [vmem:[%s3787_s8 + $0x338] sm:$0xff]  ;;  %v379_v22 = vld [vmem:[%s3787_s8 + $0x320] sm:$0xff]  ;;  %v349_v23 = vld [vmem:[%s3787_s8 + $0x230] sm:$0xff] }
  0x15   : > { %463 = vmatpush.msra.mxu0 %v279_v14  ;;  %492 = vmatpush.msra.mxu1 %v280_v15  ;;  %v350_v24 = vld [vmem:[%s3787_s8 + $0x238] sm:$0xff]  ;;  %v348_v26 = vld [vmem:[%s3787_s8 + $0x228] sm:$0xff]  ;;  %v317_v27 = vld [vmem:[%s3787_s8 + $0x130] sm:$0xff] }
  0x16   : > { %521 = vmatpush.msra.mxu2 %v281_v16  ;;  %550 = vmatpush.msra.mxu3 %v282_v17  ;;  %v318_v28 = vld [vmem:[%s3787_s8 + $0x138] sm:$0xff]  ;;  %v347_v29 = vld [vmem:[%s3787_s8 + $0x220] sm:$0xff]  ;;  %v285_v32 = vld [vmem:[%s3787_s8 + $0x30] sm:$0xff] }
  0x17   : > { %3413 = vmatmul.msk.f32.vlgmr.msra.gmra.mxu0 %vm435_vm0, %v3808_v18  ;;  %3417 = vmatmul.msk.f32.vlgmr.msra.gmra.mxu1 %vm435_vm0, %v3808_v18  ;;  %v286_v33 = vld [vmem:[%s3787_s8 + $0x38] sm:$0xff]  ;;  %v315_v34 = vld [vmem:[%s3787_s8 + $0x120] sm:$0xff]  ;;  %v316_v35 = vld [vmem:[%s3787_s8 + $0x128] sm:$0xff] }
  0x18   : > { %3421 = vmatmul.msk.f32.vlgmr.msra.gmra.mxu2 %vm435_vm0, %v3808_v18  ;;  %3425 = vmatmul.msk.f32.vlgmr.msra.gmra.mxu3 %vm435_vm0, %v3808_v18  ;;  %v385_v36 = vld [vmem:[%s3787_s8 + $0x350] sm:$0xff]  ;;  %v386_v37 = vld [vmem:[%s3787_s8 + $0x358] sm:$0xff]  ;;  %v283_v38 = vld [vmem:[%s3787_s8 + $0x20] sm:$0xff] }
  0x19   : > { %634 = vmatpush.msrb.mxu2 %v381_v19  ;;  %663 = vmatpush.msrb.mxu3 %v382_v20  ;;  %v284_v39 = vld [vmem:[%s3787_s8 + $0x28] sm:$0xff]  ;;  %v353_v40 = vld [vmem:[%s3787_s8 + $0x250] sm:$0xff]  ;;  %v354_v41 = vld [vmem:[%s3787_s8 + $0x258] sm:$0xff] }
  0x1a   : > { %605 = vmatpush.msrb.mxu1 %v380_v21  ;;  %576 = vmatpush.msrb.mxu0 %v379_v22  ;;  %v384_v43 = vld [vmem:[%s3787_s8 + $0x348] sm:$0xff]  ;;  %v383_v45 = vld [vmem:[%s3787_s8 + $0x340] sm:$0xff]  ;;  %v321_v46 = vld [vmem:[%s3787_s8 + $0x150] sm:$0xff] }
  0x1b   : > { %635 = vmatpush.msrb.mxu2 %v349_v23  ;;  %664 = vmatpush.msrb.mxu3 %v350_v24  ;;  %v322_v47 = vld [vmem:[%s3787_s8 + $0x158] sm:$0xff]  ;;  %v352_v48 = vld [vmem:[%s3787_s8 + $0x248] sm:$0xff]  ;;  %v351_v49 = vld [vmem:[%s3787_s8 + $0x240] sm:$0xff] }
  0x1c   : > { %417 = vperm.xlu1 %3715, %v411_v25   ;;  %606 = vmatpush.msrb.mxu1 %v348_v26  ;;  %v289_v51 = vld [vmem:[%s3787_s8 + $0x50] sm:$0xff]  ;;  %v290_v52 = vld [vmem:[%s3787_s8 + $0x58] sm:$0xff]  ;;  %v319_v53 = vld [vmem:[%s3787_s8 + $0x140] sm:$0xff] }
  0x1d   : > { %636 = vmatpush.msrb.mxu2 %v317_v27  ;;  %665 = vmatpush.msrb.mxu3 %v318_v28  ;;  %v320_v54 = vld [vmem:[%s3787_s8 + $0x148] sm:$0xff]  ;;  %v287_v55 = vld [vmem:[%s3787_s8 + $0x40] sm:$0xff]  ;;  %v389_v57 = vld [vmem:[%s3787_s8 + $0x370] sm:$0xff] }
  0x1e   : > { %577 = vmatpush.msrb.mxu0 %v347_v29  ;;  %607 = vmatpush.msrb.mxu1 %v316_v35  ;;  %v288_v56 = vld [vmem:[%s3787_s8 + $0x48] sm:$0xff]  ;;  %v390_v58 = vld [vmem:[%s3787_s8 + $0x378] sm:$0xff]  ;;  %v357_v59 = vld [vmem:[%s3787_s8 + $0x270] sm:$0xff] }
  0x1f   : > { %3414 = vmatmul.msk.f32.gmra.mxu0 %vm435_vm0, %v3837_v31  ;;  %3418 = vmatmul.msk.f32.gmra.mxu1 %vm435_vm0, %v3837_v31  ;;  %v358_v60 = vld [vmem:[%s3787_s8 + $0x278] sm:$0xff]  ;;  %v388_v61 = vld [vmem:[%s3787_s8 + $0x368] sm:$0xff]  ;;  %v387_v62 = vld [vmem:[%s3787_s8 + $0x360] sm:$0xff] }
  0x20   : > { %3422 = vmatmul.msk.f32.gmra.mxu2 %vm435_vm0, %v3837_v31  ;;  %3426 = vmatmul.msk.f32.gmra.mxu3 %vm435_vm0, %v3837_v31  ;;  %v325_v63 = vld [vmem:[%s3787_s8 + $0x170] sm:$0xff]  ;;  %v326_v0 = vld [vmem:[%s3787_s8 + $0x178] sm:$0xff]  ;;  %v356_v1 = vld [vmem:[%s3787_s8 + $0x268] sm:$0xff] }
  0x21   : > { %637 = vmatpush.msrb.mxu2 %v285_v32  ;;  %666 = vmatpush.msrb.mxu3 %v286_v33  ;;  %v355_v2 = vld [vmem:[%s3787_s8 + $0x260] sm:$0xff]  ;;  %v293_v3 = vld [vmem:[%s3787_s8 + $0x70] sm:$0xff]  ;;  %v294_v4 = vld [vmem:[%s3787_s8 + $0x78] sm:$0xff] }
  0x22   : > { %578 = vmatpush.msrb.mxu0 %v315_v34  ;;  %608 = vmatpush.msrb.mxu1 %v284_v39  ;;  %v323_v5 = vld [vmem:[%s3787_s8 + $0x160] sm:$0xff]  ;;  %v324_v6 = vld [vmem:[%s3787_s8 + $0x168] sm:$0xff]  ;;  %v393_v9 = vld [vmem:[%s3787_s8 + $0x390] sm:$0xff] }
  0x23   : > { %750 = vmatpush.msra.mxu2 %v385_v36  ;;  %779 = vmatpush.msra.mxu3 %v386_v37  ;;  %v291_v7 = vld [vmem:[%s3787_s8 + $0x60] sm:$0xff]  ;;  %v292_v8 = vld [vmem:[%s3787_s8 + $0x68] sm:$0xff]  ;;  %v394_v10 = vld [vmem:[%s3787_s8 + $0x398] sm:$0xff] }
  0x24   : > { %579 = vmatpush.msrb.mxu0 %v283_v38  ;;  %427 = vperm.xlu0 %3714, %v413_v42   ;;  %v361_v11 = vld [vmem:[%s3787_s8 + $0x290] sm:$0xff]  ;;  %v362_v12 = vld [vmem:[%s3787_s8 + $0x298] sm:$0xff]  ;;  %v1509_v13 = vld [vmem:[%s5518_s4 + $0x8] sm:$0xff] }
  0x25   : > { %751 = vmatpush.msra.mxu2 %v353_v40  ;;  %780 = vmatpush.msra.mxu3 %v354_v41  ;;  %v392_v14 = vld [vmem:[%s3787_s8 + $0x388] sm:$0xff]  ;;  %v391_v15 = vld [vmem:[%s3787_s8 + $0x380] sm:$0xff]  ;;  %v329_v16 = vld [vmem:[%s3787_s8 + $0x190] sm:$0xff] }
  0x26   : > { %721 = vmatpush.msra.mxu1 %v384_v43  ;;  %692 = vmatpush.msra.mxu0 %v383_v45  ;;  %v330_v17 = vld [vmem:[%s3787_s8 + $0x198] sm:$0xff]  ;;  %v360_v19 = vld [vmem:[%s3787_s8 + $0x288] sm:$0xff]  ;;  %v359_v20 = vld [vmem:[%s3787_s8 + $0x280] sm:$0xff] }
  0x27   : > { %3415 = vmatmul.msk.f32.gmra.mxu0 %vm435_vm0, %v3864_v44  ;;  %3419 = vmatmul.msk.f32.gmra.mxu1 %vm435_vm0, %v3864_v44  ;;  %v297_v21 = vld [vmem:[%s3787_s8 + $0x90] sm:$0xff]  ;;  %v298_v22 = vld [vmem:[%s3787_s8 + $0x98] sm:$0xff]  ;;  %v1508_v23 = vld [vmem:[%s5518_s4] sm:$0xff] }
  0x28   : > { %3423 = vmatmul.msk.f32.gmra.mxu2 %vm435_vm0, %v3864_v44  ;;  %3427 = vmatmul.msk.f32.gmra.mxu3 %vm435_vm0, %v3864_v44  ;;  %v327_v24 = vld [vmem:[%s3787_s8 + $0x180] sm:$0xff]  ;;  %v328_v25 = vld [vmem:[%s3787_s8 + $0x188] sm:$0xff]  ;;  %v397_v28 = vld [vmem:[%s3787_s8 + $0x3b0] sm:$0xff] }
  0x29   : > { %752 = vmatpush.msra.mxu2 %v321_v46  ;;  %781 = vmatpush.msra.mxu3 %v322_v47  ;;  %v295_v26 = vld [vmem:[%s3787_s8 + $0x80] sm:$0xff]  ;;  %v296_v27 = vld [vmem:[%s3787_s8 + $0x88] sm:$0xff]  ;;  %v398_v29 = vld [vmem:[%s3787_s8 + $0x3b8] sm:$0xff] }
  0x2a   : > { %722 = vmatpush.msra.mxu1 %v352_v48  ;;  %693 = vmatpush.msra.mxu0 %v351_v49  ;;  %v365_v30 = vld [vmem:[%s3787_s8 + $0x2b0] sm:$0xff]  ;;  %v366_v32 = vld [vmem:[%s3787_s8 + $0x2b8] sm:$0xff]  ;;  %v396_v33 = vld [vmem:[%s3787_s8 + $0x3a8] sm:$0xff] }
  0x2b   : > { %753 = vmatpush.msra.mxu2 %v289_v51  ;;  %782 = vmatpush.msra.mxu3 %v290_v52  ;;  %v395_v34 = vld [vmem:[%s3787_s8 + $0x3a0] sm:$0xff]  ;;  %v333_v35 = vld [vmem:[%s3787_s8 + $0x1b0] sm:$0xff]  ;;  %v334_v36 = vld [vmem:[%s3787_s8 + $0x1b8] sm:$0xff] }
  0x2c   : > { %694 = vmatpush.msra.mxu0 %v319_v53  ;;  %723 = vmatpush.msra.mxu1 %v320_v54  ;;  %v364_v37 = vld [vmem:[%s3787_s8 + $0x2a8] sm:$0xff]  ;;  %v363_v38 = vld [vmem:[%s3787_s8 + $0x2a0] sm:$0xff]  ;;  %v301_v39 = vld [vmem:[%s3787_s8 + $0xb0] sm:$0xff] }
  0x2d   : > { %1519 = vperm.xlu0 %3714, %v1509_v13   ;;  %1514 = vperm.xlu1 %3715, %v1508_v23   ;;  %v302_v40 = vld [vmem:[%s3787_s8 + $0xb8] sm:$0xff]  ;;  %v331_v43 = vld [vmem:[%s3787_s8 + $0x1a0] sm:$0xff]  ;;  %v332_v45 = vld [vmem:[%s3787_s8 + $0x1a8] sm:$0xff] }
  0x2e   : > { %695 = vmatpush.msra.mxu0 %v287_v55  ;;  %724 = vmatpush.msra.mxu1 %v288_v56  ;;  %v299_v46 = vld [vmem:[%s3787_s8 + $0xa0] sm:$0xff]  ;;  %v300_v47 = vld [vmem:[%s3787_s8 + $0xa8] sm:$0xff]  ;;  %v401_v48 = vld [vmem:[%s3787_s8 + $0x3d0] sm:$0xff] }
  0x2f   : > { %3416 = vmatmul.msk.f32.gmra.mxu0 %vm435_vm0, %v3882_v50  ;;  %3420 = vmatmul.msk.f32.gmra.mxu1 %vm435_vm0, %v3882_v50  ;;  %v402_v49 = vld [vmem:[%s3787_s8 + $0x3d8] sm:$0xff]  ;;  %v369_v55 = vld [vmem:[%s3787_s8 + $0x2d0] sm:$0xff]  ;;  %v372_v23 = vld [vmem:[%s3787_s8 + $0x2e8] sm:$0xff] }
  0x30   : > { %3424 = vmatmul.msk.f32.gmra.mxu2 %vm435_vm0, %v3882_v50  ;;  %3428 = vmatmul.msk.f32.gmra.mxu3 %vm435_vm0, %v3882_v50  ;;  %v370_v56 = vld [vmem:[%s3787_s8 + $0x2d8] sm:$0xff] }
  0x37   : > { %3429 = vmatmul.msk.f32.vlgmr.msrb.gmra.mxu0 %vm435_vm0, %v3808_v18  ;;  %3433 = vmatmul.msk.f32.vlgmr.msrb.gmra.mxu1 %vm435_vm0, %v3808_v18 }
  0x38   : > { %3437 = vmatmul.msk.f32.vlgmr.msrb.gmra.mxu2 %vm435_vm0, %v3808_v18  ;;  %3441 = vmatmul.msk.f32.vlgmr.msrb.gmra.mxu3 %vm435_vm0, %v3808_v18 }
  0x39   : > { %866 = vmatpush.msrb.mxu2 %v389_v57  ;;  %895 = vmatpush.msrb.mxu3 %v390_v58 }
  0x3a   : > { %837 = vmatpush.msrb.mxu1 %v388_v61  ;;  %808 = vmatpush.msrb.mxu0 %v387_v62  ;;  %v400_v61 = vld [vmem:[%s3787_s8 + $0x3c8] sm:$0xff]  ;;  %v399_v62 = vld [vmem:[%s3787_s8 + $0x3c0] sm:$0xff] }
  0x3b   : > { %867 = vmatpush.msrb.mxu2 %v357_v59  ;;  %896 = vmatpush.msrb.mxu3 %v358_v60 }
  0x3c   : > { %838 = vmatpush.msrb.mxu1 %v356_v1  ;;  %809 = vmatpush.msrb.mxu0 %v355_v2 }
  0x3d   : > { %868 = vmatpush.msrb.mxu2 %v325_v63  ;;  %897 = vmatpush.msrb.mxu3 %v326_v0  ;;  %v337_v63 = vld [vmem:[%s3787_s8 + $0x1d0] sm:$0xff]  ;;  %v338_v0 = vld [vmem:[%s3787_s8 + $0x1d8] sm:$0xff] }
  0x3e   : > { %810 = vmatpush.msrb.mxu0 %v323_v5  ;;  %839 = vmatpush.msrb.mxu1 %v324_v6 }
  0x3f   : > { %3430 = vmatmul.msk.f32.gmra.mxu0 %vm435_vm0, %v3837_v31  ;;  %3434 = vmatmul.msk.f32.gmra.mxu1 %vm435_vm0, %v3837_v31 }
  0x40   : > { %3438 = vmatmul.msk.f32.gmra.mxu2 %vm435_vm0, %v3837_v31  ;;  %3442 = vmatmul.msk.f32.gmra.mxu3 %vm435_vm0, %v3837_v31 }
  0x41   : > { %869 = vmatpush.msrb.mxu2 %v293_v3  ;;  %898 = vmatpush.msrb.mxu3 %v294_v4  ;;  %v367_v3 = vld [vmem:[%s3787_s8 + $0x2c0] sm:$0xff]  ;;  %v368_v4 = vld [vmem:[%s3787_s8 + $0x2c8] sm:$0xff] }
  0x42   : > { %811 = vmatpush.msrb.mxu0 %v291_v7  ;;  %840 = vmatpush.msrb.mxu1 %v292_v8  ;;  %v335_v7 = vld [vmem:[%s3787_s8 + $0x1c0] sm:$0xff]  ;;  %v336_v8 = vld [vmem:[%s3787_s8 + $0x1c8] sm:$0xff] }
  0x47   : > { %3431 = vmatmul.msk.f32.gmra.mxu0 %vm435_vm0, %v3864_v44  ;;  %3435 = vmatmul.msk.f32.gmra.mxu1 %vm435_vm0, %v3864_v44 }
  0x48   : > { %3439 = vmatmul.msk.f32.gmra.mxu2 %vm435_vm0, %v3864_v44  ;;  %3443 = vmatmul.msk.f32.gmra.mxu3 %vm435_vm0, %v3864_v44 }
  0x4f   : > { %3432 = vmatmul.msk.f32.gmra.mxu0 %vm435_vm0, %v3882_v50  ;;  %3436 = vmatmul.msk.f32.gmra.mxu1 %vm435_vm0, %v3882_v50 }
  0x50   : > { %3440 = vmatmul.msk.f32.gmra.mxu2 %vm435_vm0, %v3882_v50  ;;  %3444 = vmatmul.msk.f32.gmra.mxu3 %vm435_vm0, %v3882_v50 }
  0x57   : > { %3445 = vmatmul.msk.f32.vlgmr.msra.gmra.mxu0 %vm435_vm0, %v3808_v18  ;;  %3449 = vmatmul.msk.f32.vlgmr.msra.gmra.mxu1 %vm435_vm0, %v3808_v18 }
  0x58   : > { %3453 = vmatmul.msk.f32.vlgmr.msra.gmra.mxu2 %vm435_vm0, %v3808_v18  ;;  %3457 = vmatmul.msk.f32.vlgmr.msra.gmra.mxu3 %vm435_vm0, %v3808_v18 }
  0x59   : > { %982 = vmatpush.msra.mxu2 %v393_v9  ;;  %1011 = vmatpush.msra.mxu3 %v394_v10  ;;  %v303_v9 = vld [vmem:[%s3787_s8 + $0xc0] sm:$0xff]  ;;  %v304_v10 = vld [vmem:[%s3787_s8 + $0xc8] sm:$0xff] }
  0x5a   : > { %953 = vmatpush.msra.mxu1 %v392_v14  ;;  %924 = vmatpush.msra.mxu0 %v391_v15 }
  0x5b   : > { %983 = vmatpush.msra.mxu2 %v361_v11  ;;  %1012 = vmatpush.msra.mxu3 %v362_v12  ;;  %v305_v11 = vld [vmem:[%s3787_s8 + $0xd0] sm:$0xff]  ;;  %v306_v12 = vld [vmem:[%s3787_s8 + $0xd8] sm:$0xff] }
  0x5c   : > { %954 = vmatpush.msra.mxu1 %v360_v19  ;;  %925 = vmatpush.msra.mxu0 %v359_v20  ;;  %v404_v19 = vld [vmem:[%s3787_s8 + $0x3e8] sm:$0xff]  ;;  %v405_v20 = vld [vmem:[%s3787_s8 + $0x3f0] sm:$0xff] }
  0x5d   : > { %984 = vmatpush.msra.mxu2 %v329_v16  ;;  %1013 = vmatpush.msra.mxu3 %v330_v17  ;;  %v403_v17 = vld [vmem:[%s3787_s8 + $0x3e0] sm:$0xff] }
  0x5e   : > { %926 = vmatpush.msra.mxu0 %v327_v24  ;;  %955 = vmatpush.msra.mxu1 %v328_v25  ;;  %v373_v24 = vld [vmem:[%s3787_s8 + $0x2f0] sm:$0xff]  ;;  %v374_v25 = vld [vmem:[%s3787_s8 + $0x2f8] sm:$0xff] }
  0x5f   : > { %3446 = vmatmul.msk.f32.gmra.mxu0 %vm435_vm0, %v3837_v31  ;;  %3450 = vmatmul.msk.f32.gmra.mxu1 %vm435_vm0, %v3837_v31 }
  0x60   : > { %3454 = vmatmul.msk.f32.gmra.mxu2 %vm435_vm0, %v3837_v31  ;;  %3458 = vmatmul.msk.f32.gmra.mxu3 %vm435_vm0, %v3837_v31 }
  0x61   : > { %985 = vmatpush.msra.mxu2 %v297_v21  ;;  %1014 = vmatpush.msra.mxu3 %v298_v22  ;;  %v406_v21 = vld [vmem:[%s3787_s8 + $0x3f8] sm:$0xff]  ;;  %v371_v22 = vld [vmem:[%s3787_s8 + $0x2e0] sm:$0xff] }
  0x62   : > { %927 = vmatpush.msra.mxu0 %v295_v26  ;;  %956 = vmatpush.msra.mxu1 %v296_v27  ;;  %v339_v26 = vld [vmem:[%s3787_s8 + $0x1e0] sm:$0xff]  ;;  %v340_v27 = vld [vmem:[%s3787_s8 + $0x1e8] sm:$0xff] }
  0x67   : > { %3447 = vmatmul.msk.f32.gmra.mxu0 %vm435_vm0, %v3864_v44  ;;  %3451 = vmatmul.msk.f32.gmra.mxu1 %vm435_vm0, %v3864_v44 }
  0x68   : > { %3455 = vmatmul.msk.f32.gmra.mxu2 %vm435_vm0, %v3864_v44  ;;  %3459 = vmatmul.msk.f32.gmra.mxu3 %vm435_vm0, %v3864_v44 }
  0x6f   : > { %3448 = vmatmul.msk.f32.gmra.mxu0 %vm435_vm0, %v3882_v50  ;;  %3452 = vmatmul.msk.f32.gmra.mxu1 %vm435_vm0, %v3882_v50 }
  0x70   : > { %3456 = vmatmul.msk.f32.gmra.mxu2 %vm435_vm0, %v3882_v50  ;;  %3460 = vmatmul.msk.f32.gmra.mxu3 %vm435_vm0, %v3882_v50 }
  0x77   : > { %3461 = vmatmul.msk.f32.vlgmr.msrb.gmra.mxu0 %vm435_vm0, %v3808_v18  ;;  %3465 = vmatmul.msk.f32.vlgmr.msrb.gmra.mxu1 %vm435_vm0, %v3808_v18 }
  0x78   : > { %3469 = vmatmul.msk.f32.vlgmr.msrb.gmra.mxu2 %vm435_vm0, %v3808_v18  ;;  %3473 = vmatmul.msk.f32.vlgmr.msrb.gmra.mxu3 %vm435_vm0, %v3808_v18 }
  0x79   : > { %1098 = vmatpush.msrb.mxu2 %v397_v28  ;;  %1127 = vmatpush.msrb.mxu3 %v398_v29 }
  0x7a   : > { %1069 = vmatpush.msrb.mxu1 %v396_v33  ;;  %1040 = vmatpush.msrb.mxu0 %v395_v34 }
  0x7b   : > { %1099 = vmatpush.msrb.mxu2 %v365_v30  ;;  %1128 = vmatpush.msrb.mxu3 %v366_v32  ;;  %v341_v30 = vld [vmem:[%s3787_s8 + $0x1f0] sm:$0xff]  ;;  %v342_v32 = vld [vmem:[%s3787_s8 + $0x1f8] sm:$0xff] }
  0x7c   : > { %1070 = vmatpush.msrb.mxu1 %v364_v37  ;;  %1041 = vmatpush.msrb.mxu0 %v363_v38  ;;  %v309_v37 = vld [vmem:[%s3787_s8 + $0xf0] sm:$0xff]  ;;  %v310_v38 = vld [vmem:[%s3787_s8 + $0xf8] sm:$0xff] }
  0x7d   : > { %1100 = vmatpush.msrb.mxu2 %v333_v35  ;;  %1129 = vmatpush.msrb.mxu3 %v334_v36  ;;  %v307_v35 = vld [vmem:[%s3787_s8 + $0xe0] sm:$0xff]  ;;  %v308_v36 = vld [vmem:[%s3787_s8 + $0xe8] sm:$0xff] }
  0x7e   : > { %1042 = vmatpush.msrb.mxu0 %v331_v43  ;;  %1071 = vmatpush.msrb.mxu1 %v332_v45 }
  0x7f   : > { %3462 = vmatmul.msk.f32.gmra.mxu0 %vm435_vm0, %v3837_v31  ;;  %3466 = vmatmul.msk.f32.gmra.mxu1 %vm435_vm0, %v3837_v31 }
  0x80   : > { %3470 = vmatmul.msk.f32.gmra.mxu2 %vm435_vm0, %v3837_v31  ;;  %3474 = vmatmul.msk.f32.gmra.mxu3 %vm435_vm0, %v3837_v31 }
  0x81   : > { %1101 = vmatpush.msrb.mxu2 %v301_v39  ;;  %1130 = vmatpush.msrb.mxu3 %v302_v40 }
  0x82   : > { %1043 = vmatpush.msrb.mxu0 %v299_v46  ;;  %1072 = vmatpush.msrb.mxu1 %v300_v47  ;;  %v4184_v46 = vpop.permute.xlu0 %432 }
  0x87   : > { %3463 = vmatmul.msk.f32.gmra.mxu0 %vm435_vm0, %v3864_v44  ;;  %3467 = vmatmul.msk.f32.gmra.mxu1 %vm435_vm0, %v3864_v44 }
  0x88   : > { %3471 = vmatmul.msk.f32.gmra.mxu2 %vm435_vm0, %v3864_v44  ;;  %3475 = vmatmul.msk.f32.gmra.mxu3 %vm435_vm0, %v3864_v44 }
  0x8f   : > { %3464 = vmatmul.msk.f32.gmra.mxu0 %vm435_vm0, %v3882_v50  ;;  %3468 = vmatmul.msk.f32.gmra.mxu1 %vm435_vm0, %v3882_v50 }
  0x90   : > { %3472 = vmatmul.msk.f32.gmra.mxu2 %vm435_vm0, %v3882_v50  ;;  %3476 = vmatmul.msk.f32.gmra.mxu3 %vm435_vm0, %v3882_v50 }
  0x94   : > { %v4044_v41 = vpop.f32.mrf.mxu0  ;;  %v4046_v42 = vpop.f32.mrf.mxu1 }
  0x97   : > { %3477 = vmatmul.msk.f32.vlgmr.msra.gmra.mxu0 %vm435_vm0, %v3808_v18  ;;  %3481 = vmatmul.msk.f32.vlgmr.msra.gmra.mxu1 %vm435_vm0, %v3808_v18 }
  0x98   : > { %3485 = vmatmul.msk.f32.vlgmr.msra.gmra.mxu2 %vm435_vm0, %v3808_v18  ;;  %3489 = vmatmul.msk.f32.vlgmr.msra.gmra.mxu3 %vm435_vm0, %v3808_v18 }
  0x99   : > { %1214 = vmatpush.msra.mxu2 %v401_v48  ;;  %1243 = vmatpush.msra.mxu3 %v402_v49 }
  0x9a   : > { %1185 = vmatpush.msra.mxu1 %v400_v61  ;;  %1156 = vmatpush.msra.mxu0 %v399_v62  ;;  %v4208_v61 = vpop.permute.xlu0 %427 }
  0x9b   : > { %v4062_v51 = vpop.f32.mrf.mxu2  ;;  %v4064_v52 = vpop.f32.mrf.mxu3  ;;  %1215 = vmatpush.msra.mxu2 %v369_v55  ;;  %1244 = vmatpush.msra.mxu3 %v370_v56 }
  0x9c   : > { %v4066_v53 = vpop.f32.mrf.mxu0  ;;  %v4068_v54 = vpop.f32.mrf.mxu1  ;;  %1157 = vmatpush.msra.mxu0 %v367_v3  ;;  %1186 = vmatpush.msra.mxu1 %v368_v4 }
  0x9d   : > { %1216 = vmatpush.msra.mxu2 %v337_v63  ;;  %1245 = vmatpush.msra.mxu3 %v338_v0  ;;  %v4198_v56 = vpop.permute.xlu1 %422 }
  0x9e   : > { %1158 = vmatpush.msra.mxu0 %v335_v7  ;;  %1187 = vmatpush.msra.mxu1 %v336_v8 }
  0x9f   : > { %3478 = vmatmul.msk.f32.gmra.mxu0 %vm435_vm0, %v3837_v31  ;;  %3482 = vmatmul.msk.f32.gmra.mxu1 %vm435_vm0, %v3837_v31 }
  0xa0   : > { %3486 = vmatmul.msk.f32.gmra.mxu2 %vm435_vm0, %v3837_v31  ;;  %3490 = vmatmul.msk.f32.gmra.mxu3 %vm435_vm0, %v3837_v31 }
  0xa1   : > { %1159 = vmatpush.msra.mxu0 %v303_v9  ;;  %1188 = vmatpush.msra.mxu1 %v304_v10 }
  0xa2   : > { %1217 = vmatpush.msra.mxu2 %v305_v11  ;;  %1246 = vmatpush.msra.mxu3 %v306_v12 }
  0xa3   : > { %v4080_v57 = vpop.f32.mrf.mxu2  ;;  %v4082_v58 = vpop.f32.mrf.mxu3 }
  0xa4   : > { %v4084_v59 = vpop.f32.mrf.mxu0  ;;  %v4086_v60 = vpop.f32.mrf.mxu1 }
  0xa5   : > { %v4234_v12 = vpop.permute.xlu1 %417 }
  0xa7   : > { %3479 = vmatmul.msk.f32.gmra.mxu0 %vm435_vm0, %v3864_v44  ;;  %3483 = vmatmul.msk.f32.gmra.mxu1 %vm435_vm0, %v3864_v44 }
  0xa8   : > { %3487 = vmatmul.msk.f32.gmra.mxu2 %vm435_vm0, %v3864_v44  ;;  %3491 = vmatmul.msk.f32.gmra.mxu3 %vm435_vm0, %v3864_v44 }
  0xab   : > { %v4100_v1 = vpop.f32.mrf.mxu2  ;;  %v4102_v2 = vpop.f32.mrf.mxu3 }
  0xac   : > { %v4106_v5 = vpop.f32.mrf.mxu0  ;;  %v4108_v6 = vpop.f32.mrf.mxu1  ;;  %v530_v10 = vadd.f32 %v4100_v1, %v4208_v61  ;;  %v559_v11 = vadd.f32 %v4102_v2, %v4208_v61 }
  0xad   : > { %v475_v62 = vadd.f32 %v4106_v5, %v4184_v46  ;;  %v504_v63 = vadd.f32 %v4108_v6, %v4184_v46  ;;  %v472_v5 = vadd.f32 %v4084_v59, %v4208_v61  ;;  %v501_v6 = vadd.f32 %v4086_v60, %v4208_v61 }
  0xae   : > { %v527_v59 = vadd.f32 %v4080_v57, %v4198_v56  ;;  %v556_v60 = vadd.f32 %v4082_v58, %v4198_v56  ;;  %v495_v57 = vadd.f32 %v4046_v42, %v4234_v12  ;;  %v524_v58 = vadd.f32 %v4062_v51, %v4234_v12 }
  0xaf   : > { %3480 = vmatmul.msk.f32.gmra.mxu0 %vm435_vm0, %v3882_v50  ;;  %3484 = vmatmul.msk.f32.gmra.mxu1 %vm435_vm0, %v3882_v50 }
  0xb0   : > { %3488 = vmatmul.msk.f32.gmra.mxu2 %vm435_vm0, %v3882_v50  ;;  %3492 = vmatmul.msk.f32.gmra.mxu3 %vm435_vm0, %v3882_v50  ;;  %v1411_v42 = vmax.f32 %v556_v60, 0.0 }
  0xb3   : > { %v4124_v13 = vpop.f32.mrf.mxu2  ;;  %v4126_v14 = vpop.f32.mrf.mxu3 }
  0xb4   : > { %v4128_v15 = vpop.f32.mrf.mxu0  ;;  %v4130_v16 = vpop.f32.mrf.mxu1  ;;  %v533_v4 = vadd.f32 %v4124_v13, %v4184_v46  ;;  %v562_v7 = vadd.f32 %v4126_v14, %v4184_v46  ;;  %v469_v13 = vadd.f32 %v4066_v53, %v4198_v56  ;;  %v498_v14 = vadd.f32 %v4068_v54, %v4198_v56 }
  0xb5   : > { %v1440_v53 = vmax.f32 %v472_v5, 0.0  ;;  %v1441_v54 = vmax.f32 %v501_v6, 0.0 }
  0xb6   : > { %v1474_v1 = vmax.f32 %v533_v4, 0.0  ;;  %v1475_v2 = vmax.f32 %v562_v7, 0.0 }
  0xb7   : > { %3493 = vmatmul.msk.f32.vlgmr.msrb.gmra.mxu0 %vm435_vm0, %v3808_v18  ;;  %3497 = vmatmul.msk.f32.vlgmr.msrb.gmra.mxu1 %vm435_vm0, %v3808_v18 }
  0xb8   : > { %3501 = vmatmul.msk.f32.vlgmr.msrb.gmra.mxu2 %vm435_vm0, %v3808_v18  ;;  %3505 = vmatmul.msk.f32.vlgmr.msrb.gmra.mxu3 %vm435_vm0, %v3808_v18 }
  0xb9   : > { %1272 = vmatpush.msrb.mxu0 %v403_v17  ;;  %1301 = vmatpush.msrb.mxu1 %v404_v19  ;;  %v1472_v17 = vmax.f32 %v475_v62, 0.0  ;;  %v1473_v19 = vmax.f32 %v504_v63, 0.0 }
  0xba   : > { %1330 = vmatpush.msrb.mxu2 %v405_v20  ;;  %1359 = vmatpush.msrb.mxu3 %v406_v21  ;;  %v466_v20 = vadd.f32 %v4044_v41, %v4234_v12  ;;  %v553_v21 = vadd.f32 %v4064_v52, %v4234_v12 }
  0xbb   : > { %v4150_v28 = vpop.f32.mrf.mxu2  ;;  %v4152_v29 = vpop.f32.mrf.mxu3  ;;  %1273 = vmatpush.msrb.mxu0 %v371_v22  ;;  %1302 = vmatpush.msrb.mxu1 %v372_v23  ;;  %v1442_v22 = vmax.f32 %v530_v10, 0.0  ;;  %v1443_v23 = vmax.f32 %v559_v11, 0.0 }
  0xbc   : > { %v4156_v33 = vpop.f32.mrf.mxu0  ;;  %v4158_v34 = vpop.f32.mrf.mxu1  ;;  %1331 = vmatpush.msrb.mxu2 %v373_v24  ;;  %1360 = vmatpush.msrb.mxu3 %v374_v25  ;;  %v1408_v24 = vmax.f32 %v469_v13, 0.0  ;;  %v1409_v25 = vmax.f32 %v498_v14, 0.0  ;;  %v1376_v52 = vmax.f32 %v466_v20, 0.0 }
  0xbd   : > { %1274 = vmatpush.msrb.mxu0 %v339_v26  ;;  %1303 = vmatpush.msrb.mxu1 %v340_v27  ;;  %v1410_v27 = vmax.f32 %v527_v59, 0.0 }
  0xbe   : > { %1332 = vmatpush.msrb.mxu2 %v341_v30  ;;  %1361 = vmatpush.msrb.mxu3 %v342_v32  ;;  %v1377_v32 = vmax.f32 %v495_v57, 0.0 }
  0xbf   : > { %3494 = vmatmul.msk.f32.gmra.mxu0 %vm435_vm0, %v3837_v31  ;;  %3498 = vmatmul.msk.f32.gmra.mxu1 %vm435_vm0, %v3837_v31 }
  0xc0   : > { %3502 = vmatmul.msk.f32.gmra.mxu2 %vm435_vm0, %v3837_v31  ;;  %3506 = vmatmul.msk.f32.gmra.mxu3 %vm435_vm0, %v3837_v31 }
  0xc1   : > { %1275 = vmatpush.msrb.mxu0 %v307_v35  ;;  %1304 = vmatpush.msrb.mxu1 %v308_v36  ;;  %v1378_v35 = vmax.f32 %v524_v58, 0.0  ;;  %v1379_v36 = vmax.f32 %v553_v21, 0.0  ;;  %v640_v58 = vadd.f32 %v4150_v28, %v4234_v12 }
  0xc2   : > { %1333 = vmatpush.msrb.mxu2 %v309_v37  ;;  %1362 = vmatpush.msrb.mxu3 %v310_v38 }
  0xc3   : > { %v4172_v39 = vpop.f32.mrf.mxu2  ;;  %v4174_v40 = vpop.f32.mrf.mxu3 }
  0xc4   : > { %v4176_v43 = vpop.f32.mrf.mxu0  ;;  %v4178_v45 = vpop.f32.mrf.mxu1 }
  0xc7   : > { %3495 = vmatmul.msk.f32.gmra.mxu0 %vm435_vm0, %v3864_v44  ;;  %3499 = vmatmul.msk.f32.gmra.mxu1 %vm435_vm0, %v3864_v44 }
  0xc8   : > { %3503 = vmatmul.msk.f32.gmra.mxu2 %vm435_vm0, %v3864_v44  ;;  %3507 = vmatmul.msk.f32.gmra.mxu3 %vm435_vm0, %v3864_v44 }
  0xcb   : > { %v4190_v47 = vpop.f32.mrf.mxu2  ;;  %v4192_v48 = vpop.f32.mrf.mxu3 }
  0xcc   : > { %v4194_v49 = vpop.f32.mrf.mxu0  ;;  %v4196_v55 = vpop.f32.mrf.mxu1 }
  0xcf   : > { %3496 = vmatmul.msk.f32.gmra.mxu0 %vm435_vm0, %v3882_v50  ;;  %3500 = vmatmul.msk.f32.gmra.mxu1 %vm435_vm0, %v3882_v50 }
  0xd0   : > { %3504 = vmatmul.msk.f32.gmra.mxu2 %vm435_vm0, %v3882_v50  ;;  %3508 = vmatmul.msk.f32.gmra.mxu3 %vm435_vm0, %v3882_v50 }
  0xd3   : > { %v4214_v0 = vpop.f32.mrf.mxu2  ;;  %v4216_v3 = vpop.f32.mrf.mxu3 }
  0xd4   : > { %v4222_v8 = vpop.f32.mrf.mxu0  ;;  %v4224_v9 = vpop.f32.mrf.mxu1  ;;  %v649_v59 = vadd.f32 %v4214_v0, %v4184_v46  ;;  %v678_v60 = vadd.f32 %v4216_v3, %v4184_v46  ;;  %v614_v0 = vadd.f32 %v4158_v34, %v4198_v56  ;;  %v611_v34 = vadd.f32 %v4130_v16, %v4234_v12 }
  0xd7   : > { %3509 = vmatmul.msk.f32.vlgmr.msra.gmra.mxu0 %vm435_vm0, %v3808_v18  ;;  %3513 = vmatmul.msk.f32.vlgmr.msra.gmra.mxu1 %vm435_vm0, %v3808_v18 }
  0xd8   : > { %3517 = vmatmul.msk.f32.vlgmr.msra.gmra.mxu2 %vm435_vm0, %v3808_v18  ;;  %3521 = vmatmul.msk.f32.vlgmr.msra.gmra.mxu3 %vm435_vm0, %v3808_v18 }
  0xd9   : > { %1556 = vmatpush.msra.mxu0 %v1472_v17  ;;  %1585 = vmatpush.msra.mxu1 %v1473_v19  ;;  %v591_v17 = vadd.f32 %v4194_v49, %v4184_v46  ;;  %v620_v19 = vadd.f32 %v4196_v55, %v4184_v46  ;;  %v675_v49 = vadd.f32 %v4192_v48, %v4208_v61  ;;  %v1479_v48 = vmax.f32 %v678_v60, 0.0 }
  0xda   : > { %1614 = vmatpush.msra.mxu2 %v1474_v1  ;;  %1643 = vmatpush.msra.mxu3 %v1475_v2  ;;  %v588_v1 = vadd.f32 %v4176_v43, %v4208_v61  ;;  %v617_v2 = vadd.f32 %v4178_v45, %v4208_v61  ;;  %v585_v55 = vadd.f32 %v4156_v33, %v4198_v56 }
  0xdb   : > { %1557 = vmatpush.msra.mxu0 %v1440_v53  ;;  %1586 = vmatpush.msra.mxu1 %v1441_v54  ;;  %v4260_v26 = vpop.f32.mrf.mxu2  ;;  %v4262_v41 = vpop.f32.mrf.mxu3  ;;  %v646_v53 = vadd.f32 %v4190_v47, %v4208_v61  ;;  %v1476_v54 = vmax.f32 %v591_v17, 0.0  ;;  %v1477_v3 = vmax.f32 %v620_v19, 0.0  ;;  %v643_v43 = vadd.f32 %v4172_v39, %v4198_v56 }
  0xdc   : > { %1615 = vmatpush.msra.mxu2 %v1442_v22  ;;  %1644 = vmatpush.msra.mxu3 %v1443_v23  ;;  %v4264_v51 = vpop.f32.mrf.mxu0  ;;  %v4266_v30 = vpop.f32.mrf.mxu1  ;;  %v672_v45 = vadd.f32 %v4174_v40, %v4198_v56  ;;  %v1478_v47 = vmax.f32 %v649_v59, 0.0  ;;  %v582_v33 = vadd.f32 %v4128_v15, %v4234_v12  ;;  %v1444_v20 = vmax.f32 %v588_v1, 0.0 }
  0xdd   : > { %1558 = vmatpush.msra.mxu0 %v1408_v24  ;;  %1587 = vmatpush.msra.mxu1 %v1409_v25  ;;  %v1445_v57 = vmax.f32 %v617_v2, 0.0  ;;  %v1446_v21 = vmax.f32 %v646_v53, 0.0  ;;  %v1447_v22 = vmax.f32 %v675_v49, 0.0  ;;  %v1412_v23 = vmax.f32 %v585_v55, 0.0 }
  0xde   : > { %1616 = vmatpush.msra.mxu2 %v1410_v27  ;;  %1645 = vmatpush.msra.mxu3 %v1411_v42  ;;  %v1413_v24 = vmax.f32 %v614_v0, 0.0  ;;  %v1414_v25 = vmax.f32 %v643_v43, 0.0  ;;  %v1415_v27 = vmax.f32 %v672_v45, 0.0  ;;  %v1380_v28 = vmax.f32 %v582_v33, 0.0 }
  0xdf   : > { %1559 = vmatpush.msra.mxu0 %v1376_v52  ;;  %1588 = vmatpush.msra.mxu1 %v1377_v32  ;;  %v1381_v42 = vmax.f32 %v611_v34, 0.0  ;;  %v730_v43 = vadd.f32 %v4266_v30, %v4198_v56  ;;  %v698_v34 = vadd.f32 %v4222_v8, %v4234_v12 }
  0xe0   : > { %1617 = vmatpush.msra.mxu2 %v1378_v35  ;;  %1646 = vmatpush.msra.mxu3 %v1379_v36 }
  0xe1   : > { %3510 = vmatmul.msk.f32.gmra.mxu0 %vm435_vm0, %v3837_v31  ;;  %3514 = vmatmul.msk.f32.gmra.mxu1 %vm435_vm0, %v3837_v31 }
  0xe2   : > { %3518 = vmatmul.msk.f32.gmra.mxu2 %vm435_vm0, %v3837_v31  ;;  %3522 = vmatmul.msk.f32.gmra.mxu3 %vm435_vm0, %v3837_v31 }
  0xe3   : > { %v4276_v37 = vpop.f32.mrf.mxu2  ;;  %v4278_v38 = vpop.f32.mrf.mxu3 }
  0xe4   : > { %v4280_v62 = vpop.f32.mrf.mxu0  ;;  %v4282_v63 = vpop.f32.mrf.mxu1 }
  0xe9   : > { %3511 = vmatmul.msk.f32.gmra.mxu0 %vm435_vm0, %v3864_v44  ;;  %3515 = vmatmul.msk.f32.gmra.mxu1 %vm435_vm0, %v3864_v44 }
  0xea   : > { %3519 = vmatmul.msk.f32.gmra.mxu2 %vm435_vm0, %v3864_v44  ;;  %3523 = vmatmul.msk.f32.gmra.mxu3 %vm435_vm0, %v3864_v44 }
  0xeb   : > { %v4292_v4 = vpop.f32.mrf.mxu2  ;;  %v4294_v7 = vpop.f32.mrf.mxu3 }
  0xec   : > { %v4296_v5 = vpop.f32.mrf.mxu0  ;;  %v4298_v6 = vpop.f32.mrf.mxu1 }
  0xed   : > { %v707_v49 = vadd.f32 %v4296_v5, %v4184_v46  ;;  %v736_v55 = vadd.f32 %v4298_v6, %v4184_v46  ;;  %v733_v5 = vadd.f32 %v4282_v63, %v4208_v61  ;;  %v762_v6 = vadd.f32 %v4292_v4, %v4208_v61 }
  0xee   : > { %v759_v4 = vadd.f32 %v4276_v37, %v4198_v56  ;;  %v727_v37 = vadd.f32 %v4224_v9, %v4234_v12 }
  0xef   : > { %v1480_v45 = vmax.f32 %v707_v49, 0.0  ;;  %v4489_v49 = vld [vmem:[%s5517_s3 + $0x10] sm:$0xff] }
  0xf0   : > { %v1418_v8 = vmax.f32 %v759_v4, 0.0 }
  0xf1   : > { %3512 = vmatmul.msk.f32.gmra.mxu0 %vm435_vm0, %v3882_v50  ;;  %3516 = vmatmul.msk.f32.gmra.mxu1 %vm435_vm0, %v3882_v50 }
  0xf2   : > { %3520 = vmatmul.msk.f32.gmra.mxu2 %vm435_vm0, %v3882_v50  ;;  %3524 = vmatmul.msk.f32.gmra.mxu3 %vm435_vm0, %v3882_v50 }
  0xf3   : > { %v4308_v10 = vpop.f32.mrf.mxu2  ;;  %v4310_v11 = vpop.f32.mrf.mxu3 }
  0xf4   : > { %v4312_v13 = vpop.f32.mrf.mxu0  ;;  %v4314_v14 = vpop.f32.mrf.mxu1  ;;  %v765_v0 = vadd.f32 %v4308_v10, %v4184_v46  ;;  %v791_v10 = vadd.f32 %v4294_v7, %v4208_v61 }
  0xf6   : > { %v1482_v7 = vmax.f32 %v765_v0, 0.0 }
  0xf9   : > { %3525 = vmatmul.msk.f32.vlgmr.msrb.gmra.mxu0 %vm435_vm0, %v3808_v18  ;;  %3529 = vmatmul.msk.f32.vlgmr.msrb.gmra.mxu1 %vm435_vm0, %v3808_v18 }
  0xfa   : > { %3533 = vmatmul.msk.f32.vlgmr.msrb.gmra.mxu2 %vm435_vm0, %v3808_v18  ;;  %3537 = vmatmul.msk.f32.vlgmr.msrb.gmra.mxu3 %vm435_vm0, %v3808_v18  ;;  %v669_v18 = vadd.f32 %v4152_v29, %v4234_v12  ;;  %v1382_v29 = vmax.f32 %v640_v58, 0.0  ;;  %v785_v58 = vadd.f32 %v4262_v41, %v4234_v12  ;;  %v4468_v41 = vld [vmem:[%s5517_s3 + $0x8] sm:$0xff] }
  0xfb   : > { %1672 = vmatpush.msrb.mxu0 %v1476_v54  ;;  %1701 = vmatpush.msrb.mxu1 %v1477_v3  ;;  %v4352_v39 = vpop.f32.mrf.mxu2  ;;  %v4354_v40 = vpop.f32.mrf.mxu3  ;;  %v794_v54 = vadd.f32 %v4310_v11, %v4184_v46  ;;  %v704_v3 = vadd.f32 %v4280_v62, %v4208_v61  ;;  %v701_v11 = vadd.f32 %v4264_v51, %v4198_v56 }
  0xfc   : > { %1730 = vmatpush.msrb.mxu2 %v1478_v47  ;;  %1759 = vmatpush.msrb.mxu3 %v1479_v48  ;;  %v4360_v15 = vpop.f32.mrf.mxu0  ;;  %v4362_v16 = vpop.f32.mrf.mxu1  ;;  %v1383_v52 = vmax.f32 %v669_v18, 0.0  ;;  %v1481_v47 = vmax.f32 %v736_v55, 0.0  ;;  %v788_v51 = vadd.f32 %v4278_v38, %v4198_v56  ;;  %v1449_v38 = vmax.f32 %v733_v5, 0.0  ;;  %v1511_v5 = vld [vmem:[%s5518_s4 + $0x18] sm:$0xff] }
  0xfd   : > { %1673 = vmatpush.msrb.mxu0 %v1444_v20  ;;  %1702 = vmatpush.msrb.mxu1 %v1445_v57  ;;  %v1483_v30 = vmax.f32 %v794_v54, 0.0  ;;  %v1448_v20 = vmax.f32 %v704_v3, 0.0  ;;  %v756_v57 = vadd.f32 %v4260_v26, %v4234_v12  ;;  %v1450_v18 = vmax.f32 %v762_v6, 0.0  ;;  %v4513_v6 = vld [vmem:[%s5517_s3 + $0x18] sm:$0xff] }
  0xfe   : > { %1731 = vmatpush.msrb.mxu2 %v1446_v21  ;;  %1760 = vmatpush.msrb.mxu3 %v1447_v22  ;;  %v1451_v21 = vmax.f32 %v791_v10, 0.0  ;;  %v1416_v22 = vmax.f32 %v701_v11, 0.0  ;;  %v1419_v9 = vmax.f32 %v788_v51, 0.0 }
  0xff   : > { %1674 = vmatpush.msrb.mxu0 %v1412_v23  ;;  %1703 = vmatpush.msrb.mxu1 %v1413_v24  ;;  %v1417_v23 = vmax.f32 %v730_v43, 0.0  ;;  %v1384_v24 = vmax.f32 %v698_v34, 0.0  ;;  %v1386_v26 = vmax.f32 %v756_v57, 0.0 }
 0x100   : > { %1732 = vmatpush.msrb.mxu2 %v1414_v25  ;;  %1761 = vmatpush.msrb.mxu3 %v1415_v27  ;;  %v1385_v25 = vmax.f32 %v727_v37, 0.0  ;;  %v1387_v27 = vmax.f32 %v785_v58, 0.0 }
 0x101   : > { %1675 = vmatpush.msrb.mxu0 %v1380_v28  ;;  %1704 = vmatpush.msrb.mxu1 %v1381_v42 }
 0x102   : > { %1733 = vmatpush.msrb.mxu2 %v1382_v29  ;;  %1762 = vmatpush.msrb.mxu3 %v1383_v52 }
 0x103   : > { %3526 = vmatmul.msk.f32.gmra.mxu0 %vm435_vm0, %v3837_v31  ;;  %3530 = vmatmul.msk.f32.gmra.mxu1 %vm435_vm0, %v3837_v31  ;;  %v4368_v32 = vpop.f32.mrf.mxu2  ;;  %v4370_v35 = vpop.f32.mrf.mxu3 }
 0x104   : > { %3534 = vmatmul.msk.f32.gmra.mxu2 %vm435_vm0, %v3837_v31  ;;  %3538 = vmatmul.msk.f32.gmra.mxu3 %vm435_vm0, %v3837_v31  ;;  %v4376_v36 = vpop.f32.mrf.mxu0  ;;  %v4378_v17 = vpop.f32.mrf.mxu1 }
 0x105   : > { %1529 = vperm.xlu2 %3716, %v1511_v5   ;;  %v820_v34 = vadd.f32 %v4376_v36, %v4208_v61  ;;  %v849_v37 = vadd.f32 %v4378_v17, %v4208_v61  ;;  %v817_v36 = vadd.f32 %v4360_v15, %v4198_v56  ;;  %v846_v17 = vadd.f32 %v4362_v16, %v4198_v56 }
 0x106   : > { %v814_v15 = vadd.f32 %v4312_v13, %v4234_v12  ;;  %v843_v16 = vadd.f32 %v4314_v14, %v4234_v12 }
 0x10b   : > { %3527 = vmatmul.msk.f32.gmra.mxu0 %vm435_vm0, %v3864_v44  ;;  %3531 = vmatmul.msk.f32.gmra.mxu1 %vm435_vm0, %v3864_v44  ;;  %v4384_v19 = vpop.f32.mrf.mxu2  ;;  %v4386_v59 = vpop.f32.mrf.mxu3 }
 0x10c   : > { %3535 = vmatmul.msk.f32.gmra.mxu2 %vm435_vm0, %v3864_v44  ;;  %3539 = vmatmul.msk.f32.gmra.mxu3 %vm435_vm0, %v3864_v44  ;;  %v4392_v31 = vpop.f32.mrf.mxu0  ;;  %v4394_v60 = vpop.f32.mrf.mxu1 }
 0x10d   : > { %v823_v4 = vadd.f32 %v4392_v31, %v4184_v46  ;;  %v852_v51 = vadd.f32 %v4394_v60, %v4184_v46  ;;  %v878_v31 = vadd.f32 %v4384_v19, %v4208_v61  ;;  %v907_v60 = vadd.f32 %v4386_v59, %v4208_v61 }
 0x10e   : > { %v875_v19 = vadd.f32 %v4368_v32, %v4198_v56  ;;  %v904_v59 = vadd.f32 %v4370_v35, %v4198_v56  ;;  %v872_v32 = vadd.f32 %v4352_v39, %v4234_v12  ;;  %v901_v35 = vadd.f32 %v4354_v40, %v4234_v12 }
 0x10f   : > { %v1485_v58 = vmax.f32 %v852_v51, 0.0 }
 0x110   : > { %v1422_v13 = vmax.f32 %v875_v19, 0.0  ;;  %v1423_v14 = vmax.f32 %v904_v59, 0.0  ;;  %v1390_v40 = vmax.f32 %v872_v32, 0.0 }
 0x113   : > { %3528 = vmatmul.msk.f32.gmra.mxu0 %vm435_vm0, %v3882_v50  ;;  %3532 = vmatmul.msk.f32.gmra.mxu1 %vm435_vm0, %v3882_v50  ;;  %v4400_v1 = vpop.f32.mrf.mxu2  ;;  %v4402_v2 = vpop.f32.mrf.mxu3 }
 0x114   : > { %3536 = vmatmul.msk.f32.gmra.mxu2 %vm435_vm0, %v3882_v50  ;;  %3540 = vmatmul.msk.f32.gmra.mxu3 %vm435_vm0, %v3882_v50  ;;  %v4408_v44 = vpop.f32.mrf.mxu0  ;;  %v4410_v53 = vpop.f32.mrf.mxu1  ;;  %v4423_v50 = vld [vmem:[%s5517_s3] sm:$0xff] }
 0x11b   : > { %3541 = vmatmul.msk.f32.vlgmr.msra.gmra.mxu0 %vm435_vm0, %v4423_v50  ;;  %3545 = vmatmul.msk.f32.vlgmr.msra.gmra.mxu1 %vm435_vm0, %v4423_v50  ;;  %v4441_v62 = vpop.f32.mrf.mxu2  ;;  %v4443_v63 = vpop.f32.mrf.mxu3 }
 0x11c   : > { %3549 = vmatmul.msk.f32.vlgmr.msra.gmra.mxu2 %vm435_vm0, %v4423_v50  ;;  %3553 = vmatmul.msk.f32.vlgmr.msra.gmra.mxu3 %vm435_vm0, %v4423_v50  ;;  %v4453_v48 = vpop.f32.mrf.mxu0  ;;  %v4455_v33 = vpop.f32.mrf.mxu1 }
 0x11d   : > { %1788 = vmatpush.msra.mxu0 %v1480_v45  ;;  %1817 = vmatpush.msra.mxu1 %v1481_v47  ;;  %v1510_v47 = vld [vmem:[%s5518_s4 + $0x10] sm:$0xff] }
 0x11e   : > { %1846 = vmatpush.msra.mxu2 %v1482_v7  ;;  %1875 = vmatpush.msra.mxu3 %v1483_v30  ;;  %v881_v7 = vadd.f32 %v4400_v1, %v4184_v46  ;;  %v910_v30 = vadd.f32 %v4402_v2, %v4184_v46  ;;  %v1484_v2 = vmax.f32 %v823_v4, 0.0 }
 0x11f   : > { %1789 = vmatpush.msra.mxu0 %v1448_v20  ;;  %1818 = vmatpush.msra.mxu1 %v1449_v38 }
 0x120   : > { %1847 = vmatpush.msra.mxu2 %v1450_v18  ;;  %1876 = vmatpush.msra.mxu3 %v1451_v21  ;;  %v1486_v18 = vmax.f32 %v881_v7, 0.0  ;;  %v1487_v21 = vmax.f32 %v910_v30, 0.0 }
 0x121   : > { %1790 = vmatpush.msra.mxu0 %v1416_v22  ;;  %1819 = vmatpush.msra.mxu1 %v1417_v23  ;;  %v1452_v22 = vmax.f32 %v820_v34, 0.0  ;;  %v1453_v23 = vmax.f32 %v849_v37, 0.0 }
 0x122   : > { %1848 = vmatpush.msra.mxu2 %v1418_v8  ;;  %1877 = vmatpush.msra.mxu3 %v1419_v9  ;;  %v1454_v8 = vmax.f32 %v878_v31, 0.0  ;;  %v1455_v9 = vmax.f32 %v907_v60, 0.0 }
 0x123   : > { %1791 = vmatpush.msra.mxu0 %v1384_v24  ;;  %1820 = vmatpush.msra.mxu1 %v1385_v25  ;;  %v4470_v28 = vpop.f32.mrf.mxu2  ;;  %v4472_v42 = vpop.f32.mrf.mxu3  ;;  %v1420_v24 = vmax.f32 %v817_v36, 0.0  ;;  %v1421_v25 = vmax.f32 %v846_v17, 0.0 }
 0x124   : > { %1849 = vmatpush.msra.mxu2 %v1386_v26  ;;  %1878 = vmatpush.msra.mxu3 %v1387_v27  ;;  %v4474_v29 = vpop.f32.mrf.mxu0  ;;  %v4476_v52 = vpop.f32.mrf.mxu1  ;;  %v1388_v26 = vmax.f32 %v814_v15, 0.0  ;;  %v1389_v27 = vmax.f32 %v843_v16, 0.0 }
 0x125   : > { %3542 = vmatmul.msk.f32.gmra.mxu0 %vm435_vm0, %v4468_v41  ;;  %3546 = vmatmul.msk.f32.gmra.mxu1 %vm435_vm0, %v4468_v41  ;;  %v936_v15 = vadd.f32 %v4474_v29, %v4208_v61  ;;  %v965_v16 = vadd.f32 %v4476_v52, %v4208_v61  ;;  %v991_v52 = vadd.f32 %v4470_v28, %v4198_v56 }
 0x126   : > { %3550 = vmatmul.msk.f32.gmra.mxu2 %vm435_vm0, %v4468_v41  ;;  %3554 = vmatmul.msk.f32.gmra.mxu3 %vm435_vm0, %v4468_v41  ;;  %v988_v28 = vadd.f32 %v4441_v62, %v4234_v12 }
 0x127   : > { %1524 = vperm.xlu2 %3716, %v1510_v47   ;;  %v1391_v47 = vmax.f32 %v901_v35, 0.0 }
 0x12b   : > { %v4491_v55 = vpop.f32.mrf.mxu2  ;;  %v4493_v0 = vpop.f32.mrf.mxu3 }
 0x12c   : > { %v4495_v54 = vpop.f32.mrf.mxu0  ;;  %v4497_v3 = vpop.f32.mrf.mxu1 }
 0x12d   : > { %3543 = vmatmul.msk.f32.gmra.mxu0 %vm435_vm0, %v4489_v49  ;;  %3547 = vmatmul.msk.f32.gmra.mxu1 %vm435_vm0, %v4489_v49 }
 0x12e   : > { %3551 = vmatmul.msk.f32.gmra.mxu2 %vm435_vm0, %v4489_v49  ;;  %3555 = vmatmul.msk.f32.gmra.mxu3 %vm435_vm0, %v4489_v49 }
 0x133   : > { %v4515_v10 = vpop.f32.mrf.mxu2  ;;  %v4517_v11 = vpop.f32.mrf.mxu3 }
 0x134   : > { %v4519_v43 = vpop.f32.mrf.mxu0  ;;  %v4521_v45 = vpop.f32.mrf.mxu1 }
 0x135   : > { %3544 = vmatmul.msk.f32.gmra.mxu0 %vm435_vm0, %v4513_v6  ;;  %3548 = vmatmul.msk.f32.gmra.mxu1 %vm435_vm0, %v4513_v6 }
 0x136   : > { %3552 = vmatmul.msk.f32.gmra.mxu2 %vm435_vm0, %v4513_v6  ;;  %3556 = vmatmul.msk.f32.gmra.mxu3 %vm435_vm0, %v4513_v6 }
 0x13b   : > { %v4546_v20 = vpop.f32.mrf.mxu2  ;;  %v4548_v38 = vpop.f32.mrf.mxu3 }
 0x13c   : > { %v4554_v1 = vpop.f32.mrf.mxu0  ;;  %v4556_v57 = vpop.f32.mrf.mxu1 }
 0x13d   : > { %3557 = vmatmul.msk.f32.vlgmr.msrb.gmra.mxu0 %vm435_vm0, %v4423_v50  ;;  %3561 = vmatmul.msk.f32.vlgmr.msrb.gmra.mxu1 %vm435_vm0, %v4423_v50 }
 0x13e   : > { %3565 = vmatmul.msk.f32.vlgmr.msrb.gmra.mxu2 %vm435_vm0, %v4423_v50  ;;  %3569 = vmatmul.msk.f32.vlgmr.msrb.gmra.mxu3 %vm435_vm0, %v4423_v50 }
 0x13f   : > { %1904 = vmatpush.msrb.mxu0 %v1484_v2  ;;  %1933 = vmatpush.msrb.mxu1 %v1485_v58  ;;  %v939_v2 = vadd.f32 %v4495_v54, %v4184_v46  ;;  %v968_v58 = vadd.f32 %v4497_v3, %v4184_v46  ;;  %v994_v54 = vadd.f32 %v4491_v55, %v4208_v61 }
 0x140   : > { %1962 = vmatpush.msrb.mxu2 %v1486_v18  ;;  %1991 = vmatpush.msrb.mxu3 %v1487_v21  ;;  %v997_v18 = vadd.f32 %v4515_v10, %v4184_v46  ;;  %v1026_v21 = vadd.f32 %v4517_v11, %v4184_v46  ;;  %v1023_v3 = vadd.f32 %v4493_v0, %v4208_v61 }
 0x141   : > { %1905 = vmatpush.msrb.mxu0 %v1452_v22  ;;  %1934 = vmatpush.msrb.mxu1 %v1453_v23  ;;  %v933_v10 = vadd.f32 %v4453_v48, %v4198_v56  ;;  %v962_v11 = vadd.f32 %v4455_v33, %v4198_v56  ;;  %v1488_v29 = vmax.f32 %v939_v2, 0.0  ;;  %v1489_v32 = vmax.f32 %v968_v58, 0.0 }
 0x142   : > { %1963 = vmatpush.msrb.mxu2 %v1454_v8  ;;  %1992 = vmatpush.msrb.mxu3 %v1455_v9  ;;  %v1020_v55 = vadd.f32 %v4472_v42, %v4198_v56  ;;  %v1490_v0 = vmax.f32 %v997_v18, 0.0  ;;  %v1491_v35 = vmax.f32 %v1026_v21, 0.0  ;;  %v930_v48 = vadd.f32 %v4408_v44, %v4234_v12 }
 0x143   : > { %1906 = vmatpush.msrb.mxu0 %v1420_v24  ;;  %1935 = vmatpush.msrb.mxu1 %v1421_v25  ;;  %v4582_v39 = vpop.f32.mrf.mxu2  ;;  %v4584_v5 = vpop.f32.mrf.mxu3  ;;  %v959_v33 = vadd.f32 %v4410_v53, %v4234_v12  ;;  %v1456_v8 = vmax.f32 %v936_v15, 0.0  ;;  %v1457_v9 = vmax.f32 %v965_v16, 0.0  ;;  %v1017_v42 = vadd.f32 %v4443_v63, %v4234_v12 }
 0x144   : > { %1964 = vmatpush.msrb.mxu2 %v1422_v13  ;;  %1993 = vmatpush.msrb.mxu3 %v1423_v14  ;;  %v4586_v4 = vpop.f32.mrf.mxu0  ;;  %v4588_v51 = vpop.f32.mrf.mxu1  ;;  %v1458_v24 = vmax.f32 %v994_v54, 0.0  ;;  %v1459_v25 = vmax.f32 %v1023_v3, 0.0  ;;  %v1424_v13 = vmax.f32 %v933_v10, 0.0  ;;  %v1425_v14 = vmax.f32 %v962_v11, 0.0 }
 0x145   : > { %1907 = vmatpush.msrb.mxu0 %v1388_v26  ;;  %1936 = vmatpush.msrb.mxu1 %v1389_v27  ;;  %v1426_v44 = vmax.f32 %v991_v52, 0.0  ;;  %v1427_v53 = vmax.f32 %v1020_v55, 0.0  ;;  %v1392_v26 = vmax.f32 %v930_v48, 0.0  ;;  %v1393_v27 = vmax.f32 %v959_v33, 0.0 }
 0x146   : > { %1965 = vmatpush.msrb.mxu2 %v1390_v40  ;;  %1994 = vmatpush.msrb.mxu3 %v1391_v47  ;;  %v1394_v63 = vmax.f32 %v988_v28, 0.0  ;;  %v1395_v47 = vmax.f32 %v1017_v42, 0.0  ;;  %v1052_v48 = vadd.f32 %v4586_v4, %v4208_v61  ;;  %v1081_v33 = vadd.f32 %v4588_v51, %v4208_v61 }
 0x147   : > { %3558 = vmatmul.msk.f32.gmra.mxu0 %vm435_vm0, %v4468_v41  ;;  %3562 = vmatmul.msk.f32.gmra.mxu1 %vm435_vm0, %v4468_v41  ;;  %v1107_v51 = vadd.f32 %v4582_v39, %v4198_v56  ;;  %v1104_v39 = vadd.f32 %v4546_v20, %v4234_v12 }
 0x148   : > { %3566 = vmatmul.msk.f32.gmra.mxu2 %vm435_vm0, %v4468_v41  ;;  %3570 = vmatmul.msk.f32.gmra.mxu3 %vm435_vm0, %v4468_v41 }
 0x14b   : > { %v4598_v7 = vpop.f32.mrf.mxu2  ;;  %v4600_v30 = vpop.f32.mrf.mxu3 }
 0x14c   : > { %v4602_v34 = vpop.f32.mrf.mxu0  ;;  %v4604_v37 = vpop.f32.mrf.mxu1 }
 0x14f   : > { %3559 = vmatmul.msk.f32.gmra.mxu0 %vm435_vm0, %v4489_v49  ;;  %3563 = vmatmul.msk.f32.gmra.mxu1 %vm435_vm0, %v4489_v49 }
 0x150   : > { %3567 = vmatmul.msk.f32.gmra.mxu2 %vm435_vm0, %v4489_v49  ;;  %3571 = vmatmul.msk.f32.gmra.mxu3 %vm435_vm0, %v4489_v49 }
 0x153   : > { %v4614_v31 = vpop.f32.mrf.mxu2  ;;  %v4616_v60 = vpop.f32.mrf.mxu3 }
 0x154   : > { %v4618_v36 = vpop.f32.mrf.mxu0  ;;  %v4620_v17 = vpop.f32.mrf.mxu1 }
 0x157   : > { %3560 = vmatmul.msk.f32.gmra.mxu0 %vm435_vm0, %v4513_v6  ;;  %3564 = vmatmul.msk.f32.gmra.mxu1 %vm435_vm0, %v4513_v6 }
 0x158   : > { %3568 = vmatmul.msk.f32.gmra.mxu2 %vm435_vm0, %v4513_v6  ;;  %3572 = vmatmul.msk.f32.gmra.mxu3 %vm435_vm0, %v4513_v6 }
 0x15b   : > { %v4634_v19 = vpop.f32.mrf.mxu2  ;;  %v4636_v59 = vpop.f32.mrf.mxu3 }
 0x15e   : > { %v4650_v22 = vpop.f32.mrf.mxu0  ;;  %v4652_v23 = vpop.f32.mrf.mxu1 }
 0x15f   : > { %3573 = vmatmul.msk.f32.vlgmr.msra.gmra.mxu0 %vm435_vm0, %v4423_v50  ;;  %3577 = vmatmul.msk.f32.vlgmr.msra.gmra.mxu1 %vm435_vm0, %v4423_v50 }
 0x160   : > { %3581 = vmatmul.msk.f32.vlgmr.msra.gmra.mxu2 %vm435_vm0, %v4423_v50  ;;  %3585 = vmatmul.msk.f32.vlgmr.msra.gmra.mxu3 %vm435_vm0, %v4423_v50 }
 0x161   : > { %2020 = vmatpush.msra.mxu0 %v1488_v29  ;;  %2049 = vmatpush.msra.mxu1 %v1489_v32  ;;  %v1055_v29 = vadd.f32 %v4602_v34, %v4184_v46  ;;  %v1084_v32 = vadd.f32 %v4604_v37, %v4184_v46  ;;  %v1110_v34 = vadd.f32 %v4598_v7, %v4208_v61 }
 0x162   : > { %2078 = vmatpush.msra.mxu2 %v1490_v0  ;;  %2107 = vmatpush.msra.mxu3 %v1491_v35  ;;  %v1113_v0 = vadd.f32 %v4614_v31, %v4184_v46  ;;  %v1142_v35 = vadd.f32 %v4616_v60, %v4184_v46  ;;  %v1139_v37 = vadd.f32 %v4600_v30, %v4208_v61 }
 0x163   : > { %2021 = vmatpush.msra.mxu0 %v1456_v8  ;;  %2050 = vmatpush.msra.mxu1 %v1457_v9  ;;  %v1049_v31 = vadd.f32 %v4554_v1, %v4198_v56  ;;  %v1078_v60 = vadd.f32 %v4556_v57, %v4198_v56  ;;  %v1492_v4 = vmax.f32 %v1055_v29, 0.0  ;;  %v1493_v28 = vmax.f32 %v1084_v32, 0.0 }
 0x164   : > { %2079 = vmatpush.msra.mxu2 %v1458_v24  ;;  %2108 = vmatpush.msra.mxu3 %v1459_v25  ;;  %v1136_v7 = vadd.f32 %v4584_v5, %v4198_v56  ;;  %v1494_v30 = vmax.f32 %v1113_v0, 0.0  ;;  %v1495_v42 = vmax.f32 %v1142_v35, 0.0  ;;  %v1046_v1 = vadd.f32 %v4519_v43, %v4234_v12 }
 0x165   : > { %2022 = vmatpush.msra.mxu0 %v1424_v13  ;;  %2051 = vmatpush.msra.mxu1 %v1425_v14  ;;  %v4678_v62 = vpop.f32.mrf.mxu2  ;;  %v4680_v40 = vpop.f32.mrf.mxu3  ;;  %v1075_v57 = vadd.f32 %v4521_v45, %v4234_v12  ;;  %v1460_v24 = vmax.f32 %v1052_v48, 0.0  ;;  %v1461_v25 = vmax.f32 %v1081_v33, 0.0  ;;  %v1133_v5 = vadd.f32 %v4548_v38, %v4234_v12 }
 0x166   : > { %2080 = vmatpush.msra.mxu2 %v1426_v44  ;;  %2109 = vmatpush.msra.mxu3 %v1427_v53  ;;  %v4682_v2 = vpop.f32.mrf.mxu0  ;;  %v4684_v58 = vpop.f32.mrf.mxu1  ;;  %v1462_v13 = vmax.f32 %v1110_v34, 0.0  ;;  %v1463_v14 = vmax.f32 %v1139_v37, 0.0  ;;  %v1428_v44 = vmax.f32 %v1049_v31, 0.0  ;;  %v1429_v53 = vmax.f32 %v1078_v60, 0.0 }
 0x167   : > { %2023 = vmatpush.msra.mxu0 %v1392_v26  ;;  %2052 = vmatpush.msra.mxu1 %v1393_v27  ;;  %v1430_v43 = vmax.f32 %v1107_v51, 0.0  ;;  %v1431_v45 = vmax.f32 %v1136_v7, 0.0  ;;  %v1396_v26 = vmax.f32 %v1046_v1, 0.0  ;;  %v1397_v27 = vmax.f32 %v1075_v57, 0.0 }
 0x168   : > { %2081 = vmatpush.msra.mxu2 %v1394_v63  ;;  %2110 = vmatpush.msra.mxu3 %v1395_v47  ;;  %v1398_v38 = vmax.f32 %v1104_v39, 0.0  ;;  %v1399_v47 = vmax.f32 %v1133_v5, 0.0  ;;  %v1168_v1 = vadd.f32 %v4682_v2, %v4208_v61  ;;  %v1197_v57 = vadd.f32 %v4684_v58, %v4208_v61 }
 0x169   : > { %3574 = vmatmul.msk.f32.gmra.mxu0 %vm435_vm0, %v4468_v41  ;;  %3578 = vmatmul.msk.f32.gmra.mxu1 %vm435_vm0, %v4468_v41  ;;  %v1223_v58 = vadd.f32 %v4678_v62, %v4198_v56  ;;  %v1220_v62 = vadd.f32 %v4634_v19, %v4234_v12 }
 0x16a   : > { %3582 = vmatmul.msk.f32.gmra.mxu2 %vm435_vm0, %v4468_v41  ;;  %3586 = vmatmul.msk.f32.gmra.mxu3 %vm435_vm0, %v4468_v41 }
 0x16d   : > { %v4694_v18 = vpop.f32.mrf.mxu2  ;;  %v4696_v21 = vpop.f32.mrf.mxu3 }
 0x16e   : > { %v4698_v15 = vpop.f32.mrf.mxu0  ;;  %v4700_v16 = vpop.f32.mrf.mxu1 }
 0x171   : > { %3575 = vmatmul.msk.f32.gmra.mxu0 %vm435_vm0, %v4489_v49  ;;  %3579 = vmatmul.msk.f32.gmra.mxu1 %vm435_vm0, %v4489_v49 }
 0x172   : > { %3583 = vmatmul.msk.f32.gmra.mxu2 %vm435_vm0, %v4489_v49  ;;  %3587 = vmatmul.msk.f32.gmra.mxu3 %vm435_vm0, %v4489_v49 }
 0x175   : > { %v4710_v54 = vpop.f32.mrf.mxu2  ;;  %v4712_v3 = vpop.f32.mrf.mxu3 }
 0x176   : > { %v4714_v10 = vpop.f32.mrf.mxu0  ;;  %v4716_v11 = vpop.f32.mrf.mxu1 }
 0x179   : > { %3576 = vmatmul.msk.f32.gmra.mxu0 %vm435_vm0, %v4513_v6  ;;  %3580 = vmatmul.msk.f32.gmra.mxu1 %vm435_vm0, %v4513_v6 }
 0x17a   : > { %3584 = vmatmul.msk.f32.gmra.mxu2 %vm435_vm0, %v4513_v6  ;;  %3588 = vmatmul.msk.f32.gmra.mxu3 %vm435_vm0, %v4513_v6 }
 0x17d   : > { %v4730_v52 = vpop.f32.mrf.mxu2  ;;  %v4732_v55 = vpop.f32.mrf.mxu3 }
 0x180   : > { %v4746_v8 = vpop.f32.mrf.mxu0  ;;  %v4748_v9 = vpop.f32.mrf.mxu1 }
 0x181   : > { %3589 = vmatmul.msk.f32.vlgmr.msrb.gmra.mxu0 %vm435_vm0, %v4423_v50  ;;  %3593 = vmatmul.msk.f32.vlgmr.msrb.gmra.mxu1 %vm435_vm0, %v4423_v50 }
 0x182   : > { %3597 = vmatmul.msk.f32.vlgmr.msrb.gmra.mxu2 %vm435_vm0, %v4423_v50  ;;  %3601 = vmatmul.msk.f32.vlgmr.msrb.gmra.mxu3 %vm435_vm0, %v4423_v50 }
 0x183   : > { %2136 = vmatpush.msrb.mxu0 %v1492_v4  ;;  %2165 = vmatpush.msrb.mxu1 %v1493_v28  ;;  %v1171_v4 = vadd.f32 %v4698_v15, %v4184_v46  ;;  %v1200_v28 = vadd.f32 %v4700_v16, %v4184_v46  ;;  %v1226_v15 = vadd.f32 %v4694_v18, %v4208_v61 }
 0x184   : > { %2194 = vmatpush.msrb.mxu2 %v1494_v30  ;;  %2223 = vmatpush.msrb.mxu3 %v1495_v42  ;;  %v1229_v30 = vadd.f32 %v4710_v54, %v4184_v46  ;;  %v1258_v42 = vadd.f32 %v4712_v3, %v4184_v46  ;;  %v1255_v16 = vadd.f32 %v4696_v21, %v4208_v61 }
 0x185   : > { %2137 = vmatpush.msrb.mxu0 %v1460_v24  ;;  %2166 = vmatpush.msrb.mxu1 %v1461_v25  ;;  %v1165_v54 = vadd.f32 %v4650_v22, %v4198_v56  ;;  %v1194_v3 = vadd.f32 %v4652_v23, %v4198_v56  ;;  %v1496_v2 = vmax.f32 %v1171_v4, 0.0  ;;  %v1497_v39 = vmax.f32 %v1200_v28, 0.0 }
 0x186   : > { %2195 = vmatpush.msrb.mxu2 %v1462_v13  ;;  %2224 = vmatpush.msrb.mxu3 %v1463_v14  ;;  %v1252_v18 = vadd.f32 %v4680_v40, %v4198_v56  ;;  %v1498_v21 = vmax.f32 %v1229_v30, 0.0  ;;  %v1499_v5 = vmax.f32 %v1258_v42, 0.0  ;;  %v1162_v22 = vadd.f32 %v4618_v36, %v4234_v12 }
 0x187   : > { %2138 = vmatpush.msrb.mxu0 %v1428_v44  ;;  %2167 = vmatpush.msrb.mxu1 %v1429_v53  ;;  %v4774_v20 = vpop.f32.mrf.mxu2  ;;  %v4776_v63 = vpop.f32.mrf.mxu3  ;;  %v1191_v23 = vadd.f32 %v4620_v17, %v4234_v12  ;;  %v1464_v13 = vmax.f32 %v1168_v1, 0.0  ;;  %v1465_v14 = vmax.f32 %v1197_v57, 0.0  ;;  %v1249_v40 = vadd.f32 %v4636_v59, %v4234_v12 }
 0x188   : > { %2196 = vmatpush.msrb.mxu2 %v1430_v43  ;;  %2225 = vmatpush.msrb.mxu3 %v1431_v45  ;;  %v4778_v29 = vpop.f32.mrf.mxu0  ;;  %v4780_v32 = vpop.f32.mrf.mxu1  ;;  %v1466_v44 = vmax.f32 %v1226_v15, 0.0  ;;  %v1467_v53 = vmax.f32 %v1255_v16, 0.0  ;;  %v1432_v43 = vmax.f32 %v1165_v54, 0.0  ;;  %v1433_v45 = vmax.f32 %v1194_v3, 0.0 }
 0x189   : > { %2139 = vmatpush.msrb.mxu0 %v1396_v26  ;;  %2168 = vmatpush.msrb.mxu1 %v1397_v27  ;;  %v1434_v36 = vmax.f32 %v1223_v58, 0.0  ;;  %v1435_v17 = vmax.f32 %v1252_v18, 0.0  ;;  %v1400_v26 = vmax.f32 %v1162_v22, 0.0  ;;  %v1401_v27 = vmax.f32 %v1191_v23, 0.0 }
 0x18a   : > { %2197 = vmatpush.msrb.mxu2 %v1398_v38  ;;  %2226 = vmatpush.msrb.mxu3 %v1399_v47  ;;  %v1402_v59 = vmax.f32 %v1220_v62, 0.0  ;;  %v1403_v47 = vmax.f32 %v1249_v40, 0.0  ;;  %v1284_v22 = vadd.f32 %v4778_v29, %v4208_v61  ;;  %v1313_v23 = vadd.f32 %v4780_v32, %v4208_v61 }
 0x18b   : > { %3590 = vmatmul.msk.f32.gmra.mxu0 %vm435_vm0, %v4468_v41  ;;  %3594 = vmatmul.msk.f32.gmra.mxu1 %vm435_vm0, %v4468_v41  ;;  %v1368_v32 = vadd.f32 %v4776_v63, %v4198_v56 }
 0x18c   : > { %3598 = vmatmul.msk.f32.gmra.mxu2 %vm435_vm0, %v4468_v41  ;;  %3602 = vmatmul.msk.f32.gmra.mxu3 %vm435_vm0, %v4468_v41  ;;  %v1468_v62 = vmax.f32 %v1284_v22, 0.0  ;;  %v1469_v40 = vmax.f32 %v1313_v23, 0.0 }
 0x18f   : > { %v4790_v0 = vpop.f32.mrf.mxu2  ;;  %v4792_v35 = vpop.f32.mrf.mxu3 }
 0x190   : > { %v4794_v48 = vpop.f32.mrf.mxu0  ;;  %v4796_v33 = vpop.f32.mrf.mxu1 }
 0x193   : > { %3591 = vmatmul.msk.f32.gmra.mxu0 %vm435_vm0, %v4489_v49  ;;  %3595 = vmatmul.msk.f32.gmra.mxu1 %vm435_vm0, %v4489_v49 }
 0x194   : > { %3599 = vmatmul.msk.f32.gmra.mxu2 %vm435_vm0, %v4489_v49  ;;  %3603 = vmatmul.msk.f32.gmra.mxu3 %vm435_vm0, %v4489_v49 }
 0x197   : > { %v4806_v34 = vpop.f32.mrf.mxu2  ;;  %v4808_v37 = vpop.f32.mrf.mxu3 }
 0x198   : > { %v4810_v31 = vpop.f32.mrf.mxu0  ;;  %v4812_v60 = vpop.f32.mrf.mxu1 }
 0x19b   : > { %3592 = vmatmul.msk.f32.gmra.mxu0 %vm435_vm0, %v4513_v6  ;;  %3596 = vmatmul.msk.f32.gmra.mxu1 %vm435_vm0, %v4513_v6 }
 0x19c   : > { %3600 = vmatmul.msk.f32.gmra.mxu2 %vm435_vm0, %v4513_v6  ;;  %3604 = vmatmul.msk.f32.gmra.mxu3 %vm435_vm0, %v4513_v6 }
 0x19f   : > { %v4826_v51 = vpop.f32.mrf.mxu2  ;;  %v4828_v7 = vpop.f32.mrf.mxu3 }
 0x1a2   : > { %v4842_v24 = vpop.f32.mrf.mxu0  ;;  %v4844_v25 = vpop.f32.mrf.mxu1 }
 0x1a3   : > { %3605 = vmatmul.msk.f32.vlgmr.msra.gmra.mxu0 %vm435_vm0, %v4423_v50  ;;  %3609 = vmatmul.msk.f32.vlgmr.msra.gmra.mxu1 %vm435_vm0, %v4423_v50 }
 0x1a4   : > { %3613 = vmatmul.msk.f32.vlgmr.msra.gmra.mxu2 %vm435_vm0, %v4423_v50  ;;  %3617 = vmatmul.msk.f32.vlgmr.msra.gmra.mxu3 %vm435_vm0, %v4423_v50 }
 0x1a5   : > { %2252 = vmatpush.msra.mxu0 %v1496_v2  ;;  %2281 = vmatpush.msra.mxu1 %v1497_v39  ;;  %v1287_v2 = vadd.f32 %v4794_v48, %v4184_v46  ;;  %v1316_v39 = vadd.f32 %v4796_v33, %v4184_v46  ;;  %v1342_v48 = vadd.f32 %v4790_v0, %v4208_v61 }
 0x1a6   : > { %2310 = vmatpush.msra.mxu2 %v1498_v21  ;;  %2339 = vmatpush.msra.mxu3 %v1499_v5  ;;  %v1345_v21 = vadd.f32 %v4806_v34, %v4184_v46  ;;  %v1374_v5 = vadd.f32 %v4808_v37, %v4184_v46  ;;  %v1371_v33 = vadd.f32 %v4792_v35, %v4208_v61 }
 0x1a7   : > { %2253 = vmatpush.msra.mxu0 %v1464_v13  ;;  %2282 = vmatpush.msra.mxu1 %v1465_v14  ;;  %v1281_v34 = vadd.f32 %v4746_v8, %v4198_v56  ;;  %v1310_v46 = vadd.f32 %v4748_v9, %v4198_v56  ;;  %v1500_v29 = vmax.f32 %v1287_v2, 0.0  ;;  %v1501_v37 = vmax.f32 %v1316_v39, 0.0 }
 0x1a8   : > { %2311 = vmatpush.msra.mxu2 %v1466_v44  ;;  %2340 = vmatpush.msra.mxu3 %v1467_v53  ;;  %v1339_v61 = vadd.f32 %v4774_v20, %v4198_v56  ;;  %v1502_v0 = vmax.f32 %v1345_v21, 0.0  ;;  %v1503_v35 = vmax.f32 %v1374_v5, 0.0  ;;  %v1278_v8 = vadd.f32 %v4714_v10, %v4234_v12  ;;  %v4994_v21 = vpop.permute.xlu2 %1529  ;;  %v2601_v5 = vld [vmem:[%s5520_s6] sm:$0x3] }
 0x1a9   : > { %2254 = vmatpush.msra.mxu0 %v1432_v43  ;;  %2283 = vmatpush.msra.mxu1 %v1433_v45  ;;  %v4870_v19 = vpop.f32.mrf.mxu2  ;;  %v4872_v38 = vpop.f32.mrf.mxu3  ;;  %v1307_v9 = vadd.f32 %v4716_v11, %v4234_v12  ;;  %v1336_v56 = vadd.f32 %v4730_v52, %v4234_v12  ;;  %v1365_v20 = vadd.f32 %v4732_v55, %v4234_v12  ;;  %v1470_v63 = vmax.f32 %v1342_v48, 0.0 }
 0x1aa   : > { %2312 = vmatpush.msra.mxu2 %v1434_v36  ;;  %2341 = vmatpush.msra.mxu3 %v1435_v17  ;;  %v4874_v4 = vpop.f32.mrf.mxu0  ;;  %v4876_v28 = vpop.f32.mrf.mxu1  ;;  %v1471_v44 = vmax.f32 %v1371_v33, 0.0  ;;  %v1436_v53 = vmax.f32 %v1281_v34, 0.0  ;;  %v1437_v43 = vmax.f32 %v1310_v46, 0.0  ;;  %v1438_v10 = vmax.f32 %v1339_v61, 0.0 }
 0x1ab   : > { %2255 = vmatpush.msra.mxu0 %v1400_v26  ;;  %2284 = vmatpush.msra.mxu1 %v1401_v27  ;;  %v1439_v11 = vmax.f32 %v1368_v32, 0.0  ;;  %v1404_v45 = vmax.f32 %v1278_v8, 0.0  ;;  %v1405_v36 = vmax.f32 %v1307_v9, 0.0  ;;  %v1406_v12 = vmax.f32 %v1336_v56, 0.0 }
 0x1ac   : > { %2313 = vmatpush.msra.mxu2 %v1402_v59  ;;  %2342 = vmatpush.msra.mxu3 %v1403_v47  ;;  %v1407_v55 = vmax.f32 %v1365_v20, 0.0 }
 0x1ad   : > { %3606 = vmatmul.msk.f32.gmra.mxu0 %vm435_vm0, %v4468_v41  ;;  %3610 = vmatmul.msk.f32.gmra.mxu1 %vm435_vm0, %v4468_v41 }
 0x1ae   : > { %3614 = vmatmul.msk.f32.gmra.mxu2 %vm435_vm0, %v4468_v41  ;;  %3618 = vmatmul.msk.f32.gmra.mxu3 %vm435_vm0, %v4468_v41 }
 0x1af   : > { %2604 = vperm.xlu2 %3716, %v2601_v5  }
 0x1b0   : > { %v5019_v34 = vpop.permute.xlu2 %1524 }
 0x1b1   : > { %v4886_v30 = vpop.f32.mrf.mxu2  ;;  %v4888_v42 = vpop.f32.mrf.mxu3  ;;  %v1568_v8 = vadd.f32 %v4874_v4, %v5019_v34 }
 0x1b2   : > { %v4890_v1 = vpop.f32.mrf.mxu0  ;;  %v4892_v57 = vpop.f32.mrf.mxu1  ;;  %v1655_v9 = vadd.f32 %v4888_v42, %v5019_v34 }
 0x1b3   : > { %v1571_v46 = vadd.f32 %v4890_v1, %v4994_v21  ;;  %v1597_v1 = vadd.f32 %v4876_v28, %v5019_v34  ;;  %v5055_v28 = vpop.permute.xlu1 %1514 }
 0x1b5   : > { %3607 = vmatmul.msk.f32.gmra.mxu0 %vm435_vm0, %v4489_v49  ;;  %3611 = vmatmul.msk.f32.gmra.mxu1 %vm435_vm0, %v4489_v49  ;;  %v2568_v4 = vmax.f32 %v1571_v46, 0.0 }
 0x1b6   : > { %3615 = vmatmul.msk.f32.gmra.mxu2 %vm435_vm0, %v4489_v49  ;;  %3619 = vmatmul.msk.f32.gmra.mxu3 %vm435_vm0, %v4489_v49 }
 0x1b9   : > { %v4902_v15 = vpop.f32.mrf.mxu2  ;;  %v4904_v16 = vpop.f32.mrf.mxu3 }
 0x1ba   : > { %v4906_v54 = vpop.f32.mrf.mxu0  ;;  %v4908_v3 = vpop.f32.mrf.mxu1  ;;  %v1629_v32 = vadd.f32 %v4902_v15, %v4994_v21 }
 0x1bd   : > { %3608 = vmatmul.msk.f32.gmra.mxu0 %vm435_vm0, %v4513_v6  ;;  %3612 = vmatmul.msk.f32.gmra.mxu1 %vm435_vm0, %v4513_v6 }
 0x1be   : > { %3616 = vmatmul.msk.f32.gmra.mxu2 %vm435_vm0, %v4513_v6  ;;  %3620 = vmatmul.msk.f32.gmra.mxu3 %vm435_vm0, %v4513_v6 }
 0x1c1   : > { %v4922_v58 = vpop.f32.mrf.mxu2  ;;  %v4924_v18 = vpop.f32.mrf.mxu3 }
 0x1c4   : > { %v4938_v13 = vpop.f32.mrf.mxu0  ;;  %v4940_v14 = vpop.f32.mrf.mxu1 }
 0x1c5   : > { %3621 = vmatmul.msk.f32.vlgmr.msrb.gmra.mxu0 %vm435_vm0, %v4423_v50  ;;  %3625 = vmatmul.msk.f32.vlgmr.msrb.gmra.mxu1 %vm435_vm0, %v4423_v50 }
 0x1c6   : > { %3629 = vmatmul.msk.f32.vlgmr.msrb.gmra.mxu2 %vm435_vm0, %v4423_v50  ;;  %3633 = vmatmul.msk.f32.vlgmr.msrb.gmra.mxu3 %vm435_vm0, %v4423_v50 }
 0x1c7   : > { %2368 = vmatpush.msrb.mxu0 %v1500_v29  ;;  %2397 = vmatpush.msrb.mxu1 %v1501_v37  ;;  %v1600_v29 = vadd.f32 %v4892_v57, %v4994_v21  ;;  %v1626_v57 = vadd.f32 %v4886_v30, %v5019_v34 }
 0x1c8   : > { %2426 = vmatpush.msrb.mxu2 %v1502_v0  ;;  %2455 = vmatpush.msrb.mxu3 %v1503_v35  ;;  %v1658_v0 = vadd.f32 %v4904_v16, %v4994_v21  ;;  %v5033_v35 = vpop.permute.xlu0 %1519 }
 0x1c9   : > { %2369 = vmatpush.msrb.mxu0 %v1468_v62  ;;  %2398 = vmatpush.msrb.mxu1 %v1469_v40  ;;  %v1565_v16 = vadd.f32 %v4842_v24, %v5033_v35  ;;  %v1594_v40 = vadd.f32 %v4844_v25, %v5033_v35  ;;  %v2569_v56 = vmax.f32 %v1600_v29, 0.0  ;;  %v1623_v30 = vadd.f32 %v4870_v19, %v5033_v35  ;;  %v5064_v25 = vld [vmem:[%s5517_s3] sm:$0xff] }
 0x1ca   : > { %2427 = vmatpush.msrb.mxu2 %v1470_v63  ;;  %2456 = vmatpush.msrb.mxu3 %v1471_v44  ;;  %v1652_v42 = vadd.f32 %v4872_v38, %v5033_v35  ;;  %v2570_v24 = vmax.f32 %v1629_v32, 0.0  ;;  %v2571_v20 = vmax.f32 %v1658_v0, 0.0  ;;  %v1591_v19 = vadd.f32 %v4812_v60, %v5055_v28 }
 0x1cb   : > { %2370 = vmatpush.msrb.mxu0 %v1436_v53  ;;  %2399 = vmatpush.msrb.mxu1 %v1437_v43  ;;  %v4966_v52 = vpop.f32.mrf.mxu2  ;;  %v4968_v17 = vpop.f32.mrf.mxu3  ;;  %v2536_v38 = vmax.f32 %v1568_v8, 0.0  ;;  %v2537_v63 = vmax.f32 %v1597_v1, 0.0  ;;  %v1620_v44 = vadd.f32 %v4826_v51, %v5055_v28  ;;  %v1649_v53 = vadd.f32 %v4828_v7, %v5055_v28 }
 0x1cc   : > { %2428 = vmatpush.msrb.mxu2 %v1438_v10  ;;  %2457 = vmatpush.msrb.mxu3 %v1439_v11  ;;  %v4970_v26 = vpop.f32.mrf.mxu0  ;;  %v4972_v27 = vpop.f32.mrf.mxu1  ;;  %v2538_v43 = vmax.f32 %v1626_v57, 0.0  ;;  %v2539_v10 = vmax.f32 %v1655_v9, 0.0  ;;  %v2504_v11 = vmax.f32 %v1565_v16, 0.0  ;;  %v2507_v60 = vmax.f32 %v1652_v42, 0.0 }
 0x1cd   : > { %2371 = vmatpush.msrb.mxu0 %v1404_v45  ;;  %2400 = vmatpush.msrb.mxu1 %v1405_v36  ;;  %v2505_v45 = vmax.f32 %v1594_v40, 0.0  ;;  %v2474_v7 = vmax.f32 %v1620_v44, 0.0  ;;  %v2475_v5 = vmax.f32 %v1649_v53, 0.0 }
 0x1ce   : > { %2429 = vmatpush.msrb.mxu2 %v1406_v12  ;;  %2458 = vmatpush.msrb.mxu3 %v1407_v55  ;;  %v2473_v12 = vmax.f32 %v1591_v19, 0.0 }
 0x1cf   : > { %3622 = vmatmul.msk.f32.gmra.mxu0 %vm435_vm0, %v4468_v41  ;;  %3626 = vmatmul.msk.f32.gmra.mxu1 %vm435_vm0, %v4468_v41 }
 0x1d0   : > { %3630 = vmatmul.msk.f32.gmra.mxu2 %vm435_vm0, %v4468_v41  ;;  %3634 = vmatmul.msk.f32.gmra.mxu3 %vm435_vm0, %v4468_v41 }
 0x1d3   : > { %v4982_v59 = vpop.f32.mrf.mxu2  ;;  %v4984_v47 = vpop.f32.mrf.mxu3 }
 0x1d4   : > { %v4986_v2 = vpop.f32.mrf.mxu0  ;;  %v4988_v39 = vpop.f32.mrf.mxu1 }
 0x1d5   : > { %v1716_v40 = vadd.f32 %v4988_v39, %v4994_v21  ;;  %v1771_v39 = vadd.f32 %v4984_v47, %v5019_v34 }
 0x1d7   : > { %3623 = vmatmul.msk.f32.gmra.mxu0 %vm435_vm0, %v4489_v49  ;;  %3627 = vmatmul.msk.f32.gmra.mxu1 %vm435_vm0, %v4489_v49  ;;  %v2573_v19 = vmax.f32 %v1716_v40, 0.0 }
 0x1d8   : > { %3631 = vmatmul.msk.f32.gmra.mxu2 %vm435_vm0, %v4489_v49  ;;  %3635 = vmatmul.msk.f32.gmra.mxu3 %vm435_vm0, %v4489_v49 }
 0x1db   : > { %v5003_v22 = vpop.f32.mrf.mxu2  ;;  %v5005_v23 = vpop.f32.mrf.mxu3 }
 0x1dc   : > { %v5007_v48 = vpop.f32.mrf.mxu0  ;;  %v5009_v33 = vpop.f32.mrf.mxu1  ;;  %v1774_v42 = vadd.f32 %v5005_v23, %v4994_v21  ;;  %v1710_v23 = vadd.f32 %v4940_v14, %v5033_v35  ;;  %v1707_v14 = vadd.f32 %v4908_v3, %v5055_v28 }
 0x1df   : > { %3624 = vmatmul.msk.f32.gmra.mxu0 %vm435_vm0, %v4513_v6  ;;  %3628 = vmatmul.msk.f32.gmra.mxu1 %vm435_vm0, %v4513_v6 }
 0x1e0   : > { %3632 = vmatmul.msk.f32.gmra.mxu2 %vm435_vm0, %v4513_v6  ;;  %3636 = vmatmul.msk.f32.gmra.mxu3 %vm435_vm0, %v4513_v6 }
 0x1e3   : > { %v5025_v37 = vpop.f32.mrf.mxu2  ;;  %v5027_v61 = vpop.f32.mrf.mxu3 }
 0x1e6   : > { %v5043_v62 = vpop.f32.mrf.mxu0  ;;  %v5045_v15 = vpop.f32.mrf.mxu1 }
 0x1e7   : > { %3637 = vmatmul.msk.f32.vlgmr.msra.gmra.mxu0 %vm435_vm0, %v4423_v50  ;;  %3641 = vmatmul.msk.f32.vlgmr.msra.gmra.mxu1 %vm435_vm0, %v4423_v50  ;;  %v1562_v50 = vadd.f32 %v4810_v31, %v5055_v28  ;;  %v2506_v31 = vmax.f32 %v1623_v30, 0.0  ;;  %v1745_v30 = vadd.f32 %v5003_v22, %v4994_v21  ;;  %v1681_v22 = vadd.f32 %v4938_v13, %v5033_v35 }
 0x1e8   : > { %3645 = vmatmul.msk.f32.vlgmr.msra.gmra.mxu2 %vm435_vm0, %v5064_v25  ;;  %3649 = vmatmul.msk.f32.vlgmr.msra.gmra.mxu3 %vm435_vm0, %v5064_v25  ;;  %v1678_v13 = vadd.f32 %v4906_v54, %v5055_v28 }
 0x1e9   : > { %2622 = vmatpush.msra.mxu0 %v2568_v4  ;;  %2642 = vmatpush.msra.mxu1 %v2569_v56  ;;  %v2472_v36 = vmax.f32 %v1562_v50, 0.0  ;;  %v2574_v47 = vmax.f32 %v1745_v30, 0.0 }
 0x1ea   : > { %2662 = vmatpush.msra.mxu2 %v2570_v24  ;;  %2682 = vmatpush.msra.mxu3 %v2571_v20  ;;  %v1684_v24 = vadd.f32 %v4970_v26, %v5019_v34 }
 0x1eb   : > { %2623 = vmatpush.msra.mxu0 %v2536_v38  ;;  %2643 = vmatpush.msra.mxu1 %v2537_v63  ;;  %v2575_v38 = vmax.f32 %v1774_v42, 0.0  ;;  %v3719_v42 = vld [vmem:[%s5517_s3 + $0x10] sm:$0xff] }
 0x1ec   : > { %2663 = vmatpush.msra.mxu2 %v2538_v43  ;;  %2683 = vmatpush.msra.mxu3 %v2539_v10  ;;  %v2540_v63 = vmax.f32 %v1684_v24, 0.0  ;;  %v2543_v43 = vmax.f32 %v1771_v39, 0.0  ;;  %v2509_v10 = vmax.f32 %v1710_v23, 0.0 }
 0x1ed   : > { %2624 = vmatpush.msra.mxu0 %v2504_v11  ;;  %2644 = vmatpush.msra.mxu1 %v2505_v45  ;;  %v5078_v51 = vpop.f32.mrf.mxu2  ;;  %v5080_v55 = vpop.f32.mrf.mxu3  ;;  %v2476_v11 = vmax.f32 %v1678_v13, 0.0  ;;  %v2477_v45 = vmax.f32 %v1707_v14, 0.0 }
 0x1ee   : > { %2664 = vmatpush.msra.mxu2 %v2506_v31  ;;  %2684 = vmatpush.msra.mxu3 %v2507_v60  ;;  %v5082_v46 = vpop.f32.mrf.mxu0  ;;  %v5084_v29 = vpop.f32.mrf.mxu1 }
 0x1ef   : > { %2625 = vmatpush.msra.mxu0 %v2472_v36  ;;  %2645 = vmatpush.msra.mxu1 %v2473_v12 }
 0x1f0   : > { %2665 = vmatpush.msra.mxu2 %v2474_v7  ;;  %2685 = vmatpush.msra.mxu3 %v2475_v5  ;;  %v3718_v7 = vld [vmem:[%s5517_s3 + $0x8] sm:$0xff] }
 0x1f1   : > { %3638 = vmatmul.msk.f32.gmra.mxu0 %vm435_vm0, %v4468_v41  ;;  %3642 = vmatmul.msk.f32.gmra.mxu1 %vm435_vm0, %v4468_v41 }
 0x1f2   : > { %3646 = vmatmul.msk.f32.gmra.mxu2 %vm435_vm0, %v4468_v41  ;;  %3650 = vmatmul.msk.f32.gmra.mxu3 %vm435_vm0, %v4468_v41 }
 0x1f5   : > { %v5094_v32 = vpop.f32.mrf.mxu2  ;;  %v5096_v0 = vpop.f32.mrf.mxu3 }
 0x1f6   : > { %v5098_v8 = vpop.f32.mrf.mxu0  ;;  %v5100_v1 = vpop.f32.mrf.mxu1  ;;  %v1858_v13 = vadd.f32 %v5094_v32, %v5019_v34  ;;  %v1884_v32 = vadd.f32 %v5080_v55, %v5033_v35  ;;  %v1881_v55 = vadd.f32 %v5027_v61, %v5055_v28 }
 0x1f7   : > { %v1803_v23 = vadd.f32 %v5098_v8, %v4994_v21  ;;  %v1800_v8 = vadd.f32 %v5082_v46, %v5019_v34 }
 0x1f9   : > { %3639 = vmatmul.msk.f32.gmra.mxu0 %vm435_vm0, %v4489_v49  ;;  %3643 = vmatmul.msk.f32.gmra.mxu1 %vm435_vm0, %v4489_v49  ;;  %v2576_v46 = vmax.f32 %v1803_v23, 0.0 }
 0x1fa   : > { %3647 = vmatmul.msk.f32.gmra.mxu2 %vm435_vm0, %v4489_v49  ;;  %3651 = vmatmul.msk.f32.gmra.mxu3 %vm435_vm0, %v4489_v49  ;;  %v1687_v49 = vadd.f32 %v4986_v2, %v4994_v21  ;;  %v1742_v2 = vadd.f32 %v4982_v59, %v5019_v34  ;;  %v1768_v59 = vadd.f32 %v4968_v17, %v5033_v35 }
 0x1fb   : > { %v1765_v17 = vadd.f32 %v4924_v18, %v5055_v28 }
 0x1fc   : > { %v2572_v26 = vmax.f32 %v1687_v49, 0.0  ;;  %v2542_v53 = vmax.f32 %v1742_v2, 0.0  ;;  %v2511_v3 = vmax.f32 %v1768_v59, 0.0 }
 0x1fd   : > { %v5110_v41 = vpop.f32.mrf.mxu2  ;;  %v5112_v57 = vpop.f32.mrf.mxu3  ;;  %v2479_v60 = vmax.f32 %v1765_v17, 0.0 }
 0x1fe   : > { %v5114_v9 = vpop.f32.mrf.mxu0  ;;  %v5116_v16 = vpop.f32.mrf.mxu1  ;;  %v1861_v59 = vadd.f32 %v5110_v41, %v4994_v21  ;;  %v1887_v41 = vadd.f32 %v5096_v0, %v5019_v34 }
 0x200   : > { %v2578_v0 = vmax.f32 %v1861_v59, 0.0 }
 0x201   : > { %3640 = vmatmul.msk.f32.gmra.mxu0 %vm435_vm0, %v4513_v6  ;;  %3644 = vmatmul.msk.f32.gmra.mxu1 %vm435_vm0, %v4513_v6 }
 0x202   : > { %3648 = vmatmul.msk.f32.gmra.mxu2 %vm435_vm0, %v4513_v6  ;;  %3652 = vmatmul.msk.f32.gmra.mxu3 %vm435_vm0, %v4513_v6  ;;  %v1713_v6 = vadd.f32 %v4972_v27, %v5019_v34  ;;  %v1739_v27 = vadd.f32 %v4966_v52, %v5033_v35  ;;  %v1736_v52 = vadd.f32 %v4922_v58, %v5055_v28 }
 0x204   : > { %v2541_v44 = vmax.f32 %v1713_v6, 0.0  ;;  %v2510_v54 = vmax.f32 %v1739_v27, 0.0  ;;  %v2478_v18 = vmax.f32 %v1736_v52, 0.0 }
 0x205   : > { %v5130_v4 = vpop.f32.mrf.mxu2  ;;  %v5132_v56 = vpop.f32.mrf.mxu3 }
 0x208   : > { %v5146_v20 = vpop.f32.mrf.mxu0  ;;  %v5148_v50 = vpop.f32.mrf.mxu1 }
 0x209   : > { %3653 = vmatmul.msk.f32.vlgmr.msrb.gmra.mxu0 %vm435_vm0, %v5064_v25  ;;  %3657 = vmatmul.msk.f32.vlgmr.msrb.gmra.mxu1 %vm435_vm0, %v5064_v25 }
 0x20a   : > { %3661 = vmatmul.msk.f32.vlgmr.msrb.gmra.mxu2 %vm435_vm0, %v5064_v25  ;;  %3665 = vmatmul.msk.f32.vlgmr.msrb.gmra.mxu3 %vm435_vm0, %v5064_v25  ;;  %v2508_v25 = vmax.f32 %v1681_v22, 0.0  ;;  %v3720_v22 = vld [vmem:[%s5517_s3 + $0x18] sm:$0xff] }
 0x20b   : > { %2702 = vmatpush.msrb.mxu0 %v2572_v26  ;;  %2722 = vmatpush.msrb.mxu1 %v2573_v19  ;;  %v1832_v26 = vadd.f32 %v5100_v1, %v4994_v21  ;;  %v1829_v1 = vadd.f32 %v5084_v29, %v5019_v34  ;;  %v1855_v29 = vadd.f32 %v5078_v51, %v5033_v35 }
 0x20c   : > { %2742 = vmatpush.msrb.mxu2 %v2574_v47  ;;  %2762 = vmatpush.msrb.mxu3 %v2575_v38  ;;  %v1890_v47 = vadd.f32 %v5112_v57, %v4994_v21  ;;  %v5232_v38 = vld [vmem:[%s5519_s5] sm:$0x3]  ;;  %v1852_v51 = vadd.f32 %v5025_v37, %v5055_v28 }
 0x20d   : > { %2703 = vmatpush.msrb.mxu0 %v2540_v63  ;;  %2723 = vmatpush.msrb.mxu1 %v2541_v44  ;;  %v1797_v63 = vadd.f32 %v5043_v62, %v5033_v35  ;;  %v1826_v44 = vadd.f32 %v5045_v15, %v5033_v35  ;;  %v2577_v52 = vmax.f32 %v1832_v26, 0.0  ;;  %v1794_v62 = vadd.f32 %v5007_v48, %v5055_v28 }
 0x20e   : > { %2743 = vmatpush.msrb.mxu2 %v2542_v53  ;;  %2763 = vmatpush.msrb.mxu3 %v2543_v43  ;;  %v2579_v17 = vmax.f32 %v1890_v47, 0.0  ;;  %v1823_v15 = vadd.f32 %v5009_v33, %v5055_v28  ;;  %v2544_v53 = vmax.f32 %v1800_v8, 0.0  ;;  %v2545_v43 = vmax.f32 %v1829_v1, 0.0 }
 0x20f   : > { %2704 = vmatpush.msrb.mxu0 %v2508_v25  ;;  %2724 = vmatpush.msrb.mxu1 %v2509_v10  ;;  %v5174_v58 = vpop.f32.mrf.mxu2  ;;  %v5176_v31 = vpop.f32.mrf.mxu3  ;;  %v2546_v25 = vmax.f32 %v1858_v13, 0.0  ;;  %v2547_v10 = vmax.f32 %v1887_v41, 0.0  ;;  %v2514_v33 = vmax.f32 %v1855_v29, 0.0 }
 0x210   : > { %2744 = vmatpush.msrb.mxu2 %v2510_v54  ;;  %2764 = vmatpush.msrb.mxu3 %v2511_v3  ;;  %v5178_v36 = vpop.f32.mrf.mxu0  ;;  %v5180_v12 = vpop.f32.mrf.mxu1  ;;  %v2512_v54 = vmax.f32 %v1797_v63, 0.0  ;;  %v2513_v3 = vmax.f32 %v1826_v44, 0.0 }
 0x211   : > { %2705 = vmatpush.msrb.mxu0 %v2476_v11  ;;  %2725 = vmatpush.msrb.mxu1 %v2477_v45  ;;  %v2515_v11 = vmax.f32 %v1884_v32, 0.0  ;;  %v2480_v45 = vmax.f32 %v1794_v62, 0.0  ;;  %v1945_v59 = vadd.f32 %v5180_v12, %v5019_v34  ;;  %v1942_v12 = vadd.f32 %v5148_v50, %v5033_v35 }
 0x212   : > { %2745 = vmatpush.msrb.mxu2 %v2478_v18  ;;  %2765 = vmatpush.msrb.mxu3 %v2479_v60  ;;  %v2481_v18 = vmax.f32 %v1823_v15, 0.0 }
 0x213   : > { %3654 = vmatmul.msk.f32.gmra.mxu0 %vm435_vm0, %v3718_v7  ;;  %3658 = vmatmul.msk.f32.gmra.mxu1 %vm435_vm0, %v3718_v7  ;;  %v2549_v41 = vmax.f32 %v1945_v59, 0.0 }
 0x214   : > { %3662 = vmatmul.msk.f32.gmra.mxu2 %vm435_vm0, %v3718_v7  ;;  %3666 = vmatmul.msk.f32.gmra.mxu3 %vm435_vm0, %v3718_v7  ;;  %v2482_v7 = vmax.f32 %v1852_v51, 0.0 }
 0x217   : > { %v5189_v5 = vpop.f32.mrf.mxu2  ;;  %v5191_v49 = vpop.f32.mrf.mxu3 }
 0x218   : > { %v1918_v40 = vpop.f32.mrf.mxu0  ;;  %v5193_v30 = vpop.f32.mrf.mxu1  ;;  %v1974_v8 = vadd.f32 %v5189_v5, %v5019_v34  ;;  %v1971_v5 = vadd.f32 %v5174_v58, %v5033_v35  ;;  %v1968_v58 = vadd.f32 %v5130_v4, %v5055_v28 }
 0x219   : > { %v1919_v48 = vadd.f32 %v1918_v40, %v4994_v21  ;;  %v1948_v37 = vadd.f32 %v5193_v30, %v4994_v21  ;;  %v1916_v30 = vadd.f32 %v5178_v36, %v5019_v34  ;;  %v1913_v36 = vadd.f32 %v5146_v20, %v5033_v35 }
 0x21a   : > { %v1939_v20 = vadd.f32 %v5116_v16, %v5055_v28  ;;  %v2550_v63 = vmax.f32 %v1974_v8, 0.0 }
 0x21b   : > { %3655 = vmatmul.msk.f32.gmra.mxu0 %vm435_vm0, %v3719_v42  ;;  %3659 = vmatmul.msk.f32.gmra.mxu1 %vm435_vm0, %v3719_v42  ;;  %v2580_v47 = vmax.f32 %v1919_v48, 0.0  ;;  %v2581_v1 = vmax.f32 %v1948_v37, 0.0  ;;  %v2548_v50 = vmax.f32 %v1916_v30, 0.0 }
 0x21c   : > { %3663 = vmatmul.msk.f32.gmra.mxu2 %vm435_vm0, %v3719_v42  ;;  %3667 = vmatmul.msk.f32.gmra.mxu3 %vm435_vm0, %v3719_v42  ;;  %v2483_v42 = vmax.f32 %v1881_v55, 0.0  ;;  %v2486_v55 = vmax.f32 %v1968_v58, 0.0 }
 0x21f   : > { %v5202_v24 = vpop.f32.mrf.mxu2  ;;  %v5204_v6 = vpop.f32.mrf.mxu3 }
 0x220   : > { %v5206_v2 = vpop.f32.mrf.mxu0  ;;  %v5208_v39 = vpop.f32.mrf.mxu1  ;;  %v1977_v40 = vadd.f32 %v5202_v24, %v4994_v21  ;;  %v2003_v24 = vadd.f32 %v5191_v49, %v5019_v34  ;;  %v2000_v49 = vadd.f32 %v5176_v31, %v5033_v35  ;;  %v1997_v31 = vadd.f32 %v5132_v56, %v5055_v28 }
 0x221   : > { %v2485_v56 = vmax.f32 %v1939_v20, 0.0 }
 0x222   : > { %v2551_v44 = vmax.f32 %v2003_v24, 0.0 }
 0x223   : > { %3656 = vmatmul.msk.f32.gmra.mxu0 %vm435_vm0, %v3720_v22  ;;  %3660 = vmatmul.msk.f32.gmra.mxu1 %vm435_vm0, %v3720_v22 }
 0x224   : > { %3664 = vmatmul.msk.f32.gmra.mxu2 %vm435_vm0, %v3720_v22  ;;  %3668 = vmatmul.msk.f32.gmra.mxu3 %vm435_vm0, %v3720_v22  ;;  %v2006_v22 = vadd.f32 %v5204_v6, %v4994_v21  ;;  %v1910_v6 = vadd.f32 %v5114_v9, %v5055_v28  ;;  %v2582_v9 = vmax.f32 %v1977_v40, 0.0  ;;  %v2055_v40 = vadd.f32 %v5208_v39, %v5055_v28 }
 0x226   : > { %v2583_v13 = vmax.f32 %v2006_v22, 0.0  ;;  %v2484_v32 = vmax.f32 %v1910_v6, 0.0  ;;  %v2489_v24 = vmax.f32 %v2055_v40, 0.0 }
 0x227   : > { %v5221_v19 = vpop.f32.mrf.mxu2  ;;  %v5223_v27 = vpop.f32.mrf.mxu3 }
 0x228   : > { %v2084_v6 = vadd.f32 %v5221_v19, %v5055_v28 }
 0x22a   : > { %v5242_v14 = vpop.f32.mrf.mxu0  ;;  %v5244_v57 = vpop.f32.mrf.mxu1  ;;  %v2490_v19 = vmax.f32 %v2084_v6, 0.0 }
 0x22b   : > { %3669 = vmatmul.msk.f32.vlgmr.msra.gmra.mxu0 %vm435_vm0, %v5232_v38  ;;  %3670 = vmatmul.msk.f32.vlgmr.msra.gmra.mxu1 %vm435_vm0, %v5232_v38  ;;  %v2058_v48 = vadd.f32 %v5244_v57, %v5033_v35 }
 0x22c   : > { %3671 = vmatmul.msk.f32.vlgmr.msra.gmra.mxu2 %vm435_vm0, %v5232_v38  ;;  %3672 = vmatmul.msk.f32.vlgmr.msra.gmra.mxu3 %vm435_vm0, %v5232_v38 }
 0x22d   : > { %2782 = vmatpush.msra.mxu0 %v2576_v46  ;;  %2802 = vmatpush.msra.mxu1 %v2577_v52  ;;  %v2516_v46 = vmax.f32 %v1913_v36, 0.0  ;;  %v2517_v52 = vmax.f32 %v1942_v12, 0.0  ;;  %v2113_v36 = vadd.f32 %v5223_v27, %v5055_v28 }
 0x22e   : > { %2822 = vmatpush.msra.mxu2 %v2578_v0  ;;  %2842 = vmatpush.msra.mxu3 %v2579_v17  ;;  %v2518_v0 = vmax.f32 %v1971_v5, 0.0  ;;  %v2519_v17 = vmax.f32 %v2000_v49, 0.0 }
 0x22f   : > { %2783 = vmatpush.msra.mxu0 %v2544_v53  ;;  %2803 = vmatpush.msra.mxu1 %v2545_v43 }
 0x230   : > { %2823 = vmatpush.msra.mxu2 %v2546_v25  ;;  %2843 = vmatpush.msra.mxu3 %v2547_v10  ;;  %v2487_v25 = vmax.f32 %v1997_v31, 0.0 }
 0x231   : > { %2784 = vmatpush.msra.mxu0 %v2512_v54  ;;  %2804 = vmatpush.msra.mxu1 %v2513_v3  ;;  %v5273_v61 = vpop.f32.mrf.mxu2  ;;  %v5275_v60 = vpop.f32.mrf.mxu3  ;;  %v2029_v3 = vadd.f32 %v5242_v14, %v5033_v35 }
 0x232   : > { %2824 = vmatpush.msra.mxu2 %v2514_v33  ;;  %2844 = vmatpush.msra.mxu3 %v2515_v11  ;;  %v2031_v23 = vpop.f32.mrf.mxu0  ;;  %v2060_v26 = vpop.f32.mrf.mxu1  ;;  %v2087_v8 = vadd.f32 %v5273_v61, %v5033_v35 }
 0x233   : > { %2785 = vmatpush.msra.mxu0 %v2480_v45  ;;  %2805 = vmatpush.msra.mxu1 %v2481_v18  ;;  %v2032_v4 = vadd.f32 %v2031_v23, %v5019_v34  ;;  %v2061_v53 = vadd.f32 %v2060_v26, %v5019_v34  ;;  %v2520_v22 = vmax.f32 %v2029_v3, 0.0  ;;  %v2521_v23 = vmax.f32 %v2058_v48, 0.0 }
 0x234   : > { %2825 = vmatpush.msra.mxu2 %v2482_v7  ;;  %2845 = vmatpush.msra.mxu3 %v2483_v42  ;;  %v2026_v42 = vadd.f32 %v5206_v2, %v5055_v28  ;;  %v2116_v2 = vadd.f32 %v5275_v60, %v5033_v35  ;;  %v2522_v5 = vmax.f32 %v2087_v8, 0.0 }
 0x235   : > { %3673 = vmatmul.msk.f32.vlgmr.msrb.gmra.mxu0 %vm435_vm0, %v5232_v38  ;;  %3674 = vmatmul.msk.f32.vlgmr.msrb.gmra.mxu1 %vm435_vm0, %v5232_v38  ;;  %v2552_v33 = vmax.f32 %v2032_v4, 0.0  ;;  %v2553_v11 = vmax.f32 %v2061_v53, 0.0 }
 0x236   : > { %3675 = vmatmul.msk.f32.vlgmr.msrb.gmra.mxu2 %vm435_vm0, %v5232_v38  ;;  %3676 = vmatmul.msk.f32.vlgmr.msrb.gmra.mxu3 %vm435_vm0, %v5232_v38  ;;  %v2488_v39 = vmax.f32 %v2026_v42, 0.0  ;;  %v2523_v49 = vmax.f32 %v2116_v2, 0.0 }
 0x237   : > { %2862 = vmatpush.msrb.mxu0 %v2580_v47  ;;  %2882 = vmatpush.msrb.mxu1 %v2581_v1 }
 0x238   : > { %2902 = vmatpush.msrb.mxu2 %v2582_v9  ;;  %2922 = vmatpush.msrb.mxu3 %v2583_v13  ;;  %v2491_v9 = vmax.f32 %v2113_v36, 0.0 }
 0x239   : > { %2863 = vmatpush.msrb.mxu0 %v2548_v50  ;;  %2883 = vmatpush.msrb.mxu1 %v2549_v41  ;;  %v2089_v29 = vpop.f32.mrf.mxu2  ;;  %v2118_v16 = vpop.f32.mrf.mxu3 }
 0x23a   : > { %2903 = vmatpush.msrb.mxu2 %v2550_v63  ;;  %2923 = vmatpush.msrb.mxu3 %v2551_v44  ;;  %v2034_v62 = vpop.f32.mrf.mxu0  ;;  %v2063_v15 = vpop.f32.mrf.mxu1  ;;  %v2090_v26 = vadd.f32 %v2089_v29, %v5019_v34  ;;  %v2119_v30 = vadd.f32 %v2118_v16, %v5019_v34 }
 0x23b   : > { %2864 = vmatpush.msrb.mxu0 %v2516_v46  ;;  %2884 = vmatpush.msrb.mxu1 %v2517_v52  ;;  %v2035_v43 = vadd.f32 %v2034_v62, %v4994_v21  ;;  %v2064_v51 = vadd.f32 %v2063_v15, %v4994_v21 }
 0x23c   : > { %2904 = vmatpush.msrb.mxu2 %v2518_v0  ;;  %2924 = vmatpush.msrb.mxu3 %v2519_v17  ;;  %v2554_v61 = vmax.f32 %v2090_v26, 0.0  ;;  %v2555_v12 = vmax.f32 %v2119_v30, 0.0 }
 0x23d   : > { %2865 = vmatpush.msrb.mxu0 %v2484_v32  ;;  %2885 = vmatpush.msrb.mxu1 %v2485_v56  ;;  %v2584_v10 = vmax.f32 %v2035_v43, 0.0  ;;  %v2585_v54 = vmax.f32 %v2064_v51, 0.0 }
 0x23e   : > { %2905 = vmatpush.msrb.mxu2 %v2486_v55  ;;  %2925 = vmatpush.msrb.mxu3 %v2487_v25 }
 0x23f   : > { %3677 = vmatmul.msk.f32.vlgmr.msra.gmra.mxu0 %vm435_vm0, %v5232_v38  ;;  %3678 = vmatmul.msk.f32.vlgmr.msra.gmra.mxu1 %vm435_vm0, %v5232_v38 }
 0x240   : > { %3679 = vmatmul.msk.f32.vlgmr.msra.gmra.mxu2 %vm435_vm0, %v5232_v38  ;;  %3680 = vmatmul.msk.f32.vlgmr.msra.gmra.mxu3 %vm435_vm0, %v5232_v38 }
 0x241   : > { %2942 = vmatpush.msra.mxu0 %v2584_v10  ;;  %2962 = vmatpush.msra.mxu1 %v2585_v54  ;;  %v2092_v14 = vpop.f32.mrf.mxu2  ;;  %v2121_v45 = vpop.f32.mrf.mxu3 }
 0x242   : > { %v2093_v57 = vadd.f32 %v2092_v14, %v4994_v21  ;;  %v2122_v18 = vadd.f32 %v2121_v45, %v4994_v21  ;;  %v5331_v37 = vpop.f32.mrf.mxu0  ;;  %v5333_v7 = vpop.f32.mrf.mxu1 }
 0x243   : > { %2943 = vmatpush.msra.mxu0 %v2552_v33  ;;  %2963 = vmatpush.msra.mxu1 %v2553_v11  ;;  %v2142_v53 = vadd.f32 %v5331_v37, %v5055_v28  ;;  %v2171_v43 = vadd.f32 %v5333_v7, %v5055_v28 }
 0x244   : > { %v2586_v59 = vmax.f32 %v2093_v57, 0.0  ;;  %v2587_v47 = vmax.f32 %v2122_v18, 0.0 }
 0x245   : > { %2944 = vmatpush.msra.mxu0 %v2520_v22  ;;  %2964 = vmatpush.msra.mxu1 %v2521_v23  ;;  %v2492_v45 = vmax.f32 %v2142_v53, 0.0  ;;  %v2493_v57 = vmax.f32 %v2171_v43, 0.0 }
 0x246   : > { %2982 = vmatpush.msra.mxu2 %v2586_v59  ;;  %3002 = vmatpush.msra.mxu3 %v2587_v47 }
 0x247   : > { %3681 = vmatmul.msk.f32.vlgmr.msrb.gmra.mxu0 %vm435_vm0, %v5232_v38  ;;  %3682 = vmatmul.msk.f32.vlgmr.msrb.gmra.mxu1 %vm435_vm0, %v5232_v38 }
 0x248   : > { %3683 = vmatmul.msk.f32.vlgmr.msrb.gmra.mxu2 %vm435_vm0, %v5232_v38  ;;  %3684 = vmatmul.msk.f32.vlgmr.msrb.gmra.mxu3 %vm435_vm0, %v5232_v38 }
 0x249   : > { %2945 = vmatpush.msra.mxu0 %v2488_v39  ;;  %2965 = vmatpush.msra.mxu1 %v2489_v24  ;;  %v2199_v60 = vpop.f32.mrf.mxu2  ;;  %v2228_v1 = vpop.f32.mrf.mxu3 }
 0x24a   : > { %2983 = vmatpush.msra.mxu2 %v2554_v61  ;;  %3003 = vmatpush.msra.mxu3 %v2555_v12  ;;  %v2200_v40 = vadd.f32 %v2199_v60, %v5055_v28  ;;  %v2229_v22 = vadd.f32 %v2228_v1, %v5055_v28 }
 0x24c   : > { %2984 = vmatpush.msra.mxu2 %v2522_v5  ;;  %3004 = vmatpush.msra.mxu3 %v2523_v49  ;;  %v2144_v27 = vpop.f32.mrf.mxu0  ;;  %v2173_v13 = vpop.f32.mrf.mxu1  ;;  %v2494_v2 = vmax.f32 %v2200_v40, 0.0  ;;  %v2495_v39 = vmax.f32 %v2229_v22, 0.0 }
 0x24d   : > { %v2145_v0 = vadd.f32 %v2144_v27, %v5033_v35  ;;  %v2174_v17 = vadd.f32 %v2173_v13, %v5033_v35 }
 0x24e   : > { %2985 = vmatpush.msra.mxu2 %v2490_v19  ;;  %3005 = vmatpush.msra.mxu3 %v2491_v9 }
 0x24f   : > { %3685 = vmatmul.msk.f32.vlgmr.msra.gmra.mxu0 %vm435_vm0, %v5232_v38  ;;  %3686 = vmatmul.msk.f32.vlgmr.msra.gmra.mxu1 %vm435_vm0, %v5232_v38  ;;  %v2524_v51 = vmax.f32 %v2145_v0, 0.0  ;;  %v2525_v55 = vmax.f32 %v2174_v17, 0.0 }
 0x250   : > { %3687 = vmatmul.msk.f32.vlgmr.msra.gmra.mxu2 %vm435_vm0, %v5232_v38  ;;  %3688 = vmatmul.msk.f32.vlgmr.msra.gmra.mxu3 %vm435_vm0, %v5232_v38 }
 0x253   : > { %v2202_v20 = vpop.f32.mrf.mxu2  ;;  %v2231_v50 = vpop.f32.mrf.mxu3 }
 0x254   : > { %v2147_v41 = vpop.f32.mrf.mxu0  ;;  %v2176_v58 = vpop.f32.mrf.mxu1  ;;  %v2203_v18 = vadd.f32 %v2202_v20, %v5033_v35  ;;  %v2232_v37 = vadd.f32 %v2231_v50, %v5033_v35 }
 0x255   : > { %v2148_v31 = vadd.f32 %v2147_v41, %v5019_v34  ;;  %v2177_v63 = vadd.f32 %v2176_v58, %v5019_v34 }
 0x256   : > { %v2526_v30 = vmax.f32 %v2203_v18, 0.0  ;;  %v2527_v59 = vmax.f32 %v2232_v37, 0.0 }
 0x257   : > { %v2556_v4 = vmax.f32 %v2148_v31, 0.0  ;;  %v2557_v62 = vmax.f32 %v2177_v63, 0.0 }
 0x25b   : > { %v2205_v44 = vpop.f32.mrf.mxu2  ;;  %v2234_v46 = vpop.f32.mrf.mxu3 }
 0x25c   : > { %v2150_v52 = vpop.f32.mrf.mxu0  ;;  %v2179_v29 = vpop.f32.mrf.mxu1  ;;  %v2206_v54 = vadd.f32 %v2205_v44, %v5019_v34  ;;  %v2235_v3 = vadd.f32 %v2234_v46, %v5019_v34 }
 0x25d   : > { %v2151_v16 = vadd.f32 %v2150_v52, %v4994_v21  ;;  %v2180_v32 = vadd.f32 %v2179_v29, %v4994_v21 }
 0x25e   : > { %v2558_v23 = vmax.f32 %v2206_v54, 0.0  ;;  %v2559_v26 = vmax.f32 %v2235_v3, 0.0 }
 0x25f   : > { %v2588_v15 = vmax.f32 %v2151_v16, 0.0  ;;  %v2589_v56 = vmax.f32 %v2180_v32, 0.0 }
 0x261   : > { %3022 = vmatpush.msrb.mxu0 %v2588_v15  ;;  %3042 = vmatpush.msrb.mxu1 %v2589_v56 }
 0x263   : > { %v2208_v25 = vpop.f32.mrf.mxu2  ;;  %v2237_v10 = vpop.f32.mrf.mxu3  ;;  %3023 = vmatpush.msrb.mxu0 %v2556_v4  ;;  %3043 = vmatpush.msrb.mxu1 %v2557_v62 }
 0x264   : > { %v2209_v48 = vadd.f32 %v2208_v25, %v4994_v21  ;;  %v2238_v33 = vadd.f32 %v2237_v10, %v4994_v21  ;;  %v2257_v11 = vpop.f32.mrf.mxu0  ;;  %v2286_v14 = vpop.f32.mrf.mxu1 }
 0x265   : > { %3024 = vmatpush.msrb.mxu0 %v2524_v51  ;;  %3044 = vmatpush.msrb.mxu1 %v2525_v55  ;;  %v2258_v63 = vadd.f32 %v2257_v11, %v5055_v28  ;;  %v2287_v44 = vadd.f32 %v2286_v14, %v5055_v28 }
 0x266   : > { %v2590_v7 = vmax.f32 %v2209_v48, 0.0  ;;  %v2591_v42 = vmax.f32 %v2238_v33, 0.0 }
 0x267   : > { %3025 = vmatpush.msrb.mxu0 %v2492_v45  ;;  %3045 = vmatpush.msrb.mxu1 %v2493_v57  ;;  %v2496_v43 = vmax.f32 %v2258_v63, 0.0  ;;  %v2497_v51 = vmax.f32 %v2287_v44, 0.0 }
 0x268   : > { %3062 = vmatpush.msrb.mxu2 %v2590_v7  ;;  %3082 = vmatpush.msrb.mxu3 %v2591_v42 }
 0x269   : > { %3689 = vmatmul.msk.f32.vlgmr.msrb.gmra.mxu0 %vm435_vm0, %v5232_v38  ;;  %3690 = vmatmul.msk.f32.vlgmr.msrb.gmra.mxu1 %vm435_vm0, %v5232_v38 }
 0x26a   : > { %3063 = vmatpush.msrb.mxu2 %v2558_v23  ;;  %3083 = vmatpush.msrb.mxu3 %v2559_v26 }
 0x26b   : > { %v2315_v47 = vpop.f32.mrf.mxu2  ;;  %v2344_v8 = vpop.f32.mrf.mxu3 }
 0x26c   : > { %3064 = vmatpush.msrb.mxu2 %v2526_v30  ;;  %3084 = vmatpush.msrb.mxu3 %v2527_v59  ;;  %v2316_v3 = vadd.f32 %v2315_v47, %v5055_v28  ;;  %v2345_v48 = vadd.f32 %v2344_v8, %v5055_v28 }
 0x26e   : > { %v2260_v24 = vpop.f32.mrf.mxu0  ;;  %v2289_v6 = vpop.f32.mrf.mxu1  ;;  %3065 = vmatpush.msrb.mxu2 %v2494_v2  ;;  %3085 = vmatpush.msrb.mxu3 %v2495_v39  ;;  %v2498_v37 = vmax.f32 %v2316_v3, 0.0  ;;  %v2499_v7 = vmax.f32 %v2345_v48, 0.0 }
 0x26f   : > { %3691 = vmatmul.msk.f32.vlgmr.msrb.gmra.mxu2 %vm435_vm0, %v5232_v38  ;;  %3692 = vmatmul.msk.f32.vlgmr.msrb.gmra.mxu3 %vm435_vm0, %v5232_v38  ;;  %v2261_v50 = vadd.f32 %v2260_v24, %v5033_v35  ;;  %v2290_v41 = vadd.f32 %v2289_v6, %v5033_v35 }
 0x271   : > { %v2528_v29 = vmax.f32 %v2261_v50, 0.0  ;;  %v2529_v16 = vmax.f32 %v2290_v41, 0.0 }
 0x275   : > { %v2318_v36 = vpop.f32.mrf.mxu2  ;;  %v2347_v61 = vpop.f32.mrf.mxu3 }
 0x276   : > { %v2263_v12 = vpop.f32.mrf.mxu0  ;;  %v2292_v60 = vpop.f32.mrf.mxu1  ;;  %v2319_v55 = vadd.f32 %v2318_v36, %v5033_v35  ;;  %v2348_v25 = vadd.f32 %v2347_v61, %v5033_v35 }
 0x277   : > { %v2264_v9 = vadd.f32 %v2263_v12, %v5019_v34  ;;  %v2293_v27 = vadd.f32 %v2292_v60, %v5019_v34 }
 0x278   : > { %v2530_v14 = vmax.f32 %v2319_v55, 0.0  ;;  %v2531_v45 = vmax.f32 %v2348_v25, 0.0 }
 0x279   : > { %v2560_v46 = vmax.f32 %v2264_v9, 0.0  ;;  %v2561_v52 = vmax.f32 %v2293_v27, 0.0 }
 0x27d   : > { %v2321_v1 = vpop.f32.mrf.mxu2  ;;  %v2350_v5 = vpop.f32.mrf.mxu3 }
 0x27e   : > { %v2266_v49 = vpop.f32.mrf.mxu0  ;;  %v2295_v19 = vpop.f32.mrf.mxu1  ;;  %v2322_v17 = vadd.f32 %v2321_v1, %v5019_v34  ;;  %v2351_v4 = vadd.f32 %v2350_v5, %v5019_v34 }
 0x27f   : > { %v2267_v13 = vadd.f32 %v2266_v49, %v4994_v21  ;;  %v2296_v20 = vadd.f32 %v2295_v19, %v4994_v21 }
 0x280   : > { %v2562_v33 = vmax.f32 %v2322_v17, 0.0  ;;  %v2563_v11 = vmax.f32 %v2351_v4, 0.0  ;;  %v5429_v4 = vpop.permute.xlu2 %2604 }
 0x281   : > { %v2592_v58 = vmax.f32 %v2267_v13, 0.0  ;;  %v2593_v31 = vmax.f32 %v2296_v20, 0.0 }
 0x283   : > { %3102 = vmatpush.msra.mxu0 %v2592_v58  ;;  %3122 = vmatpush.msra.mxu1 %v2593_v31 }
 0x285   : > { %v2324_v32 = vpop.f32.mrf.mxu2  ;;  %v2353_v0 = vpop.f32.mrf.mxu3  ;;  %3103 = vmatpush.msra.mxu0 %v2560_v46  ;;  %3123 = vmatpush.msra.mxu1 %v2561_v52 }
 0x286   : > { %v2325_v62 = vadd.f32 %v2324_v32, %v4994_v21  ;;  %v2354_v15 = vadd.f32 %v2353_v0, %v4994_v21  ;;  %v2373_v56 = vpop.f32.mrf.mxu0  ;;  %v2402_v53 = vpop.f32.mrf.mxu1 }
 0x287   : > { %3104 = vmatpush.msra.mxu0 %v2528_v29  ;;  %3124 = vmatpush.msra.mxu1 %v2529_v16  ;;  %v2374_v5 = vadd.f32 %v2373_v56, %v5055_v28  ;;  %v2403_v49 = vadd.f32 %v2402_v53, %v5055_v28 }
 0x288   : > { %v2594_v10 = vmax.f32 %v2325_v62, 0.0  ;;  %v2595_v54 = vmax.f32 %v2354_v15, 0.0 }
 0x289   : > { %3105 = vmatpush.msra.mxu0 %v2496_v43  ;;  %3125 = vmatpush.msra.mxu1 %v2497_v51  ;;  %v2500_v46 = vmax.f32 %v2374_v5, 0.0  ;;  %v2501_v52 = vmax.f32 %v2403_v49, 0.0 }
 0x28a   : > { %3142 = vmatpush.msra.mxu2 %v2594_v10  ;;  %3162 = vmatpush.msra.mxu3 %v2595_v54 }
 0x28b   : > { %3693 = vmatmul.msk.f32.vlgmr.msra.gmra.mxu0 %vm435_vm0, %v5232_v38  ;;  %3694 = vmatmul.msk.f32.vlgmr.msra.gmra.mxu1 %vm435_vm0, %v5232_v38 }
 0x28c   : > { %3143 = vmatpush.msra.mxu2 %v2562_v33  ;;  %3163 = vmatpush.msra.mxu3 %v2563_v11 }
 0x28d   : > { %v2431_v57 = vpop.f32.mrf.mxu2  ;;  %v2460_v18 = vpop.f32.mrf.mxu3 }
 0x28e   : > { %3144 = vmatpush.msra.mxu2 %v2530_v14  ;;  %3164 = vmatpush.msra.mxu3 %v2531_v45 }
 0x290   : > { %v2376_v42 = vpop.f32.mrf.mxu0  ;;  %v2405_v40 = vpop.f32.mrf.mxu1  ;;  %3145 = vmatpush.msra.mxu2 %v2498_v37  ;;  %3165 = vmatpush.msra.mxu3 %v2499_v7 }
 0x291   : > { %3695 = vmatmul.msk.f32.vlgmr.msra.gmra.mxu2 %vm435_vm0, %v5232_v38  ;;  %3696 = vmatmul.msk.f32.vlgmr.msra.gmra.mxu3 %vm435_vm0, %v5232_v38  ;;  %v2377_v61 = vadd.f32 %v2376_v42, %v5033_v35  ;;  %v2406_v12 = vadd.f32 %v2405_v40, %v5033_v35 }
 0x293   : > { %v2532_v27 = vmax.f32 %v2377_v61, 0.0  ;;  %v2533_v13 = vmax.f32 %v2406_v12, 0.0 }
 0x297   : > { %v2434_v22 = vpop.f32.mrf.mxu2  ;;  %v2463_v23 = vpop.f32.mrf.mxu3 }
 0x298   : > { %v2379_v26 = vpop.f32.mrf.mxu0  ;;  %v2408_v30 = vpop.f32.mrf.mxu1  ;;  %v2435_v29 = vadd.f32 %v2434_v22, %v5033_v35  ;;  %v2464_v16 = vadd.f32 %v2463_v23, %v5033_v35 }
 0x299   : > { %v2380_v39 = vadd.f32 %v2379_v26, %v5019_v34  ;;  %v2409_v24 = vadd.f32 %v2408_v30, %v5019_v34 }
 0x29a   : > { %v2534_v35 = vmax.f32 %v2435_v29, 0.0  ;;  %v2535_v53 = vmax.f32 %v2464_v16, 0.0 }
 0x29b   : > { %v2564_v19 = vmax.f32 %v2380_v39, 0.0  ;;  %v2565_v9 = vmax.f32 %v2409_v24, 0.0 }
 0x29f   : > { %v2437_v59 = vpop.f32.mrf.mxu2  ;;  %v2466_v47 = vpop.f32.mrf.mxu3 }
 0x2a0   : > { %v2382_v8 = vpop.f32.mrf.mxu0  ;;  %v2411_v2 = vpop.f32.mrf.mxu1  ;;  %v2438_v41 = vadd.f32 %v2437_v59, %v5019_v34  ;;  %v2467_v58 = vadd.f32 %v2466_v47, %v5019_v34  ;;  %v2432_v34 = vadd.f32 %v2431_v57, %v5055_v28 }
 0x2a1   : > { %v2383_v6 = vadd.f32 %v2382_v8, %v4994_v21  ;;  %v2412_v36 = vadd.f32 %v2411_v2, %v4994_v21 }
 0x2a2   : > { %v2566_v62 = vmax.f32 %v2438_v41, 0.0  ;;  %v2567_v15 = vmax.f32 %v2467_v58, 0.0  ;;  %v2502_v43 = vmax.f32 %v2432_v34, 0.0 }
 0x2a3   : > { %v2596_v60 = vmax.f32 %v2383_v6, 0.0  ;;  %v2597_v1 = vmax.f32 %v2412_v36, 0.0 }
 0x2a5   : > { %3182 = vmatpush.msrb.mxu0 %v2596_v60  ;;  %3202 = vmatpush.msrb.mxu1 %v2597_v1 }
 0x2a7   : > { %v2440_v20 = vpop.f32.mrf.mxu2  ;;  %v2469_v50 = vpop.f32.mrf.mxu3  ;;  %3183 = vmatpush.msrb.mxu0 %v2564_v19  ;;  %3203 = vmatpush.msrb.mxu1 %v2565_v9 }
 0x2a8   : > { %v2441_v31 = vadd.f32 %v2440_v20, %v4994_v21  ;;  %v2470_v63 = vadd.f32 %v2469_v50, %v4994_v21  ;;  %v2647_v44 = vpop.f32.mrf.mxu1  ;;  %v2627_v17 = vpop.f32.mrf.mxu0  ;;  %v2461_v21 = vadd.f32 %v2460_v18, %v5055_v28 }
 0x2a9   : > { %3184 = vmatpush.msrb.mxu0 %v2532_v27  ;;  %3204 = vmatpush.msrb.mxu1 %v2533_v13  ;;  %v2648_v56 = vadd.f32 %v2647_v44, %v5429_v4  ;;  %v2628_v3 = vadd.f32 %v2627_v17, %v5429_v4 }
 0x2aa   : > { %v2598_v32 = vmax.f32 %v2441_v31, 0.0  ;;  %v2599_v0 = vmax.f32 %v2470_v63, 0.0  ;;  %v2503_v55 = vmax.f32 %v2461_v21, 0.0 }
 0x2ab   : > { %3185 = vmatpush.msrb.mxu0 %v2500_v46  ;;  %3205 = vmatpush.msrb.mxu1 %v2501_v52  ;;  %v3282_v25 = vrot.slane %v2648_v56, 6 }
 0x2ac   : > { %3222 = vmatpush.msrb.mxu2 %v2598_v32  ;;  %3242 = vmatpush.msrb.mxu3 %v2599_v0 }
 0x2ad   : > { %3697 = vmatmul.msk.f32.vlgmr.msrb.gmra.mxu0 %vm435_vm0, %v5232_v38  ;;  %3698 = vmatmul.msk.f32.vlgmr.msrb.gmra.mxu1 %vm435_vm0, %v5232_v38  ;;  %v3307_v14 = vsel %vm3306_vm1, %v2628_v3, %v3282_v25 }
 0x2ae   : > { %3223 = vmatpush.msrb.mxu2 %v2566_v62  ;;  %3243 = vmatpush.msrb.mxu3 %v2567_v15 }
 0x2af   : > { %v2667_v51 = vpop.f32.mrf.mxu2  ;;  %v2687_v28 = vpop.f32.mrf.mxu3 }
 0x2b0   : > { %v2668_v10 = vadd.f32 %v2667_v51, %v5429_v4  ;;  %v2688_v54 = vadd.f32 %v2687_v28, %v5429_v4  ;;  %3224 = vmatpush.msrb.mxu2 %v2534_v35  ;;  %3244 = vmatpush.msrb.mxu3 %v2535_v53 }
 0x2b2   : > { %v3283_v48 = vrot.slane %v2668_v10, 4  ;;  %v3284_v33 = vrot.slane %v2688_v54, 2  ;;  %v2727_v11 = vpop.f32.mrf.mxu1  ;;  %3225 = vmatpush.msrb.mxu2 %v2502_v43  ;;  %3245 = vmatpush.msrb.mxu3 %v2503_v55  ;;  %v2707_v57 = vpop.f32.mrf.mxu0 }
 0x2b3   : > { %3699 = vmatmul.msk.f32.vlgmr.msrb.gmra.mxu2 %vm435_vm0, %v5232_v38  ;;  %3700 = vmatmul.msk.f32.vlgmr.msrb.gmra.mxu3 %vm435_vm0, %v5232_v38  ;;  %v2728_v37 = vadd.f32 %v2727_v11, %v5429_v4  ;;  %v2708_v38 = vadd.f32 %v2707_v57, %v5429_v4 }
 0x2b4   : > { %v3309_v45 = vsel %vm3308_vm2, %v3283_v48, %v3284_v33 }
 0x2b5   : > { %v3311_v18 = vsel %vm3310_vm3, %v3307_v14, %v3309_v45  ;;  %v3285_v40 = vrot.slane %v2728_v37, 6 }
 0x2b6   : > { %3341 = vst [vmem:[%s5445_s12] sm:$0xff] %v3311_v18 }
 0x2b7   : > { %v3312_v47 = vsel %vm3306_vm1, %v2708_v38, %v3285_v40 }
 0x2b9   : > { %v2747_v7 = vpop.f32.mrf.mxu2  ;;  %v2767_v42 = vpop.f32.mrf.mxu3 }
 0x2ba   : > { %v2748_v22 = vadd.f32 %v2747_v7, %v5429_v4  ;;  %v2768_v23 = vadd.f32 %v2767_v42, %v5429_v4 }
 0x2bc   : > { %v3286_v26 = vrot.slane %v2748_v22, 4  ;;  %v3287_v30 = vrot.slane %v2768_v23, 2  ;;  %v2807_v59 = vpop.f32.mrf.mxu1  ;;  %v2787_v2 = vpop.f32.mrf.mxu0 }
 0x2bd   : > { %v2808_v24 = vadd.f32 %v2807_v59, %v5429_v4  ;;  %v2788_v5 = vadd.f32 %v2787_v2, %v5429_v4 }
 0x2be   : > { %v3313_v8 = vsel %vm3308_vm2, %v3286_v26, %v3287_v30 }
 0x2bf   : > { %v3314_v39 = vsel %vm3310_vm3, %v3312_v47, %v3313_v8  ;;  %v3288_v61 = vrot.slane %v2808_v24, 6 }
 0x2c0   : > { %3342 = vst [vmem:[%s5445_s12 + $0x8] sm:$0xff] %v3314_v39 }
 0x2c1   : > { %v3315_v9 = vsel %vm3306_vm1, %v2788_v5, %v3288_v61 }
 0x2c3   : > { %v2827_v6 = vpop.f32.mrf.mxu2  ;;  %v2847_v36 = vpop.f32.mrf.mxu3 }
 0x2c4   : > { %v2828_v12 = vadd.f32 %v2827_v6, %v5429_v4  ;;  %v2848_v60 = vadd.f32 %v2847_v36, %v5429_v4  ;;  %v2887_v1 = vpop.f32.mrf.mxu1  ;;  %v2867_v13 = vpop.f32.mrf.mxu0 }
 0x2c5   : > { %v2888_v20 = vadd.f32 %v2887_v1, %v5429_v4  ;;  %v2868_v52 = vadd.f32 %v2867_v13, %v5429_v4 }
 0x2c6   : > { %v3289_v49 = vrot.slane %v2828_v12, 4  ;;  %v3290_v19 = vrot.slane %v2848_v60, 2 }
 0x2c7   : > { %v3291_v31 = vrot.slane %v2888_v20, 6 }
 0x2c8   : > { %v3316_v27 = vsel %vm3308_vm2, %v3289_v49, %v3290_v19 }
 0x2c9   : > { %v3317_v50 = vsel %vm3310_vm3, %v3315_v9, %v3316_v27  ;;  %v3318_v32 = vsel %vm3306_vm1, %v2868_v52, %v3291_v31 }
 0x2ca   : > { %3343 = vst [vmem:[%s5445_s12 + $0x10] sm:$0xff] %v3317_v50 }
 0x2cb   : > { %v2907_v41 = vpop.f32.mrf.mxu2  ;;  %v2927_v58 = vpop.f32.mrf.mxu3 }
 0x2cc   : > { %v2908_v63 = vadd.f32 %v2907_v41, %v5429_v4  ;;  %v2928_v44 = vadd.f32 %v2927_v58, %v5429_v4  ;;  %v2967_v46 = vpop.f32.mrf.mxu1  ;;  %v2947_v21 = vpop.f32.mrf.mxu0 }
 0x2cd   : > { %v2968_v17 = vadd.f32 %v2967_v46, %v5429_v4  ;;  %v2948_v43 = vadd.f32 %v2947_v21, %v5429_v4 }
 0x2ce   : > { %v3292_v29 = vrot.slane %v2908_v63, 4  ;;  %v3293_v16 = vrot.slane %v2928_v44, 2 }
 0x2cf   : > { %v3294_v56 = vrot.slane %v2968_v17, 6 }
 0x2d0   : > { %v3319_v0 = vsel %vm3308_vm2, %v3292_v29, %v3293_v16 }
 0x2d1   : > { %v3320_v34 = vsel %vm3310_vm3, %v3318_v32, %v3319_v0  ;;  %v3321_v55 = vsel %vm3306_vm1, %v2948_v43, %v3294_v56 }
 0x2d2   : > { %3344 = vst [vmem:[%s5445_s12 + $0x18] sm:$0xff] %v3320_v34 }
 0x2d3   : > { %v2987_v62 = vpop.f32.mrf.mxu2  ;;  %v3007_v15 = vpop.f32.mrf.mxu3 }
 0x2d4   : > { %v2988_v35 = vadd.f32 %v2987_v62, %v5429_v4  ;;  %v3008_v53 = vadd.f32 %v3007_v15, %v5429_v4 }
 0x2d6   : > { %v3295_v51 = vrot.slane %v2988_v35, 4  ;;  %v3296_v28 = vrot.slane %v3008_v53, 2 }
 0x2d8   : > { %v3322_v25 = vsel %vm3308_vm2, %v3295_v51, %v3296_v28 }
 0x2d9   : > { %v3323_v10 = vsel %vm3310_vm3, %v3321_v55, %v3322_v25 }
 0x2da   : > { %3345 = vst [vmem:[%s5445_s12 + $0x20] sm:$0xff] %v3323_v10 }
 0x2e6   : > { %v3047_v54 = vpop.f32.mrf.mxu1  ;;  %v3027_v48 = vpop.f32.mrf.mxu0 }
 0x2e7   : > { %v3048_v3 = vadd.f32 %v3047_v54, %v5429_v4  ;;  %v3028_v18 = vadd.f32 %v3027_v48, %v5429_v4 }
 0x2e9   : > { %v3297_v14 = vrot.slane %v3048_v3, 6 }
 0x2eb   : > { %v3324_v42 = vsel %vm3306_vm1, %v3028_v18, %v3297_v14 }
 0x2f2   : > { %v3067_v33 = vpop.f32.mrf.mxu2  ;;  %v3087_v11 = vpop.f32.mrf.mxu3 }
 0x2f3   : > { %v3068_v45 = vadd.f32 %v3067_v33, %v5429_v4  ;;  %v3088_v57 = vadd.f32 %v3087_v11, %v5429_v4 }
 0x2f5   : > { %v3298_v37 = vrot.slane %v3068_v45, 4  ;;  %v3299_v7 = vrot.slane %v3088_v57, 2 }
 0x2f7   : > { %v3325_v40 = vsel %vm3308_vm2, %v3298_v37, %v3299_v7 }
 0x2f8   : > { %v3326_v22 = vsel %vm3310_vm3, %v3324_v42, %v3325_v40 }
 0x2f9   : > { %3346 = vst [vmem:[%s5445_s12 + $0x28] sm:$0xff] %v3326_v22 }
 0x308   : > { %v3127_v23 = vpop.f32.mrf.mxu1  ;;  %v3107_v26 = vpop.f32.mrf.mxu0 }
 0x309   : > { %v3128_v38 = vadd.f32 %v3127_v23, %v5429_v4  ;;  %v3108_v39 = vadd.f32 %v3107_v26, %v5429_v4 }
 0x30b   : > { %v3300_v47 = vrot.slane %v3128_v38, 6 }
 0x30d   : > { %v3327_v36 = vsel %vm3306_vm1, %v3108_v39, %v3300_v47 }
 0x314   : > { %v3147_v30 = vpop.f32.mrf.mxu2  ;;  %v3167_v59 = vpop.f32.mrf.mxu3 }
 0x315   : > { %v3148_v8 = vadd.f32 %v3147_v30, %v5429_v4  ;;  %v3168_v2 = vadd.f32 %v3167_v59, %v5429_v4 }
 0x317   : > { %v3301_v24 = vrot.slane %v3148_v8, 4  ;;  %v3302_v6 = vrot.slane %v3168_v2, 2 }
 0x319   : > { %v3328_v61 = vsel %vm3308_vm2, %v3301_v24, %v3302_v6 }
 0x31a   : > { %v3329_v12 = vsel %vm3310_vm3, %v3327_v36, %v3328_v61 }
 0x31b   : > { %3347 = vst [vmem:[%s5445_s12 + $0x30] sm:$0xff] %v3329_v12 }
 0x32a   : > { %v3207_v60 = vpop.f32.mrf.mxu1  ;;  %v3187_v5 = vpop.f32.mrf.mxu0 }
 0x32b   : > { %v3208_v1 = vadd.f32 %v3207_v60, %v5429_v4  ;;  %v3188_v20 = vadd.f32 %v3187_v5, %v5429_v4 }
 0x32d   : > { %v3303_v9 = vrot.slane %v3208_v1, 6 }
 0x32f   : > { %v3330_v58 = vsel %vm3306_vm1, %v3188_v20, %v3303_v9 }
 0x336   : > { %v3227_v49 = vpop.f32.mrf.mxu2  ;;  %v3247_v19 = vpop.f32.mrf.mxu3 }
 0x337   : > { %v3228_v27 = vadd.f32 %v3227_v49, %v5429_v4  ;;  %v3248_v13 = vadd.f32 %v3247_v19, %v5429_v4 }
 0x339   : > { %v3304_v50 = vrot.slane %v3228_v27, 4  ;;  %v3305_v41 = vrot.slane %v3248_v13, 2 }
 0x33b   : > { %v3331_v31 = vsel %vm3308_vm2, %v3304_v50, %v3305_v41 }
 0x33c   : > { %v3332_v63 = vsel %vm3310_vm3, %v3330_v58, %v3331_v31 }
 0x33d   : > { %3348 = vst [vmem:[%s5445_s12 + $0x38] sm:$0xff] %v3332_v63 }
 0x33e PF: > { %s17_s24 = sadd.s32 1, %s3727_s24  }
 0x33f   : > { %p14_p4 = scmp.ge.s32.totalorder %s17_s24, 4  }
 0x341   :  { %16 = sbr.rel (!%p14_p4) target bundleno = 1 (0x1), region = 78 }

// kernel: decoder_occupancy_block.7
= control target key start
LH: loop header
LB: loop body
LE: loop exit
PB: predicated region body
PF: predicated region fallthrough
CT: control target
= control target key end

     0   :  { %8 = vsyncpa [#allocation3], 0  ;;  %s1525_s0 = inlined_call_operand.vmem [shape: f32[2,2,64,64], index: 0, kind: input, shape index: {}]   ;;  %s1526_s1 = inlined_call_operand.vmem [shape: f32[128,64], index: 1, kind: input, shape index: {}, may-alias: {1,2}]   ;;  %s1527_s2 = inlined_call_operand.vmem [shape: f32[128,64], index: 2, kind: input, shape index: {}, may-alias: {1,2}]   ;;  %s1528_s3 = inlined_call_operand.hbm [shape: f32[2,2,128,128], index: 3, kind: output, shape index: {}]  }
   0x1   :  { %10 = vsyncpa [#allocation3 + $0x1], 0  ;;  %s1113_s12 = smov 0   ;;  %s1115_s13 = smov 0  }
   0x2   :  { %s1117_s14 = smov 0   ;;  %s1119_s15 = smov 0  }
   0x3 LB: > { %s1134_s16 = sadd.s32 4294967295, %s1089_s15   ;;  %s828_s17 = sadd.s32 4294967294, %s1089_s15   ;;  %s1089_s15 = sphi %s1119_s15, %s1534_s15   ;;  %s1085_s14 = sphi %s1117_s14, %s1533_s14   ;;  %s1081_s13 = sphi %s1115_s13, %s1532_s13   ;;  %s1077_s12 = sphi %s1113_s12, %s1531_s12  }
   0x4   : > { %s1138_s18 = sadd.s32 1, %s1089_s15   ;;  %s91_s19 = sadd.s32 1, %s1085_s14 }
   0x5   : > { %s88_s20 = ssub.s32 %s1089_s15, %s1138_s18  ;;  %p101_p0 = scmp.ne.s32.totalorder %s1085_s14, %s1081_s13 }
   0x6   : > { %p89_p1 = scmp.eq.s32.totalorder %s88_s20, 0  ;;  %p102_p2 = scmp.eq.s32.totalorder %s1134_s16, 1 }
   0x7   : > { %p107_p3 = scmp.ne.s32.totalorder %s1081_s13, %s1077_s12  ;;  %p108_p4 = scmp.eq.s32.totalorder %s828_s17, 1 }
   0x8   : > { %s1149_s21 = scalar_select %p89_p1, %s1085_s14, %s91_s19  }
   0x9   : > { %p1151_p5 = por %p102_p2, %p101_p0  ;;  %p1155_p6 = por %p108_p4, %p107_p3 }
   0xa   : > { %p831_p7 = scmp.ge.s32.totalorder %s1089_s15, 1  ;;  %p140_p8 = scmp.lt.s32.totalorder %s1089_s15, 3 }
   0xc   : > { %p141_p9 = pnand %p831_p7, %p140_p8 }
   0xd   : > { %p164_p10 = scmp.lt.s32.totalorder (!%p141_p9), %s1134_s16, 1  ;;  %s161_s17 = sand.u32 (!%p141_p9), 1, %s1081_s13  }
   0xe   : > { %144 = sbr.rel (%p141_p9) target bundleno = 605 (0x25d), region = 32  ;;  %s832_s19 = sshll.u32 (!%p141_p9), %s161_s17, 8 }
   0xf   : > { %s1457_s20 = scalar_lea.vmem (!%p141_p9), [#allocation2], %s832_s19  ;;  %s751_s30 = scalar_lea.sflag (!%p141_p9), [#allocation3], %s161_s17 }
  0x10   : > { %s1047_s7 = scalar_lea.hbm (!%p141_p9), %s1528_s3, 512 }
  0x13   : > { %s165_s24 = scalar_select %p164_p10, %s1134_s16, 1  ;;  %vm217_vm0 = vcmask 523264   ;;  %v185_v16 = vld [vmem:[%s1526_s1] sm:$0xff]  ;;  %v186_v17 = vld [vmem:[%s1526_s1 + $0x8] sm:$0xff]  ;;  %v187_v18 = vld [vmem:[%s1526_s1 + $0x10] sm:$0xff] }
  0x14   : > { %v188_v19 = vld [vmem:[%s1526_s1 + $0x18] sm:$0xff]  ;;  %v189_v20 = vld [vmem:[%s1526_s1 + $0x20] sm:$0xff]  ;;  %v190_v21 = vld [vmem:[%s1526_s1 + $0x28] sm:$0xff] }
  0x15   : > { %s952_s25 = sshll.u32 %s165_s24, 7  ;;  %v191_v22 = vld [vmem:[%s1526_s1 + $0x30] sm:$0xff]  ;;  %v192_v23 = vld [vmem:[%s1526_s1 + $0x38] sm:$0xff]  ;;  %v193_v24 = vld [vmem:[%s1526_s1 + $0x40] sm:$0xff]  ;;  %s953_s24 = sshll.u32 %s1134_s16, 8 }
  0x16   : > { %s168_s28 = scalar_lea.vmem %s1525_s0, %s952_s25  ;;  %v194_v25 = vld [vmem:[%s1526_s1 + $0x48] sm:$0xff]  ;;  %v195_v26 = vld [vmem:[%s1526_s1 + $0x50] sm:$0xff]  ;;  %v196_v27 = vld [vmem:[%s1526_s1 + $0x58] sm:$0xff]  ;;  %s762_s27 = scalar_lea.hbm %s1528_s3, %s953_s24 }
  0x17   : > { %v176_v0 = vld [vmem:[%s168_s28 + $0x38] sm:$0xff]  ;;  %v175_v2 = vld [vmem:[%s168_s28 + $0x30] sm:$0xff]  ;;  %v174_v4 = vld [vmem:[%s168_s28 + $0x28] sm:$0xff]  ;;  %s765_s29 = sshll.u32 %s762_s27, 4  ;;  %s766_s29 = int_to_ptr.hbm [resolvable:$true] %s765_s29 }
  0x18   : > { %v184_v1 = vld [vmem:[%s168_s28 + $0x78] sm:$0xff]  ;;  %835 = vmatpush.xpose.msk.msra.mxu0 %vm217_vm0, %v176_v0  ;;  %v183_v3 = vld [vmem:[%s168_s28 + $0x70] sm:$0xff]  ;;  %v182_v5 = vld [vmem:[%s168_s28 + $0x68] sm:$0xff]  ;;  %s1041_s16 = sshra.s32 %s766_s29, 4  ;;  %s1042_s16 = int_to_ptr.hbm [resolvable:$true] %s1041_s16 }
  0x19   : > { %859 = vmatpush.xpose.msk.msra.mxu1 %vm217_vm0, %v184_v1  ;;  %v173_v6 = vld [vmem:[%s168_s28 + $0x20] sm:$0xff]  ;;  %v172_v8 = vld [vmem:[%s168_s28 + $0x18] sm:$0xff]  ;;  %v171_v10 = vld [vmem:[%s168_s28 + $0x10] sm:$0xff]  ;;  %s1043_s4 = scalar_lea.hbm %s1042_s16, 256  ;;  %p1048_p0 = scmp.lt.s32.totalorder %s1042_s16, %s1528_s3 }
  0x1a   : > { %v181_v7 = vld [vmem:[%s168_s28 + $0x60] sm:$0xff]  ;;  %v180_v9 = vld [vmem:[%s168_s28 + $0x58] sm:$0xff]  ;;  %v179_v11 = vld [vmem:[%s168_s28 + $0x50] sm:$0xff]  ;;  %p1044_p11 = scmp.ne.s32.totalorder %s1042_s16, %s1043_s4  ;;  %p1049_p1 = scmp.lt.s32.totalorder %s1047_s7, %s1043_s4 }
  0x1b   : > { %v170_v12 = vld [vmem:[%s168_s28 + $0x8] sm:$0xff]  ;;  %v169_v14 = vld [vmem:[%s168_s28] sm:$0xff]  ;;  %v199_v30 = vld [vmem:[%s1526_s1 + $0x70] sm:$0xff] }
  0x1c   : > { %836 = vmatpush.xpose.msk.msra.mxu0 %vm217_vm0, %v175_v2  ;;  %v178_v13 = vld [vmem:[%s168_s28 + $0x48] sm:$0xff]  ;;  %v177_v15 = vld [vmem:[%s168_s28 + $0x40] sm:$0xff]  ;;  %v200_v31 = vld [vmem:[%s1526_s1 + $0x78] sm:$0xff]  ;;  %s763_s28 = sshll.u32 %s1457_s20, 4  ;;  %p1045_p12 = pnand %p1044_p11, %p1151_p5  ;;  %s764_s28 = int_to_ptr.vmem [resolvable:$true] %s763_s28 }
  0x1d   : > { %860 = vmatpush.xpose.msk.msra.mxu1 %vm217_vm0, %v183_v3  ;;  %v197_v28 = vld [vmem:[%s1526_s1 + $0x60] sm:$0xff]  ;;  %v198_v29 = vld [vmem:[%s1526_s1 + $0x68] sm:$0xff]  ;;  %v203_v0 = vld [vmem:[%s1527_s2 + $0x10] sm:$0xff]  ;;  %p1050_p2 = por %p1049_p1, %p1048_p0 }
  0x1e   : > { %v204_v1 = vld [vmem:[%s1527_s2 + $0x18] sm:$0xff]  ;;  %v205_v2 = vld [vmem:[%s1527_s2 + $0x20] sm:$0xff]  ;;  %v206_v3 = vld [vmem:[%s1527_s2 + $0x28] sm:$0xff]  ;;  %p1046_p13 = pneg %p1045_p12 }
  0x20   : > { %837 = vmatpush.xpose.msk.msra.mxu0 %vm217_vm0, %v174_v4  ;;  %v207_v4 = vld [vmem:[%s1527_s2 + $0x30] sm:$0xff]  ;;  %p1051_p3 = pnand %p1050_p2, %p1046_p13 }
  0x21   : > { %861 = vmatpush.xpose.msk.msra.mxu1 %vm217_vm0, %v182_v5  ;;  %v208_v5 = vld [vmem:[%s1527_s2 + $0x38] sm:$0xff] }
  0x24   : > { %838 = vmatpush.xpose.msk.msra.mxu0 %vm217_vm0, %v173_v6  ;;  %v209_v6 = vld [vmem:[%s1527_s2 + $0x40] sm:$0xff] }
  0x25   : > { %862 = vmatpush.xpose.msk.msra.mxu1 %vm217_vm0, %v181_v7  ;;  %v210_v7 = vld [vmem:[%s1527_s2 + $0x48] sm:$0xff] }
  0x28   : > { %839 = vmatpush.xpose.msk.msra.mxu0 %vm217_vm0, %v172_v8  ;;  %v211_v8 = vld [vmem:[%s1527_s2 + $0x50] sm:$0xff] }
  0x29   : > { %863 = vmatpush.xpose.msk.msra.mxu1 %vm217_vm0, %v180_v9  ;;  %v201_v9 = vld [vmem:[%s1527_s2] sm:$0xff] }
  0x2c   : > { %840 = vmatpush.xpose.msk.msra.mxu0 %vm217_vm0, %v171_v10  ;;  %v212_v10 = vld [vmem:[%s1527_s2 + $0x58] sm:$0xff] }
  0x2d   : > { %864 = vmatpush.xpose.msk.msra.mxu1 %vm217_vm0, %v179_v11  ;;  %v202_v11 = vld [vmem:[%s1527_s2 + $0x8] sm:$0xff] }
  0x30   : > { %841 = vmatpush.xpose.msk.msra.mxu0 %vm217_vm0, %v170_v12  ;;  %v213_v12 = vld [vmem:[%s1527_s2 + $0x60] sm:$0xff] }
  0x31   : > { %865 = vmatpush.xpose.msk.msra.mxu1 %vm217_vm0, %v178_v13  ;;  %v214_v13 = vld [vmem:[%s1527_s2 + $0x68] sm:$0xff] }
  0x34   : > { %842 = vmatpush.xpose.msk.msra.mxu0 %vm217_vm0, %v169_v14  ;;  %v215_v14 = vld [vmem:[%s1527_s2 + $0x70] sm:$0xff] }
  0x35   : > { %866 = vmatpush.xpose.msk.msra.mxu1 %vm217_vm0, %v177_v15  ;;  %v216_v15 = vld [vmem:[%s1527_s2 + $0x78] sm:$0xff] }
  0x37   : > { %843 = vmatmul.msk.f32.vlgmr.msra.gmra.mxu0 %vm217_vm0, %v185_v16 }
  0x38   : > { %867 = vmatmul.msk.f32.vlgmr.msra.gmra.mxu1 %vm217_vm0, %v185_v16 }
  0x3f   : > { %844 = vmatmul.msk.f32.gmra.mxu0 %vm217_vm0, %v186_v17 }
  0x40   : > { %868 = vmatmul.msk.f32.gmra.mxu1 %vm217_vm0, %v186_v17 }
  0x47   : > { %845 = vmatmul.msk.f32.gmra.mxu0 %vm217_vm0, %v187_v18 }
  0x48   : > { %869 = vmatmul.msk.f32.gmra.mxu1 %vm217_vm0, %v187_v18 }
  0x4f   : > { %846 = vmatmul.msk.f32.gmra.mxu0 %vm217_vm0, %v188_v19 }
  0x50   : > { %870 = vmatmul.msk.f32.gmra.mxu1 %vm217_vm0, %v188_v19 }
  0x57   : > { %847 = vmatmul.msk.f32.gmra.mxu0 %vm217_vm0, %v189_v20 }
  0x58   : > { %871 = vmatmul.msk.f32.gmra.mxu1 %vm217_vm0, %v189_v20 }
  0x5f   : > { %848 = vmatmul.msk.f32.gmra.mxu0 %vm217_vm0, %v190_v21 }
  0x60   : > { %872 = vmatmul.msk.f32.gmra.mxu1 %vm217_vm0, %v190_v21 }
  0x67   : > { %849 = vmatmul.msk.f32.gmra.mxu0 %vm217_vm0, %v191_v22 }
  0x68   : > { %873 = vmatmul.msk.f32.gmra.mxu1 %vm217_vm0, %v191_v22 }
  0x6f   : > { %850 = vmatmul.msk.f32.gmra.mxu0 %vm217_vm0, %v192_v23 }
  0x70   : > { %874 = vmatmul.msk.f32.gmra.mxu1 %vm217_vm0, %v192_v23 }
  0x77   : > { %851 = vmatmul.msk.f32.gmra.mxu0 %vm217_vm0, %v193_v24 }
  0x78   : > { %875 = vmatmul.msk.f32.gmra.mxu1 %vm217_vm0, %v193_v24 }
  0x7f   : > { %852 = vmatmul.msk.f32.gmra.mxu0 %vm217_vm0, %v194_v25 }
  0x80   : > { %876 = vmatmul.msk.f32.gmra.mxu1 %vm217_vm0, %v194_v25 }
  0x87   : > { %853 = vmatmul.msk.f32.gmra.mxu0 %vm217_vm0, %v195_v26 }
  0x88   : > { %877 = vmatmul.msk.f32.gmra.mxu1 %vm217_vm0, %v195_v26 }
  0x8f   : > { %854 = vmatmul.msk.f32.gmra.mxu0 %vm217_vm0, %v196_v27 }
  0x90   : > { %878 = vmatmul.msk.f32.gmra.mxu1 %vm217_vm0, %v196_v27 }
  0x97   : > { %855 = vmatmul.msk.f32.gmra.mxu0 %vm217_vm0, %v197_v28 }
  0x98   : > { %879 = vmatmul.msk.f32.gmra.mxu1 %vm217_vm0, %v197_v28 }
  0x9f   : > { %856 = vmatmul.msk.f32.gmra.mxu0 %vm217_vm0, %v198_v29 }
  0xa0   : > { %880 = vmatmul.msk.f32.gmra.mxu1 %vm217_vm0, %v198_v29 }
  0xa7   : > { %857 = vmatmul.msk.f32.gmra.mxu0 %vm217_vm0, %v199_v30 }
  0xa8   : > { %881 = vmatmul.msk.f32.gmra.mxu1 %vm217_vm0, %v199_v30 }
  0xaf   : > { %858 = vmatmul.msk.f32.gmra.mxu0 %vm217_vm0, %v200_v31 }
  0xb0   : > { %882 = vmatmul.msk.f32.gmra.mxu1 %vm217_vm0, %v200_v31 }
  0xb4   : > { %v1262_v32 = vpop.f32.mrf.mxu0 }
  0xb5   : > { %v1264_v33 = vpop.f32.mrf.mxu1 }
  0xbc   : > { %v1266_v34 = vpop.f32.mrf.mxu0 }
  0xbd   : > { %v1268_v35 = vpop.f32.mrf.mxu1 }
  0xc4   : > { %v1270_v36 = vpop.f32.mrf.mxu0 }
  0xc5   : > { %v1272_v37 = vpop.f32.mrf.mxu1 }
  0xcc   : > { %v1274_v38 = vpop.f32.mrf.mxu0 }
  0xcd   : > { %v1276_v39 = vpop.f32.mrf.mxu1 }
  0xd4   : > { %v1278_v40 = vpop.f32.mrf.mxu0 }
  0xd5   : > { %v1280_v41 = vpop.f32.mrf.mxu1 }
  0xdc   : > { %v1282_v42 = vpop.f32.mrf.mxu0 }
  0xdd   : > { %v1284_v43 = vpop.f32.mrf.mxu1 }
  0xe4   : > { %v325_v44 = vpop.f32.mrf.mxu0 }
  0xe5   : > { %v414_v45 = vpop.f32.mrf.mxu1 }
  0xec   : > { %v328_v46 = vpop.f32.mrf.mxu0 }
  0xed   : > { %v417_v47 = vpop.f32.mrf.mxu1 }
  0xf4   : > { %v331_v48 = vpop.f32.mrf.mxu0 }
  0xf5   : > { %v420_v49 = vpop.f32.mrf.mxu1 }
  0xfc   : > { %v334_v50 = vpop.f32.mrf.mxu0 }
  0xfd   : > { %v423_v51 = vpop.f32.mrf.mxu1 }
 0x104   : > { %v337_v52 = vpop.f32.mrf.mxu0 }
 0x105   : > { %v426_v53 = vpop.f32.mrf.mxu1 }
 0x10c   : > { %v340_v54 = vpop.f32.mrf.mxu0 }
 0x10d   : > { %v429_v55 = vpop.f32.mrf.mxu1 }
 0x114   : > { %v343_v56 = vpop.f32.mrf.mxu0 }
 0x115   : > { %v432_v57 = vpop.f32.mrf.mxu1 }
 0x11c   : > { %v346_v58 = vpop.f32.mrf.mxu0 }
 0x11d   : > { %v435_v59 = vpop.f32.mrf.mxu1 }
 0x124   : > { %v349_v60 = vpop.f32.mrf.mxu0 }
 0x125   : > { %v438_v61 = vpop.f32.mrf.mxu1 }
 0x12c   : > { %v352_v62 = vpop.f32.mrf.mxu0 }
 0x12d   : > { %v441_v63 = vpop.f32.mrf.mxu1  ;;  %883 = vmatpush.xpose.msk.msrb.mxu0 %vm217_vm0, %v352_v62  ;;  %954 = vmatpush.xpose.msk.msra.mxu2 %vm217_vm0, %v352_v62 }
 0x12e   : > { %915 = vmatpush.xpose.msk.msrb.mxu1 %vm217_vm0, %v441_v63  ;;  %970 = vmatpush.xpose.msk.msra.mxu3 %vm217_vm0, %v441_v63 }
 0x131   : > { %884 = vmatpush.xpose.msk.msrb.mxu0 %vm217_vm0, %v349_v60  ;;  %955 = vmatpush.xpose.msk.msra.mxu2 %vm217_vm0, %v349_v60 }
 0x132   : > { %916 = vmatpush.xpose.msk.msrb.mxu1 %vm217_vm0, %v438_v61  ;;  %971 = vmatpush.xpose.msk.msra.mxu3 %vm217_vm0, %v438_v61 }
 0x135   : > { %885 = vmatpush.xpose.msk.msrb.mxu0 %vm217_vm0, %v346_v58  ;;  %956 = vmatpush.xpose.msk.msra.mxu2 %vm217_vm0, %v346_v58 }
 0x136   : > { %917 = vmatpush.xpose.msk.msrb.mxu1 %vm217_vm0, %v435_v59  ;;  %972 = vmatpush.xpose.msk.msra.mxu3 %vm217_vm0, %v435_v59 }
 0x139   : > { %886 = vmatpush.xpose.msk.msrb.mxu0 %vm217_vm0, %v343_v56  ;;  %957 = vmatpush.xpose.msk.msra.mxu2 %vm217_vm0, %v343_v56 }
 0x13a   : > { %918 = vmatpush.xpose.msk.msrb.mxu1 %vm217_vm0, %v432_v57  ;;  %973 = vmatpush.xpose.msk.msra.mxu3 %vm217_vm0, %v432_v57 }
 0x13d   : > { %887 = vmatpush.xpose.msk.msrb.mxu0 %vm217_vm0, %v340_v54  ;;  %958 = vmatpush.xpose.msk.msra.mxu2 %vm217_vm0, %v340_v54 }
 0x13e   : > { %919 = vmatpush.xpose.msk.msrb.mxu1 %vm217_vm0, %v429_v55  ;;  %974 = vmatpush.xpose.msk.msra.mxu3 %vm217_vm0, %v429_v55 }
 0x141   : > { %888 = vmatpush.xpose.msk.msrb.mxu0 %vm217_vm0, %v337_v52  ;;  %959 = vmatpush.xpose.msk.msra.mxu2 %vm217_vm0, %v337_v52 }
 0x142   : > { %920 = vmatpush.xpose.msk.msrb.mxu1 %vm217_vm0, %v426_v53  ;;  %975 = vmatpush.xpose.msk.msra.mxu3 %vm217_vm0, %v426_v53 }
 0x145   : > { %889 = vmatpush.xpose.msk.msrb.mxu0 %vm217_vm0, %v334_v50  ;;  %960 = vmatpush.xpose.msk.msra.mxu2 %vm217_vm0, %v334_v50 }
 0x146   : > { %921 = vmatpush.xpose.msk.msrb.mxu1 %vm217_vm0, %v423_v51  ;;  %976 = vmatpush.xpose.msk.msra.mxu3 %vm217_vm0, %v423_v51 }
 0x149   : > { %890 = vmatpush.xpose.msk.msrb.mxu0 %vm217_vm0, %v331_v48  ;;  %961 = vmatpush.xpose.msk.msra.mxu2 %vm217_vm0, %v331_v48 }
 0x14a   : > { %922 = vmatpush.xpose.msk.msrb.mxu1 %vm217_vm0, %v420_v49  ;;  %977 = vmatpush.xpose.msk.msra.mxu3 %vm217_vm0, %v420_v49 }
 0x14d   : > { %891 = vmatpush.xpose.msk.msrb.mxu0 %vm217_vm0, %v328_v46  ;;  %962 = vmatpush.xpose.msk.msra.mxu2 %vm217_vm0, %v328_v46 }
 0x14e   : > { %923 = vmatpush.xpose.msk.msrb.mxu1 %vm217_vm0, %v417_v47  ;;  %978 = vmatpush.xpose.msk.msra.mxu3 %vm217_vm0, %v417_v47 }
 0x151   : > { %892 = vmatpush.xpose.msk.msrb.mxu0 %vm217_vm0, %v325_v44  ;;  %963 = vmatpush.xpose.msk.msra.mxu2 %vm217_vm0, %v325_v44 }
 0x152   : > { %924 = vmatpush.xpose.msk.msrb.mxu1 %vm217_vm0, %v414_v45  ;;  %979 = vmatpush.xpose.msk.msra.mxu3 %vm217_vm0, %v414_v45 }
 0x155   : > { %893 = vmatpush.xpose.msk.msrb.mxu0 %vm217_vm0, %v1282_v42  ;;  %964 = vmatpush.xpose.msk.msra.mxu2 %vm217_vm0, %v1282_v42 }
 0x156   : > { %925 = vmatpush.xpose.msk.msrb.mxu1 %vm217_vm0, %v1284_v43  ;;  %980 = vmatpush.xpose.msk.msra.mxu3 %vm217_vm0, %v1284_v43 }
 0x159   : > { %894 = vmatpush.xpose.msk.msrb.mxu0 %vm217_vm0, %v1278_v40  ;;  %965 = vmatpush.xpose.msk.msra.mxu2 %vm217_vm0, %v1278_v40 }
 0x15a   : > { %926 = vmatpush.xpose.msk.msrb.mxu1 %vm217_vm0, %v1280_v41  ;;  %981 = vmatpush.xpose.msk.msra.mxu3 %vm217_vm0, %v1280_v41 }
 0x15d   : > { %895 = vmatpush.xpose.msk.msrb.mxu0 %vm217_vm0, %v1274_v38  ;;  %966 = vmatpush.xpose.msk.msra.mxu2 %vm217_vm0, %v1274_v38 }
 0x15e   : > { %927 = vmatpush.xpose.msk.msrb.mxu1 %vm217_vm0, %v1276_v39  ;;  %982 = vmatpush.xpose.msk.msra.mxu3 %vm217_vm0, %v1276_v39 }
 0x161   : > { %896 = vmatpush.xpose.msk.msrb.mxu0 %vm217_vm0, %v1270_v36  ;;  %967 = vmatpush.xpose.msk.msra.mxu2 %vm217_vm0, %v1270_v36 }
 0x162   : > { %928 = vmatpush.xpose.msk.msrb.mxu1 %vm217_vm0, %v1272_v37  ;;  %983 = vmatpush.xpose.msk.msra.mxu3 %vm217_vm0, %v1272_v37 }
 0x165   : > { %897 = vmatpush.xpose.msk.msrb.mxu0 %vm217_vm0, %v1266_v34  ;;  %968 = vmatpush.xpose.msk.msra.mxu2 %vm217_vm0, %v1266_v34 }
 0x166   : > { %929 = vmatpush.xpose.msk.msrb.mxu1 %vm217_vm0, %v1268_v35  ;;  %984 = vmatpush.xpose.msk.msra.mxu3 %vm217_vm0, %v1268_v35 }
 0x169   : > { %898 = vmatpush.xpose.msk.msrb.mxu0 %vm217_vm0, %v1262_v32  ;;  %969 = vmatpush.xpose.msk.msra.mxu2 %vm217_vm0, %v1262_v32 }
 0x16a   : > { %930 = vmatpush.xpose.msk.msrb.mxu1 %vm217_vm0, %v1264_v33  ;;  %985 = vmatpush.xpose.msk.msra.mxu3 %vm217_vm0, %v1264_v33 }
 0x16c   : > { %901 = vmatmul.msk.f32.vlgmr.msra.gmra.mxu2 %vm217_vm0, %v203_v0  ;;  %899 = vmatmul.msk.f32.vlgmr.msrb.gmra.mxu0 %vm217_vm0, %v201_v9 }
 0x16d   : > { %933 = vmatmul.msk.f32.vlgmr.msra.gmra.mxu3 %vm217_vm0, %v203_v0  ;;  %931 = vmatmul.msk.f32.vlgmr.msrb.gmra.mxu1 %vm217_vm0, %v201_v9 }
 0x174   : > { %902 = vmatmul.msk.f32.gmra.mxu2 %vm217_vm0, %v204_v1  ;;  %900 = vmatmul.msk.f32.gmra.mxu0 %vm217_vm0, %v202_v11 }
 0x175   : > { %934 = vmatmul.msk.f32.gmra.mxu3 %vm217_vm0, %v204_v1  ;;  %932 = vmatmul.msk.f32.gmra.mxu1 %vm217_vm0, %v202_v11 }
 0x17c   : > { %903 = vmatmul.msk.f32.gmra.mxu2 %vm217_vm0, %v205_v2 }
 0x17d   : > { %935 = vmatmul.msk.f32.gmra.mxu3 %vm217_vm0, %v205_v2 }
 0x184   : > { %904 = vmatmul.msk.f32.gmra.mxu2 %vm217_vm0, %v206_v3 }
 0x185   : > { %936 = vmatmul.msk.f32.gmra.mxu3 %vm217_vm0, %v206_v3 }
 0x18c   : > { %905 = vmatmul.msk.f32.gmra.mxu2 %vm217_vm0, %v207_v4 }
 0x18d   : > { %937 = vmatmul.msk.f32.gmra.mxu3 %vm217_vm0, %v207_v4 }
 0x194   : > { %906 = vmatmul.msk.f32.gmra.mxu2 %vm217_vm0, %v208_v5 }
 0x195   : > { %938 = vmatmul.msk.f32.gmra.mxu3 %vm217_vm0, %v208_v5 }
 0x19c   : > { %907 = vmatmul.msk.f32.gmra.mxu2 %vm217_vm0, %v209_v6 }
 0x19d   : > { %939 = vmatmul.msk.f32.gmra.mxu3 %vm217_vm0, %v209_v6 }
 0x1a4   : > { %908 = vmatmul.msk.f32.gmra.mxu2 %vm217_vm0, %v210_v7 }
 0x1a5   : > { %940 = vmatmul.msk.f32.gmra.mxu3 %vm217_vm0, %v210_v7 }
 0x1ac   : > { %909 = vmatmul.msk.f32.gmra.mxu2 %vm217_vm0, %v211_v8 }
 0x1ad   : > { %941 = vmatmul.msk.f32.gmra.mxu3 %vm217_vm0, %v211_v8 }
 0x1b4   : > { %910 = vmatmul.msk.f32.gmra.mxu2 %vm217_vm0, %v212_v10 }
 0x1b5   : > { %942 = vmatmul.msk.f32.gmra.mxu3 %vm217_vm0, %v212_v10 }
 0x1bc   : > { %911 = vmatmul.msk.f32.gmra.mxu2 %vm217_vm0, %v213_v12 }
 0x1bd   : > { %943 = vmatmul.msk.f32.gmra.mxu3 %vm217_vm0, %v213_v12 }
 0x1c4   : > { %912 = vmatmul.msk.f32.gmra.mxu2 %vm217_vm0, %v214_v13 }
 0x1c5   : > { %944 = vmatmul.msk.f32.gmra.mxu3 %vm217_vm0, %v214_v13 }
 0x1cc   : > { %913 = vmatmul.msk.f32.gmra.mxu2 %vm217_vm0, %v215_v14 }
 0x1cd   : > { %945 = vmatmul.msk.f32.gmra.mxu3 %vm217_vm0, %v215_v14 }
 0x1d4   : > { %914 = vmatmul.msk.f32.gmra.mxu2 %vm217_vm0, %v216_v15 }
 0x1d5   : > { %946 = vmatmul.msk.f32.gmra.mxu3 %vm217_vm0, %v216_v15 }
 0x1e9   : > { %v557_v32 = vpop.f32.mrf.mxu0 }
 0x1ea   : > { %718 = vst [vmem:[%s1457_s20] sm:$0xff] %v557_v32  ;;  %v670_v35 = vpop.f32.mrf.mxu1 }
 0x1eb   : > { %734 = vst [vmem:[%s1457_s20 + $0x80] sm:$0xff] %v670_v35 }
 0x1ef   : > { %v563_v16 = vpop.f32.mrf.mxu2 }
 0x1f0   : > { %720 = vst [vmem:[%s1457_s20 + $0x10] sm:$0xff] %v563_v16  ;;  %v676_v17 = vpop.f32.mrf.mxu3 }
 0x1f1   : > { %736 = vst [vmem:[%s1457_s20 + $0x90] sm:$0xff] %v676_v17  ;;  %v560_v36 = vpop.f32.mrf.mxu0 }
 0x1f2   : > { %719 = vst [vmem:[%s1457_s20 + $0x8] sm:$0xff] %v560_v36  ;;  %v673_v39 = vpop.f32.mrf.mxu1 }
 0x1f3   : > { %735 = vst [vmem:[%s1457_s20 + $0x88] sm:$0xff] %v673_v39 }
 0x1f7   : > { %v566_v18 = vpop.f32.mrf.mxu2 }
 0x1f8   : > { %721 = vst [vmem:[%s1457_s20 + $0x18] sm:$0xff] %v566_v18  ;;  %v679_v19 = vpop.f32.mrf.mxu3 }
 0x1f9   : > { %737 = vst [vmem:[%s1457_s20 + $0x98] sm:$0xff] %v679_v19 }
 0x1ff   : > { %v569_v20 = vpop.f32.mrf.mxu2 }
 0x200   : > { %722 = vst [vmem:[%s1457_s20 + $0x20] sm:$0xff] %v569_v20  ;;  %v682_v21 = vpop.f32.mrf.mxu3 }
 0x201   : > { %738 = vst [vmem:[%s1457_s20 + $0xa0] sm:$0xff] %v682_v21 }
 0x207   : > { %v572_v22 = vpop.f32.mrf.mxu2 }
 0x208   : > { %723 = vst [vmem:[%s1457_s20 + $0x28] sm:$0xff] %v572_v22  ;;  %v685_v23 = vpop.f32.mrf.mxu3 }
 0x209   : > { %739 = vst [vmem:[%s1457_s20 + $0xa8] sm:$0xff] %v685_v23 }
 0x20f   : > { %v575_v24 = vpop.f32.mrf.mxu2 }
 0x210   : > { %724 = vst [vmem:[%s1457_s20 + $0x30] sm:$0xff] %v575_v24  ;;  %v688_v25 = vpop.f32.mrf.mxu3 }
 0x211   : > { %740 = vst [vmem:[%s1457_s20 + $0xb0] sm:$0xff] %v688_v25 }
 0x217   : > { %v578_v26 = vpop.f32.mrf.mxu2 }
 0x218   : > { %725 = vst [vmem:[%s1457_s20 + $0x38] sm:$0xff] %v578_v26  ;;  %v691_v27 = vpop.f32.mrf.mxu3 }
 0x219   : > { %741 = vst [vmem:[%s1457_s20 + $0xb8] sm:$0xff] %v691_v27 }
 0x21f   : > { %v581_v28 = vpop.f32.mrf.mxu2 }
 0x220   : > { %726 = vst [vmem:[%s1457_s20 + $0x40] sm:$0xff] %v581_v28  ;;  %v694_v29 = vpop.f32.mrf.mxu3 }
 0x221   : > { %742 = vst [vmem:[%s1457_s20 + $0xc0] sm:$0xff] %v694_v29 }
 0x227   : > { %v584_v30 = vpop.f32.mrf.mxu2 }
 0x228   : > { %727 = vst [vmem:[%s1457_s20 + $0x48] sm:$0xff] %v584_v30  ;;  %v697_v31 = vpop.f32.mrf.mxu3 }
 0x229   : > { %743 = vst [vmem:[%s1457_s20 + $0xc8] sm:$0xff] %v697_v31 }
 0x22f   : > { %v587_v33 = vpop.f32.mrf.mxu2 }
 0x230   : > { %728 = vst [vmem:[%s1457_s20 + $0x50] sm:$0xff] %v587_v33  ;;  %v700_v34 = vpop.f32.mrf.mxu3 }
 0x231   : > { %744 = vst [vmem:[%s1457_s20 + $0xd0] sm:$0xff] %v700_v34 }
 0x237   : > { %v590_v37 = vpop.f32.mrf.mxu2 }
 0x238   : > { %729 = vst [vmem:[%s1457_s20 + $0x58] sm:$0xff] %v590_v37  ;;  %v703_v38 = vpop.f32.mrf.mxu3 }
 0x239   : > { %745 = vst [vmem:[%s1457_s20 + $0xd8] sm:$0xff] %v703_v38 }
 0x23f   : > { %v593_v40 = vpop.f32.mrf.mxu2 }
 0x240   : > { %730 = vst [vmem:[%s1457_s20 + $0x60] sm:$0xff] %v593_v40  ;;  %v706_v41 = vpop.f32.mrf.mxu3 }
 0x241   : > { %746 = vst [vmem:[%s1457_s20 + $0xe0] sm:$0xff] %v706_v41 }
 0x247   : > { %v596_v42 = vpop.f32.mrf.mxu2 }
 0x248   : > { %731 = vst [vmem:[%s1457_s20 + $0x68] sm:$0xff] %v596_v42  ;;  %v709_v43 = vpop.f32.mrf.mxu3 }
 0x249   : > { %747 = vst [vmem:[%s1457_s20 + $0xe8] sm:$0xff] %v709_v43 }
 0x24f   : > { %v599_v44 = vpop.f32.mrf.mxu2 }
 0x250   : > { %732 = vst [vmem:[%s1457_s20 + $0x70] sm:$0xff] %v599_v44  ;;  %v712_v45 = vpop.f32.mrf.mxu3 }
 0x251   : > { %748 = vst [vmem:[%s1457_s20 + $0xf0] sm:$0xff] %v712_v45 }
 0x257   : > { %v602_v46 = vpop.f32.mrf.mxu2 }
 0x258   : > { %733 = vst [vmem:[%s1457_s20 + $0x78] sm:$0xff] %v602_v46  ;;  %v715_v47 = vpop.f32.mrf.mxu3 }
 0x259   : > { %749 = vst [vmem:[%s1457_s20 + $0xf8] sm:$0xff] %v715_v47 }
 0x25a   : > { %1054 = shalt.err (!%p1051_p3)
}
 0x25b   : > { %s1091_s10 = smov 128   ;;  %s1092_s11 = smov 8  }
 0x25c   : > { %986 = dma.vmem_to_hbm [thread:$0]  (%p1151_p5), %s764_s28, 4096, %s766_s29, %s751_s30, %s1091_s10, %s1091_s10, %s1092_s11  }
 0x25d PF: > { %p992_p4 = scmp.ge.s32.totalorder %s1089_s15, 2  ;;  %s780_s17 = sand.u32 1, %s1077_s12  }
 0x25e   : > { %s781_s19 = scalar_lea.sflag [#allocation3], %s780_s17 }
 0x25f   : > { %p989_p7 = pnand %p992_p4, %p1155_p6 }
 0x261   : > { %p990_p8 = pneg %p989_p7 }
 0x263   : > { %1072 = dma.done.wait (%p990_p8), %s781_s19, 4096  }
 0x264   : > { %1074 = vsyncadd (%p990_p8), %s781_s19, 4294963200  ;;  %p13_p9 = scmp.ge.s32.totalorder %s1138_s18, 4   ;;  %s1531_s12 = smov %s1081_s13 }
 0x265   : > { %s1532_s13 = smov %s1085_s14  ;;  %s1533_s14 = smov %s1149_s21 }
 0x266   : > { %s1534_s15 = smov %s1138_s18  ;;  %15 = sbr.rel (!%p13_p9) target bundleno = 3 (0x3), region = 67 }
 0x26b   :  { %787 = vsyncpa [#allocation3], 1 }
 0x26c   :  { %789 = vsyncpa [#allocation3 + $0x1], 1 }

</bundles_post_ra>
